<compile_context>
chip_gen: v6e
topology: v6e:2x2x1
jax: 0.10.0
libtpu: 0.0.40
codegen_flags: <defaults>
</compile_context>

<pallas_src>
import functools
import math

import numpy as np
import jax
import jax.numpy as jnp
from jax.experimental import pallas as pl
from jax.experimental.pallas import tpu as pltpu


# ----------------------------- fixed edge-filter taps -----------------------------
_SOBEL_X = np.array([[-1, 0, 1], [-2, 0, 2], [-1, 0, 1]], np.float32)
_SOBEL_Y = np.array([[-1, -2, -1], [0, 0, 0], [1, 2, 1]], np.float32)
_SCHARR_X = np.array([[-3, 0, 3], [-10, 0, 10], [-3, 0, 3]], np.float32)
_SCHARR_Y = np.array([[-3, -10, -3], [0, 0, 0], [3, 10, 3]], np.float32)
_LAPLACE_3 = np.array([[2, 0, 2], [0, -8, 0], [2, 0, 2]], np.float32)   # cv2.Laplacian ksize=3
_ROBERTS_X = np.array([[-1, 0], [0, 1]], np.float32)
_ROBERTS_Y = np.array([[0, -1], [1, 0]], np.float32)
_PREWITT_X = np.array([[1, 1, 1], [0, 0, 0], [-1, -1, -1]], np.float32)
_PREWITT_Y = np.array([[-1, 0, 1], [-1, 0, 1], [-1, 0, 1]], np.float32)


# ------------------------ host-side structured operator builders ------------------
def _reflect101(i, n):
    if i < 0:
        return -i
    if i >= n:
        return 2 * n - 2 - i
    return i


def _filter_matrix(H, W, kern):
    """(P,P) matrix M so that (x_flat @ M) == cv2-style correlation with `kern`
    (anchor = kernel center, BORDER_REFLECT_101)."""
    kh, kw = kern.shape
    ay, ax = kh // 2, kw // 2
    M = np.zeros((H * W, H * W), np.float32)
    for y in range(H):
        for x in range(W):
            for i in range(kh):
                for j in range(kw):
                    c = float(kern[i, j])
                    if c == 0.0:
                        continue
                    sy = _reflect101(y + i - ay, H)
                    sx = _reflect101(x + j - ax, W)
                    M[sy * W + sx, y * W + x] += c
    return M


def _edge_operator_matrices(H, W):
    fm = functools.partial(_filter_matrix, H, W)
    ops = [
        0.5 * (fm(_SOBEL_X) + fm(_SOBEL_Y)),
        0.5 * (fm(_SCHARR_X) + fm(_SCHARR_Y)),
        fm(_LAPLACE_3),
        0.5 * (fm(_ROBERTS_X) + fm(_ROBERTS_Y)),
        0.5 * (fm(_PREWITT_X) + fm(_PREWITT_Y)),
    ]
    return np.stack(ops)                                      # (5, P, P)


def _shift_matrices(H, W):
    """(9,P,P); tap t = (dy+1)*3 + (dx+1): (x@S_t)[h*W+w] = x[h+dy, w+dx], zero OOB."""
    mats = []
    for dy in (-1, 0, 1):
        for dx in (-1, 0, 1):
            S = np.zeros((H * W, H * W), np.float32)
            for h in range(H):
                for w in range(W):
                    hs, ws = h + dy, w + dx
                    if 0 <= hs < H and 0 <= ws < W:
                        S[hs * W + ws, h * W + w] = 1.0
            mats.append(S)
    return np.stack(mats)


def _border_masks(H, W):
    """(9,1,P) 0/1 masks: mask[t, 0, h*W+w] == 1 iff neighbor (h+dy, w+dx) is in-bounds."""
    P = H * W
    m = np.zeros((9, 1, P), np.float32)
    for t in range(9):
        dy, dx = t // 3 - 1, t % 3 - 1
        for h in range(H):
            for w in range(W):
                if 0 <= h + dy < H and 0 <= w + dx < W:
                    m[t, 0, h * W + w] = 1.0
    return m


def _pool_select_matrix(H, W):
    """(P, P/4): picks the top-left (even h, even w) element of each 2x2 window."""
    Q = np.zeros((H * W, (H // 2) * (W // 2)), np.float32)
    for h2 in range(H // 2):
        for w2 in range(W // 2):
            Q[(2 * h2) * W + 2 * w2, h2 * (W // 2) + w2] = 1.0
    return Q


def _deconv_scatter_matrices(H, W):
    """(4, P, 4P); tap t = ky*2 + kx scatters y[h,w] to output (2h+ky, 2w+kx)."""
    mats = []
    for ky in (0, 1):
        for kx in (0, 1):
            T = np.zeros((H * W, 4 * H * W), np.float32)
            for h in range(H):
                for w in range(W):
                    T[h * W + w, (2 * h + ky) * (2 * W) + (2 * w + kx)] = 1.0
            mats.append(T)
    return np.stack(mats)


# --------------------------------- Pallas kernel ----------------------------------
def _new_block_kernel(x_ref, em_ref, g_ref, m0_ref, s1_ref, s2_ref, s3_ref,
                      q0_ref, q1_ref, q2_ref, t1_ref, t2_ref, t3_ref,
                      w1_ref, b1_ref, wc_ref, bc_ref, wd_ref, bd_ref,
                      o_ref, *, H, W, C, G):
    x = x_ref[0]                                   # (N, P0), N = G*C images stacked on sublanes
    N = G * C
    P0 = H * W

    def mm(a, b):
        return jnp.dot(a, b, preferred_element_type=jnp.float32)

    # zero-padded spatial shift at full resolution: lane roll (XLU) + 0/1 border mask.
    def shift0(h, t):
        dy, dx = t // 3 - 1, t % 3 - 1
        if dy == 0 and dx == 0:
            return h
        s = dy * W + dx
        return pltpu.roll(h, shift=(-s) % P0, axis=1) * m0_ref[t]

    # low-res zero-padded shift via the small (P,P) 0/1 shift matrices.
    def shift_small(h, s_ref, t):
        return h if t == 4 else mm(h, s_ref[t])

    # ---- getOperator: 5 fixed edge filters + per-image standardization -------------
    inv_n = 1.0 / float(C * P0)
    feats = []
    for k in range(5):
        d = mm(x, em_ref[k])                       # (N, P0), REFLECT_101 border baked in
        rs1 = jnp.sum(d, axis=1, keepdims=True)    # (N, 1)
        rs2 = jnp.sum(d * d, axis=1, keepdims=True)
        tot1 = mm(g_ref[...], rs1)                 # per-image totals broadcast back to rows
        tot2 = mm(g_ref[...], rs2)
        mean = tot1 * inv_n
        var = jnp.maximum(tot2 * inv_n - mean * mean, 0.0)
        feats.append((d - mean) * jax.lax.rsqrt(var + 1e-12))

    # ---- conv1: one fused matmul against the 45-way (tap x edge-group) stack -------
    stack1 = jnp.concatenate(
        [shift0(feats[grp], t) for t in range(9) for grp in range(5)], axis=0)   # (45N, P0)
    a1 = mm(w1_ref[...], stack1) + b1_ref[...]                                   # (N, P0)

    def conv_p0(h, layer):
        stack = jnp.concatenate([shift0(h, t) for t in range(9)], axis=0)        # (9N, P0)
        return mm(wc_ref[layer], stack) + bc_ref[layer]

    def conv_small(h, s_ref, layer):
        stack = jnp.concatenate([shift_small(h, s_ref, t) for t in range(9)], axis=0)
        return mm(wc_ref[layer], stack) + bc_ref[layer]

    # 2x2/2 maxpool: max over {here, right, down, diag} then select even positions.
    # (rolled wrap values never land on the selected even positions, so no mask needed)
    def maxpool_p0(h):
        r = pltpu.roll(h, shift=(-1) % P0, axis=1)
        dn = pltpu.roll(h, shift=(-W) % P0, axis=1)
        dr = pltpu.roll(h, shift=(-(W + 1)) % P0, axis=1)
        m = jnp.maximum(jnp.maximum(h, r), jnp.maximum(dn, dr))
        return mm(m, q0_ref[...])

    def maxpool_small(h, s_ref, q_ref):
        m = jnp.maximum(jnp.maximum(h, mm(h, s_ref[5])),
                        jnp.maximum(mm(h, s_ref[7]), mm(h, s_ref[8])))
        return mm(m, q_ref[...])

    # ConvTranspose2d(k=2, s=2): all 4 channel mixes in one matmul, then 4 scatters.
    def deconv(h, t_ref, layer):
        mixed = mm(wd_ref[layer], h)               # (4N, Pin)
        acc = None
        for t in range(4):
            part = mm(mixed[t * N:(t + 1) * N, :], t_ref[t])
            acc = part if acc is None else acc + part
        return acc + bd_ref[layer]

    # encoder / decoder (no nonlinearities in the reference module)
    a2 = conv_small(maxpool_p0(a1), s1_ref, 0)                      # (N, P1)
    a3 = conv_small(maxpool_small(a2, s1_ref, q1_ref), s2_ref, 1)   # (N, P2)
    a4 = conv_small(maxpool_small(a3, s2_ref, q2_ref), s3_ref, 2)   # (N, P3)
    a5 = conv_small(deconv(a4, t1_ref, 0), s2_ref, 3)               # (N, P2)
    a6 = conv_small(deconv(a5, t2_ref, 1), s1_ref, 4)               # (N, P1)
    a7 = conv_p0(deconv(a6, t3_ref, 2), 5)                          # (N, P0)

    o_ref[0] = (x * a7).astype(o_ref.dtype)                         # orign_maps * features


# ----------------------------------- wrapper ---------------------------------------
def new_block_forward(x, params):
    """x: (B, C, H, W) f32; params: {'conv1'..'conv7', 'deconv1'..'deconv3': (w, b)}."""
    B, C, H, W = map(int, x.shape)
    assert H % 8 == 0 and W % 8 == 0, "three 2x2 poolings require H, W divisible by 8"
    assert (H * W) % 128 == 0, "flattened spatial axis must be lane-aligned (H*W % 128 == 0)"
    # TODO(synk): the F.interpolate('nearest') fallback in the PyTorch forward (only hit
    # when pooled sizes do not divide evenly) is not implemented; unreachable under asserts.

    P0 = H * W
    P1 = (H // 2) * (W // 2)
    P2 = (H // 4) * (W // 4)
    P3 = (H // 8) * (W // 8)

    # images per grid step: fill sublanes (>= 8 rows) and fold small batches completely
    # so the operator constants are fetched / held in VMEM exactly once per core.
    G = 1
    for cand in range(B, 0, -1):
        if B % cand == 0 and cand * C <= 128:
            G = cand
            break
    N = G * C

    # shape-only structured operators
    em = jnp.asarray(_edge_operator_matrices(H, W))              # (5, P0, P0)
    m0 = jnp.asarray(_border_masks(H, W))                        # (9, 1, P0)
    s1 = jnp.asarray(_shift_matrices(H // 2, W // 2))            # (9, P1, P1)
    s2 = jnp.asarray(_shift_matrices(H // 4, W // 4))            # (9, P2, P2)
    s3 = jnp.asarray(_shift_matrices(H // 8, W // 8))            # (9, P3, P3)
    q0 = jnp.asarray(_pool_select_matrix(H, W))                  # (P0, P1)
    q1 = jnp.asarray(_pool_select_matrix(H // 2, W // 2))        # (P1, P2)
    q2 = jnp.asarray(_pool_select_matrix(H // 4, W // 4))        # (P2, P3)
    t1 = jnp.asarray(_deconv_scatter_matrices(H // 8, W // 8))   # (4, P3, P2)
    t2 = jnp.asarray(_deconv_scatter_matrices(H // 4, W // 4))   # (4, P2, P1)
    t3 = jnp.asarray(_deconv_scatter_matrices(H // 2, W // 2))   # (4, P1, P0)
    gmat = jnp.asarray(np.kron(np.eye(G, dtype=np.float32),
                               np.ones((C, C), np.float32)))     # (N, N) per-image reduce

    # ----- weight repacking: fused, block-diagonal over the G images in a block -----
    eyeG = jnp.eye(G, dtype=jnp.float32)

    def pack_conv1(w):          # (C, 5C, 3, 3) -> (N, 45N)
        wt = jnp.transpose(w, (2, 3, 0, 1)).reshape(9, C, 5, C)          # (t, co, grp, ci)
        return jnp.einsum("ab,tori->aotrbi", eyeG, wt).reshape(N, 45 * N)

    def pack_conv(w):           # (C, C, 3, 3) -> (N, 9N)
        wt = jnp.transpose(w, (2, 3, 0, 1)).reshape(9, C, C)             # (t, co, ci)
        return jnp.einsum("ab,toi->aotbi", eyeG, wt).reshape(N, 9 * N)

    def pack_deconv(w):         # torch (Cin, Cout, 2, 2) -> (4N, N)
        wt = jnp.transpose(w, (2, 3, 1, 0)).reshape(4, C, C)             # (t, co, ci)
        return jnp.einsum("ab,toi->taobi", eyeG, wt).reshape(4 * N, N)

    def pack_bias(b):
        return jnp.tile(b, (G,)).reshape(N, 1)

    w1p = pack_conv1(params["conv1"][0])
    b1p = pack_bias(params["conv1"][1])
    wcp = jnp.stack([pack_conv(params[f"conv{i}"][0]) for i in range(2, 8)], axis=0)
    bcp = jnp.stack([pack_bias(params[f"conv{i}"][1]) for i in range(2, 8)], axis=0)
    wdp = jnp.stack([pack_deconv(params[f"deconv{i}"][0]) for i in range(1, 4)], axis=0)
    bdp = jnp.stack([pack_bias(params[f"deconv{i}"][1]) for i in range(1, 4)], axis=0)

    xf = x.astype(jnp.float32).reshape(B // G, N, P0)            # lane-dense: H*W on lanes

    consts = (em, gmat, m0, s1, s2, s3, q0, q1, q2, t1, t2, t3,
              w1p, b1p, wcp, bcp, wdp, bdp)

    def _const_spec(a):
        zeros = (0,) * a.ndim
        return pl.BlockSpec(a.shape, lambda b, _z=zeros: _z)     # same block every step

    in_specs = [pl.BlockSpec((1, N, P0), lambda b: (b, 0, 0))] + [_const_spec(a) for a in consts]

    # ----- cost estimate for the roll-based formulation (review item) ----------------
    def _mmf(m, k, n):
        return 2 * m * k * n

    fl = 5 * _mmf(N, P0, P0) + _mmf(N, 45 * N, P0) + _mmf(N, 9 * N, P0)
    for p, reps in ((P1, 2), (P2, 2), (P3, 1)):
        fl += reps * (_mmf(N, 9 * N, p) + 8 * _mmf(N, p, p))
    fl += _mmf(N, P0, P1)                                        # pool1 select
    fl += 3 * _mmf(N, P1, P1) + _mmf(N, P1, P2)                  # pool2
    fl += 3 * _mmf(N, P2, P2) + _mmf(N, P2, P3)                  # pool3
    for pi, po in ((P3, P2), (P2, P1), (P1, P0)):                # deconv1..3
        fl += _mmf(4 * N, N, pi) + 4 * _mmf(N, pi, po)
    flops = (B // G) * fl
    const_bytes = sum(int(a.size) * a.dtype.itemsize for a in consts)
    bytes_accessed = int(const_bytes + 2 * B * C * P0 * 4)

    out = pl.pallas_call(
        functools.partial(_new_block_kernel, H=H, W=W, C=C, G=G),
        out_shape=jax.ShapeDtypeStruct((B // G, N, P0), jnp.float32),
        grid=(B // G,),
        in_specs=in_specs,
        out_specs=pl.BlockSpec((1, N, P0), lambda b: (b, 0, 0)),
        compiler_params=pltpu.CompilerParams(
            dimension_semantics=("parallel",),      # megacore shards batch groups when >1
            vmem_limit_bytes=32 * 1024 * 1024,      # ~4 MB actually used at this size
        ),
        cost_estimate=pl.CostEstimate(
            flops=int(flops), transcendentals=5 * B, bytes_accessed=bytes_accessed),
    )(xf, *consts)

    return out.reshape(B, C, H, W).astype(x.dtype)


# -------------------------- pure-JAX reference (independent) -----------------------
def _corr_reflect(x, k):
    """cv2-style correlation, anchor at kernel center, BORDER_REFLECT_101."""
    kh, kw = k.shape
    ay, ax = kh // 2, kw // 2
    H, W = x.shape[2], x.shape[3]
    xp = jnp.pad(x, ((0, 0), (0, 0), (ay, kh - 1 - ay), (ax, kw - 1 - ax)), mode="reflect")
    out = jnp.zeros_like(x)
    for i in range(kh):
        for j in range(kw):
            c = float(k[i, j])
            if c != 0.0:
                out = out + c * xp[:, :, i:i + H, j:j + W]
    return out


def _norm_ref(d):
    mean = jnp.mean(d, axis=(1, 2, 3), keepdims=True)
    std = jnp.std(d, axis=(1, 2, 3), keepdims=True)
    return (d - mean) / std


def _conv2d_ref(x, w, b):
    y = jax.lax.conv_general_dilated(x, w, window_strides=(1, 1), padding=((1, 1), (1, 1)),
                                     dimension_numbers=("NCHW", "OIHW", "NCHW"))
    return y + b[None, :, None, None]


def _maxpool_ref(x):
    return jax.lax.reduce_window(x, jnp.float32(-jnp.inf), jax.lax.max,
                                 (1, 1, 2, 2), (1, 1, 2, 2), "VALID")


def _deconv_ref(x, w, b):
    Bx, _, H, W = x.shape
    Co = w.shape[1]
    y = jnp.einsum("nchw,coij->nohiwj", x, w).reshape(Bx, Co, 2 * H, 2 * W)
    return y + b[None, :, None, None]


def _reference(x, params):
    x = x.astype(jnp.float32)
    e1 = _norm_ref(0.5 * (_corr_reflect(x, _SOBEL_X) + _corr_reflect(x, _SOBEL_Y)))
    e2 = _norm_ref(0.5 * (_corr_reflect(x, _SCHARR_X) + _corr_reflect(x, _SCHARR_Y)))
    e3 = _norm_ref(_corr_reflect(x, _LAPLACE_3))
    e4 = _norm_ref(0.5 * (_corr_reflect(x, _ROBERTS_X) + _corr_reflect(x, _ROBERTS_Y)))
    e5 = _norm_ref(0.5 * (_corr_reflect(x, _PREWITT_X) + _corr_reflect(x, _PREWITT_Y)))
    h = jnp.concatenate([e1, e2, e3, e4, e5], axis=1)
    h = _conv2d_ref(h, *params["conv1"])
    h = _maxpool_ref(h)
    h = _conv2d_ref(h, *params["conv2"])
    h = _maxpool_ref(h)
    h = _conv2d_ref(h, *params["conv3"])
    h = _maxpool_ref(h)
    h = _conv2d_ref(h, *params["conv4"])
    h = _deconv_ref(h, *params["deconv1"])
    h = _conv2d_ref(h, *params["conv5"])
    h = _deconv_ref(h, *params["deconv2"])
    h = _conv2d_ref(h, *params["conv6"])
    h = _deconv_ref(h, *params["deconv3"])
    h = _conv2d_ref(h, *params["conv7"])
    return x * h


# ------------------------------------- main ----------------------------------------
if __name__ == "__main__":
    root = jax.random.PRNGKey(0)
    B, C, H, W = 2, 4, 16, 16
    keys = jax.random.split(root, 32)

    x = jax.random.normal(keys[0], (B, C, H, W), dtype=jnp.float32)

    def _uniform(k, shape, bound):
        return jax.random.uniform(k, shape, jnp.float32, -bound, bound)

    params = {}
    ki = 1
    bound = 1.0 / math.sqrt(5 * C * 9)
    params["conv1"] = (_uniform(keys[ki], (C, 5 * C, 3, 3), bound),
                       _uniform(keys[ki + 1], (C,), bound))
    ki += 2
    for i in range(2, 8):
        bound = 1.0 / math.sqrt(C * 9)
        params[f"conv{i}"] = (_uniform(keys[ki], (C, C, 3, 3), bound),
                              _uniform(keys[ki + 1], (C,), bound))
        ki += 2
    for i in range(1, 4):
        bound = 1.0 / math.sqrt(C * 4)
        params[f"deconv{i}"] = (_uniform(keys[ki], (C, C, 2, 2), bound),
                                _uniform(keys[ki + 1], (C,), bound))
        ki += 2

    out = jax.block_until_ready(new_block_forward(x, params))
    ref = jax.block_until_ready(_reference(x, params))

    assert out.shape == x.shape and out.dtype == x.dtype
    assert bool(jnp.allclose(out, ref, atol=2e-2, rtol=2e-2)), "mismatch vs pure-JAX reference"
    print("KERNEL_OK")
</pallas_src>

<mosaic_0001>
module attributes {stable_mosaic.version = 11 : i64} {
  func.func @_new_block_kernel(%arg0: i32, %arg1: memref<1x8x256xf32, #tpu.memory_space<vmem>>, %arg2: memref<5x256x256xf32, #tpu.memory_space<vmem>>, %arg3: memref<8x8xf32, #tpu.memory_space<vmem>>, %arg4: memref<9x1x256xf32, #tpu.memory_space<vmem>>, %arg5: memref<9x64x64xf32, #tpu.memory_space<vmem>>, %arg6: memref<9x16x16xf32, #tpu.memory_space<vmem>>, %arg7: memref<9x4x4xf32, #tpu.memory_space<vmem>>, %arg8: memref<256x64xf32, #tpu.memory_space<vmem>>, %arg9: memref<64x16xf32, #tpu.memory_space<vmem>>, %arg10: memref<16x4xf32, #tpu.memory_space<vmem>>, %arg11: memref<4x4x16xf32, #tpu.memory_space<vmem>>, %arg12: memref<4x16x64xf32, #tpu.memory_space<vmem>>, %arg13: memref<4x64x256xf32, #tpu.memory_space<vmem>>, %arg14: memref<8x360xf32, #tpu.memory_space<vmem>>, %arg15: memref<8x1xf32, #tpu.memory_space<vmem>>, %arg16: memref<6x8x72xf32, #tpu.memory_space<vmem>>, %arg17: memref<6x8x1xf32, #tpu.memory_space<vmem>>, %arg18: memref<3x32x8xf32, #tpu.memory_space<vmem>>, %arg19: memref<3x8x1xf32, #tpu.memory_space<vmem>>, %arg20: memref<1x8x256xf32, #tpu.memory_space<vmem>>) attributes {dimension_semantics = [#tpu.dimension_semantics<parallel>], iteration_bounds = array<i64: 1>, scalar_prefetch = 0 : i64, scratch_operands = 0 : i64, tpu.core_type = #tpu.core_type<tc>, window_params = [{transform_indices = @transform_0, window_bounds = array<i64: 1, 8, 256>}, {pipeline_mode = #tpu.pipeline_mode<synchronous>, transform_indices = @transform_1, window_bounds = array<i64: 5, 256, 256>}, {pipeline_mode = #tpu.pipeline_mode<synchronous>, transform_indices = @transform_2, window_bounds = array<i64: 8, 8>}, {pipeline_mode = #tpu.pipeline_mode<synchronous>, transform_indices = @transform_3, window_bounds = array<i64: 9, 1, 256>}, {pipeline_mode = #tpu.pipeline_mode<synchronous>, transform_indices = @transform_4, window_bounds = array<i64: 9, 64, 64>}, {pipeline_mode = #tpu.pipeline_mode<synchronous>, transform_indices = @transform_5, window_bounds = array<i64: 9, 16, 16>}, {pipeline_mode = #tpu.pipeline_mode<synchronous>, transform_indices = @transform_6, window_bounds = array<i64: 9, 4, 4>}, {pipeline_mode = #tpu.pipeline_mode<synchronous>, transform_indices = @transform_7, window_bounds = array<i64: 256, 64>}, {pipeline_mode = #tpu.pipeline_mode<synchronous>, transform_indices = @transform_8, window_bounds = array<i64: 64, 16>}, {pipeline_mode = #tpu.pipeline_mode<synchronous>, transform_indices = @transform_9, window_bounds = array<i64: 16, 4>}, {pipeline_mode = #tpu.pipeline_mode<synchronous>, transform_indices = @transform_10, window_bounds = array<i64: 4, 4, 16>}, {pipeline_mode = #tpu.pipeline_mode<synchronous>, transform_indices = @transform_11, window_bounds = array<i64: 4, 16, 64>}, {pipeline_mode = #tpu.pipeline_mode<synchronous>, transform_indices = @transform_12, window_bounds = array<i64: 4, 64, 256>}, {pipeline_mode = #tpu.pipeline_mode<synchronous>, transform_indices = @transform_13, window_bounds = array<i64: 8, 360>}, {pipeline_mode = #tpu.pipeline_mode<synchronous>, transform_indices = @transform_14, window_bounds = array<i64: 8, 1>}, {pipeline_mode = #tpu.pipeline_mode<synchronous>, transform_indices = @transform_15, window_bounds = array<i64: 6, 8, 72>}, {pipeline_mode = #tpu.pipeline_mode<synchronous>, transform_indices = @transform_16, window_bounds = array<i64: 6, 8, 1>}, {pipeline_mode = #tpu.pipeline_mode<synchronous>, transform_indices = @transform_17, window_bounds = array<i64: 3, 32, 8>}, {pipeline_mode = #tpu.pipeline_mode<synchronous>, transform_indices = @transform_18, window_bounds = array<i64: 3, 8, 1>}, {transform_indices = @transform_19, window_bounds = array<i64: 1, 8, 256>}]} {
    %c0 = arith.constant 0 : index
    %c0_0 = arith.constant 0 : index
    %c0_1 = arith.constant 0 : index
    %0 = vector.load %arg1[%c0, %c0_0, %c0_1] : memref<1x8x256xf32, #tpu.memory_space<vmem>>, vector<1x8x256xf32>
    %1 = vector.shape_cast %0 : vector<1x8x256xf32> to vector<8x256xf32>
    %c0_2 = arith.constant 0 : index
    %c0_3 = arith.constant 0 : index
    %c0_4 = arith.constant 0 : index
    %2 = vector.load %arg2[%c0_2, %c0_3, %c0_4] : memref<5x256x256xf32, #tpu.memory_space<vmem>>, vector<1x256x256xf32>
    %3 = vector.shape_cast %2 : vector<1x256x256xf32> to vector<256x256xf32>
    %cst = arith.constant dense<0.000000e+00> : vector<8x256xf32>
    %4 = tpu.matmul %1, %3, %cst {dimension_numbers = #tpu.dot_dimension_numbers<[1], [0], [0], [1], [0, 0, 1, 1], [], []>} : vector<8x256xf32>, vector<256x256xf32>, vector<8x256xf32> -> vector<8x256xf32>
    %cst_5 = arith.constant dense<0.000000e+00> : vector<8xf32>
    %5 = vector.multi_reduction <add>, %4, %cst_5 [1] : vector<8x256xf32> to vector<8xf32>
    %6 = vector.shape_cast %5 : vector<8xf32> to vector<8x1xf32>
    %7 = arith.mulf %4, %4 : vector<8x256xf32>
    %cst_6 = arith.constant dense<0.000000e+00> : vector<8xf32>
    %8 = vector.multi_reduction <add>, %7, %cst_6 [1] : vector<8x256xf32> to vector<8xf32>
    %9 = vector.shape_cast %8 : vector<8xf32> to vector<8x1xf32>
    %c0_7 = arith.constant 0 : index
    %c0_8 = arith.constant 0 : index
    %10 = vector.load %arg3[%c0_7, %c0_8] : memref<8x8xf32, #tpu.memory_space<vmem>>, vector<8x8xf32>
    %cst_9 = arith.constant dense<0.000000e+00> : vector<8x1xf32>
    %11 = tpu.matmul %10, %6, %cst_9 {dimension_numbers = #tpu.dot_dimension_numbers<[1], [0], [0], [1], [0, 0, 1, 1], [], []>} : vector<8x8xf32>, vector<8x1xf32>, vector<8x1xf32> -> vector<8x1xf32>
    %c0_10 = arith.constant 0 : index
    %c0_11 = arith.constant 0 : index
    %12 = vector.load %arg3[%c0_10, %c0_11] : memref<8x8xf32, #tpu.memory_space<vmem>>, vector<8x8xf32>
    %cst_12 = arith.constant dense<0.000000e+00> : vector<8x1xf32>
    %13 = tpu.matmul %12, %9, %cst_12 {dimension_numbers = #tpu.dot_dimension_numbers<[1], [0], [0], [1], [0, 0, 1, 1], [], []>} : vector<8x8xf32>, vector<8x1xf32>, vector<8x1xf32> -> vector<8x1xf32>
    %cst_13 = arith.constant 9.765625E-4 : f32
    %14 = vector.broadcast %cst_13 : f32 to vector<8x1xf32>
    %15 = arith.mulf %11, %14 : vector<8x1xf32>
    %cst_14 = arith.constant 9.765625E-4 : f32
    %16 = vector.broadcast %cst_14 : f32 to vector<8x1xf32>
    %17 = arith.mulf %13, %16 : vector<8x1xf32>
    %18 = arith.mulf %15, %15 : vector<8x1xf32>
    %19 = arith.subf %17, %18 : vector<8x1xf32>
    %cst_15 = arith.constant 0.000000e+00 : f32
    %20 = vector.broadcast %cst_15 : f32 to vector<8x1xf32>
    %21 = arith.maximumf %19, %20 : vector<8x1xf32>
    %22 = vector.broadcast %15 : vector<8x1xf32> to vector<8x256xf32>
    %23 = arith.subf %4, %22 : vector<8x256xf32>
    %cst_16 = arith.constant 9.99999996E-13 : f32
    %24 = vector.broadcast %cst_16 : f32 to vector<8x1xf32>
    %25 = arith.addf %21, %24 : vector<8x1xf32>
    %26 = math.rsqrt %25 : vector<8x1xf32>
    %27 = vector.broadcast %26 : vector<8x1xf32> to vector<8x256xf32>
    %28 = arith.mulf %23, %27 : vector<8x256xf32>
    %c1 = arith.constant 1 : index
    %c0_17 = arith.constant 0 : index
    %c0_18 = arith.constant 0 : index
    %29 = vector.load %arg2[%c1, %c0_17, %c0_18] : memref<5x256x256xf32, #tpu.memory_space<vmem>>, vector<1x256x256xf32>
    %30 = vector.shape_cast %29 : vector<1x256x256xf32> to vector<256x256xf32>
    %cst_19 = arith.constant dense<0.000000e+00> : vector<8x256xf32>
    %31 = tpu.matmul %1, %30, %cst_19 {dimension_numbers = #tpu.dot_dimension_numbers<[1], [0], [0], [1], [0, 0, 1, 1], [], []>} : vector<8x256xf32>, vector<256x256xf32>, vector<8x256xf32> -> vector<8x256xf32>
    %cst_20 = arith.constant dense<0.000000e+00> : vector<8xf32>
    %32 = vector.multi_reduction <add>, %31, %cst_20 [1] : vector<8x256xf32> to vector<8xf32>
    %33 = vector.shape_cast %32 : vector<8xf32> to vector<8x1xf32>
    %34 = arith.mulf %31, %31 : vector<8x256xf32>
    %cst_21 = arith.constant dense<0.000000e+00> : vector<8xf32>
    %35 = vector.multi_reduction <add>, %34, %cst_21 [1] : vector<8x256xf32> to vector<8xf32>
    %36 = vector.shape_cast %35 : vector<8xf32> to vector<8x1xf32>
    %c0_22 = arith.constant 0 : index
    %c0_23 = arith.constant 0 : index
    %37 = vector.load %arg3[%c0_22, %c0_23] : memref<8x8xf32, #tpu.memory_space<vmem>>, vector<8x8xf32>
    %cst_24 = arith.constant dense<0.000000e+00> : vector<8x1xf32>
    %38 = tpu.matmul %37, %33, %cst_24 {dimension_numbers = #tpu.dot_dimension_numbers<[1], [0], [0], [1], [0, 0, 1, 1], [], []>} : vector<8x8xf32>, vector<8x1xf32>, vector<8x1xf32> -> vector<8x1xf32>
    %c0_25 = arith.constant 0 : index
    %c0_26 = arith.constant 0 : index
    %39 = vector.load %arg3[%c0_25, %c0_26] : memref<8x8xf32, #tpu.memory_space<vmem>>, vector<8x8xf32>
    %cst_27 = arith.constant dense<0.000000e+00> : vector<8x1xf32>
    %40 = tpu.matmul %39, %36, %cst_27 {dimension_numbers = #tpu.dot_dimension_numbers<[1], [0], [0], [1], [0, 0, 1, 1], [], []>} : vector<8x8xf32>, vector<8x1xf32>, vector<8x1xf32> -> vector<8x1xf32>
    %cst_28 = arith.constant 9.765625E-4 : f32
    %41 = vector.broadcast %cst_28 : f32 to vector<8x1xf32>
    %42 = arith.mulf %38, %41 : vector<8x1xf32>
    %cst_29 = arith.constant 9.765625E-4 : f32
    %43 = vector.broadcast %cst_29 : f32 to vector<8x1xf32>
    %44 = arith.mulf %40, %43 : vector<8x1xf32>
    %45 = arith.mulf %42, %42 : vector<8x1xf32>
    %46 = arith.subf %44, %45 : vector<8x1xf32>
    %cst_30 = arith.constant 0.000000e+00 : f32
    %47 = vector.broadcast %cst_30 : f32 to vector<8x1xf32>
    %48 = arith.maximumf %46, %47 : vector<8x1xf32>
    %49 = vector.broadcast %42 : vector<8x1xf32> to vector<8x256xf32>
    %50 = arith.subf %31, %49 : vector<8x256xf32>
    %cst_31 = arith.constant 9.99999996E-13 : f32
    %51 = vector.broadcast %cst_31 : f32 to vector<8x1xf32>
    %52 = arith.addf %48, %51 : vector<8x1xf32>
    %53 = math.rsqrt %52 : vector<8x1xf32>
    %54 = vector.broadcast %53 : vector<8x1xf32> to vector<8x256xf32>
    %55 = arith.mulf %50, %54 : vector<8x256xf32>
    %c2 = arith.constant 2 : index
    %c0_32 = arith.constant 0 : index
    %c0_33 = arith.constant 0 : index
    %56 = vector.load %arg2[%c2, %c0_32, %c0_33] : memref<5x256x256xf32, #tpu.memory_space<vmem>>, vector<1x256x256xf32>
    %57 = vector.shape_cast %56 : vector<1x256x256xf32> to vector<256x256xf32>
    %cst_34 = arith.constant dense<0.000000e+00> : vector<8x256xf32>
    %58 = tpu.matmul %1, %57, %cst_34 {dimension_numbers = #tpu.dot_dimension_numbers<[1], [0], [0], [1], [0, 0, 1, 1], [], []>} : vector<8x256xf32>, vector<256x256xf32>, vector<8x256xf32> -> vector<8x256xf32>
    %cst_35 = arith.constant dense<0.000000e+00> : vector<8xf32>
    %59 = vector.multi_reduction <add>, %58, %cst_35 [1] : vector<8x256xf32> to vector<8xf32>
    %60 = vector.shape_cast %59 : vector<8xf32> to vector<8x1xf32>
    %61 = arith.mulf %58, %58 : vector<8x256xf32>
    %cst_36 = arith.constant dense<0.000000e+00> : vector<8xf32>
    %62 = vector.multi_reduction <add>, %61, %cst_36 [1] : vector<8x256xf32> to vector<8xf32>
    %63 = vector.shape_cast %62 : vector<8xf32> to vector<8x1xf32>
    %c0_37 = arith.constant 0 : index
    %c0_38 = arith.constant 0 : index
    %64 = vector.load %arg3[%c0_37, %c0_38] : memref<8x8xf32, #tpu.memory_space<vmem>>, vector<8x8xf32>
    %cst_39 = arith.constant dense<0.000000e+00> : vector<8x1xf32>
    %65 = tpu.matmul %64, %60, %cst_39 {dimension_numbers = #tpu.dot_dimension_numbers<[1], [0], [0], [1], [0, 0, 1, 1], [], []>} : vector<8x8xf32>, vector<8x1xf32>, vector<8x1xf32> -> vector<8x1xf32>
    %c0_40 = arith.constant 0 : index
    %c0_41 = arith.constant 0 : index
    %66 = vector.load %arg3[%c0_40, %c0_41] : memref<8x8xf32, #tpu.memory_space<vmem>>, vector<8x8xf32>
    %cst_42 = arith.constant dense<0.000000e+00> : vector<8x1xf32>
    %67 = tpu.matmul %66, %63, %cst_42 {dimension_numbers = #tpu.dot_dimension_numbers<[1], [0], [0], [1], [0, 0, 1, 1], [], []>} : vector<8x8xf32>, vector<8x1xf32>, vector<8x1xf32> -> vector<8x1xf32>
    %cst_43 = arith.constant 9.765625E-4 : f32
    %68 = vector.broadcast %cst_43 : f32 to vector<8x1xf32>
    %69 = arith.mulf %65, %68 : vector<8x1xf32>
    %cst_44 = arith.constant 9.765625E-4 : f32
    %70 = vector.broadcast %cst_44 : f32 to vector<8x1xf32>
    %71 = arith.mulf %67, %70 : vector<8x1xf32>
    %72 = arith.mulf %69, %69 : vector<8x1xf32>
    %73 = arith.subf %71, %72 : vector<8x1xf32>
    %cst_45 = arith.constant 0.000000e+00 : f32
    %74 = vector.broadcast %cst_45 : f32 to vector<8x1xf32>
    %75 = arith.maximumf %73, %74 : vector<8x1xf32>
    %76 = vector.broadcast %69 : vector<8x1xf32> to vector<8x256xf32>
    %77 = arith.subf %58, %76 : vector<8x256xf32>
    %cst_46 = arith.constant 9.99999996E-13 : f32
    %78 = vector.broadcast %cst_46 : f32 to vector<8x1xf32>
    %79 = arith.addf %75, %78 : vector<8x1xf32>
    %80 = math.rsqrt %79 : vector<8x1xf32>
    %81 = vector.broadcast %80 : vector<8x1xf32> to vector<8x256xf32>
    %82 = arith.mulf %77, %81 : vector<8x256xf32>
    %c3 = arith.constant 3 : index
    %c0_47 = arith.constant 0 : index
    %c0_48 = arith.constant 0 : index
    %83 = vector.load %arg2[%c3, %c0_47, %c0_48] : memref<5x256x256xf32, #tpu.memory_space<vmem>>, vector<1x256x256xf32>
    %84 = vector.shape_cast %83 : vector<1x256x256xf32> to vector<256x256xf32>
    %cst_49 = arith.constant dense<0.000000e+00> : vector<8x256xf32>
    %85 = tpu.matmul %1, %84, %cst_49 {dimension_numbers = #tpu.dot_dimension_numbers<[1], [0], [0], [1], [0, 0, 1, 1], [], []>} : vector<8x256xf32>, vector<256x256xf32>, vector<8x256xf32> -> vector<8x256xf32>
    %cst_50 = arith.constant dense<0.000000e+00> : vector<8xf32>
    %86 = vector.multi_reduction <add>, %85, %cst_50 [1] : vector<8x256xf32> to vector<8xf32>
    %87 = vector.shape_cast %86 : vector<8xf32> to vector<8x1xf32>
    %88 = arith.mulf %85, %85 : vector<8x256xf32>
    %cst_51 = arith.constant dense<0.000000e+00> : vector<8xf32>
    %89 = vector.multi_reduction <add>, %88, %cst_51 [1] : vector<8x256xf32> to vector<8xf32>
    %90 = vector.shape_cast %89 : vector<8xf32> to vector<8x1xf32>
    %c0_52 = arith.constant 0 : index
    %c0_53 = arith.constant 0 : index
    %91 = vector.load %arg3[%c0_52, %c0_53] : memref<8x8xf32, #tpu.memory_space<vmem>>, vector<8x8xf32>
    %cst_54 = arith.constant dense<0.000000e+00> : vector<8x1xf32>
    %92 = tpu.matmul %91, %87, %cst_54 {dimension_numbers = #tpu.dot_dimension_numbers<[1], [0], [0], [1], [0, 0, 1, 1], [], []>} : vector<8x8xf32>, vector<8x1xf32>, vector<8x1xf32> -> vector<8x1xf32>
    %c0_55 = arith.constant 0 : index
    %c0_56 = arith.constant 0 : index
    %93 = vector.load %arg3[%c0_55, %c0_56] : memref<8x8xf32, #tpu.memory_space<vmem>>, vector<8x8xf32>
    %cst_57 = arith.constant dense<0.000000e+00> : vector<8x1xf32>
    %94 = tpu.matmul %93, %90, %cst_57 {dimension_numbers = #tpu.dot_dimension_numbers<[1], [0], [0], [1], [0, 0, 1, 1], [], []>} : vector<8x8xf32>, vector<8x1xf32>, vector<8x1xf32> -> vector<8x1xf32>
    %cst_58 = arith.constant 9.765625E-4 : f32
    %95 = vector.broadcast %cst_58 : f32 to vector<8x1xf32>
    %96 = arith.mulf %92, %95 : vector<8x1xf32>
    %cst_59 = arith.constant 9.765625E-4 : f32
    %97 = vector.broadcast %cst_59 : f32 to vector<8x1xf32>
    %98 = arith.mulf %94, %97 : vector<8x1xf32>
    %99 = arith.mulf %96, %96 : vector<8x1xf32>
    %100 = arith.subf %98, %99 : vector<8x1xf32>
    %cst_60 = arith.constant 0.000000e+00 : f32
    %101 = vector.broadcast %cst_60 : f32 to vector<8x1xf32>
    %102 = arith.maximumf %100, %101 : vector<8x1xf32>
    %103 = vector.broadcast %96 : vector<8x1xf32> to vector<8x256xf32>
    %104 = arith.subf %85, %103 : vector<8x256xf32>
    %cst_61 = arith.constant 9.99999996E-13 : f32
    %105 = vector.broadcast %cst_61 : f32 to vector<8x1xf32>
    %106 = arith.addf %102, %105 : vector<8x1xf32>
    %107 = math.rsqrt %106 : vector<8x1xf32>
    %108 = vector.broadcast %107 : vector<8x1xf32> to vector<8x256xf32>
    %109 = arith.mulf %104, %108 : vector<8x256xf32>
    %c4 = arith.constant 4 : index
    %c0_62 = arith.constant 0 : index
    %c0_63 = arith.constant 0 : index
    %110 = vector.load %arg2[%c4, %c0_62, %c0_63] : memref<5x256x256xf32, #tpu.memory_space<vmem>>, vector<1x256x256xf32>
    %111 = vector.shape_cast %110 : vector<1x256x256xf32> to vector<256x256xf32>
    %cst_64 = arith.constant dense<0.000000e+00> : vector<8x256xf32>
    %112 = tpu.matmul %1, %111, %cst_64 {dimension_numbers = #tpu.dot_dimension_numbers<[1], [0], [0], [1], [0, 0, 1, 1], [], []>} : vector<8x256xf32>, vector<256x256xf32>, vector<8x256xf32> -> vector<8x256xf32>
    %cst_65 = arith.constant dense<0.000000e+00> : vector<8xf32>
    %113 = vector.multi_reduction <add>, %112, %cst_65 [1] : vector<8x256xf32> to vector<8xf32>
    %114 = vector.shape_cast %113 : vector<8xf32> to vector<8x1xf32>
    %115 = arith.mulf %112, %112 : vector<8x256xf32>
    %cst_66 = arith.constant dense<0.000000e+00> : vector<8xf32>
    %116 = vector.multi_reduction <add>, %115, %cst_66 [1] : vector<8x256xf32> to vector<8xf32>
    %117 = vector.shape_cast %116 : vector<8xf32> to vector<8x1xf32>
    %c0_67 = arith.constant 0 : index
    %c0_68 = arith.constant 0 : index
    %118 = vector.load %arg3[%c0_67, %c0_68] : memref<8x8xf32, #tpu.memory_space<vmem>>, vector<8x8xf32>
    %cst_69 = arith.constant dense<0.000000e+00> : vector<8x1xf32>
    %119 = tpu.matmul %118, %114, %cst_69 {dimension_numbers = #tpu.dot_dimension_numbers<[1], [0], [0], [1], [0, 0, 1, 1], [], []>} : vector<8x8xf32>, vector<8x1xf32>, vector<8x1xf32> -> vector<8x1xf32>
    %c0_70 = arith.constant 0 : index
    %c0_71 = arith.constant 0 : index
    %120 = vector.load %arg3[%c0_70, %c0_71] : memref<8x8xf32, #tpu.memory_space<vmem>>, vector<8x8xf32>
    %cst_72 = arith.constant dense<0.000000e+00> : vector<8x1xf32>
    %121 = tpu.matmul %120, %117, %cst_72 {dimension_numbers = #tpu.dot_dimension_numbers<[1], [0], [0], [1], [0, 0, 1, 1], [], []>} : vector<8x8xf32>, vector<8x1xf32>, vector<8x1xf32> -> vector<8x1xf32>
    %cst_73 = arith.constant 9.765625E-4 : f32
    %122 = vector.broadcast %cst_73 : f32 to vector<8x1xf32>
    %123 = arith.mulf %119, %122 : vector<8x1xf32>
    %cst_74 = arith.constant 9.765625E-4 : f32
    %124 = vector.broadcast %cst_74 : f32 to vector<8x1xf32>
    %125 = arith.mulf %121, %124 : vector<8x1xf32>
    %126 = arith.mulf %123, %123 : vector<8x1xf32>
    %127 = arith.subf %125, %126 : vector<8x1xf32>
    %cst_75 = arith.constant 0.000000e+00 : f32
    %128 = vector.broadcast %cst_75 : f32 to vector<8x1xf32>
    %129 = arith.maximumf %127, %128 : vector<8x1xf32>
    %130 = vector.broadcast %123 : vector<8x1xf32> to vector<8x256xf32>
    %131 = arith.subf %112, %130 : vector<8x256xf32>
    %cst_76 = arith.constant 9.99999996E-13 : f32
    %132 = vector.broadcast %cst_76 : f32 to vector<8x1xf32>
    %133 = arith.addf %129, %132 : vector<8x1xf32>
    %134 = math.rsqrt %133 : vector<8x1xf32>
    %135 = vector.broadcast %134 : vector<8x1xf32> to vector<8x256xf32>
    %136 = arith.mulf %131, %135 : vector<8x256xf32>
    %c17_i32 = arith.constant 17 : i32
    %137 = tpu.dynamic_rotate %28 by %c17_i32 dim 1 : vector<8x256xf32>, i32 -> vector<8x256xf32>
    %c0_77 = arith.constant 0 : index
    %c0_78 = arith.constant 0 : index
    %c0_79 = arith.constant 0 : index
    %138 = vector.load %arg4[%c0_77, %c0_78, %c0_79] : memref<9x1x256xf32, #tpu.memory_space<vmem>>, vector<1x1x256xf32>
    %139 = vector.shape_cast %138 : vector<1x1x256xf32> to vector<1x256xf32>
    %140 = vector.broadcast %139 : vector<1x256xf32> to vector<8x256xf32>
    %141 = arith.mulf %137, %140 : vector<8x256xf32>
    %c17_i32_80 = arith.constant 17 : i32
    %142 = tpu.dynamic_rotate %55 by %c17_i32_80 dim 1 : vector<8x256xf32>, i32 -> vector<8x256xf32>
    %c0_81 = arith.constant 0 : index
    %c0_82 = arith.constant 0 : index
    %c0_83 = arith.constant 0 : index
    %143 = vector.load %arg4[%c0_81, %c0_82, %c0_83] : memref<9x1x256xf32, #tpu.memory_space<vmem>>, vector<1x1x256xf32>
    %144 = vector.shape_cast %143 : vector<1x1x256xf32> to vector<1x256xf32>
    %145 = vector.broadcast %144 : vector<1x256xf32> to vector<8x256xf32>
    %146 = arith.mulf %142, %145 : vector<8x256xf32>
    %c17_i32_84 = arith.constant 17 : i32
    %147 = tpu.dynamic_rotate %82 by %c17_i32_84 dim 1 : vector<8x256xf32>, i32 -> vector<8x256xf32>
    %c0_85 = arith.constant 0 : index
    %c0_86 = arith.constant 0 : index
    %c0_87 = arith.constant 0 : index
    %148 = vector.load %arg4[%c0_85, %c0_86, %c0_87] : memref<9x1x256xf32, #tpu.memory_space<vmem>>, vector<1x1x256xf32>
    %149 = vector.shape_cast %148 : vector<1x1x256xf32> to vector<1x256xf32>
    %150 = vector.broadcast %149 : vector<1x256xf32> to vector<8x256xf32>
    %151 = arith.mulf %147, %150 : vector<8x256xf32>
    %c17_i32_88 = arith.constant 17 : i32
    %152 = tpu.dynamic_rotate %109 by %c17_i32_88 dim 1 : vector<8x256xf32>, i32 -> vector<8x256xf32>
    %c0_89 = arith.constant 0 : index
    %c0_90 = arith.constant 0 : index
    %c0_91 = arith.constant 0 : index
    %153 = vector.load %arg4[%c0_89, %c0_90, %c0_91] : memref<9x1x256xf32, #tpu.memory_space<vmem>>, vector<1x1x256xf32>
    %154 = vector.shape_cast %153 : vector<1x1x256xf32> to vector<1x256xf32>
    %155 = vector.broadcast %154 : vector<1x256xf32> to vector<8x256xf32>
    %156 = arith.mulf %152, %155 : vector<8x256xf32>
    %c17_i32_92 = arith.constant 17 : i32
    %157 = tpu.dynamic_rotate %136 by %c17_i32_92 dim 1 : vector<8x256xf32>, i32 -> vector<8x256xf32>
    %c0_93 = arith.constant 0 : index
    %c0_94 = arith.constant 0 : index
    %c0_95 = arith.constant 0 : index
    %158 = vector.load %arg4[%c0_93, %c0_94, %c0_95] : memref<9x1x256xf32, #tpu.memory_space<vmem>>, vector<1x1x256xf32>
    %159 = vector.shape_cast %158 : vector<1x1x256xf32> to vector<1x256xf32>
    %160 = vector.broadcast %159 : vector<1x256xf32> to vector<8x256xf32>
    %161 = arith.mulf %157, %160 : vector<8x256xf32>
    %c16_i32 = arith.constant 16 : i32
    %162 = tpu.dynamic_rotate %28 by %c16_i32 dim 1 : vector<8x256xf32>, i32 -> vector<8x256xf32>
    %c1_96 = arith.constant 1 : index
    %c0_97 = arith.constant 0 : index
    %c0_98 = arith.constant 0 : index
    %163 = vector.load %arg4[%c1_96, %c0_97, %c0_98] : memref<9x1x256xf32, #tpu.memory_space<vmem>>, vector<1x1x256xf32>
    %164 = vector.shape_cast %163 : vector<1x1x256xf32> to vector<1x256xf32>
    %165 = vector.broadcast %164 : vector<1x256xf32> to vector<8x256xf32>
    %166 = arith.mulf %162, %165 : vector<8x256xf32>
    %c16_i32_99 = arith.constant 16 : i32
    %167 = tpu.dynamic_rotate %55 by %c16_i32_99 dim 1 : vector<8x256xf32>, i32 -> vector<8x256xf32>
    %c1_100 = arith.constant 1 : index
    %c0_101 = arith.constant 0 : index
    %c0_102 = arith.constant 0 : index
    %168 = vector.load %arg4[%c1_100, %c0_101, %c0_102] : memref<9x1x256xf32, #tpu.memory_space<vmem>>, vector<1x1x256xf32>
    %169 = vector.shape_cast %168 : vector<1x1x256xf32> to vector<1x256xf32>
    %170 = vector.broadcast %169 : vector<1x256xf32> to vector<8x256xf32>
    %171 = arith.mulf %167, %170 : vector<8x256xf32>
    %c16_i32_103 = arith.constant 16 : i32
    %172 = tpu.dynamic_rotate %82 by %c16_i32_103 dim 1 : vector<8x256xf32>, i32 -> vector<8x256xf32>
    %c1_104 = arith.constant 1 : index
    %c0_105 = arith.constant 0 : index
    %c0_106 = arith.constant 0 : index
    %173 = vector.load %arg4[%c1_104, %c0_105, %c0_106] : memref<9x1x256xf32, #tpu.memory_space<vmem>>, vector<1x1x256xf32>
    %174 = vector.shape_cast %173 : vector<1x1x256xf32> to vector<1x256xf32>
    %175 = vector.broadcast %174 : vector<1x256xf32> to vector<8x256xf32>
    %176 = arith.mulf %172, %175 : vector<8x256xf32>
    %c16_i32_107 = arith.constant 16 : i32
    %177 = tpu.dynamic_rotate %109 by %c16_i32_107 dim 1 : vector<8x256xf32>, i32 -> vector<8x256xf32>
    %c1_108 = arith.constant 1 : index
    %c0_109 = arith.constant 0 : index
    %c0_110 = arith.constant 0 : index
    %178 = vector.load %arg4[%c1_108, %c0_109, %c0_110] : memref<9x1x256xf32, #tpu.memory_space<vmem>>, vector<1x1x256xf32>
    %179 = vector.shape_cast %178 : vector<1x1x256xf32> to vector<1x256xf32>
    %180 = vector.broadcast %179 : vector<1x256xf32> to vector<8x256xf32>
    %181 = arith.mulf %177, %180 : vector<8x256xf32>
    %c16_i32_111 = arith.constant 16 : i32
    %182 = tpu.dynamic_rotate %136 by %c16_i32_111 dim 1 : vector<8x256xf32>, i32 -> vector<8x256xf32>
    %c1_112 = arith.constant 1 : index
    %c0_113 = arith.constant 0 : index
    %c0_114 = arith.constant 0 : index
    %183 = vector.load %arg4[%c1_112, %c0_113, %c0_114] : memref<9x1x256xf32, #tpu.memory_space<vmem>>, vector<1x1x256xf32>
    %184 = vector.shape_cast %183 : vector<1x1x256xf32> to vector<1x256xf32>
    %185 = vector.broadcast %184 : vector<1x256xf32> to vector<8x256xf32>
    %186 = arith.mulf %182, %185 : vector<8x256xf32>
    %c15_i32 = arith.constant 15 : i32
    %187 = tpu.dynamic_rotate %28 by %c15_i32 dim 1 : vector<8x256xf32>, i32 -> vector<8x256xf32>
    %c2_115 = arith.constant 2 : index
    %c0_116 = arith.constant 0 : index
    %c0_117 = arith.constant 0 : index
    %188 = vector.load %arg4[%c2_115, %c0_116, %c0_117] : memref<9x1x256xf32, #tpu.memory_space<vmem>>, vector<1x1x256xf32>
    %189 = vector.shape_cast %188 : vector<1x1x256xf32> to vector<1x256xf32>
    %190 = vector.broadcast %189 : vector<1x256xf32> to vector<8x256xf32>
    %191 = arith.mulf %187, %190 : vector<8x256xf32>
    %c15_i32_118 = arith.constant 15 : i32
    %192 = tpu.dynamic_rotate %55 by %c15_i32_118 dim 1 : vector<8x256xf32>, i32 -> vector<8x256xf32>
    %c2_119 = arith.constant 2 : index
    %c0_120 = arith.constant 0 : index
    %c0_121 = arith.constant 0 : index
    %193 = vector.load %arg4[%c2_119, %c0_120, %c0_121] : memref<9x1x256xf32, #tpu.memory_space<vmem>>, vector<1x1x256xf32>
    %194 = vector.shape_cast %193 : vector<1x1x256xf32> to vector<1x256xf32>
    %195 = vector.broadcast %194 : vector<1x256xf32> to vector<8x256xf32>
    %196 = arith.mulf %192, %195 : vector<8x256xf32>
    %c15_i32_122 = arith.constant 15 : i32
    %197 = tpu.dynamic_rotate %82 by %c15_i32_122 dim 1 : vector<8x256xf32>, i32 -> vector<8x256xf32>
    %c2_123 = arith.constant 2 : index
    %c0_124 = arith.constant 0 : index
    %c0_125 = arith.constant 0 : index
    %198 = vector.load %arg4[%c2_123, %c0_124, %c0_125] : memref<9x1x256xf32, #tpu.memory_space<vmem>>, vector<1x1x256xf32>
    %199 = vector.shape_cast %198 : vector<1x1x256xf32> to vector<1x256xf32>
    %200 = vector.broadcast %199 : vector<1x256xf32> to vector<8x256xf32>
    %201 = arith.mulf %197, %200 : vector<8x256xf32>
    %c15_i32_126 = arith.constant 15 : i32
    %202 = tpu.dynamic_rotate %109 by %c15_i32_126 dim 1 : vector<8x256xf32>, i32 -> vector<8x256xf32>
    %c2_127 = arith.constant 2 : index
    %c0_128 = arith.constant 0 : index
    %c0_129 = arith.constant 0 : index
    %203 = vector.load %arg4[%c2_127, %c0_128, %c0_129] : memref<9x1x256xf32, #tpu.memory_space<vmem>>, vector<1x1x256xf32>
    %204 = vector.shape_cast %203 : vector<1x1x256xf32> to vector<1x256xf32>
    %205 = vector.broadcast %204 : vector<1x256xf32> to vector<8x256xf32>
    %206 = arith.mulf %202, %205 : vector<8x256xf32>
    %c15_i32_130 = arith.constant 15 : i32
    %207 = tpu.dynamic_rotate %136 by %c15_i32_130 dim 1 : vector<8x256xf32>, i32 -> vector<8x256xf32>
    %c2_131 = arith.constant 2 : index
    %c0_132 = arith.constant 0 : index
    %c0_133 = arith.constant 0 : index
    %208 = vector.load %arg4[%c2_131, %c0_132, %c0_133] : memref<9x1x256xf32, #tpu.memory_space<vmem>>, vector<1x1x256xf32>
    %209 = vector.shape_cast %208 : vector<1x1x256xf32> to vector<1x256xf32>
    %210 = vector.broadcast %209 : vector<1x256xf32> to vector<8x256xf32>
    %211 = arith.mulf %207, %210 : vector<8x256xf32>
    %c1_i32 = arith.constant 1 : i32
    %212 = tpu.dynamic_rotate %28 by %c1_i32 dim 1 : vector<8x256xf32>, i32 -> vector<8x256xf32>
    %c3_134 = arith.constant 3 : index
    %c0_135 = arith.constant 0 : index
    %c0_136 = arith.constant 0 : index
    %213 = vector.load %arg4[%c3_134, %c0_135, %c0_136] : memref<9x1x256xf32, #tpu.memory_space<vmem>>, vector<1x1x256xf32>
    %214 = vector.shape_cast %213 : vector<1x1x256xf32> to vector<1x256xf32>
    %215 = vector.broadcast %214 : vector<1x256xf32> to vector<8x256xf32>
    %216 = arith.mulf %212, %215 : vector<8x256xf32>
    %c1_i32_137 = arith.constant 1 : i32
    %217 = tpu.dynamic_rotate %55 by %c1_i32_137 dim 1 : vector<8x256xf32>, i32 -> vector<8x256xf32>
    %c3_138 = arith.constant 3 : index
    %c0_139 = arith.constant 0 : index
    %c0_140 = arith.constant 0 : index
    %218 = vector.load %arg4[%c3_138, %c0_139, %c0_140] : memref<9x1x256xf32, #tpu.memory_space<vmem>>, vector<1x1x256xf32>
    %219 = vector.shape_cast %218 : vector<1x1x256xf32> to vector<1x256xf32>
    %220 = vector.broadcast %219 : vector<1x256xf32> to vector<8x256xf32>
    %221 = arith.mulf %217, %220 : vector<8x256xf32>
    %c1_i32_141 = arith.constant 1 : i32
    %222 = tpu.dynamic_rotate %82 by %c1_i32_141 dim 1 : vector<8x256xf32>, i32 -> vector<8x256xf32>
    %c3_142 = arith.constant 3 : index
    %c0_143 = arith.constant 0 : index
    %c0_144 = arith.constant 0 : index
    %223 = vector.load %arg4[%c3_142, %c0_143, %c0_144] : memref<9x1x256xf32, #tpu.memory_space<vmem>>, vector<1x1x256xf32>
    %224 = vector.shape_cast %223 : vector<1x1x256xf32> to vector<1x256xf32>
    %225 = vector.broadcast %224 : vector<1x256xf32> to vector<8x256xf32>
    %226 = arith.mulf %222, %225 : vector<8x256xf32>
    %c1_i32_145 = arith.constant 1 : i32
    %227 = tpu.dynamic_rotate %109 by %c1_i32_145 dim 1 : vector<8x256xf32>, i32 -> vector<8x256xf32>
    %c3_146 = arith.constant 3 : index
    %c0_147 = arith.constant 0 : index
    %c0_148 = arith.constant 0 : index
    %228 = vector.load %arg4[%c3_146, %c0_147, %c0_148] : memref<9x1x256xf32, #tpu.memory_space<vmem>>, vector<1x1x256xf32>
    %229 = vector.shape_cast %228 : vector<1x1x256xf32> to vector<1x256xf32>
    %230 = vector.broadcast %229 : vector<1x256xf32> to vector<8x256xf32>
    %231 = arith.mulf %227, %230 : vector<8x256xf32>
    %c1_i32_149 = arith.constant 1 : i32
    %232 = tpu.dynamic_rotate %136 by %c1_i32_149 dim 1 : vector<8x256xf32>, i32 -> vector<8x256xf32>
    %c3_150 = arith.constant 3 : index
    %c0_151 = arith.constant 0 : index
    %c0_152 = arith.constant 0 : index
    %233 = vector.load %arg4[%c3_150, %c0_151, %c0_152] : memref<9x1x256xf32, #tpu.memory_space<vmem>>, vector<1x1x256xf32>
    %234 = vector.shape_cast %233 : vector<1x1x256xf32> to vector<1x256xf32>
    %235 = vector.broadcast %234 : vector<1x256xf32> to vector<8x256xf32>
    %236 = arith.mulf %232, %235 : vector<8x256xf32>
    %c255_i32 = arith.constant 255 : i32
    %237 = tpu.dynamic_rotate %28 by %c255_i32 dim 1 : vector<8x256xf32>, i32 -> vector<8x256xf32>
    %c5 = arith.constant 5 : index
    %c0_153 = arith.constant 0 : index
    %c0_154 = arith.constant 0 : index
    %238 = vector.load %arg4[%c5, %c0_153, %c0_154] : memref<9x1x256xf32, #tpu.memory_space<vmem>>, vector<1x1x256xf32>
    %239 = vector.shape_cast %238 : vector<1x1x256xf32> to vector<1x256xf32>
    %240 = vector.broadcast %239 : vector<1x256xf32> to vector<8x256xf32>
    %241 = arith.mulf %237, %240 : vector<8x256xf32>
    %c255_i32_155 = arith.constant 255 : i32
    %242 = tpu.dynamic_rotate %55 by %c255_i32_155 dim 1 : vector<8x256xf32>, i32 -> vector<8x256xf32>
    %c5_156 = arith.constant 5 : index
    %c0_157 = arith.constant 0 : index
    %c0_158 = arith.constant 0 : index
    %243 = vector.load %arg4[%c5_156, %c0_157, %c0_158] : memref<9x1x256xf32, #tpu.memory_space<vmem>>, vector<1x1x256xf32>
    %244 = vector.shape_cast %243 : vector<1x1x256xf32> to vector<1x256xf32>
    %245 = vector.broadcast %244 : vector<1x256xf32> to vector<8x256xf32>
    %246 = arith.mulf %242, %245 : vector<8x256xf32>
    %c255_i32_159 = arith.constant 255 : i32
    %247 = tpu.dynamic_rotate %82 by %c255_i32_159 dim 1 : vector<8x256xf32>, i32 -> vector<8x256xf32>
    %c5_160 = arith.constant 5 : index
    %c0_161 = arith.constant 0 : index
    %c0_162 = arith.constant 0 : index
    %248 = vector.load %arg4[%c5_160, %c0_161, %c0_162] : memref<9x1x256xf32, #tpu.memory_space<vmem>>, vector<1x1x256xf32>
    %249 = vector.shape_cast %248 : vector<1x1x256xf32> to vector<1x256xf32>
    %250 = vector.broadcast %249 : vector<1x256xf32> to vector<8x256xf32>
    %251 = arith.mulf %247, %250 : vector<8x256xf32>
    %c255_i32_163 = arith.constant 255 : i32
    %252 = tpu.dynamic_rotate %109 by %c255_i32_163 dim 1 : vector<8x256xf32>, i32 -> vector<8x256xf32>
    %c5_164 = arith.constant 5 : index
    %c0_165 = arith.constant 0 : index
    %c0_166 = arith.constant 0 : index
    %253 = vector.load %arg4[%c5_164, %c0_165, %c0_166] : memref<9x1x256xf32, #tpu.memory_space<vmem>>, vector<1x1x256xf32>
    %254 = vector.shape_cast %253 : vector<1x1x256xf32> to vector<1x256xf32>
    %255 = vector.broadcast %254 : vector<1x256xf32> to vector<8x256xf32>
    %256 = arith.mulf %252, %255 : vector<8x256xf32>
    %c255_i32_167 = arith.constant 255 : i32
    %257 = tpu.dynamic_rotate %136 by %c255_i32_167 dim 1 : vector<8x256xf32>, i32 -> vector<8x256xf32>
    %c5_168 = arith.constant 5 : index
    %c0_169 = arith.constant 0 : index
    %c0_170 = arith.constant 0 : index
    %258 = vector.load %arg4[%c5_168, %c0_169, %c0_170] : memref<9x1x256xf32, #tpu.memory_space<vmem>>, vector<1x1x256xf32>
    %259 = vector.shape_cast %258 : vector<1x1x256xf32> to vector<1x256xf32>
    %260 = vector.broadcast %259 : vector<1x256xf32> to vector<8x256xf32>
    %261 = arith.mulf %257, %260 : vector<8x256xf32>
    %c241_i32 = arith.constant 241 : i32
    %262 = tpu.dynamic_rotate %28 by %c241_i32 dim 1 : vector<8x256xf32>, i32 -> vector<8x256xf32>
    %c6 = arith.constant 6 : index
    %c0_171 = arith.constant 0 : index
    %c0_172 = arith.constant 0 : index
    %263 = vector.load %arg4[%c6, %c0_171, %c0_172] : memref<9x1x256xf32, #tpu.memory_space<vmem>>, vector<1x1x256xf32>
    %264 = vector.shape_cast %263 : vector<1x1x256xf32> to vector<1x256xf32>
    %265 = vector.broadcast %264 : vector<1x256xf32> to vector<8x256xf32>
    %266 = arith.mulf %262, %265 : vector<8x256xf32>
    %c241_i32_173 = arith.constant 241 : i32
    %267 = tpu.dynamic_rotate %55 by %c241_i32_173 dim 1 : vector<8x256xf32>, i32 -> vector<8x256xf32>
    %c6_174 = arith.constant 6 : index
    %c0_175 = arith.constant 0 : index
    %c0_176 = arith.constant 0 : index
    %268 = vector.load %arg4[%c6_174, %c0_175, %c0_176] : memref<9x1x256xf32, #tpu.memory_space<vmem>>, vector<1x1x256xf32>
    %269 = vector.shape_cast %268 : vector<1x1x256xf32> to vector<1x256xf32>
    %270 = vector.broadcast %269 : vector<1x256xf32> to vector<8x256xf32>
    %271 = arith.mulf %267, %270 : vector<8x256xf32>
    %c241_i32_177 = arith.constant 241 : i32
    %272 = tpu.dynamic_rotate %82 by %c241_i32_177 dim 1 : vector<8x256xf32>, i32 -> vector<8x256xf32>
    %c6_178 = arith.constant 6 : index
    %c0_179 = arith.constant 0 : index
    %c0_180 = arith.constant 0 : index
    %273 = vector.load %arg4[%c6_178, %c0_179, %c0_180] : memref<9x1x256xf32, #tpu.memory_space<vmem>>, vector<1x1x256xf32>
    %274 = vector.shape_cast %273 : vector<1x1x256xf32> to vector<1x256xf32>
    %275 = vector.broadcast %274 : vector<1x256xf32> to vector<8x256xf32>
    %276 = arith.mulf %272, %275 : vector<8x256xf32>
    %c241_i32_181 = arith.constant 241 : i32
    %277 = tpu.dynamic_rotate %109 by %c241_i32_181 dim 1 : vector<8x256xf32>, i32 -> vector<8x256xf32>
    %c6_182 = arith.constant 6 : index
    %c0_183 = arith.constant 0 : index
    %c0_184 = arith.constant 0 : index
    %278 = vector.load %arg4[%c6_182, %c0_183, %c0_184] : memref<9x1x256xf32, #tpu.memory_space<vmem>>, vector<1x1x256xf32>
    %279 = vector.shape_cast %278 : vector<1x1x256xf32> to vector<1x256xf32>
    %280 = vector.broadcast %279 : vector<1x256xf32> to vector<8x256xf32>
    %281 = arith.mulf %277, %280 : vector<8x256xf32>
    %c241_i32_185 = arith.constant 241 : i32
    %282 = tpu.dynamic_rotate %136 by %c241_i32_185 dim 1 : vector<8x256xf32>, i32 -> vector<8x256xf32>
    %c6_186 = arith.constant 6 : index
    %c0_187 = arith.constant 0 : index
    %c0_188 = arith.constant 0 : index
    %283 = vector.load %arg4[%c6_186, %c0_187, %c0_188] : memref<9x1x256xf32, #tpu.memory_space<vmem>>, vector<1x1x256xf32>
    %284 = vector.shape_cast %283 : vector<1x1x256xf32> to vector<1x256xf32>
    %285 = vector.broadcast %284 : vector<1x256xf32> to vector<8x256xf32>
    %286 = arith.mulf %282, %285 : vector<8x256xf32>
    %c240_i32 = arith.constant 240 : i32
    %287 = tpu.dynamic_rotate %28 by %c240_i32 dim 1 : vector<8x256xf32>, i32 -> vector<8x256xf32>
    %c7 = arith.constant 7 : index
    %c0_189 = arith.constant 0 : index
    %c0_190 = arith.constant 0 : index
    %288 = vector.load %arg4[%c7, %c0_189, %c0_190] : memref<9x1x256xf32, #tpu.memory_space<vmem>>, vector<1x1x256xf32>
    %289 = vector.shape_cast %288 : vector<1x1x256xf32> to vector<1x256xf32>
    %290 = vector.broadcast %289 : vector<1x256xf32> to vector<8x256xf32>
    %291 = arith.mulf %287, %290 : vector<8x256xf32>
    %c240_i32_191 = arith.constant 240 : i32
    %292 = tpu.dynamic_rotate %55 by %c240_i32_191 dim 1 : vector<8x256xf32>, i32 -> vector<8x256xf32>
    %c7_192 = arith.constant 7 : index
    %c0_193 = arith.constant 0 : index
    %c0_194 = arith.constant 0 : index
    %293 = vector.load %arg4[%c7_192, %c0_193, %c0_194] : memref<9x1x256xf32, #tpu.memory_space<vmem>>, vector<1x1x256xf32>
    %294 = vector.shape_cast %293 : vector<1x1x256xf32> to vector<1x256xf32>
    %295 = vector.broadcast %294 : vector<1x256xf32> to vector<8x256xf32>
    %296 = arith.mulf %292, %295 : vector<8x256xf32>
    %c240_i32_195 = arith.constant 240 : i32
    %297 = tpu.dynamic_rotate %82 by %c240_i32_195 dim 1 : vector<8x256xf32>, i32 -> vector<8x256xf32>
    %c7_196 = arith.constant 7 : index
    %c0_197 = arith.constant 0 : index
    %c0_198 = arith.constant 0 : index
    %298 = vector.load %arg4[%c7_196, %c0_197, %c0_198] : memref<9x1x256xf32, #tpu.memory_space<vmem>>, vector<1x1x256xf32>
    %299 = vector.shape_cast %298 : vector<1x1x256xf32> to vector<1x256xf32>
    %300 = vector.broadcast %299 : vector<1x256xf32> to vector<8x256xf32>
    %301 = arith.mulf %297, %300 : vector<8x256xf32>
    %c240_i32_199 = arith.constant 240 : i32
    %302 = tpu.dynamic_rotate %109 by %c240_i32_199 dim 1 : vector<8x256xf32>, i32 -> vector<8x256xf32>
    %c7_200 = arith.constant 7 : index
    %c0_201 = arith.constant 0 : index
    %c0_202 = arith.constant 0 : index
    %303 = vector.load %arg4[%c7_200, %c0_201, %c0_202] : memref<9x1x256xf32, #tpu.memory_space<vmem>>, vector<1x1x256xf32>
    %304 = vector.shape_cast %303 : vector<1x1x256xf32> to vector<1x256xf32>
    %305 = vector.broadcast %304 : vector<1x256xf32> to vector<8x256xf32>
    %306 = arith.mulf %302, %305 : vector<8x256xf32>
    %c240_i32_203 = arith.constant 240 : i32
    %307 = tpu.dynamic_rotate %136 by %c240_i32_203 dim 1 : vector<8x256xf32>, i32 -> vector<8x256xf32>
    %c7_204 = arith.constant 7 : index
    %c0_205 = arith.constant 0 : index
    %c0_206 = arith.constant 0 : index
    %308 = vector.load %arg4[%c7_204, %c0_205, %c0_206] : memref<9x1x256xf32, #tpu.memory_space<vmem>>, vector<1x1x256xf32>
    %309 = vector.shape_cast %308 : vector<1x1x256xf32> to vector<1x256xf32>
    %310 = vector.broadcast %309 : vector<1x256xf32> to vector<8x256xf32>
    %311 = arith.mulf %307, %310 : vector<8x256xf32>
    %c239_i32 = arith.constant 239 : i32
    %312 = tpu.dynamic_rotate %28 by %c239_i32 dim 1 : vector<8x256xf32>, i32 -> vector<8x256xf32>
    %c8 = arith.constant 8 : index
    %c0_207 = arith.constant 0 : index
    %c0_208 = arith.constant 0 : index
    %313 = vector.load %arg4[%c8, %c0_207, %c0_208] : memref<9x1x256xf32, #tpu.memory_space<vmem>>, vector<1x1x256xf32>
    %314 = vector.shape_cast %313 : vector<1x1x256xf32> to vector<1x256xf32>
    %315 = vector.broadcast %314 : vector<1x256xf32> to vector<8x256xf32>
    %316 = arith.mulf %312, %315 : vector<8x256xf32>
    %c239_i32_209 = arith.constant 239 : i32
    %317 = tpu.dynamic_rotate %55 by %c239_i32_209 dim 1 : vector<8x256xf32>, i32 -> vector<8x256xf32>
    %c8_210 = arith.constant 8 : index
    %c0_211 = arith.constant 0 : index
    %c0_212 = arith.constant 0 : index
    %318 = vector.load %arg4[%c8_210, %c0_211, %c0_212] : memref<9x1x256xf32, #tpu.memory_space<vmem>>, vector<1x1x256xf32>
    %319 = vector.shape_cast %318 : vector<1x1x256xf32> to vector<1x256xf32>
    %320 = vector.broadcast %319 : vector<1x256xf32> to vector<8x256xf32>
    %321 = arith.mulf %317, %320 : vector<8x256xf32>
    %c239_i32_213 = arith.constant 239 : i32
    %322 = tpu.dynamic_rotate %82 by %c239_i32_213 dim 1 : vector<8x256xf32>, i32 -> vector<8x256xf32>
    %c8_214 = arith.constant 8 : index
    %c0_215 = arith.constant 0 : index
    %c0_216 = arith.constant 0 : index
    %323 = vector.load %arg4[%c8_214, %c0_215, %c0_216] : memref<9x1x256xf32, #tpu.memory_space<vmem>>, vector<1x1x256xf32>
    %324 = vector.shape_cast %323 : vector<1x1x256xf32> to vector<1x256xf32>
    %325 = vector.broadcast %324 : vector<1x256xf32> to vector<8x256xf32>
    %326 = arith.mulf %322, %325 : vector<8x256xf32>
    %c239_i32_217 = arith.constant 239 : i32
    %327 = tpu.dynamic_rotate %109 by %c239_i32_217 dim 1 : vector<8x256xf32>, i32 -> vector<8x256xf32>
    %c8_218 = arith.constant 8 : index
    %c0_219 = arith.constant 0 : index
    %c0_220 = arith.constant 0 : index
    %328 = vector.load %arg4[%c8_218, %c0_219, %c0_220] : memref<9x1x256xf32, #tpu.memory_space<vmem>>, vector<1x1x256xf32>
    %329 = vector.shape_cast %328 : vector<1x1x256xf32> to vector<1x256xf32>
    %330 = vector.broadcast %329 : vector<1x256xf32> to vector<8x256xf32>
    %331 = arith.mulf %327, %330 : vector<8x256xf32>
    %c239_i32_221 = arith.constant 239 : i32
    %332 = tpu.dynamic_rotate %136 by %c239_i32_221 dim 1 : vector<8x256xf32>, i32 -> vector<8x256xf32>
    %c8_222 = arith.constant 8 : index
    %c0_223 = arith.constant 0 : index
    %c0_224 = arith.constant 0 : index
    %333 = vector.load %arg4[%c8_222, %c0_223, %c0_224] : memref<9x1x256xf32, #tpu.memory_space<vmem>>, vector<1x1x256xf32>
    %334 = vector.shape_cast %333 : vector<1x1x256xf32> to vector<1x256xf32>
    %335 = vector.broadcast %334 : vector<1x256xf32> to vector<8x256xf32>
    %336 = arith.mulf %332, %335 : vector<8x256xf32>
    %337 = tpu.concatenate %141, %146, %151, %156, %161, %166, %171, %176, %181, %186, %191, %196, %201, %206, %211, %216 in 0 : vector<8x256xf32>, vector<8x256xf32>, vector<8x256xf32>, vector<8x256xf32>, vector<8x256xf32>, vector<8x256xf32>, vector<8x256xf32>, vector<8x256xf32>, vector<8x256xf32>, vector<8x256xf32>, vector<8x256xf32>, vector<8x256xf32>, vector<8x256xf32>, vector<8x256xf32>, vector<8x256xf32>, vector<8x256xf32> -> vector<128x256xf32>
    %338 = tpu.concatenate %221, %226, %231, %236, %28, %55, %82, %109, %136, %241, %246, %251, %256, %261, %266, %271 in 0 : vector<8x256xf32>, vector<8x256xf32>, vector<8x256xf32>, vector<8x256xf32>, vector<8x256xf32>, vector<8x256xf32>, vector<8x256xf32>, vector<8x256xf32>, vector<8x256xf32>, vector<8x256xf32>, vector<8x256xf32>, vector<8x256xf32>, vector<8x256xf32>, vector<8x256xf32>, vector<8x256xf32>, vector<8x256xf32> -> vector<128x256xf32>
    %339 = tpu.concatenate %276, %281, %286, %291, %296, %301, %306, %311, %316, %321, %326, %331, %336 in 0 : vector<8x256xf32>, vector<8x256xf32>, vector<8x256xf32>, vector<8x256xf32>, vector<8x256xf32>, vector<8x256xf32>, vector<8x256xf32>, vector<8x256xf32>, vector<8x256xf32>, vector<8x256xf32>, vector<8x256xf32>, vector<8x256xf32>, vector<8x256xf32> -> vector<104x256xf32>
    %340 = tpu.concatenate %337, %338, %339 in 0 : vector<128x256xf32>, vector<128x256xf32>, vector<104x256xf32> -> vector<360x256xf32>
    %c0_225 = arith.constant 0 : index
    %c0_226 = arith.constant 0 : index
    %341 = vector.load %arg14[%c0_225, %c0_226] : memref<8x360xf32, #tpu.memory_space<vmem>>, vector<8x360xf32>
    %cst_227 = arith.constant dense<0.000000e+00> : vector<8x256xf32>
    %342 = tpu.matmul %341, %340, %cst_227 {dimension_numbers = #tpu.dot_dimension_numbers<[1], [0], [0], [1], [0, 0, 1, 1], [], []>} : vector<8x360xf32>, vector<360x256xf32>, vector<8x256xf32> -> vector<8x256xf32>
    %c0_228 = arith.constant 0 : index
    %c0_229 = arith.constant 0 : index
    %343 = vector.load %arg15[%c0_228, %c0_229] : memref<8x1xf32, #tpu.memory_space<vmem>>, vector<8x1xf32>
    %344 = vector.broadcast %343 : vector<8x1xf32> to vector<8x256xf32>
    %345 = arith.addf %342, %344 : vector<8x256xf32>
    %c255_i32_230 = arith.constant 255 : i32
    %346 = tpu.dynamic_rotate %345 by %c255_i32_230 dim 1 : vector<8x256xf32>, i32 -> vector<8x256xf32>
    %c240_i32_231 = arith.constant 240 : i32
    %347 = tpu.dynamic_rotate %345 by %c240_i32_231 dim 1 : vector<8x256xf32>, i32 -> vector<8x256xf32>
    %c239_i32_232 = arith.constant 239 : i32
    %348 = tpu.dynamic_rotate %345 by %c239_i32_232 dim 1 : vector<8x256xf32>, i32 -> vector<8x256xf32>
    %349 = arith.maximumf %345, %346 : vector<8x256xf32>
    %350 = arith.maximumf %347, %348 : vector<8x256xf32>
    %351 = arith.maximumf %349, %350 : vector<8x256xf32>
    %c0_233 = arith.constant 0 : index
    %c0_234 = arith.constant 0 : index
    %352 = vector.load %arg8[%c0_233, %c0_234] : memref<256x64xf32, #tpu.memory_space<vmem>>, vector<256x64xf32>
    %cst_235 = arith.constant dense<0.000000e+00> : vector<8x64xf32>
    %353 = tpu.matmul %351, %352, %cst_235 {dimension_numbers = #tpu.dot_dimension_numbers<[1], [0], [0], [1], [0, 0, 1, 1], [], []>} : vector<8x256xf32>, vector<256x64xf32>, vector<8x64xf32> -> vector<8x64xf32>
    %c0_236 = arith.constant 0 : index
    %c0_237 = arith.constant 0 : index
    %c0_238 = arith.constant 0 : index
    %354 = vector.load %arg5[%c0_236, %c0_237, %c0_238] : memref<9x64x64xf32, #tpu.memory_space<vmem>>, vector<1x64x64xf32>
    %355 = vector.shape_cast %354 : vector<1x64x64xf32> to vector<64x64xf32>
    %cst_239 = arith.constant dense<0.000000e+00> : vector<8x64xf32>
    %356 = tpu.matmul %353, %355, %cst_239 {dimension_numbers = #tpu.dot_dimension_numbers<[1], [0], [0], [1], [0, 0, 1, 1], [], []>} : vector<8x64xf32>, vector<64x64xf32>, vector<8x64xf32> -> vector<8x64xf32>
    %c1_240 = arith.constant 1 : index
    %c0_241 = arith.constant 0 : index
    %c0_242 = arith.constant 0 : index
    %357 = vector.load %arg5[%c1_240, %c0_241, %c0_242] : memref<9x64x64xf32, #tpu.memory_space<vmem>>, vector<1x64x64xf32>
    %358 = vector.shape_cast %357 : vector<1x64x64xf32> to vector<64x64xf32>
    %cst_243 = arith.constant dense<0.000000e+00> : vector<8x64xf32>
    %359 = tpu.matmul %353, %358, %cst_243 {dimension_numbers = #tpu.dot_dimension_numbers<[1], [0], [0], [1], [0, 0, 1, 1], [], []>} : vector<8x64xf32>, vector<64x64xf32>, vector<8x64xf32> -> vector<8x64xf32>
    %c2_244 = arith.constant 2 : index
    %c0_245 = arith.constant 0 : index
    %c0_246 = arith.constant 0 : index
    %360 = vector.load %arg5[%c2_244, %c0_245, %c0_246] : memref<9x64x64xf32, #tpu.memory_space<vmem>>, vector<1x64x64xf32>
    %361 = vector.shape_cast %360 : vector<1x64x64xf32> to vector<64x64xf32>
    %cst_247 = arith.constant dense<0.000000e+00> : vector<8x64xf32>
    %362 = tpu.matmul %353, %361, %cst_247 {dimension_numbers = #tpu.dot_dimension_numbers<[1], [0], [0], [1], [0, 0, 1, 1], [], []>} : vector<8x64xf32>, vector<64x64xf32>, vector<8x64xf32> -> vector<8x64xf32>
    %c3_248 = arith.constant 3 : index
    %c0_249 = arith.constant 0 : index
    %c0_250 = arith.constant 0 : index
    %363 = vector.load %arg5[%c3_248, %c0_249, %c0_250] : memref<9x64x64xf32, #tpu.memory_space<vmem>>, vector<1x64x64xf32>
    %364 = vector.shape_cast %363 : vector<1x64x64xf32> to vector<64x64xf32>
    %cst_251 = arith.constant dense<0.000000e+00> : vector<8x64xf32>
    %365 = tpu.matmul %353, %364, %cst_251 {dimension_numbers = #tpu.dot_dimension_numbers<[1], [0], [0], [1], [0, 0, 1, 1], [], []>} : vector<8x64xf32>, vector<64x64xf32>, vector<8x64xf32> -> vector<8x64xf32>
    %c5_252 = arith.constant 5 : index
    %c0_253 = arith.constant 0 : index
    %c0_254 = arith.constant 0 : index
    %366 = vector.load %arg5[%c5_252, %c0_253, %c0_254] : memref<9x64x64xf32, #tpu.memory_space<vmem>>, vector<1x64x64xf32>
    %367 = vector.shape_cast %366 : vector<1x64x64xf32> to vector<64x64xf32>
    %cst_255 = arith.constant dense<0.000000e+00> : vector<8x64xf32>
    %368 = tpu.matmul %353, %367, %cst_255 {dimension_numbers = #tpu.dot_dimension_numbers<[1], [0], [0], [1], [0, 0, 1, 1], [], []>} : vector<8x64xf32>, vector<64x64xf32>, vector<8x64xf32> -> vector<8x64xf32>
    %c6_256 = arith.constant 6 : index
    %c0_257 = arith.constant 0 : index
    %c0_258 = arith.constant 0 : index
    %369 = vector.load %arg5[%c6_256, %c0_257, %c0_258] : memref<9x64x64xf32, #tpu.memory_space<vmem>>, vector<1x64x64xf32>
    %370 = vector.shape_cast %369 : vector<1x64x64xf32> to vector<64x64xf32>
    %cst_259 = arith.constant dense<0.000000e+00> : vector<8x64xf32>
    %371 = tpu.matmul %353, %370, %cst_259 {dimension_numbers = #tpu.dot_dimension_numbers<[1], [0], [0], [1], [0, 0, 1, 1], [], []>} : vector<8x64xf32>, vector<64x64xf32>, vector<8x64xf32> -> vector<8x64xf32>
    %c7_260 = arith.constant 7 : index
    %c0_261 = arith.constant 0 : index
    %c0_262 = arith.constant 0 : index
    %372 = vector.load %arg5[%c7_260, %c0_261, %c0_262] : memref<9x64x64xf32, #tpu.memory_space<vmem>>, vector<1x64x64xf32>
    %373 = vector.shape_cast %372 : vector<1x64x64xf32> to vector<64x64xf32>
    %cst_263 = arith.constant dense<0.000000e+00> : vector<8x64xf32>
    %374 = tpu.matmul %353, %373, %cst_263 {dimension_numbers = #tpu.dot_dimension_numbers<[1], [0], [0], [1], [0, 0, 1, 1], [], []>} : vector<8x64xf32>, vector<64x64xf32>, vector<8x64xf32> -> vector<8x64xf32>
    %c8_264 = arith.constant 8 : index
    %c0_265 = arith.constant 0 : index
    %c0_266 = arith.constant 0 : index
    %375 = vector.load %arg5[%c8_264, %c0_265, %c0_266] : memref<9x64x64xf32, #tpu.memory_space<vmem>>, vector<1x64x64xf32>
    %376 = vector.shape_cast %375 : vector<1x64x64xf32> to vector<64x64xf32>
    %cst_267 = arith.constant dense<0.000000e+00> : vector<8x64xf32>
    %377 = tpu.matmul %353, %376, %cst_267 {dimension_numbers = #tpu.dot_dimension_numbers<[1], [0], [0], [1], [0, 0, 1, 1], [], []>} : vector<8x64xf32>, vector<64x64xf32>, vector<8x64xf32> -> vector<8x64xf32>
    %378 = tpu.concatenate %356, %359, %362, %365, %353, %368, %371, %374, %377 in 0 : vector<8x64xf32>, vector<8x64xf32>, vector<8x64xf32>, vector<8x64xf32>, vector<8x64xf32>, vector<8x64xf32>, vector<8x64xf32>, vector<8x64xf32>, vector<8x64xf32> -> vector<72x64xf32>
    %c0_268 = arith.constant 0 : index
    %c0_269 = arith.constant 0 : index
    %c0_270 = arith.constant 0 : index
    %379 = vector.load %arg16[%c0_268, %c0_269, %c0_270] : memref<6x8x72xf32, #tpu.memory_space<vmem>>, vector<1x8x72xf32>
    %380 = vector.shape_cast %379 : vector<1x8x72xf32> to vector<8x72xf32>
    %cst_271 = arith.constant dense<0.000000e+00> : vector<8x64xf32>
    %381 = tpu.matmul %380, %378, %cst_271 {dimension_numbers = #tpu.dot_dimension_numbers<[1], [0], [0], [1], [0, 0, 1, 1], [], []>} : vector<8x72xf32>, vector<72x64xf32>, vector<8x64xf32> -> vector<8x64xf32>
    %c0_272 = arith.constant 0 : index
    %c0_273 = arith.constant 0 : index
    %c0_274 = arith.constant 0 : index
    %382 = vector.load %arg17[%c0_272, %c0_273, %c0_274] : memref<6x8x1xf32, #tpu.memory_space<vmem>>, vector<1x8x1xf32>
    %383 = vector.shape_cast %382 : vector<1x8x1xf32> to vector<8x1xf32>
    %384 = vector.broadcast %383 : vector<8x1xf32> to vector<8x64xf32>
    %385 = arith.addf %381, %384 : vector<8x64xf32>
    %c5_275 = arith.constant 5 : index
    %c0_276 = arith.constant 0 : index
    %c0_277 = arith.constant 0 : index
    %386 = vector.load %arg5[%c5_275, %c0_276, %c0_277] : memref<9x64x64xf32, #tpu.memory_space<vmem>>, vector<1x64x64xf32>
    %387 = vector.shape_cast %386 : vector<1x64x64xf32> to vector<64x64xf32>
    %cst_278 = arith.constant dense<0.000000e+00> : vector<8x64xf32>
    %388 = tpu.matmul %385, %387, %cst_278 {dimension_numbers = #tpu.dot_dimension_numbers<[1], [0], [0], [1], [0, 0, 1, 1], [], []>} : vector<8x64xf32>, vector<64x64xf32>, vector<8x64xf32> -> vector<8x64xf32>
    %389 = arith.maximumf %385, %388 : vector<8x64xf32>
    %c7_279 = arith.constant 7 : index
    %c0_280 = arith.constant 0 : index
    %c0_281 = arith.constant 0 : index
    %390 = vector.load %arg5[%c7_279, %c0_280, %c0_281] : memref<9x64x64xf32, #tpu.memory_space<vmem>>, vector<1x64x64xf32>
    %391 = vector.shape_cast %390 : vector<1x64x64xf32> to vector<64x64xf32>
    %cst_282 = arith.constant dense<0.000000e+00> : vector<8x64xf32>
    %392 = tpu.matmul %385, %391, %cst_282 {dimension_numbers = #tpu.dot_dimension_numbers<[1], [0], [0], [1], [0, 0, 1, 1], [], []>} : vector<8x64xf32>, vector<64x64xf32>, vector<8x64xf32> -> vector<8x64xf32>
    %c8_283 = arith.constant 8 : index
    %c0_284 = arith.constant 0 : index
    %c0_285 = arith.constant 0 : index
    %393 = vector.load %arg5[%c8_283, %c0_284, %c0_285] : memref<9x64x64xf32, #tpu.memory_space<vmem>>, vector<1x64x64xf32>
    %394 = vector.shape_cast %393 : vector<1x64x64xf32> to vector<64x64xf32>
    %cst_286 = arith.constant dense<0.000000e+00> : vector<8x64xf32>
    %395 = tpu.matmul %385, %394, %cst_286 {dimension_numbers = #tpu.dot_dimension_numbers<[1], [0], [0], [1], [0, 0, 1, 1], [], []>} : vector<8x64xf32>, vector<64x64xf32>, vector<8x64xf32> -> vector<8x64xf32>
    %396 = arith.maximumf %392, %395 : vector<8x64xf32>
    %397 = arith.maximumf %389, %396 : vector<8x64xf32>
    %c0_287 = arith.constant 0 : index
    %c0_288 = arith.constant 0 : index
    %398 = vector.load %arg9[%c0_287, %c0_288] : memref<64x16xf32, #tpu.memory_space<vmem>>, vector<64x16xf32>
    %cst_289 = arith.constant dense<0.000000e+00> : vector<8x16xf32>
    %399 = tpu.matmul %397, %398, %cst_289 {dimension_numbers = #tpu.dot_dimension_numbers<[1], [0], [0], [1], [0, 0, 1, 1], [], []>} : vector<8x64xf32>, vector<64x16xf32>, vector<8x16xf32> -> vector<8x16xf32>
    %c0_290 = arith.constant 0 : index
    %c0_291 = arith.constant 0 : index
    %c0_292 = arith.constant 0 : index
    %400 = vector.load %arg6[%c0_290, %c0_291, %c0_292] : memref<9x16x16xf32, #tpu.memory_space<vmem>>, vector<1x16x16xf32>
    %401 = vector.shape_cast %400 : vector<1x16x16xf32> to vector<16x16xf32>
    %cst_293 = arith.constant dense<0.000000e+00> : vector<8x16xf32>
    %402 = tpu.matmul %399, %401, %cst_293 {dimension_numbers = #tpu.dot_dimension_numbers<[1], [0], [0], [1], [0, 0, 1, 1], [], []>} : vector<8x16xf32>, vector<16x16xf32>, vector<8x16xf32> -> vector<8x16xf32>
    %c1_294 = arith.constant 1 : index
    %c0_295 = arith.constant 0 : index
    %c0_296 = arith.constant 0 : index
    %403 = vector.load %arg6[%c1_294, %c0_295, %c0_296] : memref<9x16x16xf32, #tpu.memory_space<vmem>>, vector<1x16x16xf32>
    %404 = vector.shape_cast %403 : vector<1x16x16xf32> to vector<16x16xf32>
    %cst_297 = arith.constant dense<0.000000e+00> : vector<8x16xf32>
    %405 = tpu.matmul %399, %404, %cst_297 {dimension_numbers = #tpu.dot_dimension_numbers<[1], [0], [0], [1], [0, 0, 1, 1], [], []>} : vector<8x16xf32>, vector<16x16xf32>, vector<8x16xf32> -> vector<8x16xf32>
    %c2_298 = arith.constant 2 : index
    %c0_299 = arith.constant 0 : index
    %c0_300 = arith.constant 0 : index
    %406 = vector.load %arg6[%c2_298, %c0_299, %c0_300] : memref<9x16x16xf32, #tpu.memory_space<vmem>>, vector<1x16x16xf32>
    %407 = vector.shape_cast %406 : vector<1x16x16xf32> to vector<16x16xf32>
    %cst_301 = arith.constant dense<0.000000e+00> : vector<8x16xf32>
    %408 = tpu.matmul %399, %407, %cst_301 {dimension_numbers = #tpu.dot_dimension_numbers<[1], [0], [0], [1], [0, 0, 1, 1], [], []>} : vector<8x16xf32>, vector<16x16xf32>, vector<8x16xf32> -> vector<8x16xf32>
    %c3_302 = arith.constant 3 : index
    %c0_303 = arith.constant 0 : index
    %c0_304 = arith.constant 0 : index
    %409 = vector.load %arg6[%c3_302, %c0_303, %c0_304] : memref<9x16x16xf32, #tpu.memory_space<vmem>>, vector<1x16x16xf32>
    %410 = vector.shape_cast %409 : vector<1x16x16xf32> to vector<16x16xf32>
    %cst_305 = arith.constant dense<0.000000e+00> : vector<8x16xf32>
    %411 = tpu.matmul %399, %410, %cst_305 {dimension_numbers = #tpu.dot_dimension_numbers<[1], [0], [0], [1], [0, 0, 1, 1], [], []>} : vector<8x16xf32>, vector<16x16xf32>, vector<8x16xf32> -> vector<8x16xf32>
    %c5_306 = arith.constant 5 : index
    %c0_307 = arith.constant 0 : index
    %c0_308 = arith.constant 0 : index
    %412 = vector.load %arg6[%c5_306, %c0_307, %c0_308] : memref<9x16x16xf32, #tpu.memory_space<vmem>>, vector<1x16x16xf32>
    %413 = vector.shape_cast %412 : vector<1x16x16xf32> to vector<16x16xf32>
    %cst_309 = arith.constant dense<0.000000e+00> : vector<8x16xf32>
    %414 = tpu.matmul %399, %413, %cst_309 {dimension_numbers = #tpu.dot_dimension_numbers<[1], [0], [0], [1], [0, 0, 1, 1], [], []>} : vector<8x16xf32>, vector<16x16xf32>, vector<8x16xf32> -> vector<8x16xf32>
    %c6_310 = arith.constant 6 : index
    %c0_311 = arith.constant 0 : index
    %c0_312 = arith.constant 0 : index
    %415 = vector.load %arg6[%c6_310, %c0_311, %c0_312] : memref<9x16x16xf32, #tpu.memory_space<vmem>>, vector<1x16x16xf32>
    %416 = vector.shape_cast %415 : vector<1x16x16xf32> to vector<16x16xf32>
    %cst_313 = arith.constant dense<0.000000e+00> : vector<8x16xf32>
    %417 = tpu.matmul %399, %416, %cst_313 {dimension_numbers = #tpu.dot_dimension_numbers<[1], [0], [0], [1], [0, 0, 1, 1], [], []>} : vector<8x16xf32>, vector<16x16xf32>, vector<8x16xf32> -> vector<8x16xf32>
    %c7_314 = arith.constant 7 : index
    %c0_315 = arith.constant 0 : index
    %c0_316 = arith.constant 0 : index
    %418 = vector.load %arg6[%c7_314, %c0_315, %c0_316] : memref<9x16x16xf32, #tpu.memory_space<vmem>>, vector<1x16x16xf32>
    %419 = vector.shape_cast %418 : vector<1x16x16xf32> to vector<16x16xf32>
    %cst_317 = arith.constant dense<0.000000e+00> : vector<8x16xf32>
    %420 = tpu.matmul %399, %419, %cst_317 {dimension_numbers = #tpu.dot_dimension_numbers<[1], [0], [0], [1], [0, 0, 1, 1], [], []>} : vector<8x16xf32>, vector<16x16xf32>, vector<8x16xf32> -> vector<8x16xf32>
    %c8_318 = arith.constant 8 : index
    %c0_319 = arith.constant 0 : index
    %c0_320 = arith.constant 0 : index
    %421 = vector.load %arg6[%c8_318, %c0_319, %c0_320] : memref<9x16x16xf32, #tpu.memory_space<vmem>>, vector<1x16x16xf32>
    %422 = vector.shape_cast %421 : vector<1x16x16xf32> to vector<16x16xf32>
    %cst_321 = arith.constant dense<0.000000e+00> : vector<8x16xf32>
    %423 = tpu.matmul %399, %422, %cst_321 {dimension_numbers = #tpu.dot_dimension_numbers<[1], [0], [0], [1], [0, 0, 1, 1], [], []>} : vector<8x16xf32>, vector<16x16xf32>, vector<8x16xf32> -> vector<8x16xf32>
    %424 = tpu.concatenate %402, %405, %408, %411, %399, %414, %417, %420, %423 in 0 : vector<8x16xf32>, vector<8x16xf32>, vector<8x16xf32>, vector<8x16xf32>, vector<8x16xf32>, vector<8x16xf32>, vector<8x16xf32>, vector<8x16xf32>, vector<8x16xf32> -> vector<72x16xf32>
    %c1_322 = arith.constant 1 : index
    %c0_323 = arith.constant 0 : index
    %c0_324 = arith.constant 0 : index
    %425 = vector.load %arg16[%c1_322, %c0_323, %c0_324] : memref<6x8x72xf32, #tpu.memory_space<vmem>>, vector<1x8x72xf32>
    %426 = vector.shape_cast %425 : vector<1x8x72xf32> to vector<8x72xf32>
    %cst_325 = arith.constant dense<0.000000e+00> : vector<8x16xf32>
    %427 = tpu.matmul %426, %424, %cst_325 {dimension_numbers = #tpu.dot_dimension_numbers<[1], [0], [0], [1], [0, 0, 1, 1], [], []>} : vector<8x72xf32>, vector<72x16xf32>, vector<8x16xf32> -> vector<8x16xf32>
    %c1_326 = arith.constant 1 : index
    %c0_327 = arith.constant 0 : index
    %c0_328 = arith.constant 0 : index
    %428 = vector.load %arg17[%c1_326, %c0_327, %c0_328] : memref<6x8x1xf32, #tpu.memory_space<vmem>>, vector<1x8x1xf32>
    %429 = vector.shape_cast %428 : vector<1x8x1xf32> to vector<8x1xf32>
    %430 = vector.broadcast %429 : vector<8x1xf32> to vector<8x16xf32>
    %431 = arith.addf %427, %430 : vector<8x16xf32>
    %c5_329 = arith.constant 5 : index
    %c0_330 = arith.constant 0 : index
    %c0_331 = arith.constant 0 : index
    %432 = vector.load %arg6[%c5_329, %c0_330, %c0_331] : memref<9x16x16xf32, #tpu.memory_space<vmem>>, vector<1x16x16xf32>
    %433 = vector.shape_cast %432 : vector<1x16x16xf32> to vector<16x16xf32>
    %cst_332 = arith.constant dense<0.000000e+00> : vector<8x16xf32>
    %434 = tpu.matmul %431, %433, %cst_332 {dimension_numbers = #tpu.dot_dimension_numbers<[1], [0], [0], [1], [0, 0, 1, 1], [], []>} : vector<8x16xf32>, vector<16x16xf32>, vector<8x16xf32> -> vector<8x16xf32>
    %435 = arith.maximumf %431, %434 : vector<8x16xf32>
    %c7_333 = arith.constant 7 : index
    %c0_334 = arith.constant 0 : index
    %c0_335 = arith.constant 0 : index
    %436 = vector.load %arg6[%c7_333, %c0_334, %c0_335] : memref<9x16x16xf32, #tpu.memory_space<vmem>>, vector<1x16x16xf32>
    %437 = vector.shape_cast %436 : vector<1x16x16xf32> to vector<16x16xf32>
    %cst_336 = arith.constant dense<0.000000e+00> : vector<8x16xf32>
    %438 = tpu.matmul %431, %437, %cst_336 {dimension_numbers = #tpu.dot_dimension_numbers<[1], [0], [0], [1], [0, 0, 1, 1], [], []>} : vector<8x16xf32>, vector<16x16xf32>, vector<8x16xf32> -> vector<8x16xf32>
    %c8_337 = arith.constant 8 : index
    %c0_338 = arith.constant 0 : index
    %c0_339 = arith.constant 0 : index
    %439 = vector.load %arg6[%c8_337, %c0_338, %c0_339] : memref<9x16x16xf32, #tpu.memory_space<vmem>>, vector<1x16x16xf32>
    %440 = vector.shape_cast %439 : vector<1x16x16xf32> to vector<16x16xf32>
    %cst_340 = arith.constant dense<0.000000e+00> : vector<8x16xf32>
    %441 = tpu.matmul %431, %440, %cst_340 {dimension_numbers = #tpu.dot_dimension_numbers<[1], [0], [0], [1], [0, 0, 1, 1], [], []>} : vector<8x16xf32>, vector<16x16xf32>, vector<8x16xf32> -> vector<8x16xf32>
    %442 = arith.maximumf %438, %441 : vector<8x16xf32>
    %443 = arith.maximumf %435, %442 : vector<8x16xf32>
    %c0_341 = arith.constant 0 : index
    %c0_342 = arith.constant 0 : index
    %444 = vector.load %arg10[%c0_341, %c0_342] : memref<16x4xf32, #tpu.memory_space<vmem>>, vector<16x4xf32>
    %cst_343 = arith.constant dense<0.000000e+00> : vector<8x4xf32>
    %445 = tpu.matmul %443, %444, %cst_343 {dimension_numbers = #tpu.dot_dimension_numbers<[1], [0], [0], [1], [0, 0, 1, 1], [], []>} : vector<8x16xf32>, vector<16x4xf32>, vector<8x4xf32> -> vector<8x4xf32>
    %c0_344 = arith.constant 0 : index
    %c0_345 = arith.constant 0 : index
    %c0_346 = arith.constant 0 : index
    %446 = vector.load %arg7[%c0_344, %c0_345, %c0_346] : memref<9x4x4xf32, #tpu.memory_space<vmem>>, vector<1x4x4xf32>
    %447 = vector.shape_cast %446 : vector<1x4x4xf32> to vector<4x4xf32>
    %cst_347 = arith.constant dense<0.000000e+00> : vector<8x4xf32>
    %448 = tpu.matmul %445, %447, %cst_347 {dimension_numbers = #tpu.dot_dimension_numbers<[1], [0], [0], [1], [0, 0, 1, 1], [], []>} : vector<8x4xf32>, vector<4x4xf32>, vector<8x4xf32> -> vector<8x4xf32>
    %c1_348 = arith.constant 1 : index
    %c0_349 = arith.constant 0 : index
    %c0_350 = arith.constant 0 : index
    %449 = vector.load %arg7[%c1_348, %c0_349, %c0_350] : memref<9x4x4xf32, #tpu.memory_space<vmem>>, vector<1x4x4xf32>
    %450 = vector.shape_cast %449 : vector<1x4x4xf32> to vector<4x4xf32>
    %cst_351 = arith.constant dense<0.000000e+00> : vector<8x4xf32>
    %451 = tpu.matmul %445, %450, %cst_351 {dimension_numbers = #tpu.dot_dimension_numbers<[1], [0], [0], [1], [0, 0, 1, 1], [], []>} : vector<8x4xf32>, vector<4x4xf32>, vector<8x4xf32> -> vector<8x4xf32>
    %c2_352 = arith.constant 2 : index
    %c0_353 = arith.constant 0 : index
    %c0_354 = arith.constant 0 : index
    %452 = vector.load %arg7[%c2_352, %c0_353, %c0_354] : memref<9x4x4xf32, #tpu.memory_space<vmem>>, vector<1x4x4xf32>
    %453 = vector.shape_cast %452 : vector<1x4x4xf32> to vector<4x4xf32>
    %cst_355 = arith.constant dense<0.000000e+00> : vector<8x4xf32>
    %454 = tpu.matmul %445, %453, %cst_355 {dimension_numbers = #tpu.dot_dimension_numbers<[1], [0], [0], [1], [0, 0, 1, 1], [], []>} : vector<8x4xf32>, vector<4x4xf32>, vector<8x4xf32> -> vector<8x4xf32>
    %c3_356 = arith.constant 3 : index
    %c0_357 = arith.constant 0 : index
    %c0_358 = arith.constant 0 : index
    %455 = vector.load %arg7[%c3_356, %c0_357, %c0_358] : memref<9x4x4xf32, #tpu.memory_space<vmem>>, vector<1x4x4xf32>
    %456 = vector.shape_cast %455 : vector<1x4x4xf32> to vector<4x4xf32>
    %cst_359 = arith.constant dense<0.000000e+00> : vector<8x4xf32>
    %457 = tpu.matmul %445, %456, %cst_359 {dimension_numbers = #tpu.dot_dimension_numbers<[1], [0], [0], [1], [0, 0, 1, 1], [], []>} : vector<8x4xf32>, vector<4x4xf32>, vector<8x4xf32> -> vector<8x4xf32>
    %c5_360 = arith.constant 5 : index
    %c0_361 = arith.constant 0 : index
    %c0_362 = arith.constant 0 : index
    %458 = vector.load %arg7[%c5_360, %c0_361, %c0_362] : memref<9x4x4xf32, #tpu.memory_space<vmem>>, vector<1x4x4xf32>
    %459 = vector.shape_cast %458 : vector<1x4x4xf32> to vector<4x4xf32>
    %cst_363 = arith.constant dense<0.000000e+00> : vector<8x4xf32>
    %460 = tpu.matmul %445, %459, %cst_363 {dimension_numbers = #tpu.dot_dimension_numbers<[1], [0], [0], [1], [0, 0, 1, 1], [], []>} : vector<8x4xf32>, vector<4x4xf32>, vector<8x4xf32> -> vector<8x4xf32>
    %c6_364 = arith.constant 6 : index
    %c0_365 = arith.constant 0 : index
    %c0_366 = arith.constant 0 : index
    %461 = vector.load %arg7[%c6_364, %c0_365, %c0_366] : memref<9x4x4xf32, #tpu.memory_space<vmem>>, vector<1x4x4xf32>
    %462 = vector.shape_cast %461 : vector<1x4x4xf32> to vector<4x4xf32>
    %cst_367 = arith.constant dense<0.000000e+00> : vector<8x4xf32>
    %463 = tpu.matmul %445, %462, %cst_367 {dimension_numbers = #tpu.dot_dimension_numbers<[1], [0], [0], [1], [0, 0, 1, 1], [], []>} : vector<8x4xf32>, vector<4x4xf32>, vector<8x4xf32> -> vector<8x4xf32>
    %c7_368 = arith.constant 7 : index
    %c0_369 = arith.constant 0 : index
    %c0_370 = arith.constant 0 : index
    %464 = vector.load %arg7[%c7_368, %c0_369, %c0_370] : memref<9x4x4xf32, #tpu.memory_space<vmem>>, vector<1x4x4xf32>
    %465 = vector.shape_cast %464 : vector<1x4x4xf32> to vector<4x4xf32>
    %cst_371 = arith.constant dense<0.000000e+00> : vector<8x4xf32>
    %466 = tpu.matmul %445, %465, %cst_371 {dimension_numbers = #tpu.dot_dimension_numbers<[1], [0], [0], [1], [0, 0, 1, 1], [], []>} : vector<8x4xf32>, vector<4x4xf32>, vector<8x4xf32> -> vector<8x4xf32>
    %c8_372 = arith.constant 8 : index
    %c0_373 = arith.constant 0 : index
    %c0_374 = arith.constant 0 : index
    %467 = vector.load %arg7[%c8_372, %c0_373, %c0_374] : memref<9x4x4xf32, #tpu.memory_space<vmem>>, vector<1x4x4xf32>
    %468 = vector.shape_cast %467 : vector<1x4x4xf32> to vector<4x4xf32>
    %cst_375 = arith.constant dense<0.000000e+00> : vector<8x4xf32>
    %469 = tpu.matmul %445, %468, %cst_375 {dimension_numbers = #tpu.dot_dimension_numbers<[1], [0], [0], [1], [0, 0, 1, 1], [], []>} : vector<8x4xf32>, vector<4x4xf32>, vector<8x4xf32> -> vector<8x4xf32>
    %470 = tpu.concatenate %448, %451, %454, %457, %445, %460, %463, %466, %469 in 0 : vector<8x4xf32>, vector<8x4xf32>, vector<8x4xf32>, vector<8x4xf32>, vector<8x4xf32>, vector<8x4xf32>, vector<8x4xf32>, vector<8x4xf32>, vector<8x4xf32> -> vector<72x4xf32>
    %c2_376 = arith.constant 2 : index
    %c0_377 = arith.constant 0 : index
    %c0_378 = arith.constant 0 : index
    %471 = vector.load %arg16[%c2_376, %c0_377, %c0_378] : memref<6x8x72xf32, #tpu.memory_space<vmem>>, vector<1x8x72xf32>
    %472 = vector.shape_cast %471 : vector<1x8x72xf32> to vector<8x72xf32>
    %cst_379 = arith.constant dense<0.000000e+00> : vector<8x4xf32>
    %473 = tpu.matmul %472, %470, %cst_379 {dimension_numbers = #tpu.dot_dimension_numbers<[1], [0], [0], [1], [0, 0, 1, 1], [], []>} : vector<8x72xf32>, vector<72x4xf32>, vector<8x4xf32> -> vector<8x4xf32>
    %c2_380 = arith.constant 2 : index
    %c0_381 = arith.constant 0 : index
    %c0_382 = arith.constant 0 : index
    %474 = vector.load %arg17[%c2_380, %c0_381, %c0_382] : memref<6x8x1xf32, #tpu.memory_space<vmem>>, vector<1x8x1xf32>
    %475 = vector.shape_cast %474 : vector<1x8x1xf32> to vector<8x1xf32>
    %476 = vector.broadcast %475 : vector<8x1xf32> to vector<8x4xf32>
    %477 = arith.addf %473, %476 : vector<8x4xf32>
    %c0_383 = arith.constant 0 : index
    %c0_384 = arith.constant 0 : index
    %c0_385 = arith.constant 0 : index
    %478 = vector.load %arg18[%c0_383, %c0_384, %c0_385] : memref<3x32x8xf32, #tpu.memory_space<vmem>>, vector<1x32x8xf32>
    %479 = vector.shape_cast %478 : vector<1x32x8xf32> to vector<32x8xf32>
    %cst_386 = arith.constant dense<0.000000e+00> : vector<32x4xf32>
    %480 = tpu.matmul %479, %477, %cst_386 {dimension_numbers = #tpu.dot_dimension_numbers<[1], [0], [0], [1], [0, 0, 1, 1], [], []>} : vector<32x8xf32>, vector<8x4xf32>, vector<32x4xf32> -> vector<32x4xf32>
    %481 = vector.extract_strided_slice %480 {offsets = [0, 0], sizes = [8, 4], strides = [1, 1]} : vector<32x4xf32> to vector<8x4xf32>
    %c0_387 = arith.constant 0 : index
    %c0_388 = arith.constant 0 : index
    %c0_389 = arith.constant 0 : index
    %482 = vector.load %arg11[%c0_387, %c0_388, %c0_389] : memref<4x4x16xf32, #tpu.memory_space<vmem>>, vector<1x4x16xf32>
    %483 = vector.shape_cast %482 : vector<1x4x16xf32> to vector<4x16xf32>
    %cst_390 = arith.constant dense<0.000000e+00> : vector<8x16xf32>
    %484 = tpu.matmul %481, %483, %cst_390 {dimension_numbers = #tpu.dot_dimension_numbers<[1], [0], [0], [1], [0, 0, 1, 1], [], []>} : vector<8x4xf32>, vector<4x16xf32>, vector<8x16xf32> -> vector<8x16xf32>
    %485 = vector.extract_strided_slice %480 {offsets = [8, 0], sizes = [8, 4], strides = [1, 1]} : vector<32x4xf32> to vector<8x4xf32>
    %c1_391 = arith.constant 1 : index
    %c0_392 = arith.constant 0 : index
    %c0_393 = arith.constant 0 : index
    %486 = vector.load %arg11[%c1_391, %c0_392, %c0_393] : memref<4x4x16xf32, #tpu.memory_space<vmem>>, vector<1x4x16xf32>
    %487 = vector.shape_cast %486 : vector<1x4x16xf32> to vector<4x16xf32>
    %cst_394 = arith.constant dense<0.000000e+00> : vector<8x16xf32>
    %488 = tpu.matmul %485, %487, %cst_394 {dimension_numbers = #tpu.dot_dimension_numbers<[1], [0], [0], [1], [0, 0, 1, 1], [], []>} : vector<8x4xf32>, vector<4x16xf32>, vector<8x16xf32> -> vector<8x16xf32>
    %489 = arith.addf %484, %488 : vector<8x16xf32>
    %490 = vector.extract_strided_slice %480 {offsets = [16, 0], sizes = [8, 4], strides = [1, 1]} : vector<32x4xf32> to vector<8x4xf32>
    %c2_395 = arith.constant 2 : index
    %c0_396 = arith.constant 0 : index
    %c0_397 = arith.constant 0 : index
    %491 = vector.load %arg11[%c2_395, %c0_396, %c0_397] : memref<4x4x16xf32, #tpu.memory_space<vmem>>, vector<1x4x16xf32>
    %492 = vector.shape_cast %491 : vector<1x4x16xf32> to vector<4x16xf32>
    %cst_398 = arith.constant dense<0.000000e+00> : vector<8x16xf32>
    %493 = tpu.matmul %490, %492, %cst_398 {dimension_numbers = #tpu.dot_dimension_numbers<[1], [0], [0], [1], [0, 0, 1, 1], [], []>} : vector<8x4xf32>, vector<4x16xf32>, vector<8x16xf32> -> vector<8x16xf32>
    %494 = arith.addf %489, %493 : vector<8x16xf32>
    %495 = vector.extract_strided_slice %480 {offsets = [24, 0], sizes = [8, 4], strides = [1, 1]} : vector<32x4xf32> to vector<8x4xf32>
    %c3_399 = arith.constant 3 : index
    %c0_400 = arith.constant 0 : index
    %c0_401 = arith.constant 0 : index
    %496 = vector.load %arg11[%c3_399, %c0_400, %c0_401] : memref<4x4x16xf32, #tpu.memory_space<vmem>>, vector<1x4x16xf32>
    %497 = vector.shape_cast %496 : vector<1x4x16xf32> to vector<4x16xf32>
    %cst_402 = arith.constant dense<0.000000e+00> : vector<8x16xf32>
    %498 = tpu.matmul %495, %497, %cst_402 {dimension_numbers = #tpu.dot_dimension_numbers<[1], [0], [0], [1], [0, 0, 1, 1], [], []>} : vector<8x4xf32>, vector<4x16xf32>, vector<8x16xf32> -> vector<8x16xf32>
    %499 = arith.addf %494, %498 : vector<8x16xf32>
    %c0_403 = arith.constant 0 : index
    %c0_404 = arith.constant 0 : index
    %c0_405 = arith.constant 0 : index
    %500 = vector.load %arg19[%c0_403, %c0_404, %c0_405] : memref<3x8x1xf32, #tpu.memory_space<vmem>>, vector<1x8x1xf32>
    %501 = vector.shape_cast %500 : vector<1x8x1xf32> to vector<8x1xf32>
    %502 = vector.broadcast %501 : vector<8x1xf32> to vector<8x16xf32>
    %503 = arith.addf %499, %502 : vector<8x16xf32>
    %c0_406 = arith.constant 0 : index
    %c0_407 = arith.constant 0 : index
    %c0_408 = arith.constant 0 : index
    %504 = vector.load %arg6[%c0_406, %c0_407, %c0_408] : memref<9x16x16xf32, #tpu.memory_space<vmem>>, vector<1x16x16xf32>
    %505 = vector.shape_cast %504 : vector<1x16x16xf32> to vector<16x16xf32>
    %cst_409 = arith.constant dense<0.000000e+00> : vector<8x16xf32>
    %506 = tpu.matmul %503, %505, %cst_409 {dimension_numbers = #tpu.dot_dimension_numbers<[1], [0], [0], [1], [0, 0, 1, 1], [], []>} : vector<8x16xf32>, vector<16x16xf32>, vector<8x16xf32> -> vector<8x16xf32>
    %c1_410 = arith.constant 1 : index
    %c0_411 = arith.constant 0 : index
    %c0_412 = arith.constant 0 : index
    %507 = vector.load %arg6[%c1_410, %c0_411, %c0_412] : memref<9x16x16xf32, #tpu.memory_space<vmem>>, vector<1x16x16xf32>
    %508 = vector.shape_cast %507 : vector<1x16x16xf32> to vector<16x16xf32>
    %cst_413 = arith.constant dense<0.000000e+00> : vector<8x16xf32>
    %509 = tpu.matmul %503, %508, %cst_413 {dimension_numbers = #tpu.dot_dimension_numbers<[1], [0], [0], [1], [0, 0, 1, 1], [], []>} : vector<8x16xf32>, vector<16x16xf32>, vector<8x16xf32> -> vector<8x16xf32>
    %c2_414 = arith.constant 2 : index
    %c0_415 = arith.constant 0 : index
    %c0_416 = arith.constant 0 : index
    %510 = vector.load %arg6[%c2_414, %c0_415, %c0_416] : memref<9x16x16xf32, #tpu.memory_space<vmem>>, vector<1x16x16xf32>
    %511 = vector.shape_cast %510 : vector<1x16x16xf32> to vector<16x16xf32>
    %cst_417 = arith.constant dense<0.000000e+00> : vector<8x16xf32>
    %512 = tpu.matmul %503, %511, %cst_417 {dimension_numbers = #tpu.dot_dimension_numbers<[1], [0], [0], [1], [0, 0, 1, 1], [], []>} : vector<8x16xf32>, vector<16x16xf32>, vector<8x16xf32> -> vector<8x16xf32>
    %c3_418 = arith.constant 3 : index
    %c0_419 = arith.constant 0 : index
    %c0_420 = arith.constant 0 : index
    %513 = vector.load %arg6[%c3_418, %c0_419, %c0_420] : memref<9x16x16xf32, #tpu.memory_space<vmem>>, vector<1x16x16xf32>
    %514 = vector.shape_cast %513 : vector<1x16x16xf32> to vector<16x16xf32>
    %cst_421 = arith.constant dense<0.000000e+00> : vector<8x16xf32>
    %515 = tpu.matmul %503, %514, %cst_421 {dimension_numbers = #tpu.dot_dimension_numbers<[1], [0], [0], [1], [0, 0, 1, 1], [], []>} : vector<8x16xf32>, vector<16x16xf32>, vector<8x16xf32> -> vector<8x16xf32>
    %c5_422 = arith.constant 5 : index
    %c0_423 = arith.constant 0 : index
    %c0_424 = arith.constant 0 : index
    %516 = vector.load %arg6[%c5_422, %c0_423, %c0_424] : memref<9x16x16xf32, #tpu.memory_space<vmem>>, vector<1x16x16xf32>
    %517 = vector.shape_cast %516 : vector<1x16x16xf32> to vector<16x16xf32>
    %cst_425 = arith.constant dense<0.000000e+00> : vector<8x16xf32>
    %518 = tpu.matmul %503, %517, %cst_425 {dimension_numbers = #tpu.dot_dimension_numbers<[1], [0], [0], [1], [0, 0, 1, 1], [], []>} : vector<8x16xf32>, vector<16x16xf32>, vector<8x16xf32> -> vector<8x16xf32>
    %c6_426 = arith.constant 6 : index
    %c0_427 = arith.constant 0 : index
    %c0_428 = arith.constant 0 : index
    %519 = vector.load %arg6[%c6_426, %c0_427, %c0_428] : memref<9x16x16xf32, #tpu.memory_space<vmem>>, vector<1x16x16xf32>
    %520 = vector.shape_cast %519 : vector<1x16x16xf32> to vector<16x16xf32>
    %cst_429 = arith.constant dense<0.000000e+00> : vector<8x16xf32>
    %521 = tpu.matmul %503, %520, %cst_429 {dimension_numbers = #tpu.dot_dimension_numbers<[1], [0], [0], [1], [0, 0, 1, 1], [], []>} : vector<8x16xf32>, vector<16x16xf32>, vector<8x16xf32> -> vector<8x16xf32>
    %c7_430 = arith.constant 7 : index
    %c0_431 = arith.constant 0 : index
    %c0_432 = arith.constant 0 : index
    %522 = vector.load %arg6[%c7_430, %c0_431, %c0_432] : memref<9x16x16xf32, #tpu.memory_space<vmem>>, vector<1x16x16xf32>
    %523 = vector.shape_cast %522 : vector<1x16x16xf32> to vector<16x16xf32>
    %cst_433 = arith.constant dense<0.000000e+00> : vector<8x16xf32>
    %524 = tpu.matmul %503, %523, %cst_433 {dimension_numbers = #tpu.dot_dimension_numbers<[1], [0], [0], [1], [0, 0, 1, 1], [], []>} : vector<8x16xf32>, vector<16x16xf32>, vector<8x16xf32> -> vector<8x16xf32>
    %c8_434 = arith.constant 8 : index
    %c0_435 = arith.constant 0 : index
    %c0_436 = arith.constant 0 : index
    %525 = vector.load %arg6[%c8_434, %c0_435, %c0_436] : memref<9x16x16xf32, #tpu.memory_space<vmem>>, vector<1x16x16xf32>
    %526 = vector.shape_cast %525 : vector<1x16x16xf32> to vector<16x16xf32>
    %cst_437 = arith.constant dense<0.000000e+00> : vector<8x16xf32>
    %527 = tpu.matmul %503, %526, %cst_437 {dimension_numbers = #tpu.dot_dimension_numbers<[1], [0], [0], [1], [0, 0, 1, 1], [], []>} : vector<8x16xf32>, vector<16x16xf32>, vector<8x16xf32> -> vector<8x16xf32>
    %528 = tpu.concatenate %506, %509, %512, %515, %503, %518, %521, %524, %527 in 0 : vector<8x16xf32>, vector<8x16xf32>, vector<8x16xf32>, vector<8x16xf32>, vector<8x16xf32>, vector<8x16xf32>, vector<8x16xf32>, vector<8x16xf32>, vector<8x16xf32> -> vector<72x16xf32>
    %c3_438 = arith.constant 3 : index
    %c0_439 = arith.constant 0 : index
    %c0_440 = arith.constant 0 : index
    %529 = vector.load %arg16[%c3_438, %c0_439, %c0_440] : memref<6x8x72xf32, #tpu.memory_space<vmem>>, vector<1x8x72xf32>
    %530 = vector.shape_cast %529 : vector<1x8x72xf32> to vector<8x72xf32>
    %cst_441 = arith.constant dense<0.000000e+00> : vector<8x16xf32>
    %531 = tpu.matmul %530, %528, %cst_441 {dimension_numbers = #tpu.dot_dimension_numbers<[1], [0], [0], [1], [0, 0, 1, 1], [], []>} : vector<8x72xf32>, vector<72x16xf32>, vector<8x16xf32> -> vector<8x16xf32>
    %c3_442 = arith.constant 3 : index
    %c0_443 = arith.constant 0 : index
    %c0_444 = arith.constant 0 : index
    %532 = vector.load %arg17[%c3_442, %c0_443, %c0_444] : memref<6x8x1xf32, #tpu.memory_space<vmem>>, vector<1x8x1xf32>
    %533 = vector.shape_cast %532 : vector<1x8x1xf32> to vector<8x1xf32>
    %534 = vector.broadcast %533 : vector<8x1xf32> to vector<8x16xf32>
    %535 = arith.addf %531, %534 : vector<8x16xf32>
    %c1_445 = arith.constant 1 : index
    %c0_446 = arith.constant 0 : index
    %c0_447 = arith.constant 0 : index
    %536 = vector.load %arg18[%c1_445, %c0_446, %c0_447] : memref<3x32x8xf32, #tpu.memory_space<vmem>>, vector<1x32x8xf32>
    %537 = vector.shape_cast %536 : vector<1x32x8xf32> to vector<32x8xf32>
    %cst_448 = arith.constant dense<0.000000e+00> : vector<32x16xf32>
    %538 = tpu.matmul %537, %535, %cst_448 {dimension_numbers = #tpu.dot_dimension_numbers<[1], [0], [0], [1], [0, 0, 1, 1], [], []>} : vector<32x8xf32>, vector<8x16xf32>, vector<32x16xf32> -> vector<32x16xf32>
    %539 = vector.extract_strided_slice %538 {offsets = [0, 0], sizes = [8, 16], strides = [1, 1]} : vector<32x16xf32> to vector<8x16xf32>
    %c0_449 = arith.constant 0 : index
    %c0_450 = arith.constant 0 : index
    %c0_451 = arith.constant 0 : index
    %540 = vector.load %arg12[%c0_449, %c0_450, %c0_451] : memref<4x16x64xf32, #tpu.memory_space<vmem>>, vector<1x16x64xf32>
    %541 = vector.shape_cast %540 : vector<1x16x64xf32> to vector<16x64xf32>
    %cst_452 = arith.constant dense<0.000000e+00> : vector<8x64xf32>
    %542 = tpu.matmul %539, %541, %cst_452 {dimension_numbers = #tpu.dot_dimension_numbers<[1], [0], [0], [1], [0, 0, 1, 1], [], []>} : vector<8x16xf32>, vector<16x64xf32>, vector<8x64xf32> -> vector<8x64xf32>
    %543 = vector.extract_strided_slice %538 {offsets = [8, 0], sizes = [8, 16], strides = [1, 1]} : vector<32x16xf32> to vector<8x16xf32>
    %c1_453 = arith.constant 1 : index
    %c0_454 = arith.constant 0 : index
    %c0_455 = arith.constant 0 : index
    %544 = vector.load %arg12[%c1_453, %c0_454, %c0_455] : memref<4x16x64xf32, #tpu.memory_space<vmem>>, vector<1x16x64xf32>
    %545 = vector.shape_cast %544 : vector<1x16x64xf32> to vector<16x64xf32>
    %cst_456 = arith.constant dense<0.000000e+00> : vector<8x64xf32>
    %546 = tpu.matmul %543, %545, %cst_456 {dimension_numbers = #tpu.dot_dimension_numbers<[1], [0], [0], [1], [0, 0, 1, 1], [], []>} : vector<8x16xf32>, vector<16x64xf32>, vector<8x64xf32> -> vector<8x64xf32>
    %547 = arith.addf %542, %546 : vector<8x64xf32>
    %548 = vector.extract_strided_slice %538 {offsets = [16, 0], sizes = [8, 16], strides = [1, 1]} : vector<32x16xf32> to vector<8x16xf32>
    %c2_457 = arith.constant 2 : index
    %c0_458 = arith.constant 0 : index
    %c0_459 = arith.constant 0 : index
    %549 = vector.load %arg12[%c2_457, %c0_458, %c0_459] : memref<4x16x64xf32, #tpu.memory_space<vmem>>, vector<1x16x64xf32>
    %550 = vector.shape_cast %549 : vector<1x16x64xf32> to vector<16x64xf32>
    %cst_460 = arith.constant dense<0.000000e+00> : vector<8x64xf32>
    %551 = tpu.matmul %548, %550, %cst_460 {dimension_numbers = #tpu.dot_dimension_numbers<[1], [0], [0], [1], [0, 0, 1, 1], [], []>} : vector<8x16xf32>, vector<16x64xf32>, vector<8x64xf32> -> vector<8x64xf32>
    %552 = arith.addf %547, %551 : vector<8x64xf32>
    %553 = vector.extract_strided_slice %538 {offsets = [24, 0], sizes = [8, 16], strides = [1, 1]} : vector<32x16xf32> to vector<8x16xf32>
    %c3_461 = arith.constant 3 : index
    %c0_462 = arith.constant 0 : index
    %c0_463 = arith.constant 0 : index
    %554 = vector.load %arg12[%c3_461, %c0_462, %c0_463] : memref<4x16x64xf32, #tpu.memory_space<vmem>>, vector<1x16x64xf32>
    %555 = vector.shape_cast %554 : vector<1x16x64xf32> to vector<16x64xf32>
    %cst_464 = arith.constant dense<0.000000e+00> : vector<8x64xf32>
    %556 = tpu.matmul %553, %555, %cst_464 {dimension_numbers = #tpu.dot_dimension_numbers<[1], [0], [0], [1], [0, 0, 1, 1], [], []>} : vector<8x16xf32>, vector<16x64xf32>, vector<8x64xf32> -> vector<8x64xf32>
    %557 = arith.addf %552, %556 : vector<8x64xf32>
    %c1_465 = arith.constant 1 : index
    %c0_466 = arith.constant 0 : index
    %c0_467 = arith.constant 0 : index
    %558 = vector.load %arg19[%c1_465, %c0_466, %c0_467] : memref<3x8x1xf32, #tpu.memory_space<vmem>>, vector<1x8x1xf32>
    %559 = vector.shape_cast %558 : vector<1x8x1xf32> to vector<8x1xf32>
    %560 = vector.broadcast %559 : vector<8x1xf32> to vector<8x64xf32>
    %561 = arith.addf %557, %560 : vector<8x64xf32>
    %c0_468 = arith.constant 0 : index
    %c0_469 = arith.constant 0 : index
    %c0_470 = arith.constant 0 : index
    %562 = vector.load %arg5[%c0_468, %c0_469, %c0_470] : memref<9x64x64xf32, #tpu.memory_space<vmem>>, vector<1x64x64xf32>
    %563 = vector.shape_cast %562 : vector<1x64x64xf32> to vector<64x64xf32>
    %cst_471 = arith.constant dense<0.000000e+00> : vector<8x64xf32>
    %564 = tpu.matmul %561, %563, %cst_471 {dimension_numbers = #tpu.dot_dimension_numbers<[1], [0], [0], [1], [0, 0, 1, 1], [], []>} : vector<8x64xf32>, vector<64x64xf32>, vector<8x64xf32> -> vector<8x64xf32>
    %c1_472 = arith.constant 1 : index
    %c0_473 = arith.constant 0 : index
    %c0_474 = arith.constant 0 : index
    %565 = vector.load %arg5[%c1_472, %c0_473, %c0_474] : memref<9x64x64xf32, #tpu.memory_space<vmem>>, vector<1x64x64xf32>
    %566 = vector.shape_cast %565 : vector<1x64x64xf32> to vector<64x64xf32>
    %cst_475 = arith.constant dense<0.000000e+00> : vector<8x64xf32>
    %567 = tpu.matmul %561, %566, %cst_475 {dimension_numbers = #tpu.dot_dimension_numbers<[1], [0], [0], [1], [0, 0, 1, 1], [], []>} : vector<8x64xf32>, vector<64x64xf32>, vector<8x64xf32> -> vector<8x64xf32>
    %c2_476 = arith.constant 2 : index
    %c0_477 = arith.constant 0 : index
    %c0_478 = arith.constant 0 : index
    %568 = vector.load %arg5[%c2_476, %c0_477, %c0_478] : memref<9x64x64xf32, #tpu.memory_space<vmem>>, vector<1x64x64xf32>
    %569 = vector.shape_cast %568 : vector<1x64x64xf32> to vector<64x64xf32>
    %cst_479 = arith.constant dense<0.000000e+00> : vector<8x64xf32>
    %570 = tpu.matmul %561, %569, %cst_479 {dimension_numbers = #tpu.dot_dimension_numbers<[1], [0], [0], [1], [0, 0, 1, 1], [], []>} : vector<8x64xf32>, vector<64x64xf32>, vector<8x64xf32> -> vector<8x64xf32>
    %c3_480 = arith.constant 3 : index
    %c0_481 = arith.constant 0 : index
    %c0_482 = arith.constant 0 : index
    %571 = vector.load %arg5[%c3_480, %c0_481, %c0_482] : memref<9x64x64xf32, #tpu.memory_space<vmem>>, vector<1x64x64xf32>
    %572 = vector.shape_cast %571 : vector<1x64x64xf32> to vector<64x64xf32>
    %cst_483 = arith.constant dense<0.000000e+00> : vector<8x64xf32>
    %573 = tpu.matmul %561, %572, %cst_483 {dimension_numbers = #tpu.dot_dimension_numbers<[1], [0], [0], [1], [0, 0, 1, 1], [], []>} : vector<8x64xf32>, vector<64x64xf32>, vector<8x64xf32> -> vector<8x64xf32>
    %c5_484 = arith.constant 5 : index
    %c0_485 = arith.constant 0 : index
    %c0_486 = arith.constant 0 : index
    %574 = vector.load %arg5[%c5_484, %c0_485, %c0_486] : memref<9x64x64xf32, #tpu.memory_space<vmem>>, vector<1x64x64xf32>
    %575 = vector.shape_cast %574 : vector<1x64x64xf32> to vector<64x64xf32>
    %cst_487 = arith.constant dense<0.000000e+00> : vector<8x64xf32>
    %576 = tpu.matmul %561, %575, %cst_487 {dimension_numbers = #tpu.dot_dimension_numbers<[1], [0], [0], [1], [0, 0, 1, 1], [], []>} : vector<8x64xf32>, vector<64x64xf32>, vector<8x64xf32> -> vector<8x64xf32>
    %c6_488 = arith.constant 6 : index
    %c0_489 = arith.constant 0 : index
    %c0_490 = arith.constant 0 : index
    %577 = vector.load %arg5[%c6_488, %c0_489, %c0_490] : memref<9x64x64xf32, #tpu.memory_space<vmem>>, vector<1x64x64xf32>
    %578 = vector.shape_cast %577 : vector<1x64x64xf32> to vector<64x64xf32>
    %cst_491 = arith.constant dense<0.000000e+00> : vector<8x64xf32>
    %579 = tpu.matmul %561, %578, %cst_491 {dimension_numbers = #tpu.dot_dimension_numbers<[1], [0], [0], [1], [0, 0, 1, 1], [], []>} : vector<8x64xf32>, vector<64x64xf32>, vector<8x64xf32> -> vector<8x64xf32>
    %c7_492 = arith.constant 7 : index
    %c0_493 = arith.constant 0 : index
    %c0_494 = arith.constant 0 : index
    %580 = vector.load %arg5[%c7_492, %c0_493, %c0_494] : memref<9x64x64xf32, #tpu.memory_space<vmem>>, vector<1x64x64xf32>
    %581 = vector.shape_cast %580 : vector<1x64x64xf32> to vector<64x64xf32>
    %cst_495 = arith.constant dense<0.000000e+00> : vector<8x64xf32>
    %582 = tpu.matmul %561, %581, %cst_495 {dimension_numbers = #tpu.dot_dimension_numbers<[1], [0], [0], [1], [0, 0, 1, 1], [], []>} : vector<8x64xf32>, vector<64x64xf32>, vector<8x64xf32> -> vector<8x64xf32>
    %c8_496 = arith.constant 8 : index
    %c0_497 = arith.constant 0 : index
    %c0_498 = arith.constant 0 : index
    %583 = vector.load %arg5[%c8_496, %c0_497, %c0_498] : memref<9x64x64xf32, #tpu.memory_space<vmem>>, vector<1x64x64xf32>
    %584 = vector.shape_cast %583 : vector<1x64x64xf32> to vector<64x64xf32>
    %cst_499 = arith.constant dense<0.000000e+00> : vector<8x64xf32>
    %585 = tpu.matmul %561, %584, %cst_499 {dimension_numbers = #tpu.dot_dimension_numbers<[1], [0], [0], [1], [0, 0, 1, 1], [], []>} : vector<8x64xf32>, vector<64x64xf32>, vector<8x64xf32> -> vector<8x64xf32>
    %586 = tpu.concatenate %564, %567, %570, %573, %561, %576, %579, %582, %585 in 0 : vector<8x64xf32>, vector<8x64xf32>, vector<8x64xf32>, vector<8x64xf32>, vector<8x64xf32>, vector<8x64xf32>, vector<8x64xf32>, vector<8x64xf32>, vector<8x64xf32> -> vector<72x64xf32>
    %c4_500 = arith.constant 4 : index
    %c0_501 = arith.constant 0 : index
    %c0_502 = arith.constant 0 : index
    %587 = vector.load %arg16[%c4_500, %c0_501, %c0_502] : memref<6x8x72xf32, #tpu.memory_space<vmem>>, vector<1x8x72xf32>
    %588 = vector.shape_cast %587 : vector<1x8x72xf32> to vector<8x72xf32>
    %cst_503 = arith.constant dense<0.000000e+00> : vector<8x64xf32>
    %589 = tpu.matmul %588, %586, %cst_503 {dimension_numbers = #tpu.dot_dimension_numbers<[1], [0], [0], [1], [0, 0, 1, 1], [], []>} : vector<8x72xf32>, vector<72x64xf32>, vector<8x64xf32> -> vector<8x64xf32>
    %c4_504 = arith.constant 4 : index
    %c0_505 = arith.constant 0 : index
    %c0_506 = arith.constant 0 : index
    %590 = vector.load %arg17[%c4_504, %c0_505, %c0_506] : memref<6x8x1xf32, #tpu.memory_space<vmem>>, vector<1x8x1xf32>
    %591 = vector.shape_cast %590 : vector<1x8x1xf32> to vector<8x1xf32>
    %592 = vector.broadcast %591 : vector<8x1xf32> to vector<8x64xf32>
    %593 = arith.addf %589, %592 : vector<8x64xf32>
    %c2_507 = arith.constant 2 : index
    %c0_508 = arith.constant 0 : index
    %c0_509 = arith.constant 0 : index
    %594 = vector.load %arg18[%c2_507, %c0_508, %c0_509] : memref<3x32x8xf32, #tpu.memory_space<vmem>>, vector<1x32x8xf32>
    %595 = vector.shape_cast %594 : vector<1x32x8xf32> to vector<32x8xf32>
    %cst_510 = arith.constant dense<0.000000e+00> : vector<32x64xf32>
    %596 = tpu.matmul %595, %593, %cst_510 {dimension_numbers = #tpu.dot_dimension_numbers<[1], [0], [0], [1], [0, 0, 1, 1], [], []>} : vector<32x8xf32>, vector<8x64xf32>, vector<32x64xf32> -> vector<32x64xf32>
    %597 = vector.extract_strided_slice %596 {offsets = [0, 0], sizes = [8, 64], strides = [1, 1]} : vector<32x64xf32> to vector<8x64xf32>
    %c0_511 = arith.constant 0 : index
    %c0_512 = arith.constant 0 : index
    %c0_513 = arith.constant 0 : index
    %598 = vector.load %arg13[%c0_511, %c0_512, %c0_513] : memref<4x64x256xf32, #tpu.memory_space<vmem>>, vector<1x64x256xf32>
    %599 = vector.shape_cast %598 : vector<1x64x256xf32> to vector<64x256xf32>
    %cst_514 = arith.constant dense<0.000000e+00> : vector<8x256xf32>
    %600 = tpu.matmul %597, %599, %cst_514 {dimension_numbers = #tpu.dot_dimension_numbers<[1], [0], [0], [1], [0, 0, 1, 1], [], []>} : vector<8x64xf32>, vector<64x256xf32>, vector<8x256xf32> -> vector<8x256xf32>
    %601 = vector.extract_strided_slice %596 {offsets = [8, 0], sizes = [8, 64], strides = [1, 1]} : vector<32x64xf32> to vector<8x64xf32>
    %c1_515 = arith.constant 1 : index
    %c0_516 = arith.constant 0 : index
    %c0_517 = arith.constant 0 : index
    %602 = vector.load %arg13[%c1_515, %c0_516, %c0_517] : memref<4x64x256xf32, #tpu.memory_space<vmem>>, vector<1x64x256xf32>
    %603 = vector.shape_cast %602 : vector<1x64x256xf32> to vector<64x256xf32>
    %cst_518 = arith.constant dense<0.000000e+00> : vector<8x256xf32>
    %604 = tpu.matmul %601, %603, %cst_518 {dimension_numbers = #tpu.dot_dimension_numbers<[1], [0], [0], [1], [0, 0, 1, 1], [], []>} : vector<8x64xf32>, vector<64x256xf32>, vector<8x256xf32> -> vector<8x256xf32>
    %605 = arith.addf %600, %604 : vector<8x256xf32>
    %606 = vector.extract_strided_slice %596 {offsets = [16, 0], sizes = [8, 64], strides = [1, 1]} : vector<32x64xf32> to vector<8x64xf32>
    %c2_519 = arith.constant 2 : index
    %c0_520 = arith.constant 0 : index
    %c0_521 = arith.constant 0 : index
    %607 = vector.load %arg13[%c2_519, %c0_520, %c0_521] : memref<4x64x256xf32, #tpu.memory_space<vmem>>, vector<1x64x256xf32>
    %608 = vector.shape_cast %607 : vector<1x64x256xf32> to vector<64x256xf32>
    %cst_522 = arith.constant dense<0.000000e+00> : vector<8x256xf32>
    %609 = tpu.matmul %606, %608, %cst_522 {dimension_numbers = #tpu.dot_dimension_numbers<[1], [0], [0], [1], [0, 0, 1, 1], [], []>} : vector<8x64xf32>, vector<64x256xf32>, vector<8x256xf32> -> vector<8x256xf32>
    %610 = arith.addf %605, %609 : vector<8x256xf32>
    %611 = vector.extract_strided_slice %596 {offsets = [24, 0], sizes = [8, 64], strides = [1, 1]} : vector<32x64xf32> to vector<8x64xf32>
    %c3_523 = arith.constant 3 : index
    %c0_524 = arith.constant 0 : index
    %c0_525 = arith.constant 0 : index
    %612 = vector.load %arg13[%c3_523, %c0_524, %c0_525] : memref<4x64x256xf32, #tpu.memory_space<vmem>>, vector<1x64x256xf32>
    %613 = vector.shape_cast %612 : vector<1x64x256xf32> to vector<64x256xf32>
    %cst_526 = arith.constant dense<0.000000e+00> : vector<8x256xf32>
    %614 = tpu.matmul %611, %613, %cst_526 {dimension_numbers = #tpu.dot_dimension_numbers<[1], [0], [0], [1], [0, 0, 1, 1], [], []>} : vector<8x64xf32>, vector<64x256xf32>, vector<8x256xf32> -> vector<8x256xf32>
    %615 = arith.addf %610, %614 : vector<8x256xf32>
    %c2_527 = arith.constant 2 : index
    %c0_528 = arith.constant 0 : index
    %c0_529 = arith.constant 0 : index
    %616 = vector.load %arg19[%c2_527, %c0_528, %c0_529] : memref<3x8x1xf32, #tpu.memory_space<vmem>>, vector<1x8x1xf32>
    %617 = vector.shape_cast %616 : vector<1x8x1xf32> to vector<8x1xf32>
    %618 = vector.broadcast %617 : vector<8x1xf32> to vector<8x256xf32>
    %619 = arith.addf %615, %618 : vector<8x256xf32>
    %c17_i32_530 = arith.constant 17 : i32
    %620 = tpu.dynamic_rotate %619 by %c17_i32_530 dim 1 : vector<8x256xf32>, i32 -> vector<8x256xf32>
    %c0_531 = arith.constant 0 : index
    %c0_532 = arith.constant 0 : index
    %c0_533 = arith.constant 0 : index
    %621 = vector.load %arg4[%c0_531, %c0_532, %c0_533] : memref<9x1x256xf32, #tpu.memory_space<vmem>>, vector<1x1x256xf32>
    %622 = vector.shape_cast %621 : vector<1x1x256xf32> to vector<1x256xf32>
    %623 = vector.broadcast %622 : vector<1x256xf32> to vector<8x256xf32>
    %624 = arith.mulf %620, %623 : vector<8x256xf32>
    %c16_i32_534 = arith.constant 16 : i32
    %625 = tpu.dynamic_rotate %619 by %c16_i32_534 dim 1 : vector<8x256xf32>, i32 -> vector<8x256xf32>
    %c1_535 = arith.constant 1 : index
    %c0_536 = arith.constant 0 : index
    %c0_537 = arith.constant 0 : index
    %626 = vector.load %arg4[%c1_535, %c0_536, %c0_537] : memref<9x1x256xf32, #tpu.memory_space<vmem>>, vector<1x1x256xf32>
    %627 = vector.shape_cast %626 : vector<1x1x256xf32> to vector<1x256xf32>
    %628 = vector.broadcast %627 : vector<1x256xf32> to vector<8x256xf32>
    %629 = arith.mulf %625, %628 : vector<8x256xf32>
    %c15_i32_538 = arith.constant 15 : i32
    %630 = tpu.dynamic_rotate %619 by %c15_i32_538 dim 1 : vector<8x256xf32>, i32 -> vector<8x256xf32>
    %c2_539 = arith.constant 2 : index
    %c0_540 = arith.constant 0 : index
    %c0_541 = arith.constant 0 : index
    %631 = vector.load %arg4[%c2_539, %c0_540, %c0_541] : memref<9x1x256xf32, #tpu.memory_space<vmem>>, vector<1x1x256xf32>
    %632 = vector.shape_cast %631 : vector<1x1x256xf32> to vector<1x256xf32>
    %633 = vector.broadcast %632 : vector<1x256xf32> to vector<8x256xf32>
    %634 = arith.mulf %630, %633 : vector<8x256xf32>
    %c1_i32_542 = arith.constant 1 : i32
    %635 = tpu.dynamic_rotate %619 by %c1_i32_542 dim 1 : vector<8x256xf32>, i32 -> vector<8x256xf32>
    %c3_543 = arith.constant 3 : index
    %c0_544 = arith.constant 0 : index
    %c0_545 = arith.constant 0 : index
    %636 = vector.load %arg4[%c3_543, %c0_544, %c0_545] : memref<9x1x256xf32, #tpu.memory_space<vmem>>, vector<1x1x256xf32>
    %637 = vector.shape_cast %636 : vector<1x1x256xf32> to vector<1x256xf32>
    %638 = vector.broadcast %637 : vector<1x256xf32> to vector<8x256xf32>
    %639 = arith.mulf %635, %638 : vector<8x256xf32>
    %c255_i32_546 = arith.constant 255 : i32
    %640 = tpu.dynamic_rotate %619 by %c255_i32_546 dim 1 : vector<8x256xf32>, i32 -> vector<8x256xf32>
    %c5_547 = arith.constant 5 : index
    %c0_548 = arith.constant 0 : index
    %c0_549 = arith.constant 0 : index
    %641 = vector.load %arg4[%c5_547, %c0_548, %c0_549] : memref<9x1x256xf32, #tpu.memory_space<vmem>>, vector<1x1x256xf32>
    %642 = vector.shape_cast %641 : vector<1x1x256xf32> to vector<1x256xf32>
    %643 = vector.broadcast %642 : vector<1x256xf32> to vector<8x256xf32>
    %644 = arith.mulf %640, %643 : vector<8x256xf32>
    %c241_i32_550 = arith.constant 241 : i32
    %645 = tpu.dynamic_rotate %619 by %c241_i32_550 dim 1 : vector<8x256xf32>, i32 -> vector<8x256xf32>
    %c6_551 = arith.constant 6 : index
    %c0_552 = arith.constant 0 : index
    %c0_553 = arith.constant 0 : index
    %646 = vector.load %arg4[%c6_551, %c0_552, %c0_553] : memref<9x1x256xf32, #tpu.memory_space<vmem>>, vector<1x1x256xf32>
    %647 = vector.shape_cast %646 : vector<1x1x256xf32> to vector<1x256xf32>
    %648 = vector.broadcast %647 : vector<1x256xf32> to vector<8x256xf32>
    %649 = arith.mulf %645, %648 : vector<8x256xf32>
    %c240_i32_554 = arith.constant 240 : i32
    %650 = tpu.dynamic_rotate %619 by %c240_i32_554 dim 1 : vector<8x256xf32>, i32 -> vector<8x256xf32>
    %c7_555 = arith.constant 7 : index
    %c0_556 = arith.constant 0 : index
    %c0_557 = arith.constant 0 : index
    %651 = vector.load %arg4[%c7_555, %c0_556, %c0_557] : memref<9x1x256xf32, #tpu.memory_space<vmem>>, vector<1x1x256xf32>
    %652 = vector.shape_cast %651 : vector<1x1x256xf32> to vector<1x256xf32>
    %653 = vector.broadcast %652 : vector<1x256xf32> to vector<8x256xf32>
    %654 = arith.mulf %650, %653 : vector<8x256xf32>
    %c239_i32_558 = arith.constant 239 : i32
    %655 = tpu.dynamic_rotate %619 by %c239_i32_558 dim 1 : vector<8x256xf32>, i32 -> vector<8x256xf32>
    %c8_559 = arith.constant 8 : index
    %c0_560 = arith.constant 0 : index
    %c0_561 = arith.constant 0 : index
    %656 = vector.load %arg4[%c8_559, %c0_560, %c0_561] : memref<9x1x256xf32, #tpu.memory_space<vmem>>, vector<1x1x256xf32>
    %657 = vector.shape_cast %656 : vector<1x1x256xf32> to vector<1x256xf32>
    %658 = vector.broadcast %657 : vector<1x256xf32> to vector<8x256xf32>
    %659 = arith.mulf %655, %658 : vector<8x256xf32>
    %660 = tpu.concatenate %624, %629, %634, %639, %619, %644, %649, %654, %659 in 0 : vector<8x256xf32>, vector<8x256xf32>, vector<8x256xf32>, vector<8x256xf32>, vector<8x256xf32>, vector<8x256xf32>, vector<8x256xf32>, vector<8x256xf32>, vector<8x256xf32> -> vector<72x256xf32>
    %c5_562 = arith.constant 5 : index
    %c0_563 = arith.constant 0 : index
    %c0_564 = arith.constant 0 : index
    %661 = vector.load %arg16[%c5_562, %c0_563, %c0_564] : memref<6x8x72xf32, #tpu.memory_space<vmem>>, vector<1x8x72xf32>
    %662 = vector.shape_cast %661 : vector<1x8x72xf32> to vector<8x72xf32>
    %cst_565 = arith.constant dense<0.000000e+00> : vector<8x256xf32>
    %663 = tpu.matmul %662, %660, %cst_565 {dimension_numbers = #tpu.dot_dimension_numbers<[1], [0], [0], [1], [0, 0, 1, 1], [], []>} : vector<8x72xf32>, vector<72x256xf32>, vector<8x256xf32> -> vector<8x256xf32>
    %c5_566 = arith.constant 5 : index
    %c0_567 = arith.constant 0 : index
    %c0_568 = arith.constant 0 : index
    %664 = vector.load %arg17[%c5_566, %c0_567, %c0_568] : memref<6x8x1xf32, #tpu.memory_space<vmem>>, vector<1x8x1xf32>
    %665 = vector.shape_cast %664 : vector<1x8x1xf32> to vector<8x1xf32>
    %666 = vector.broadcast %665 : vector<8x1xf32> to vector<8x256xf32>
    %667 = arith.addf %663, %666 : vector<8x256xf32>
    %668 = arith.mulf %1, %667 : vector<8x256xf32>
    %c0_569 = arith.constant 0 : index
    %c0_570 = arith.constant 0 : index
    %c0_571 = arith.constant 0 : index
    %669 = vector.load %arg20[%c0_569, %c0_570, %c0_571] : memref<1x8x256xf32, #tpu.memory_space<vmem>>, vector<1x8x256xf32>
    %670 = vector.shape_cast %669 : vector<1x8x256xf32> to vector<8x256xf32>
    %671 = vector.shape_cast %668 : vector<8x256xf32> to vector<1x8x256xf32>
    tpu.vector_store %arg20[%c0_569, %c0_570, %c0_571], %671 {strides = array<i32>} : memref<1x8x256xf32, #tpu.memory_space<vmem>>, vector<1x8x256xf32>,
    return
  }
  func.func @transform_0(%arg0: i32) -> (i32, i32, i32) {
    %c0_i32 = arith.constant 0 : i32
    %c0_i32_0 = arith.constant 0 : i32
    %c0_i32_1 = arith.constant 0 : i32
    return %arg0, %c0_i32, %c0_i32_0 : i32, i32, i32
  }
  func.func @transform_1(%arg0: i32) -> (i32, i32, i32) {
    %c0_i32 = arith.constant 0 : i32
    %c0_i32_0 = arith.constant 0 : i32
    %c0_i32_1 = arith.constant 0 : i32
    %c0_i32_2 = arith.constant 0 : i32
    return %c0_i32, %c0_i32_0, %c0_i32_1 : i32, i32, i32
  }
  func.func @transform_2(%arg0: i32) -> (i32, i32) {
    %c0_i32 = arith.constant 0 : i32
    %c0_i32_0 = arith.constant 0 : i32
    %c0_i32_1 = arith.constant 0 : i32
    return %c0_i32, %c0_i32_0 : i32, i32
  }
  func.func @transform_3(%arg0: i32) -> (i32, i32, i32) {
    %c0_i32 = arith.constant 0 : i32
    %c0_i32_0 = arith.constant 0 : i32
    %c0_i32_1 = arith.constant 0 : i32
    %c0_i32_2 = arith.constant 0 : i32
    return %c0_i32, %c0_i32_0, %c0_i32_1 : i32, i32, i32
  }
  func.func @transform_4(%arg0: i32) -> (i32, i32, i32) {
    %c0_i32 = arith.constant 0 : i32
    %c0_i32_0 = arith.constant 0 : i32
    %c0_i32_1 = arith.constant 0 : i32
    %c0_i32_2 = arith.constant 0 : i32
    return %c0_i32, %c0_i32_0, %c0_i32_1 : i32, i32, i32
  }
  func.func @transform_5(%arg0: i32) -> (i32, i32, i32) {
    %c0_i32 = arith.constant 0 : i32
    %c0_i32_0 = arith.constant 0 : i32
    %c0_i32_1 = arith.constant 0 : i32
    %c0_i32_2 = arith.constant 0 : i32
    return %c0_i32, %c0_i32_0, %c0_i32_1 : i32, i32, i32
  }
  func.func @transform_6(%arg0: i32) -> (i32, i32, i32) {
    %c0_i32 = arith.constant 0 : i32
    %c0_i32_0 = arith.constant 0 : i32
    %c0_i32_1 = arith.constant 0 : i32
    %c0_i32_2 = arith.constant 0 : i32
    return %c0_i32, %c0_i32_0, %c0_i32_1 : i32, i32, i32
  }
  func.func @transform_7(%arg0: i32) -> (i32, i32) {
    %c0_i32 = arith.constant 0 : i32
    %c0_i32_0 = arith.constant 0 : i32
    %c0_i32_1 = arith.constant 0 : i32
    return %c0_i32, %c0_i32_0 : i32, i32
  }
  func.func @transform_8(%arg0: i32) -> (i32, i32) {
    %c0_i32 = arith.constant 0 : i32
    %c0_i32_0 = arith.constant 0 : i32
    %c0_i32_1 = arith.constant 0 : i32
    return %c0_i32, %c0_i32_0 : i32, i32
  }
  func.func @transform_9(%arg0: i32) -> (i32, i32) {
    %c0_i32 = arith.constant 0 : i32
    %c0_i32_0 = arith.constant 0 : i32
    %c0_i32_1 = arith.constant 0 : i32
    return %c0_i32, %c0_i32_0 : i32, i32
  }
  func.func @transform_10(%arg0: i32) -> (i32, i32, i32) {
    %c0_i32 = arith.constant 0 : i32
    %c0_i32_0 = arith.constant 0 : i32
    %c0_i32_1 = arith.constant 0 : i32
    %c0_i32_2 = arith.constant 0 : i32
    return %c0_i32, %c0_i32_0, %c0_i32_1 : i32, i32, i32
  }
  func.func @transform_11(%arg0: i32) -> (i32, i32, i32) {
    %c0_i32 = arith.constant 0 : i32
    %c0_i32_0 = arith.constant 0 : i32
    %c0_i32_1 = arith.constant 0 : i32
    %c0_i32_2 = arith.constant 0 : i32
    return %c0_i32, %c0_i32_0, %c0_i32_1 : i32, i32, i32
  }
  func.func @transform_12(%arg0: i32) -> (i32, i32, i32) {
    %c0_i32 = arith.constant 0 : i32
    %c0_i32_0 = arith.constant 0 : i32
    %c0_i32_1 = arith.constant 0 : i32
    %c0_i32_2 = arith.constant 0 : i32
    return %c0_i32, %c0_i32_0, %c0_i32_1 : i32, i32, i32
  }
  func.func @transform_13(%arg0: i32) -> (i32, i32) {
    %c0_i32 = arith.constant 0 : i32
    %c0_i32_0 = arith.constant 0 : i32
    %c0_i32_1 = arith.constant 0 : i32
    return %c0_i32, %c0_i32_0 : i32, i32
  }
  func.func @transform_14(%arg0: i32) -> (i32, i32) {
    %c0_i32 = arith.constant 0 : i32
    %c0_i32_0 = arith.constant 0 : i32
    %c0_i32_1 = arith.constant 0 : i32
    return %c0_i32, %c0_i32_0 : i32, i32
  }
  func.func @transform_15(%arg0: i32) -> (i32, i32, i32) {
    %c0_i32 = arith.constant 0 : i32
    %c0_i32_0 = arith.constant 0 : i32
    %c0_i32_1 = arith.constant 0 : i32
    %c0_i32_2 = arith.constant 0 : i32
    return %c0_i32, %c0_i32_0, %c0_i32_1 : i32, i32, i32
  }
  func.func @transform_16(%arg0: i32) -> (i32, i32, i32) {
    %c0_i32 = arith.constant 0 : i32
    %c0_i32_0 = arith.constant 0 : i32
    %c0_i32_1 = arith.constant 0 : i32
    %c0_i32_2 = arith.constant 0 : i32
    return %c0_i32, %c0_i32_0, %c0_i32_1 : i32, i32, i32
  }
  func.func @transform_17(%arg0: i32) -> (i32, i32, i32) {
    %c0_i32 = arith.constant 0 : i32
    %c0_i32_0 = arith.constant 0 : i32
    %c0_i32_1 = arith.constant 0 : i32
    %c0_i32_2 = arith.constant 0 : i32
    return %c0_i32, %c0_i32_0, %c0_i32_1 : i32, i32, i32
  }
  func.func @transform_18(%arg0: i32) -> (i32, i32, i32) {
    %c0_i32 = arith.constant 0 : i32
    %c0_i32_0 = arith.constant 0 : i32
    %c0_i32_1 = arith.constant 0 : i32
    %c0_i32_2 = arith.constant 0 : i32
    return %c0_i32, %c0_i32_0, %c0_i32_1 : i32, i32, i32
  }
  func.func @transform_19(%arg0: i32) -> (i32, i32, i32) {
    %c0_i32 = arith.constant 0 : i32
    %c0_i32_0 = arith.constant 0 : i32
    %c0_i32_1 = arith.constant 0 : i32
    return %arg0, %c0_i32, %c0_i32_0 : i32, i32, i32
  }
}

</mosaic_0001>

<bundles_post_ra>
// kernel: tpu_custom_call.1
= control target key start
LH: loop header
LB: loop body
LE: loop exit
PB: predicated region body
PF: predicated region fallthrough
CT: control target
= control target key end

     0   :  { %s11626_s0 = inlined_call_operand.hbm [shape: f32[1,8,256], index: 0, kind: input, shape index: {}]   ;;  %s11627_s1 = inlined_call_operand.hbm [shape: f32[5,256,256], index: 1, kind: input, shape index: {}]   ;;  %s11628_s2 = inlined_call_operand.hbm [shape: f32[8,8], index: 2, kind: input, shape index: {}]   ;;  %s11629_s3 = inlined_call_operand.hbm [shape: f32[9,1,256], index: 3, kind: input, shape index: {}]   ;;  %s11630_s4 = inlined_call_operand.hbm [shape: f32[9,64,64], index: 4, kind: input, shape index: {}]   ;;  %s11631_s5 = inlined_call_operand.hbm [shape: f32[9,16,16], index: 5, kind: input, shape index: {}]   ;;  %s11632_s6 = inlined_call_operand.vmem [shape: f32[9,4,4], index: 6, kind: input, shape index: {}]   ;;  %s11633_s7 = inlined_call_operand.vmem [shape: f32[256,64], index: 7, kind: input, shape index: {}]   ;;  %s11634_s8 = inlined_call_operand.vmem [shape: f32[64,16], index: 8, kind: input, shape index: {}]   ;;  %s11635_s9 = inlined_call_operand.vmem [shape: f32[16,4], index: 9, kind: input, shape index: {}]   ;;  %s11636_s10 = inlined_call_operand.hbm [shape: f32[4,4,16], index: 10, kind: input, shape index: {}]   ;;  %s11637_s11 = inlined_call_operand.hbm [shape: f32[4,16,64], index: 11, kind: input, shape index: {}]   ;;  %s11638_s12 = inlined_call_operand.hbm [shape: f32[4,64,256], index: 12, kind: input, shape index: {}]   ;;  %s11639_s13 = inlined_call_operand.hbm [shape: f32[8,360], index: 13, kind: input, shape index: {}]   ;;  %s11640_s14 = inlined_call_operand.vmem [shape: f32[8,1], index: 14, kind: input, shape index: {}]   ;;  %s11641_s15 = inlined_call_operand.hbm [shape: f32[6,8,72], index: 15, kind: input, shape index: {}]   ;;  %s11642_s16 = inlined_call_operand.vmem [shape: f32[6,8,1], index: 16, kind: input, shape index: {}]   ;;  %s11643_s17 = inlined_call_operand.vmem [shape: f32[3,32,8], index: 17, kind: input, shape index: {}]   ;;  %s11644_s18 = inlined_call_operand.vmem [shape: f32[3,8,1], index: 18, kind: input, shape index: {}]   ;;  %s11645_s19 = inlined_call_operand.hbm [shape: f32[1,8,256], index: 19, kind: output, shape index: {}]  }
   0x1   :  { %11657 = sst [smem:[#allocation35_spill]] %s11626_s0 }
   0x2   :  { %11658 = sst [smem:[#allocation36_spill]] %s11627_s1 }
   0x3   :  { %11659 = sst [smem:[#allocation37_spill]] %s11628_s2 }
   0x4   :  { %11660 = sst [smem:[#allocation38_spill]] %s11629_s3 }
   0x5   :  { %11661 = sst [smem:[#allocation39_spill]] %s11645_s19 }
   0x6   :  { %24 = vsyncpa [#allocation3], 0 }
   0x7   :  { %25 = vsyncpa [#allocation6], 0 }
   0x8   :  { %26 = vsyncpa [#allocation9], 0 }
   0x9   :  { %27 = vsyncpa [#allocation12], 0 }
   0xa   :  { %28 = vsyncpa [#allocation15], 0 }
   0xb   :  { %29 = vsyncpa [#allocation18], 0 }
   0xc   :  { %30 = vsyncpa [#allocation4], 0  ;;  %s9571_s0 = smov [#allocation5]  }
   0xd   :  { %s46_s30 = sshll.u32 %s9571_s0, 4  ;;  %s47_s30 = int_to_ptr.vmem [resolvable:$true] %s46_s30 }
   0xe   :  { %s9325_s20 = scalar_lea.vmem %s47_s30, 40960  ;;  %p9330_p1 = scmp.lt.s32.totalorder %s47_s30, %s47_s30 }
   0xf   :  { %p9326_p0 = scmp.ne.s32.totalorder %s47_s30, %s9325_s20  ;;  %p9331_p2 = scmp.lt.s32.totalorder %s9325_s20, %s9325_s20 }
  0x11   :  { %p9332_p3 = por %p9331_p2, %p9330_p1 }
  0x13   :  { %p9333_p4 = pnand %p9332_p3, %p9326_p0 }
  0x15   :  { %9336 = shalt.err (!%p9333_p4)
}
  0x16   :  { %s9572_s21 = smov 256   ;;  %s9573_s1 = smov 16  }
  0x17   :  { %s11662_s23 = sld [smem:[#allocation36_spill]]  ;;  %s9574_s24 = smov [#allocation8]  }
  0x18   :  { %s68_s25 = sshll.u32 %s9574_s24, 4  ;;  %s69_s25 = int_to_ptr.vmem [resolvable:$true] %s68_s25 }
  0x19   :  { %s9345_s3 = scalar_lea.vmem %s69_s25, 288  ;;  %p9350_p6 = scmp.lt.s32.totalorder %s69_s25, %s69_s25 }
  0x1a   :  { %p9346_p5 = scmp.ne.s32.totalorder %s69_s25, %s9345_s3  ;;  %p9351_p7 = scmp.lt.s32.totalorder %s9345_s3, %s9345_s3 }
  0x1c   :  { %p9352_p8 = por %p9351_p7, %p9350_p6 }
  0x1d   :  { %52 = dma.hbm_to_vmem [thread:$0]  %s11662_s23, 40960, %s47_s30, [#allocation6], %s9572_s21, %s9572_s21, %s9573_s1  }
  0x1e   :  { %p9353_p9 = pnand %p9352_p8, %p9346_p5 }
  0x20   :  { %9356 = shalt.err (!%p9353_p9)
}
  0x21   :  { %s9575_s26 = smov 32   ;;  %s9576_s27 = smov 2  }
  0x22   :  { %s11663_s0 = sld [smem:[#allocation38_spill]]  ;;  %s9577_s20 = smov [#allocation11]  }
  0x23   :  { %s92_s19 = sshll.u32 %s9577_s20, 4  ;;  %s9578_s22 = smov [#allocation14]   ;;  %s93_s19 = int_to_ptr.vmem [resolvable:$true] %s92_s19 }
  0x24   :  { %s124_s30 = sshll.u32 %s9578_s22, 4  ;;  %s9365_s2 = scalar_lea.vmem %s93_s19, 2304  ;;  %s125_s30 = int_to_ptr.vmem [resolvable:$true] %s124_s30 }
  0x25   :  { %p9366_p10 = scmp.ne.s32.totalorder %s93_s19, %s9365_s2  ;;  %p9370_p11 = scmp.lt.s32.totalorder %s93_s19, %s93_s19 }
  0x26   :  { %p9371_p12 = scmp.lt.s32.totalorder %s9365_s2, %s9365_s2 }
  0x28   :  { %74 = dma.hbm_to_vmem [thread:$0]  %s11663_s0, 288, %s69_s25, [#allocation9], %s9575_s26, %s9575_s26, %s9576_s27  }
  0x29   :  { %p9372_p13 = por %p9371_p12, %p9370_p11 }
  0x2b   :  { %p9373_p0 = pnand %p9372_p13, %p9366_p10 }
  0x2d   :  { %9376 = shalt.err (!%p9373_p0)
}
  0x2e   :  { %s9579_s23 = smov 128   ;;  %s9580_s24 = smov 8  }
  0x2f   :  { %98 = dma.hbm_to_vmem [thread:$0]  %s11631_s5, 2304, %s93_s19, [#allocation12], %s9579_s23, %s9579_s23, %s9580_s24  }
  0x30   :  { %s9385_s26 = scalar_lea.vmem %s125_s30, 1024  ;;  %p9390_p2 = scmp.lt.s32.totalorder %s125_s30, %s125_s30 }
  0x31   :  { %p9386_p1 = scmp.ne.s32.totalorder %s125_s30, %s9385_s26  ;;  %p9391_p3 = scmp.lt.s32.totalorder %s9385_s26, %s9385_s26 }
  0x33   :  { %p9392_p4 = por %p9391_p3, %p9390_p2 }
  0x35   :  { %p9393_p5 = pnand %p9392_p4, %p9386_p1 }
  0x37   :  { %9396 = shalt.err (!%p9393_p5)
}
  0x38   :  { %130 = dma.hbm_to_vmem [thread:$0]  %s11637_s11, 1024, %s125_s30, [#allocation15], %s9579_s23, %s9579_s23, %s9580_s24  }
  0x39   :  { %s9581_s29 = smov [#allocation17]   ;;  %s9582_s20 = smov [#allocation2]  }
  0x3a   :  { %s149_s0 = sshll.u32 %s9581_s29, 4  ;;  %s37_s22 = sshll.u32 %s9582_s20, 4  ;;  %s150_s0 = int_to_ptr.vmem [resolvable:$true] %s149_s0  ;;  %s38_s22 = int_to_ptr.vmem [resolvable:$true] %s37_s22 }
  0x3b   :  { %s9405_s5 = scalar_lea.vmem %s150_s0, 384  ;;  %p9410_p7 = scmp.lt.s32.totalorder %s150_s0, %s150_s0 }
  0x3c   :  { %p9406_p6 = scmp.ne.s32.totalorder %s150_s0, %s9405_s5  ;;  %p9411_p8 = scmp.lt.s32.totalorder %s9405_s5, %s9405_s5 }
  0x3e   :  { %p9412_p9 = por %p9411_p8, %p9410_p7 }
  0x40   :  { %p9413_p10 = pnand %p9412_p9, %p9406_p6 }
  0x42   :  { %9416 = shalt.err (!%p9413_p10)
}
  0x43   :  { %152 = dma.hbm_to_vmem [thread:$0]  %s11639_s13, 384, %s150_s0, [#allocation18]  }
  0x44   :  { %s9425_s3 = scalar_lea.vmem %s38_s22, 256  ;;  %p9430_p12 = scmp.lt.s32.totalorder %s38_s22, %s38_s22 }
  0x45   :  { %p9426_p11 = scmp.ne.s32.totalorder %s38_s22, %s9425_s3  ;;  %p9431_p13 = scmp.lt.s32.totalorder %s9425_s3, %s9425_s3 }
  0x47   :  { %p9432_p0 = por %p9431_p13, %p9430_p12 }
  0x49   :  { %p9433_p1 = pnand %p9432_p0, %p9426_p11 }
  0x4b   :  { %9436 = shalt.err (!%p9433_p1)
}
  0x4c   :  { %s11664_s25 = sld [smem:[#allocation35_spill]]  ;;  %s9583_s26 = smov [#allocation7]  }
  0x4d   :  { %s59_s27 = sshll.u32 %s9583_s26, 4  ;;  %s9584_s28 = smov [#allocation10]   ;;  %s60_s27 = int_to_ptr.vmem [resolvable:$true] %s59_s27 }
  0x4e   :  { %s80_s29 = sshll.u32 %s9584_s28, 4  ;;  %s9445_s20 = scalar_lea.vmem %s60_s27, 128  ;;  %s81_s29 = int_to_ptr.vmem [resolvable:$true] %s80_s29 }
  0x4f   :  { %p9446_p2 = scmp.ne.s32.totalorder %s60_s27, %s9445_s20  ;;  %p9450_p3 = scmp.lt.s32.totalorder %s60_s27, %s60_s27 }
  0x50   :  { %p9451_p4 = scmp.lt.s32.totalorder %s9445_s20, %s9445_s20 }
  0x52   :  { %40 = dma.hbm_to_vmem [thread:$0]  %s11664_s25, 256, %s38_s22, [#allocation3]  }
  0x53   :  { %p9452_p5 = por %p9451_p4, %p9450_p3 }
  0x55   :  { %p9453_p6 = pnand %p9452_p5, %p9446_p2 }
  0x57   :  { %9456 = shalt.err (!%p9453_p6)
}
  0x58   :  { %s11665_s5 = sld [smem:[#allocation37_spill]]  ;;  %s9465_s19 = scalar_lea.vmem %s81_s29, 9216 }
  0x59   :  { %p9466_p7 = scmp.ne.s32.totalorder %s81_s29, %s9465_s19  ;;  %p9470_p8 = scmp.lt.s32.totalorder %s81_s29, %s81_s29 }
  0x5a   :  { %p9471_p9 = scmp.lt.s32.totalorder %s9465_s19, %s9465_s19 }
  0x5c   :  { %p9472_p10 = por %p9471_p9, %p9470_p8 }
  0x5e   :  { %62 = dma.hbm_to_vmem [thread:$0]  %s11665_s5, 128, %s60_s27, [#allocation6]  }
  0x5f   :  { %p9473_p11 = pnand %p9472_p10, %p9466_p7 }
  0x61   :  { %9476 = shalt.err (!%p9473_p11)
}
  0x62   :  { %86 = dma.hbm_to_vmem [thread:$0]  %s11630_s4, 9216, %s81_s29, [#allocation9], %s9579_s23, %s9579_s23, %s9580_s24  }
  0x63   :  { %s9585_s3 = smov [#allocation13]  }
  0x64   :  { %s112_s11 = sshll.u32 %s9585_s3, 4  ;;  %s113_s11 = int_to_ptr.vmem [resolvable:$true] %s112_s11 }
  0x65   :  { %s9485_s30 = scalar_lea.vmem %s113_s11, 256  ;;  %p9490_p13 = scmp.lt.s32.totalorder %s113_s11, %s113_s11 }
  0x66   :  { %p9486_p12 = scmp.ne.s32.totalorder %s113_s11, %s9485_s30  ;;  %p9491_p0 = scmp.lt.s32.totalorder %s9485_s30, %s9485_s30 }
  0x68   :  { %p9492_p1 = por %p9491_p0, %p9490_p13 }
  0x6a   :  { %p9493_p2 = pnand %p9492_p1, %p9486_p12 }
  0x6c   :  { %9496 = shalt.err (!%p9493_p2)
}
  0x6d   :  { %s9586_s25 = smov 64   ;;  %s9587_s26 = smov 4  }
  0x6e   :  { %118 = dma.hbm_to_vmem [thread:$0]  %s11636_s10, 256, %s113_s11, [#allocation12], %s9586_s25, %s9586_s25, %s9587_s26  }
  0x6f   :  { %s9588_s20 = smov [#allocation16]   ;;  %s9589_s4 = smov [#allocation19]  }
  0x70   :  { %s136_s13 = sshll.u32 %s9588_s20, 4  ;;  %s160_s29 = sshll.u32 %s9589_s4, 4  ;;  %s137_s13 = int_to_ptr.vmem [resolvable:$true] %s136_s13  ;;  %s161_s29 = int_to_ptr.vmem [resolvable:$true] %s160_s29 }
  0x71   :  { %s9505_s0 = scalar_lea.vmem %s137_s13, 8192  ;;  %p9510_p4 = scmp.lt.s32.totalorder %s137_s13, %s137_s13 }
  0x72   :  { %p9506_p3 = scmp.ne.s32.totalorder %s137_s13, %s9505_s0  ;;  %p9511_p5 = scmp.lt.s32.totalorder %s9505_s0, %s9505_s0 }
  0x74   :  { %p9512_p6 = por %p9511_p5, %p9510_p4 }
  0x76   :  { %p9513_p7 = pnand %p9512_p6, %p9506_p3 }
  0x78   :  { %9516 = shalt.err (!%p9513_p7)
}
  0x79   :  { %142 = dma.hbm_to_vmem [thread:$0]  %s11638_s12, 8192, %s137_s13, [#allocation15], %s9572_s21, %s9572_s21, %s9573_s1  }
  0x7a   :  { %s9525_s10 = scalar_lea.vmem %s161_s29, 768  ;;  %p9530_p9 = scmp.lt.s32.totalorder %s161_s29, %s161_s29 }
  0x7b   :  { %p9526_p8 = scmp.ne.s32.totalorder %s161_s29, %s9525_s10  ;;  %p9531_p10 = scmp.lt.s32.totalorder %s9525_s10, %s9525_s10 }
  0x7d   :  { %p9532_p11 = por %p9531_p10, %p9530_p9 }
  0x7f   :  { %p9533_p12 = pnand %p9532_p11, %p9526_p8 }
  0x81   :  { %9536 = shalt.err (!%p9533_p12)
}
  0x82   :  { %166 = dma.hbm_to_vmem [thread:$0]  %s11641_s15, 768, %s161_s29, [#allocation18], %s9579_s23, %s9579_s23, %s9580_s24  }
  0x83   :  { %9557 = dma.done.wait [#allocation3], 256  }
  0x84   :  { %9558 = vsyncadd [#allocation3], 4294967040 }
  0x85   :  { %9559 = dma.done.wait [#allocation6], 41088  }
  0x86   :  { %9560 = vsyncadd [#allocation6], 4294926208 }
  0x87   :  { %9561 = dma.done.wait [#allocation9], 9504  }
  0x88   :  { %9562 = vsyncadd [#allocation9], 4294957792 }
  0x89   :  { %9563 = dma.done.wait [#allocation12], 2560  }
  0x8a   :  { %9564 = vsyncadd [#allocation12], 4294964736 }
  0x8b   :  { %9565 = dma.done.wait [#allocation15], 9216  }
  0x8c   :  { %9566 = vsyncadd [#allocation15], 4294958080 }
  0x8d   :  { %9567 = dma.done.wait [#allocation18], 1152  }
  0x8e   :  { %9568 = vsyncadd [#allocation18], 4294966144  ;;  %v239_v0 = vld [vmem:[#allocation5 + $0xf8] sm:$0xff]  ;;  %v238_v1 = vld [vmem:[#allocation5 + $0xf0] sm:$0xff]  ;;  %vm9591_vm0 = vmmov 0   ;;  %vm352_vm1 = vcmask 64512  }
  0x8f   :  { %v237_v2 = vld [vmem:[#allocation5 + $0xe8] sm:$0xff]  ;;  %272 = vmatprep.subr.mxu0 %v239_v0  ;;  %v236_v3 = vld [vmem:[#allocation5 + $0xe0] sm:$0xff]  ;;  %v235_v4 = vld [vmem:[#allocation5 + $0xd8] sm:$0xff]  ;;  %s9593_s12 = smov 1   ;;  %s9594_s15 = smov 15   ;;  %vm2179_vm10 = vcmask 850944  }
  0x90   :  { %273 = vmatpush1.msra.mxu0 %v238_v1  ;;  %v234_v5 = vld [vmem:[#allocation5 + $0xd0] sm:$0xff]  ;;  %v233_v6 = vld [vmem:[#allocation5 + $0xc8] sm:$0xff]  ;;  %v232_v7 = vld [vmem:[#allocation5 + $0xc0] sm:$0xff]  ;;  %s9595_s21 = smov 17   ;;  %s9596_s23 = smov 113   ;;  %vm2459_vm11 = vcmask 523264  }
  0x91   :  { %274 = vmatprep.subr.mxu0 %v237_v2  ;;  %v231_v8 = vld [vmem:[#allocation5 + $0xb8] sm:$0xff]  ;;  %v230_v9 = vld [vmem:[#allocation5 + $0xb0] sm:$0xff]  ;;  %v229_v10 = vld [vmem:[#allocation5 + $0xa8] sm:$0xff]  ;;  %v11646_v2 = vmov 0.0   ;;  %s9597_s24 = smov 127   ;;  %s9598_s3 = smov 111  }
  0x92   :  { %275 = vmatpush1.msra.mxu0 %v236_v3  ;;  %v228_v11 = vld [vmem:[#allocation5 + $0xa0] sm:$0xff]  ;;  %v227_v12 = vld [vmem:[#allocation5 + $0x98] sm:$0xff]  ;;  %v226_v13 = vld [vmem:[#allocation5 + $0x90] sm:$0xff]  ;;  %8404 = vmatprep.subr.mxu1 %v11646_v2  ;;  %s9599_s11 = smov 112   ;;  %vm3093_vm12 = vcmask 588800   ;;  %vm3466_vm13 = vcmask 130048  }
  0x93   :  { %276 = vmatprep.subr.mxu0 %v235_v4  ;;  %v225_v14 = vld [vmem:[#allocation5 + $0x88] sm:$0xff]  ;;  %v224_v15 = vld [vmem:[#allocation5 + $0x80] sm:$0xff]  ;;  %v223_v16 = vld [vmem:[#allocation5 + $0x78] sm:$0xff]  ;;  %8406 = vmatprep.mubr.msk.f32.mxu1 %vm9591_vm0, %v11646_v2  ;;  %vm4429_vm14 = vcmask 1043456   ;;  %vm4425_vm15 = vcmask 31744  }
  0x94   :  { %277 = vmatpush1.msra.mxu0 %v234_v5  ;;  %v222_v17 = vld [vmem:[#allocation5 + $0x70] sm:$0xff]  ;;  %v221_v18 = vld [vmem:[#allocation5 + $0x68] sm:$0xff]  ;;  %v220_v19 = vld [vmem:[#allocation5 + $0x60] sm:$0xff] }
  0x95   :  { %278 = vmatprep.subr.mxu0 %v233_v6  ;;  %v219_v20 = vld [vmem:[#allocation5 + $0x58] sm:$0xff]  ;;  %v218_v21 = vld [vmem:[#allocation5 + $0x50] sm:$0xff]  ;;  %v217_v22 = vld [vmem:[#allocation5 + $0x48] sm:$0xff] }
  0x96   :  { %279 = vmatpush1.msra.mxu0 %v232_v7  ;;  %v216_v23 = vld [vmem:[#allocation5 + $0x40] sm:$0xff]  ;;  %v9752_v24 = vld [vmem:[#allocation2 + $0x8] sm:$0xff]  ;;  %v214_v26 = vld [vmem:[#allocation5 + $0x30] sm:$0xff] }
  0x97   :  { %280 = vmatprep.subr.mxu0 %v231_v8  ;;  %v215_v25 = vld [vmem:[#allocation5 + $0x38] sm:$0xff]  ;;  %336 = vmatprep.mubr.f32.mxu0 %v9752_v24  ;;  %v213_v27 = vld [vmem:[#allocation5 + $0x28] sm:$0xff]  ;;  %v212_v28 = vld [vmem:[#allocation5 + $0x20] sm:$0xff] }
  0x98   :  { %281 = vmatpush1.msra.mxu0 %v230_v9  ;;  %v211_v29 = vld [vmem:[#allocation5 + $0x18] sm:$0xff]  ;;  %v210_v30 = vld [vmem:[#allocation5 + $0x10] sm:$0xff]  ;;  %v209_v31 = vld [vmem:[#allocation5 + $0x8] sm:$0xff] }
  0x99   :  { %282 = vmatprep.subr.mxu0 %v229_v10  ;;  %v208_v32 = vld [vmem:[#allocation5] sm:$0xff]  ;;  %v271_v33 = vld [vmem:[#allocation5 + $0x1f8] sm:$0xff]  ;;  %v270_v34 = vld [vmem:[#allocation5 + $0x1f0] sm:$0xff] }
  0x9a   :  { %283 = vmatpush1.msra.mxu0 %v228_v11  ;;  %v269_v35 = vld [vmem:[#allocation5 + $0x1e8] sm:$0xff]  ;;  %v268_v36 = vld [vmem:[#allocation5 + $0x1e0] sm:$0xff]  ;;  %v267_v37 = vld [vmem:[#allocation5 + $0x1d8] sm:$0xff] }
  0x9b   :  { %284 = vmatprep.subr.mxu0 %v227_v12  ;;  %v266_v38 = vld [vmem:[#allocation5 + $0x1d0] sm:$0xff]  ;;  %v265_v39 = vld [vmem:[#allocation5 + $0x1c8] sm:$0xff]  ;;  %v264_v40 = vld [vmem:[#allocation5 + $0x1c0] sm:$0xff] }
  0x9c   :  { %285 = vmatpush1.msra.mxu0 %v226_v13  ;;  %v263_v41 = vld [vmem:[#allocation5 + $0x1b8] sm:$0xff]  ;;  %v262_v42 = vld [vmem:[#allocation5 + $0x1b0] sm:$0xff]  ;;  %v261_v43 = vld [vmem:[#allocation5 + $0x1a8] sm:$0xff] }
  0x9d   :  { %286 = vmatprep.subr.mxu0 %v225_v14  ;;  %v260_v44 = vld [vmem:[#allocation5 + $0x1a0] sm:$0xff]  ;;  %v259_v45 = vld [vmem:[#allocation5 + $0x198] sm:$0xff]  ;;  %v258_v46 = vld [vmem:[#allocation5 + $0x190] sm:$0xff] }
  0x9e   :  { %287 = vmatpush1.msra.mxu0 %v224_v15  ;;  %v257_v47 = vld [vmem:[#allocation5 + $0x188] sm:$0xff]  ;;  %v256_v48 = vld [vmem:[#allocation5 + $0x180] sm:$0xff]  ;;  %v255_v49 = vld [vmem:[#allocation5 + $0x178] sm:$0xff] }
  0x9f   :  { %288 = vmatprep.subr.mxu0 %v223_v16  ;;  %v254_v50 = vld [vmem:[#allocation5 + $0x170] sm:$0xff]  ;;  %v253_v51 = vld [vmem:[#allocation5 + $0x168] sm:$0xff]  ;;  %v252_v52 = vld [vmem:[#allocation5 + $0x160] sm:$0xff] }
  0xa0   :  { %289 = vmatpush1.msra.mxu0 %v222_v17  ;;  %v251_v53 = vld [vmem:[#allocation5 + $0x158] sm:$0xff]  ;;  %v250_v54 = vld [vmem:[#allocation5 + $0x150] sm:$0xff]  ;;  %v249_v55 = vld [vmem:[#allocation5 + $0x148] sm:$0xff] }
  0xa1   :  { %290 = vmatprep.subr.mxu0 %v221_v18  ;;  %v248_v56 = vld [vmem:[#allocation5 + $0x140] sm:$0xff]  ;;  %v247_v57 = vld [vmem:[#allocation5 + $0x138] sm:$0xff]  ;;  %v246_v58 = vld [vmem:[#allocation5 + $0x130] sm:$0xff] }
  0xa2   :  { %291 = vmatpush1.msra.mxu0 %v220_v19  ;;  %v245_v59 = vld [vmem:[#allocation5 + $0x128] sm:$0xff]  ;;  %v244_v60 = vld [vmem:[#allocation5 + $0x120] sm:$0xff]  ;;  %v243_v61 = vld [vmem:[#allocation5 + $0x118] sm:$0xff] }
  0xa3   :  { %292 = vmatprep.subr.mxu0 %v219_v20  ;;  %v242_v62 = vld [vmem:[#allocation5 + $0x110] sm:$0xff]  ;;  %v241_v63 = vld [vmem:[#allocation5 + $0x108] sm:$0xff]  ;;  %v240_v0 = vld [vmem:[#allocation5 + $0x100] sm:$0xff] }
  0xa4   :  { %293 = vmatpush1.msra.mxu0 %v218_v21  ;;  %v9755_v1 = vld [vmem:[#allocation2] sm:$0xff]  ;;  %v9774_v9 = vld [vmem:[#allocation7] sm:$0xff]  ;;  %v549_v11 = vld [vmem:[#allocation5 + $0x2f8] sm:$0xff] }
  0xa5   :  { %294 = vmatprep.subr.mxu0 %v217_v22  ;;  %v548_v13 = vld [vmem:[#allocation5 + $0x2f0] sm:$0xff]  ;;  %v547_v14 = vld [vmem:[#allocation5 + $0x2e8] sm:$0xff]  ;;  %v546_v15 = vld [vmem:[#allocation5 + $0x2e0] sm:$0xff] }
  0xa6   :  { %295 = vmatpush1.msra.mxu0 %v216_v23  ;;  %v545_v16 = vld [vmem:[#allocation5 + $0x2d8] sm:$0xff]  ;;  %v544_v17 = vld [vmem:[#allocation5 + $0x2d0] sm:$0xff]  ;;  %v543_v18 = vld [vmem:[#allocation5 + $0x2c8] sm:$0xff] }
  0xa7   :  { %296 = vmatprep.subr.mxu0 %v215_v25  ;;  %v542_v19 = vld [vmem:[#allocation5 + $0x2c0] sm:$0xff]  ;;  %v541_v20 = vld [vmem:[#allocation5 + $0x2b8] sm:$0xff]  ;;  %v540_v21 = vld [vmem:[#allocation5 + $0x2b0] sm:$0xff] }
  0xa8   :  { %297 = vmatpush1.msra.mxu0 %v214_v26  ;;  %v539_v22 = vld [vmem:[#allocation5 + $0x2a8] sm:$0xff]  ;;  %v538_v23 = vld [vmem:[#allocation5 + $0x2a0] sm:$0xff]  ;;  %v537_v25 = vld [vmem:[#allocation5 + $0x298] sm:$0xff] }
  0xa9   :  { %298 = vmatprep.subr.mxu0 %v213_v27  ;;  %v536_v26 = vld [vmem:[#allocation5 + $0x290] sm:$0xff]  ;;  %v535_v27 = vld [vmem:[#allocation5 + $0x288] sm:$0xff] }
  0xaa   :  { %299 = vmatpush1.msra.mxu0 %v212_v28  ;;  %v534_v28 = vld [vmem:[#allocation5 + $0x280] sm:$0xff] }
  0xab   :  { %300 = vmatprep.subr.mxu0 %v211_v29  ;;  %v533_v29 = vld [vmem:[#allocation5 + $0x278] sm:$0xff] }
  0xac   :  { %301 = vmatpush1.msra.mxu0 %v210_v30  ;;  %v532_v30 = vld [vmem:[#allocation5 + $0x270] sm:$0xff] }
  0xad   :  { %302 = vmatprep.subr.mxu0 %v209_v31  ;;  %v531_v31 = vld [vmem:[#allocation5 + $0x268] sm:$0xff] }
  0xae   :  { %303 = vmatpush1.msra.mxu0 %v208_v32  ;;  %v530_v32 = vld [vmem:[#allocation5 + $0x260] sm:$0xff] }
  0xaf   :  { %304 = vmatprep.subr.mxu0 %v271_v33  ;;  %v529_v33 = vld [vmem:[#allocation5 + $0x258] sm:$0xff] }
  0xb0   :  { %305 = vmatpush2.msra.mxu0 %v270_v34  ;;  %v528_v34 = vld [vmem:[#allocation5 + $0x250] sm:$0xff] }
  0xb1   :  { %306 = vmatprep.subr.mxu0 %v269_v35  ;;  %v527_v35 = vld [vmem:[#allocation5 + $0x248] sm:$0xff] }
  0xb2   :  { %307 = vmatpush2.msra.mxu0 %v268_v36  ;;  %v526_v36 = vld [vmem:[#allocation5 + $0x240] sm:$0xff] }
  0xb3   :  { %308 = vmatprep.subr.mxu0 %v267_v37  ;;  %v525_v37 = vld [vmem:[#allocation5 + $0x238] sm:$0xff] }
  0xb4   :  { %309 = vmatpush2.msra.mxu0 %v266_v38  ;;  %v524_v38 = vld [vmem:[#allocation5 + $0x230] sm:$0xff] }
  0xb5   :  { %310 = vmatprep.subr.mxu0 %v265_v39  ;;  %v523_v39 = vld [vmem:[#allocation5 + $0x228] sm:$0xff] }
  0xb6   :  { %311 = vmatpush2.msra.mxu0 %v264_v40  ;;  %v522_v40 = vld [vmem:[#allocation5 + $0x220] sm:$0xff] }
  0xb7   :  { %312 = vmatprep.subr.mxu0 %v263_v41  ;;  %v521_v41 = vld [vmem:[#allocation5 + $0x218] sm:$0xff] }
  0xb8   :  { %313 = vmatpush2.msra.mxu0 %v262_v42  ;;  %v520_v42 = vld [vmem:[#allocation5 + $0x210] sm:$0xff] }
  0xb9   :  { %314 = vmatprep.subr.mxu0 %v261_v43  ;;  %v519_v43 = vld [vmem:[#allocation5 + $0x208] sm:$0xff] }
  0xba   :  { %315 = vmatpush2.msra.mxu0 %v260_v44  ;;  %v518_v44 = vld [vmem:[#allocation5 + $0x200] sm:$0xff] }
  0xbb   :  { %316 = vmatprep.subr.mxu0 %v259_v45  ;;  %v581_v45 = vld [vmem:[#allocation5 + $0x3f8] sm:$0xff] }
  0xbc   :  { %317 = vmatpush2.msra.mxu0 %v258_v46  ;;  %v580_v46 = vld [vmem:[#allocation5 + $0x3f0] sm:$0xff] }
  0xbd   :  { %318 = vmatprep.subr.mxu0 %v257_v47  ;;  %v579_v47 = vld [vmem:[#allocation5 + $0x3e8] sm:$0xff] }
  0xbe   :  { %319 = vmatpush2.msra.mxu0 %v256_v48  ;;  %v578_v48 = vld [vmem:[#allocation5 + $0x3e0] sm:$0xff] }
  0xbf   :  { %320 = vmatprep.subr.mxu0 %v255_v49  ;;  %v577_v49 = vld [vmem:[#allocation5 + $0x3d8] sm:$0xff] }
  0xc0   :  { %321 = vmatpush2.msra.mxu0 %v254_v50  ;;  %v576_v50 = vld [vmem:[#allocation5 + $0x3d0] sm:$0xff] }
  0xc1   :  { %322 = vmatprep.subr.mxu0 %v253_v51  ;;  %v575_v51 = vld [vmem:[#allocation5 + $0x3c8] sm:$0xff] }
  0xc2   :  { %323 = vmatpush2.msra.mxu0 %v252_v52  ;;  %v574_v52 = vld [vmem:[#allocation5 + $0x3c0] sm:$0xff] }
  0xc3   :  { %324 = vmatprep.subr.mxu0 %v251_v53  ;;  %v573_v53 = vld [vmem:[#allocation5 + $0x3b8] sm:$0xff] }
  0xc4   :  { %325 = vmatpush2.msra.mxu0 %v250_v54  ;;  %v572_v54 = vld [vmem:[#allocation5 + $0x3b0] sm:$0xff] }
  0xc5   :  { %326 = vmatprep.subr.mxu0 %v249_v55  ;;  %v571_v55 = vld [vmem:[#allocation5 + $0x3a8] sm:$0xff] }
  0xc6   :  { %327 = vmatpush2.msra.mxu0 %v248_v56  ;;  %v570_v56 = vld [vmem:[#allocation5 + $0x3a0] sm:$0xff] }
  0xc7   :  { %328 = vmatprep.subr.mxu0 %v247_v57  ;;  %v569_v57 = vld [vmem:[#allocation5 + $0x398] sm:$0xff] }
  0xc8   :  { %329 = vmatpush2.msra.mxu0 %v246_v58  ;;  %v568_v58 = vld [vmem:[#allocation5 + $0x390] sm:$0xff] }
  0xc9   :  { %330 = vmatprep.subr.mxu0 %v245_v59  ;;  %v567_v59 = vld [vmem:[#allocation5 + $0x388] sm:$0xff] }
  0xca   :  { %331 = vmatpush2.msra.mxu0 %v244_v60  ;;  %v566_v60 = vld [vmem:[#allocation5 + $0x380] sm:$0xff] }
  0xcb   :  { %332 = vmatprep.subr.mxu0 %v243_v61  ;;  %v565_v61 = vld [vmem:[#allocation5 + $0x378] sm:$0xff] }
  0xcc   :  { %333 = vmatpush2.msra.mxu0 %v242_v62  ;;  %v564_v62 = vld [vmem:[#allocation5 + $0x370] sm:$0xff] }
  0xcd   :  { %334 = vmatprep.subr.mxu0 %v241_v63  ;;  %v563_v63 = vld [vmem:[#allocation5 + $0x368] sm:$0xff] }
  0xce   :  { %335 = vmatpush2.msra.mxu0 %v240_v0  ;;  %v562_v0 = vld [vmem:[#allocation5 + $0x360] sm:$0xff] }
  0xcf   :  { %337 = vmatmul.mubr.f32.vlgmr.msra.gmra.mxu0 %v9755_v1  ;;  %8414 = vmatprep.subr.mxu0 %v11646_v2 }
  0xd0   :  { %8416 = vmatprep.mubr.msk.f32.mxu0 %vm9591_vm0, %v11646_v2 }
 0x18f   :  { %v9760_v3 = vpop.f32.mrf.mxu0 }
 0x190   :  { %v346_v7 = vmul.f32 %v9760_v3, %v9760_v3 }
 0x191   :  { %v9762_v4 = vpop.f32.mrf.mxu0 }
 0x192   :  { %v343_v5 = vadd.f32 %v9762_v4, %v9760_v3  ;;  %v347_v6 = vmul.f32 %v9762_v4, %v9762_v4 }
 0x194   :  { %344 = vadd.xlane.f32.xlu0 %v343_v5  ;;  %v348_v8 = vadd.f32 %v347_v6, %v346_v7  ;;  %v561_v5 = vld [vmem:[#allocation5 + $0x358] sm:$0xff]  ;;  %v560_v6 = vld [vmem:[#allocation5 + $0x350] sm:$0xff]  ;;  %v559_v7 = vld [vmem:[#allocation5 + $0x348] sm:$0xff] }
 0x198   :  { %349 = vadd.xlane.f32.xlu0 %v348_v8  ;;  %v558_v8 = vld [vmem:[#allocation5 + $0x340] sm:$0xff] }
 0x21d   :  { %v345_v10 = vpop.xlane.xlu0 %344 }
 0x21e   :  { %8405 = vmatpush3.msra.mxu1 %v345_v10  ;;  %v557_v10 = vld [vmem:[#allocation5 + $0x338] sm:$0xff] }
 0x21f   :  { %8407 = vmatmul.mubr.msk.f32.vlgmr.msra.gmra.mxu1 %vm352_vm1, %v9774_v9  ;;  %8409 = vmatprep.subr.mxu1 %v11646_v2 }
 0x220   :  { %8411 = vmatprep.mubr.msk.f32.mxu1 %vm9591_vm0, %v11646_v2 }
 0x221   :  { %v350_v12 = vpop.xlane.xlu0 %349 }
 0x222   :  { %8410 = vmatpush3.msra.mxu1 %v350_v12  ;;  %v555_v12 = vld [vmem:[#allocation5 + $0x328] sm:$0xff] }
 0x223   :  { %8412 = vmatmul.mubr.msk.f32.vlgmr.msra.gmra.mxu1 %vm352_vm1, %v9774_v9  ;;  %582 = vmatprep.subr.mxu1 %v549_v11  ;;  %v556_v11 = vld [vmem:[#allocation5 + $0x330] sm:$0xff] }
 0x224   :  { %583 = vmatpush1.msra.mxu1 %v548_v13  ;;  %646 = vmatprep.mubr.f32.mxu1 %v9752_v24  ;;  %v554_v13 = vld [vmem:[#allocation5 + $0x320] sm:$0xff] }
 0x225   :  { %584 = vmatprep.subr.mxu1 %v547_v14  ;;  %v553_v14 = vld [vmem:[#allocation5 + $0x318] sm:$0xff] }
 0x226   :  { %585 = vmatpush1.msra.mxu1 %v546_v15  ;;  %v552_v15 = vld [vmem:[#allocation5 + $0x310] sm:$0xff] }
 0x227   :  { %586 = vmatprep.subr.mxu1 %v545_v16  ;;  %v551_v16 = vld [vmem:[#allocation5 + $0x308] sm:$0xff] }
 0x228   :  { %587 = vmatpush1.msra.mxu1 %v544_v17  ;;  %v550_v17 = vld [vmem:[#allocation5 + $0x300] sm:$0xff] }
 0x229   :  { %588 = vmatprep.subr.mxu1 %v543_v18  ;;  %v854_v18 = vld [vmem:[#allocation5 + $0x4f8] sm:$0xff] }
 0x22a   :  { %589 = vmatpush1.msra.mxu1 %v542_v19  ;;  %v853_v19 = vld [vmem:[#allocation5 + $0x4f0] sm:$0xff] }
 0x22b   :  { %590 = vmatprep.subr.mxu1 %v541_v20  ;;  %v852_v20 = vld [vmem:[#allocation5 + $0x4e8] sm:$0xff] }
 0x22c   :  { %591 = vmatpush1.msra.mxu1 %v540_v21  ;;  %v851_v21 = vld [vmem:[#allocation5 + $0x4e0] sm:$0xff] }
 0x22d   :  { %592 = vmatprep.subr.mxu1 %v539_v22  ;;  %v850_v22 = vld [vmem:[#allocation5 + $0x4d8] sm:$0xff] }
 0x22e   :  { %593 = vmatpush1.msra.mxu1 %v538_v23  ;;  %v849_v23 = vld [vmem:[#allocation5 + $0x4d0] sm:$0xff] }
 0x22f   :  { %594 = vmatprep.subr.mxu1 %v537_v25  ;;  %v848_v25 = vld [vmem:[#allocation5 + $0x4c8] sm:$0xff] }
 0x230   :  { %595 = vmatpush1.msra.mxu1 %v536_v26  ;;  %v847_v26 = vld [vmem:[#allocation5 + $0x4c0] sm:$0xff] }
 0x231   :  { %596 = vmatprep.subr.mxu1 %v535_v27  ;;  %v846_v27 = vld [vmem:[#allocation5 + $0x4b8] sm:$0xff] }
 0x232   :  { %597 = vmatpush1.msra.mxu1 %v534_v28  ;;  %v845_v28 = vld [vmem:[#allocation5 + $0x4b0] sm:$0xff] }
 0x233   :  { %598 = vmatprep.subr.mxu1 %v533_v29  ;;  %v844_v29 = vld [vmem:[#allocation5 + $0x4a8] sm:$0xff] }
 0x234   :  { %599 = vmatpush1.msra.mxu1 %v532_v30  ;;  %v843_v30 = vld [vmem:[#allocation5 + $0x4a0] sm:$0xff] }
 0x235   :  { %600 = vmatprep.subr.mxu1 %v531_v31  ;;  %v842_v31 = vld [vmem:[#allocation5 + $0x498] sm:$0xff] }
 0x236   :  { %601 = vmatpush1.msra.mxu1 %v530_v32  ;;  %v841_v32 = vld [vmem:[#allocation5 + $0x490] sm:$0xff] }
 0x237   :  { %602 = vmatprep.subr.mxu1 %v529_v33  ;;  %v840_v33 = vld [vmem:[#allocation5 + $0x488] sm:$0xff] }
 0x238   :  { %603 = vmatpush1.msra.mxu1 %v528_v34  ;;  %v839_v34 = vld [vmem:[#allocation5 + $0x480] sm:$0xff] }
 0x239   :  { %604 = vmatprep.subr.mxu1 %v527_v35  ;;  %v838_v35 = vld [vmem:[#allocation5 + $0x478] sm:$0xff] }
 0x23a   :  { %605 = vmatpush1.msra.mxu1 %v526_v36  ;;  %v837_v36 = vld [vmem:[#allocation5 + $0x470] sm:$0xff] }
 0x23b   :  { %606 = vmatprep.subr.mxu1 %v525_v37  ;;  %v836_v37 = vld [vmem:[#allocation5 + $0x468] sm:$0xff] }
 0x23c   :  { %607 = vmatpush1.msra.mxu1 %v524_v38  ;;  %v835_v38 = vld [vmem:[#allocation5 + $0x460] sm:$0xff] }
 0x23d   :  { %608 = vmatprep.subr.mxu1 %v523_v39  ;;  %v834_v39 = vld [vmem:[#allocation5 + $0x458] sm:$0xff] }
 0x23e   :  { %609 = vmatpush1.msra.mxu1 %v522_v40  ;;  %v833_v40 = vld [vmem:[#allocation5 + $0x450] sm:$0xff] }
 0x23f   :  { %610 = vmatprep.subr.mxu1 %v521_v41  ;;  %v832_v41 = vld [vmem:[#allocation5 + $0x448] sm:$0xff] }
 0x240   :  { %611 = vmatpush1.msra.mxu1 %v520_v42  ;;  %v831_v42 = vld [vmem:[#allocation5 + $0x440] sm:$0xff] }
 0x241   :  { %612 = vmatprep.subr.mxu1 %v519_v43  ;;  %v830_v43 = vld [vmem:[#allocation5 + $0x438] sm:$0xff] }
 0x242   :  { %613 = vmatpush1.msra.mxu1 %v518_v44  ;;  %v829_v44 = vld [vmem:[#allocation5 + $0x430] sm:$0xff] }
 0x243   :  { %614 = vmatprep.subr.mxu1 %v581_v45  ;;  %v828_v45 = vld [vmem:[#allocation5 + $0x428] sm:$0xff] }
 0x244   :  { %615 = vmatpush2.msra.mxu1 %v580_v46  ;;  %v827_v46 = vld [vmem:[#allocation5 + $0x420] sm:$0xff] }
 0x245   :  { %616 = vmatprep.subr.mxu1 %v579_v47  ;;  %v826_v47 = vld [vmem:[#allocation5 + $0x418] sm:$0xff] }
 0x246   :  { %617 = vmatpush2.msra.mxu1 %v578_v48  ;;  %v825_v48 = vld [vmem:[#allocation5 + $0x410] sm:$0xff] }
 0x247   :  { %618 = vmatprep.subr.mxu1 %v577_v49  ;;  %v824_v49 = vld [vmem:[#allocation5 + $0x408] sm:$0xff] }
 0x248   :  { %619 = vmatpush2.msra.mxu1 %v576_v50  ;;  %v823_v50 = vld [vmem:[#allocation5 + $0x400] sm:$0xff] }
 0x249   :  { %620 = vmatprep.subr.mxu1 %v575_v51  ;;  %v886_v51 = vld [vmem:[#allocation5 + $0x5f8] sm:$0xff] }
 0x24a   :  { %621 = vmatpush2.msra.mxu1 %v574_v52  ;;  %v885_v52 = vld [vmem:[#allocation5 + $0x5f0] sm:$0xff] }
 0x24b   :  { %622 = vmatprep.subr.mxu1 %v573_v53  ;;  %v884_v53 = vld [vmem:[#allocation5 + $0x5e8] sm:$0xff] }
 0x24c   :  { %623 = vmatpush2.msra.mxu1 %v572_v54  ;;  %v883_v54 = vld [vmem:[#allocation5 + $0x5e0] sm:$0xff] }
 0x24d   :  { %624 = vmatprep.subr.mxu1 %v571_v55  ;;  %v882_v55 = vld [vmem:[#allocation5 + $0x5d8] sm:$0xff] }
 0x24e   :  { %625 = vmatpush2.msra.mxu1 %v570_v56  ;;  %v881_v56 = vld [vmem:[#allocation5 + $0x5d0] sm:$0xff] }
 0x24f   :  { %626 = vmatprep.subr.mxu1 %v569_v57  ;;  %v880_v57 = vld [vmem:[#allocation5 + $0x5c8] sm:$0xff] }
 0x250   :  { %627 = vmatpush2.msra.mxu1 %v568_v58  ;;  %v879_v58 = vld [vmem:[#allocation5 + $0x5c0] sm:$0xff] }
 0x251   :  { %628 = vmatprep.subr.mxu1 %v567_v59  ;;  %v878_v59 = vld [vmem:[#allocation5 + $0x5b8] sm:$0xff] }
 0x252   :  { %629 = vmatpush2.msra.mxu1 %v566_v60  ;;  %v877_v60 = vld [vmem:[#allocation5 + $0x5b0] sm:$0xff] }
 0x253   :  { %630 = vmatprep.subr.mxu1 %v565_v61  ;;  %v876_v61 = vld [vmem:[#allocation5 + $0x5a8] sm:$0xff] }
 0x254   :  { %631 = vmatpush2.msra.mxu1 %v564_v62  ;;  %v875_v62 = vld [vmem:[#allocation5 + $0x5a0] sm:$0xff] }
 0x255   :  { %632 = vmatprep.subr.mxu1 %v563_v63  ;;  %v874_v63 = vld [vmem:[#allocation5 + $0x598] sm:$0xff] }
 0x256   :  { %633 = vmatpush2.msra.mxu1 %v562_v0  ;;  %v873_v0 = vld [vmem:[#allocation5 + $0x590] sm:$0xff] }
 0x257   :  { %634 = vmatprep.subr.mxu1 %v561_v5  ;;  %v872_v5 = vld [vmem:[#allocation5 + $0x588] sm:$0xff] }
 0x258   :  { %635 = vmatpush2.msra.mxu1 %v560_v6  ;;  %v871_v6 = vld [vmem:[#allocation5 + $0x580] sm:$0xff] }
 0x259   :  { %636 = vmatprep.subr.mxu1 %v559_v7  ;;  %v870_v7 = vld [vmem:[#allocation5 + $0x578] sm:$0xff] }
 0x25a   :  { %637 = vmatpush2.msra.mxu1 %v558_v8  ;;  %v869_v8 = vld [vmem:[#allocation5 + $0x570] sm:$0xff] }
 0x25b   :  { %638 = vmatprep.subr.mxu1 %v557_v10  ;;  %v868_v10 = vld [vmem:[#allocation5 + $0x568] sm:$0xff] }
 0x25c   :  { %639 = vmatpush2.msra.mxu1 %v556_v11  ;;  %v867_v11 = vld [vmem:[#allocation5 + $0x560] sm:$0xff] }
 0x25d   :  { %640 = vmatprep.subr.mxu1 %v555_v12  ;;  %v866_v12 = vld [vmem:[#allocation5 + $0x558] sm:$0xff] }
 0x25e   :  { %641 = vmatpush2.msra.mxu1 %v554_v13  ;;  %v865_v13 = vld [vmem:[#allocation5 + $0x550] sm:$0xff] }
 0x25f   :  { %642 = vmatprep.subr.mxu1 %v553_v14  ;;  %v864_v14 = vld [vmem:[#allocation5 + $0x548] sm:$0xff] }
 0x260   :  { %643 = vmatpush2.msra.mxu1 %v552_v15  ;;  %v863_v15 = vld [vmem:[#allocation5 + $0x540] sm:$0xff] }
 0x261   :  { %644 = vmatprep.subr.mxu1 %v551_v16  ;;  %v862_v16 = vld [vmem:[#allocation5 + $0x538] sm:$0xff] }
 0x262   :  { %645 = vmatpush2.msra.mxu1 %v550_v17  ;;  %v861_v17 = vld [vmem:[#allocation5 + $0x530] sm:$0xff] }
 0x263   :  { %647 = vmatmul.mubr.f32.vlgmr.msra.gmra.mxu1 %v9755_v1  ;;  %887 = vmatprep.subr.mxu1 %v854_v18  ;;  %v860_v18 = vld [vmem:[#allocation5 + $0x528] sm:$0xff] }
 0x264   :  { %888 = vmatpush1.msra.mxu1 %v853_v19  ;;  %951 = vmatprep.mubr.f32.mxu1 %v9752_v24  ;;  %v859_v19 = vld [vmem:[#allocation5 + $0x520] sm:$0xff] }
 0x265   :  { %889 = vmatprep.subr.mxu1 %v852_v20  ;;  %v858_v20 = vld [vmem:[#allocation5 + $0x518] sm:$0xff] }
 0x266   :  { %890 = vmatpush1.msra.mxu1 %v851_v21  ;;  %v857_v21 = vld [vmem:[#allocation5 + $0x510] sm:$0xff] }
 0x267   :  { %891 = vmatprep.subr.mxu1 %v850_v22  ;;  %v856_v22 = vld [vmem:[#allocation5 + $0x508] sm:$0xff] }
 0x268   :  { %892 = vmatpush1.msra.mxu1 %v849_v23  ;;  %v855_v23 = vld [vmem:[#allocation5 + $0x500] sm:$0xff] }
 0x269   :  { %893 = vmatprep.subr.mxu1 %v848_v25 }
 0x26a   :  { %894 = vmatpush1.msra.mxu1 %v847_v26 }
 0x26b   :  { %895 = vmatprep.subr.mxu1 %v846_v27 }
 0x26c   :  { %896 = vmatpush1.msra.mxu1 %v845_v28 }
 0x26d   :  { %897 = vmatprep.subr.mxu1 %v844_v29 }
 0x26e   :  { %898 = vmatpush1.msra.mxu1 %v843_v30 }
 0x26f   :  { %899 = vmatprep.subr.mxu1 %v842_v31 }
 0x270   :  { %900 = vmatpush1.msra.mxu1 %v841_v32 }
 0x271   :  { %901 = vmatprep.subr.mxu1 %v840_v33 }
 0x272   :  { %902 = vmatpush1.msra.mxu1 %v839_v34 }
 0x273   :  { %903 = vmatprep.subr.mxu1 %v838_v35 }
 0x274   :  { %904 = vmatpush1.msra.mxu1 %v837_v36 }
 0x275   :  { %905 = vmatprep.subr.mxu1 %v836_v37 }
 0x276   :  { %906 = vmatpush1.msra.mxu1 %v835_v38 }
 0x277   :  { %907 = vmatprep.subr.mxu1 %v834_v39 }
 0x278   :  { %908 = vmatpush1.msra.mxu1 %v833_v40 }
 0x279   :  { %909 = vmatprep.subr.mxu1 %v832_v41 }
 0x27a   :  { %910 = vmatpush1.msra.mxu1 %v831_v42 }
 0x27b   :  { %911 = vmatprep.subr.mxu1 %v830_v43 }
 0x27c   :  { %912 = vmatpush1.msra.mxu1 %v829_v44 }
 0x27d   :  { %913 = vmatprep.subr.mxu1 %v828_v45 }
 0x27e   :  { %914 = vmatpush1.msra.mxu1 %v827_v46 }
 0x27f   :  { %915 = vmatprep.subr.mxu1 %v826_v47 }
 0x280   :  { %916 = vmatpush1.msra.mxu1 %v825_v48  ;;  %v1159_v48 = vld [vmem:[#allocation5 + $0x6f8] sm:$0xff] }
 0x281   :  { %917 = vmatprep.subr.mxu1 %v824_v49 }
 0x282   :  { %918 = vmatpush1.msra.mxu1 %v823_v50  ;;  %v1158_v50 = vld [vmem:[#allocation5 + $0x6f0] sm:$0xff] }
 0x283   :  { %919 = vmatprep.subr.mxu1 %v886_v51  ;;  %v1157_v51 = vld [vmem:[#allocation5 + $0x6e8] sm:$0xff] }
 0x284   :  { %920 = vmatpush2.msra.mxu1 %v885_v52  ;;  %v1156_v52 = vld [vmem:[#allocation5 + $0x6e0] sm:$0xff] }
 0x285   :  { %921 = vmatprep.subr.mxu1 %v884_v53  ;;  %v1155_v53 = vld [vmem:[#allocation5 + $0x6d8] sm:$0xff] }
 0x286   :  { %922 = vmatpush2.msra.mxu1 %v883_v54  ;;  %v1154_v54 = vld [vmem:[#allocation5 + $0x6d0] sm:$0xff] }
 0x287   :  { %923 = vmatprep.subr.mxu1 %v882_v55  ;;  %v1153_v55 = vld [vmem:[#allocation5 + $0x6c8] sm:$0xff] }
 0x288   :  { %924 = vmatpush2.msra.mxu1 %v881_v56  ;;  %v1152_v56 = vld [vmem:[#allocation5 + $0x6c0] sm:$0xff] }
 0x289   :  { %925 = vmatprep.subr.mxu1 %v880_v57  ;;  %v1151_v57 = vld [vmem:[#allocation5 + $0x6b8] sm:$0xff] }
 0x28a   :  { %926 = vmatpush2.msra.mxu1 %v879_v58  ;;  %v1150_v58 = vld [vmem:[#allocation5 + $0x6b0] sm:$0xff] }
 0x28b   :  { %927 = vmatprep.subr.mxu1 %v878_v59  ;;  %v1149_v59 = vld [vmem:[#allocation5 + $0x6a8] sm:$0xff] }
 0x28c   :  { %928 = vmatpush2.msra.mxu1 %v877_v60  ;;  %v1148_v60 = vld [vmem:[#allocation5 + $0x6a0] sm:$0xff] }
 0x28d   :  { %929 = vmatprep.subr.mxu1 %v876_v61  ;;  %v1147_v61 = vld [vmem:[#allocation5 + $0x698] sm:$0xff] }
 0x28e   :  { %930 = vmatpush2.msra.mxu1 %v875_v62  ;;  %v1146_v62 = vld [vmem:[#allocation5 + $0x690] sm:$0xff] }
 0x28f   :  { %931 = vmatprep.subr.mxu1 %v874_v63  ;;  %v1144_v63 = vld [vmem:[#allocation5 + $0x680] sm:$0xff] }
 0x290   :  { %932 = vmatpush2.msra.mxu1 %v873_v0  ;;  %v1143_v0 = vld [vmem:[#allocation5 + $0x678] sm:$0xff] }
 0x291   :  { %933 = vmatprep.subr.mxu1 %v872_v5  ;;  %v1142_v5 = vld [vmem:[#allocation5 + $0x670] sm:$0xff] }
 0x292   :  { %934 = vmatpush2.msra.mxu1 %v871_v6  ;;  %v1141_v6 = vld [vmem:[#allocation5 + $0x668] sm:$0xff] }
 0x293   :  { %935 = vmatprep.subr.mxu1 %v870_v7  ;;  %v1140_v7 = vld [vmem:[#allocation5 + $0x660] sm:$0xff] }
 0x294   :  { %936 = vmatpush2.msra.mxu1 %v869_v8  ;;  %v1139_v8 = vld [vmem:[#allocation5 + $0x658] sm:$0xff] }
 0x295   :  { %937 = vmatprep.subr.mxu1 %v868_v10  ;;  %v1138_v10 = vld [vmem:[#allocation5 + $0x650] sm:$0xff] }
 0x296   :  { %938 = vmatpush2.msra.mxu1 %v867_v11  ;;  %v1137_v11 = vld [vmem:[#allocation5 + $0x648] sm:$0xff] }
 0x297   :  { %939 = vmatprep.subr.mxu1 %v866_v12  ;;  %v1136_v12 = vld [vmem:[#allocation5 + $0x640] sm:$0xff] }
 0x298   :  { %940 = vmatpush2.msra.mxu1 %v865_v13  ;;  %v1135_v13 = vld [vmem:[#allocation5 + $0x638] sm:$0xff] }
 0x299   :  { %941 = vmatprep.subr.mxu1 %v864_v14  ;;  %v1134_v14 = vld [vmem:[#allocation5 + $0x630] sm:$0xff] }
 0x29a   :  { %942 = vmatpush2.msra.mxu1 %v863_v15  ;;  %v1133_v15 = vld [vmem:[#allocation5 + $0x628] sm:$0xff] }
 0x29b   :  { %943 = vmatprep.subr.mxu1 %v862_v16  ;;  %v1132_v16 = vld [vmem:[#allocation5 + $0x620] sm:$0xff] }
 0x29c   :  { %944 = vmatpush2.msra.mxu1 %v861_v17  ;;  %v1131_v17 = vld [vmem:[#allocation5 + $0x618] sm:$0xff] }
 0x29d   :  { %945 = vmatprep.subr.mxu1 %v860_v18  ;;  %v1130_v18 = vld [vmem:[#allocation5 + $0x610] sm:$0xff] }
 0x29e   :  { %946 = vmatpush2.msra.mxu1 %v859_v19  ;;  %v1129_v19 = vld [vmem:[#allocation5 + $0x608] sm:$0xff] }
 0x29f   :  { %947 = vmatprep.subr.mxu1 %v858_v20  ;;  %v1128_v20 = vld [vmem:[#allocation5 + $0x600] sm:$0xff] }
 0x2a0   :  { %948 = vmatpush2.msra.mxu1 %v857_v21  ;;  %v1191_v21 = vld [vmem:[#allocation5 + $0x7f8] sm:$0xff] }
 0x2a1   :  { %949 = vmatprep.subr.mxu1 %v856_v22  ;;  %v1190_v22 = vld [vmem:[#allocation5 + $0x7f0] sm:$0xff] }
 0x2a2   :  { %950 = vmatpush2.msra.mxu1 %v855_v23  ;;  %v1189_v23 = vld [vmem:[#allocation5 + $0x7e8] sm:$0xff] }
 0x2a3   :  { %952 = vmatmul.mubr.f32.vlgmr.msra.gmra.mxu1 %v9755_v1  ;;  %8434 = vmatprep.subr.mxu1 %v11646_v2 }
 0x2a4   :  { %8436 = vmatprep.mubr.msk.f32.mxu1 %vm9591_vm0, %v11646_v2 }
 0x2df   :  { %v422_v25 = vpop.f32.mrf.mxu1 }
 0x2e0   :  { %v9790_v26 = vmul.f32 0.0009765625, %v422_v25  ;;  %v1188_v25 = vld [vmem:[#allocation5 + $0x7e0] sm:$0xff] }
 0x2e1   :  { %v8408_v27 = vpop.f32.mrf.mxu1 }
 0x2e2   :  { %v9794_v28 = vmul.f32 %v9790_v26, %v9790_v26  ;;  %v1187_v27 = vld [vmem:[#allocation5 + $0x7d8] sm:$0xff] }
 0x2e3   :  { %v492_v29 = vpop.f32.mrf.mxu1 }
 0x2e4   :  { %v9796_v30 = vmul.f32 0.0009765625, %v492_v29  ;;  %v1186_v29 = vld [vmem:[#allocation5 + $0x7d0] sm:$0xff] }
 0x2e5   :  { %v8413_v31 = vpop.f32.mrf.mxu1 }
 0x2e6   :  { %v499_v32 = vsub.f32 %v9796_v30, %v9794_v28  ;;  %v1185_v31 = vld [vmem:[#allocation5 + $0x7c8] sm:$0xff] }
 0x323   :  { %v9800_v33 = vpop.f32.mrf.mxu1 }
 0x324   :  { %v656_v36 = vmul.f32 %v9800_v33, %v9800_v33 }
 0x325   :  { %v9802_v34 = vpop.f32.mrf.mxu1 }
 0x326   :  { %v653_v35 = vadd.f32 %v9802_v34, %v9800_v33  ;;  %v657_v37 = vmul.f32 %v9802_v34, %v9802_v34 }
 0x328   :  { %654 = vadd.xlane.f32.xlu1 %v653_v35  ;;  %v658_v38 = vadd.f32 %v657_v37, %v656_v36  ;;  %v1184_v35 = vld [vmem:[#allocation5 + $0x7c0] sm:$0xff]  ;;  %v1183_v36 = vld [vmem:[#allocation5 + $0x7b8] sm:$0xff]  ;;  %v1182_v37 = vld [vmem:[#allocation5 + $0x7b0] sm:$0xff] }
 0x32c   :  { %659 = vadd.xlane.f32.xlu1 %v658_v38  ;;  %v1181_v38 = vld [vmem:[#allocation5 + $0x7a8] sm:$0xff] }
 0x363   :  { %v9810_v39 = vpop.f32.mrf.mxu1 }
 0x364   :  { %v961_v42 = vmul.f32 %v9810_v39, %v9810_v39 }
 0x365   :  { %v9812_v40 = vpop.f32.mrf.mxu1 }
 0x366   :  { %v958_v41 = vadd.f32 %v9812_v40, %v9810_v39  ;;  %v962_v43 = vmul.f32 %v9812_v40, %v9812_v40 }
 0x368   :  { %959 = vadd.xlane.f32.xlu0 %v958_v41  ;;  %v963_v44 = vadd.f32 %v962_v43, %v961_v42  ;;  %v1180_v41 = vld [vmem:[#allocation5 + $0x7a0] sm:$0xff]  ;;  %v1179_v42 = vld [vmem:[#allocation5 + $0x798] sm:$0xff]  ;;  %v1178_v43 = vld [vmem:[#allocation5 + $0x790] sm:$0xff] }
 0x36a   :  { %964 = vadd.xlane.f32.xlu1 %v963_v44  ;;  %v1177_v44 = vld [vmem:[#allocation5 + $0x788] sm:$0xff] }
 0x3b1   :  { %v655_v45 = vpop.xlane.xlu1 %654 }
 0x3b2   :  { %8415 = vmatpush3.msra.mxu0 %v655_v45  ;;  %v1176_v45 = vld [vmem:[#allocation5 + $0x780] sm:$0xff] }
 0x3b3   :  { %8419 = vmatprep.subr.mxu0 %v11646_v2  ;;  %8417 = vmatmul.mubr.msk.f32.vlgmr.msra.gmra.mxu0 %vm352_vm1, %v9774_v9 }
 0x3b4   :  { %8421 = vmatprep.mubr.msk.f32.mxu0 %vm9591_vm0, %v11646_v2 }
 0x3b5   :  { %v660_v46 = vpop.xlane.xlu1 %659 }
 0x3b6   :  { %8420 = vmatpush3.msra.mxu0 %v660_v46  ;;  %v1175_v46 = vld [vmem:[#allocation5 + $0x778] sm:$0xff] }
 0x3b7   :  { %8422 = vmatmul.mubr.msk.f32.vlgmr.msra.gmra.mxu0 %vm352_vm1, %v9774_v9  ;;  %8424 = vmatprep.subr.mxu0 %v11646_v2 }
 0x3b8   :  { %8426 = vmatprep.mubr.msk.f32.mxu0 %vm9591_vm0, %v11646_v2 }
 0x3f1   :  { %v960_v47 = vpop.xlane.xlu0 %959 }
 0x3f2   :  { %8425 = vmatpush3.msra.mxu0 %v960_v47  ;;  %v1174_v47 = vld [vmem:[#allocation5 + $0x770] sm:$0xff] }
 0x3f3   :  { %8427 = vmatmul.mubr.msk.f32.vlgmr.msra.gmra.mxu0 %vm352_vm1, %v9774_v9  ;;  %8429 = vmatprep.subr.mxu0 %v11646_v2  ;;  %v965_v49 = vpop.xlane.xlu1 %964 }
 0x3f4   :  { %8430 = vmatpush3.msra.mxu0 %v965_v49  ;;  %8431 = vmatprep.mubr.msk.f32.mxu0 %vm9591_vm0, %v11646_v2  ;;  %v1172_v49 = vld [vmem:[#allocation5 + $0x760] sm:$0xff] }
 0x3f5   :  { %1192 = vmatprep.subr.mxu0 %v1159_v48  ;;  %v1173_v48 = vld [vmem:[#allocation5 + $0x768] sm:$0xff] }
 0x3f7   :  { %8432 = vmatmul.mubr.msk.f32.vlgmr.msra.gmra.mxu0 %vm352_vm1, %v9774_v9 }
 0x3f8   :  { %1193 = vmatpush1.msra.mxu0 %v1158_v50  ;;  %1256 = vmatprep.mubr.f32.mxu0 %v9752_v24  ;;  %v1145_v24 = vld [vmem:[#allocation5 + $0x688] sm:$0xff]  ;;  %v1171_v50 = vld [vmem:[#allocation5 + $0x758] sm:$0xff] }
 0x3f9   :  { %1194 = vmatprep.subr.mxu0 %v1157_v51  ;;  %v1170_v51 = vld [vmem:[#allocation5 + $0x750] sm:$0xff] }
 0x3fa   :  { %1195 = vmatpush1.msra.mxu0 %v1156_v52  ;;  %v1169_v52 = vld [vmem:[#allocation5 + $0x748] sm:$0xff] }
 0x3fb   :  { %1196 = vmatprep.subr.mxu0 %v1155_v53  ;;  %v1168_v53 = vld [vmem:[#allocation5 + $0x740] sm:$0xff] }
 0x3fc   :  { %1197 = vmatpush1.msra.mxu0 %v1154_v54  ;;  %v1167_v54 = vld [vmem:[#allocation5 + $0x738] sm:$0xff] }
 0x3fd   :  { %1198 = vmatprep.subr.mxu0 %v1153_v55  ;;  %v1166_v55 = vld [vmem:[#allocation5 + $0x730] sm:$0xff] }
 0x3fe   :  { %1199 = vmatpush1.msra.mxu0 %v1152_v56  ;;  %v1165_v56 = vld [vmem:[#allocation5 + $0x728] sm:$0xff] }
 0x3ff   :  { %1200 = vmatprep.subr.mxu0 %v1151_v57  ;;  %v1164_v57 = vld [vmem:[#allocation5 + $0x720] sm:$0xff] }
 0x400   :  { %1201 = vmatpush1.msra.mxu0 %v1150_v58  ;;  %v1163_v58 = vld [vmem:[#allocation5 + $0x718] sm:$0xff] }
 0x401   :  { %1202 = vmatprep.subr.mxu0 %v1149_v59  ;;  %v1162_v59 = vld [vmem:[#allocation5 + $0x710] sm:$0xff] }
 0x402   :  { %1203 = vmatpush1.msra.mxu0 %v1148_v60  ;;  %v1161_v60 = vld [vmem:[#allocation5 + $0x708] sm:$0xff] }
 0x403   :  { %1204 = vmatprep.subr.mxu0 %v1147_v61  ;;  %v1160_v61 = vld [vmem:[#allocation5 + $0x700] sm:$0xff] }
 0x404   :  { %1205 = vmatpush1.msra.mxu0 %v1146_v62 }
 0x405   :  { %1206 = vmatprep.subr.mxu0 %v1145_v24 }
 0x406   :  { %1207 = vmatpush1.msra.mxu0 %v1144_v63 }
 0x407   :  { %1208 = vmatprep.subr.mxu0 %v1143_v0 }
 0x408   :  { %1209 = vmatpush1.msra.mxu0 %v1142_v5 }
 0x409   :  { %1210 = vmatprep.subr.mxu0 %v1141_v6 }
 0x40a   :  { %1211 = vmatpush1.msra.mxu0 %v1140_v7 }
 0x40b   :  { %1212 = vmatprep.subr.mxu0 %v1139_v8 }
 0x40c   :  { %1213 = vmatpush1.msra.mxu0 %v1138_v10 }
 0x40d   :  { %1214 = vmatprep.subr.mxu0 %v1137_v11 }
 0x40e   :  { %1215 = vmatpush1.msra.mxu0 %v1136_v12 }
 0x40f   :  { %1216 = vmatprep.subr.mxu0 %v1135_v13 }
 0x410   :  { %1217 = vmatpush1.msra.mxu0 %v1134_v14 }
 0x411   :  { %1218 = vmatprep.subr.mxu0 %v1133_v15 }
 0x412   :  { %1219 = vmatpush1.msra.mxu0 %v1132_v16 }
 0x413   :  { %1220 = vmatprep.subr.mxu0 %v1131_v17 }
 0x414   :  { %1221 = vmatpush1.msra.mxu0 %v1130_v18 }
 0x415   :  { %1222 = vmatprep.subr.mxu0 %v1129_v19 }
 0x416   :  { %1223 = vmatpush1.msra.mxu0 %v1128_v20 }
 0x417   :  { %1224 = vmatprep.subr.mxu0 %v1191_v21 }
 0x418   :  { %1225 = vmatpush2.msra.mxu0 %v1190_v22 }
 0x419   :  { %1226 = vmatprep.subr.mxu0 %v1189_v23 }
 0x41a   :  { %1227 = vmatpush2.msra.mxu0 %v1188_v25  ;;  %v1464_v25 = vld [vmem:[#allocation5 + $0x8f8] sm:$0xff] }
 0x41b   :  { %1228 = vmatprep.subr.mxu0 %v1187_v27 }
 0x41c   :  { %1229 = vmatpush2.msra.mxu0 %v1186_v29  ;;  %v1463_v29 = vld [vmem:[#allocation5 + $0x8f0] sm:$0xff] }
 0x41d   :  { %1230 = vmatprep.subr.mxu0 %v1185_v31  ;;  %v1462_v31 = vld [vmem:[#allocation5 + $0x8e8] sm:$0xff] }
 0x41e   :  { %1231 = vmatpush2.msra.mxu0 %v1184_v35  ;;  %v1461_v35 = vld [vmem:[#allocation5 + $0x8e0] sm:$0xff] }
 0x41f   :  { %1232 = vmatprep.subr.mxu0 %v1183_v36  ;;  %v1460_v36 = vld [vmem:[#allocation5 + $0x8d8] sm:$0xff] }
 0x420   :  { %1233 = vmatpush2.msra.mxu0 %v1182_v37  ;;  %v9248_v37 = vld [vmem:[#allocation2 + $0x8] sm:$0xff] }
 0x421   :  { %1234 = vmatprep.subr.mxu0 %v1181_v38  ;;  %v1459_v38 = vld [vmem:[#allocation5 + $0x8d0] sm:$0xff] }
 0x422   :  { %1235 = vmatpush2.msra.mxu0 %v1180_v41  ;;  %v1458_v41 = vld [vmem:[#allocation5 + $0x8c8] sm:$0xff] }
 0x423   :  { %1236 = vmatprep.subr.mxu0 %v1179_v42  ;;  %v1457_v42 = vld [vmem:[#allocation5 + $0x8c0] sm:$0xff] }
 0x424   :  { %1237 = vmatpush2.msra.mxu0 %v1178_v43  ;;  %v1456_v43 = vld [vmem:[#allocation5 + $0x8b8] sm:$0xff] }
 0x425   :  { %1238 = vmatprep.subr.mxu0 %v1177_v44  ;;  %v1455_v44 = vld [vmem:[#allocation5 + $0x8b0] sm:$0xff] }
 0x426   :  { %1239 = vmatpush2.msra.mxu0 %v1176_v45  ;;  %v1454_v45 = vld [vmem:[#allocation5 + $0x8a8] sm:$0xff] }
 0x427   :  { %1240 = vmatprep.subr.mxu0 %v1175_v46  ;;  %v1453_v46 = vld [vmem:[#allocation5 + $0x8a0] sm:$0xff] }
 0x428   :  { %1241 = vmatpush2.msra.mxu0 %v1174_v47  ;;  %v1451_v47 = vld [vmem:[#allocation5 + $0x890] sm:$0xff] }
 0x429   :  { %1242 = vmatprep.subr.mxu0 %v1173_v48  ;;  %v1450_v48 = vld [vmem:[#allocation5 + $0x888] sm:$0xff] }
 0x42a   :  { %1243 = vmatpush2.msra.mxu0 %v1172_v49  ;;  %v1449_v49 = vld [vmem:[#allocation5 + $0x880] sm:$0xff] }
 0x42b   :  { %1244 = vmatprep.subr.mxu0 %v1171_v50  ;;  %v1448_v50 = vld [vmem:[#allocation5 + $0x878] sm:$0xff] }
 0x42c   :  { %1245 = vmatpush2.msra.mxu0 %v1170_v51  ;;  %v1447_v51 = vld [vmem:[#allocation5 + $0x870] sm:$0xff] }
 0x42d   :  { %1246 = vmatprep.subr.mxu0 %v1169_v52  ;;  %v1446_v52 = vld [vmem:[#allocation5 + $0x868] sm:$0xff] }
 0x42e   :  { %1247 = vmatpush2.msra.mxu0 %v1168_v53  ;;  %v1445_v53 = vld [vmem:[#allocation5 + $0x860] sm:$0xff] }
 0x42f   :  { %1248 = vmatprep.subr.mxu0 %v1167_v54  ;;  %v1444_v54 = vld [vmem:[#allocation5 + $0x858] sm:$0xff] }
 0x430   :  { %1249 = vmatpush2.msra.mxu0 %v1166_v55  ;;  %v1443_v55 = vld [vmem:[#allocation5 + $0x850] sm:$0xff] }
 0x431   :  { %1250 = vmatprep.subr.mxu0 %v1165_v56  ;;  %v1442_v56 = vld [vmem:[#allocation5 + $0x848] sm:$0xff] }
 0x432   :  { %1251 = vmatpush2.msra.mxu0 %v1164_v57  ;;  %v1441_v57 = vld [vmem:[#allocation5 + $0x840] sm:$0xff] }
 0x433   :  { %1252 = vmatprep.subr.mxu0 %v1163_v58  ;;  %v1440_v58 = vld [vmem:[#allocation5 + $0x838] sm:$0xff] }
 0x434   :  { %1253 = vmatpush2.msra.mxu0 %v1162_v59  ;;  %v1439_v59 = vld [vmem:[#allocation5 + $0x830] sm:$0xff] }
 0x435   :  { %1254 = vmatprep.subr.mxu0 %v1161_v60  ;;  %v1438_v60 = vld [vmem:[#allocation5 + $0x828] sm:$0xff] }
 0x436   :  { %1255 = vmatpush2.msra.mxu0 %v1160_v61  ;;  %v1437_v61 = vld [vmem:[#allocation5 + $0x820] sm:$0xff] }
 0x437   :  { %1257 = vmatmul.mubr.f32.vlgmr.msra.gmra.mxu0 %v9755_v1  ;;  %8444 = vmatprep.subr.mxu0 %v11646_v2 }
 0x438   :  { %8446 = vmatprep.mubr.msk.f32.mxu0 %vm9591_vm0, %v11646_v2 }
 0x473   :  { %v727_v62 = vpop.f32.mrf.mxu0 }
 0x474   :  { %v9842_v24 = vmul.f32 0.0009765625, %v727_v62  ;;  %v1436_v62 = vld [vmem:[#allocation5 + $0x818] sm:$0xff] }
 0x475   :  { %v8418_v63 = vpop.f32.mrf.mxu0 }
 0x476   :  { %v9846_v0 = vmul.f32 %v9842_v24, %v9842_v24  ;;  %v1435_v63 = vld [vmem:[#allocation5 + $0x810] sm:$0xff] }
 0x477   :  { %v797_v5 = vpop.f32.mrf.mxu0 }
 0x478   :  { %v9848_v6 = vmul.f32 0.0009765625, %v797_v5  ;;  %v1434_v5 = vld [vmem:[#allocation5 + $0x808] sm:$0xff] }
 0x479   :  { %v8423_v7 = vpop.f32.mrf.mxu0 }
 0x47a   :  { %v804_v1 = vsub.f32 %v9848_v6, %v9846_v0  ;;  %v1433_v7 = vld [vmem:[#allocation5 + $0x800] sm:$0xff] }
 0x47c   :  { %v805_v28 = vmax.f32 %v804_v1, 0.0 }
 0x47e   :  { %v813_v30 = vadd.f32 1e-12, %v805_v28 }
 0x4b3   :  { %v1032_v8 = vpop.f32.mrf.mxu0 }
 0x4b4   :  { %v9852_v10 = vmul.f32 0.0009765625, %v1032_v8  ;;  %v1496_v8 = vld [vmem:[#allocation5 + $0x9f8] sm:$0xff] }
 0x4b5   :  { %v8428_v11 = vpop.f32.mrf.mxu0 }
 0x4b6   :  { %v9856_v13 = vmul.f32 %v9852_v10, %v9852_v10  ;;  %v1495_v11 = vld [vmem:[#allocation5 + $0x9f0] sm:$0xff] }
 0x4b7   :  { %v1102_v12 = vpop.f32.mrf.mxu0 }
 0x4b8   :  { %v9858_v14 = vmul.f32 0.0009765625, %v1102_v12  ;;  %v1494_v12 = vld [vmem:[#allocation5 + $0x9e8] sm:$0xff] }
 0x4b9   :  { %v8433_v15 = vpop.f32.mrf.mxu0 }
 0x4ba   :  { %v1109_v16 = vsub.f32 %v9858_v14, %v9856_v13  ;;  %v1493_v15 = vld [vmem:[#allocation5 + $0x9e0] sm:$0xff] }
 0x4bb   :  { %v9250_v14 = vld [vmem:[#allocation7] sm:$0xff] }
 0x4f7   :  { %v9862_v17 = vpop.f32.mrf.mxu0 }
 0x4f8   :  { %v1266_v20 = vmul.f32 %v9862_v17, %v9862_v17 }
 0x4f9   :  { %v9864_v18 = vpop.f32.mrf.mxu0 }
 0x4fa   :  { %v1263_v19 = vadd.f32 %v9864_v18, %v9862_v17  ;;  %v1267_v21 = vmul.f32 %v9864_v18, %v9864_v18 }
 0x4fc   :  { %1264 = vadd.xlane.f32.xlu0 %v1263_v19  ;;  %v1268_v22 = vadd.f32 %v1267_v21, %v1266_v20  ;;  %v1492_v19 = vld [vmem:[#allocation5 + $0x9d8] sm:$0xff]  ;;  %v1491_v20 = vld [vmem:[#allocation5 + $0x9d0] sm:$0xff]  ;;  %v1490_v21 = vld [vmem:[#allocation5 + $0x9c8] sm:$0xff] }
 0x4fe   :  { %1269 = vadd.xlane.f32.xlu1 %v1268_v22  ;;  %v1489_v22 = vld [vmem:[#allocation5 + $0x9c0] sm:$0xff] }
 0x585   :  { %v1265_v23 = vpop.xlane.xlu0 %1264 }
 0x586   :  { %8435 = vmatpush3.msra.mxu1 %v1265_v23  ;;  %v1488_v23 = vld [vmem:[#allocation5 + $0x9b8] sm:$0xff] }
 0x587   :  { %v1270_v27 = vpop.xlane.xlu1 %1269  ;;  %8437 = vmatmul.mubr.msk.f32.vlgmr.msra.gmra.mxu1 %vm352_vm1, %v9774_v9  ;;  %8439 = vmatprep.subr.mxu1 %v11646_v2 }
 0x588   :  { %8440 = vmatpush3.msra.mxu1 %v1270_v27  ;;  %8441 = vmatprep.mubr.msk.f32.mxu1 %vm9591_vm0, %v11646_v2  ;;  %v1486_v27 = vld [vmem:[#allocation5 + $0x9a8] sm:$0xff] }
 0x589   :  { %1497 = vmatprep.subr.mxu1 %v1464_v25  ;;  %v1487_v25 = vld [vmem:[#allocation5 + $0x9b0] sm:$0xff] }
 0x58b   :  { %8442 = vmatmul.mubr.msk.f32.vlgmr.msra.gmra.mxu1 %vm352_vm1, %v9774_v9  ;;  %v1452_v9 = vld [vmem:[#allocation5 + $0x898] sm:$0xff] }
 0x58c   :  { %1498 = vmatpush1.msra.mxu1 %v1463_v29  ;;  %1561 = vmatprep.mubr.f32.mxu1 %v9248_v37  ;;  %v1485_v29 = vld [vmem:[#allocation5 + $0x9a0] sm:$0xff] }
 0x58d   :  { %1499 = vmatprep.subr.mxu1 %v1462_v31  ;;  %v1484_v31 = vld [vmem:[#allocation5 + $0x998] sm:$0xff]  ;;  %v1481_v37 = vld [vmem:[#allocation5 + $0x980] sm:$0xff] }
 0x58e   :  { %1500 = vmatpush1.msra.mxu1 %v1461_v35  ;;  %v1483_v35 = vld [vmem:[#allocation5 + $0x990] sm:$0xff] }
 0x58f   :  { %1501 = vmatprep.subr.mxu1 %v1460_v36  ;;  %v1482_v36 = vld [vmem:[#allocation5 + $0x988] sm:$0xff] }
 0x590   :  { %1502 = vmatpush1.msra.mxu1 %v1459_v38  ;;  %v1480_v38 = vld [vmem:[#allocation5 + $0x978] sm:$0xff] }
 0x591   :  { %1503 = vmatprep.subr.mxu1 %v1458_v41  ;;  %v1479_v41 = vld [vmem:[#allocation5 + $0x970] sm:$0xff] }
 0x592   :  { %1504 = vmatpush1.msra.mxu1 %v1457_v42  ;;  %v1478_v42 = vld [vmem:[#allocation5 + $0x968] sm:$0xff] }
 0x593   :  { %1505 = vmatprep.subr.mxu1 %v1456_v43  ;;  %v1477_v43 = vld [vmem:[#allocation5 + $0x960] sm:$0xff] }
 0x594   :  { %1506 = vmatpush1.msra.mxu1 %v1455_v44  ;;  %v1476_v44 = vld [vmem:[#allocation5 + $0x958] sm:$0xff] }
 0x595   :  { %1507 = vmatprep.subr.mxu1 %v1454_v45  ;;  %v1475_v45 = vld [vmem:[#allocation5 + $0x950] sm:$0xff] }
 0x596   :  { %1508 = vmatpush1.msra.mxu1 %v1453_v46  ;;  %v1474_v46 = vld [vmem:[#allocation5 + $0x948] sm:$0xff] }
 0x597   :  { %1509 = vmatprep.subr.mxu1 %v1452_v9  ;;  %v1473_v9 = vld [vmem:[#allocation5 + $0x940] sm:$0xff] }
 0x598   :  { %1510 = vmatpush1.msra.mxu1 %v1451_v47  ;;  %v1472_v47 = vld [vmem:[#allocation5 + $0x938] sm:$0xff] }
 0x599   :  { %1511 = vmatprep.subr.mxu1 %v1450_v48  ;;  %v1471_v48 = vld [vmem:[#allocation5 + $0x930] sm:$0xff] }
 0x59a   :  { %1512 = vmatpush1.msra.mxu1 %v1449_v49  ;;  %v1470_v49 = vld [vmem:[#allocation5 + $0x928] sm:$0xff] }
 0x59b   :  { %1513 = vmatprep.subr.mxu1 %v1448_v50  ;;  %v1469_v50 = vld [vmem:[#allocation5 + $0x920] sm:$0xff] }
 0x59c   :  { %1514 = vmatpush1.msra.mxu1 %v1447_v51  ;;  %v1468_v51 = vld [vmem:[#allocation5 + $0x918] sm:$0xff] }
 0x59d   :  { %1515 = vmatprep.subr.mxu1 %v1446_v52  ;;  %v1467_v52 = vld [vmem:[#allocation5 + $0x910] sm:$0xff] }
 0x59e   :  { %1516 = vmatpush1.msra.mxu1 %v1445_v53  ;;  %v1466_v53 = vld [vmem:[#allocation5 + $0x908] sm:$0xff] }
 0x59f   :  { %1517 = vmatprep.subr.mxu1 %v1444_v54  ;;  %v1465_v54 = vld [vmem:[#allocation5 + $0x900] sm:$0xff] }
 0x5a0   :  { %1518 = vmatpush1.msra.mxu1 %v1443_v55  ;;  %v9249_v55 = vld [vmem:[#allocation2] sm:$0xff] }
 0x5a1   :  { %1519 = vmatprep.subr.mxu1 %v1442_v56  ;;  %v9592_v56 = vmov 0  }
 0x5a2   :  { %1520 = vmatpush1.msra.mxu1 %v1441_v57  ;;  %9222 = vset.pattern.permute.xlu1 %v9592_v56 }
 0x5a3   :  { %1521 = vmatprep.subr.mxu1 %v1440_v58  ;;  %9221 = vset.pattern.permute.xlu0 %v9592_v56 }
 0x5a4   :  { %1522 = vmatpush1.msra.mxu1 %v1439_v59 }
 0x5a5   :  { %1523 = vmatprep.subr.mxu1 %v1438_v60 }
 0x5a6   :  { %1524 = vmatpush1.msra.mxu1 %v1437_v61 }
 0x5a7   :  { %1525 = vmatprep.subr.mxu1 %v1436_v62 }
 0x5a8   :  { %1526 = vmatpush1.msra.mxu1 %v1435_v63 }
 0x5a9   :  { %1527 = vmatprep.subr.mxu1 %v1434_v5 }
 0x5aa   :  { %1528 = vmatpush1.msra.mxu1 %v1433_v7 }
 0x5ab   :  { %1529 = vmatprep.subr.mxu1 %v1496_v8  ;;  %v500_v8 = vmax.f32 %v499_v32, 0.0 }
 0x5ac   :  { %1530 = vmatpush2.msra.mxu1 %v1495_v11 }
 0x5ad   :  { %1531 = vmatprep.subr.mxu1 %v1494_v12 }
 0x5ae   :  { %1532 = vmatpush2.msra.mxu1 %v1493_v15 }
 0x5af   :  { %1533 = vmatprep.subr.mxu1 %v1492_v19 }
 0x5b0   :  { %1534 = vmatpush2.msra.mxu1 %v1491_v20 }
 0x5b1   :  { %1535 = vmatprep.subr.mxu1 %v1490_v21  ;;  %v508_v21 = vadd.f32 1e-12, %v500_v8 }
 0x5b2   :  { %1536 = vmatpush2.msra.mxu1 %v1489_v22 }
 0x5b3   :  { %1537 = vmatprep.subr.mxu1 %v1488_v23  ;;  %9238 = vrsqrt.f32 %v508_v21  ;;  %v1110_v23 = vmax.f32 %v1109_v16, 0.0 }
 0x5b4   :  { %1538 = vmatpush2.msra.mxu1 %v1487_v25  ;;  %9240 = vrsqrt.f32 %v813_v30 }
 0x5b5   :  { %1539 = vmatprep.subr.mxu1 %v1486_v27  ;;  %v1118_v27 = vadd.f32 1e-12, %v1110_v23 }
 0x5b6   :  { %1540 = vmatpush2.msra.mxu1 %v1485_v29 }
 0x5b7   :  { %1541 = vmatprep.subr.mxu1 %v1484_v31 }
 0x5b8   :  { %1542 = vmatpush2.msra.mxu1 %v1483_v35 }
 0x5b9   :  { %1543 = vmatprep.subr.mxu1 %v1482_v36 }
 0x5ba   :  { %1544 = vmatpush2.msra.mxu1 %v1481_v37 }
 0x5bb   :  { %1545 = vmatprep.subr.mxu1 %v1480_v38 }
 0x5bc   :  { %1546 = vmatpush2.msra.mxu1 %v1479_v41 }
 0x5bd   :  { %1547 = vmatprep.subr.mxu1 %v1478_v42 }
 0x5be   :  { %1548 = vmatpush2.msra.mxu1 %v1477_v43 }
 0x5bf   :  { %1549 = vmatprep.subr.mxu1 %v1476_v44 }
 0x5c0   :  { %1550 = vmatpush2.msra.mxu1 %v1475_v45  ;;  %v9239_v25 = vpop.eup %9238 }
 0x5c1   :  { %1551 = vmatprep.subr.mxu1 %v1474_v46  ;;  %v9241_v29 = vpop.eup %9240 }
 0x5c2   :  { %1552 = vmatpush2.msra.mxu1 %v1473_v9 }
 0x5c3   :  { %1553 = vmatprep.subr.mxu1 %v1472_v47 }
 0x5c4   :  { %1554 = vmatpush2.msra.mxu1 %v1471_v48 }
 0x5c5   :  { %1555 = vmatprep.subr.mxu1 %v1470_v49 }
 0x5c6   :  { %1556 = vmatpush2.msra.mxu1 %v1469_v50 }
 0x5c7   :  { %1557 = vmatprep.subr.mxu1 %v1468_v51 }
 0x5c8   :  { %1558 = vmatpush2.msra.mxu1 %v1467_v52  ;;  %v1908_v52 = vld [vmem:[#allocation8 + $0x6] sm:$0x3] }
 0x5c9   :  { %1559 = vmatprep.subr.mxu1 %v1466_v53 }
 0x5ca   :  { %1560 = vmatpush2.msra.mxu1 %v1465_v54 }
 0x5cb   :  { %1562 = vmatmul.mubr.f32.vlgmr.msra.gmra.mxu1 %v9249_v55 }
 0x5cc   :  { %2318 = vmatprep.mubr.f32.mxu1 %v11646_v2 }
 0x647   :  { %v1337_v57 = vpop.f32.mrf.mxu1 }
 0x648   :  { %v1411_v58 = vmul.f32 0.0009765625, %v1337_v57 }
 0x649   :  { %v8438_v59 = vpop.f32.mrf.mxu1 }
 0x64a   :  { %v1413_v61 = vmul.f32 %v1411_v58, %v1411_v58 }
 0x64b   :  { %v1407_v60 = vpop.f32.mrf.mxu1 }
 0x64c   :  { %v1412_v62 = vmul.f32 0.0009765625, %v1407_v60 }
 0x64d   :  { %v8443_v63 = vpop.f32.mrf.mxu1 }
 0x64e   :  { %v1414_v5 = vsub.f32 %v1412_v62, %v1413_v61 }
 0x650   :  { %v1415_v32 = vmax.f32 %v1414_v5, 0.0 }
 0x652   :  { %v1423_v22 = vadd.f32 1e-12, %v1415_v32 }
 0x654   :  { %9242 = vrsqrt.f32 %v1423_v22 }
 0x655   :  { %9244 = vrsqrt.f32 %v1118_v27 }
 0x661   :  { %v9243_v0 = vpop.eup %9242 }
 0x662   :  { %v9245_v6 = vpop.eup %9244 }
 0x68b   :  { %v9880_v7 = vpop.f32.mrf.mxu1 }
 0x68c   :  { %v1571_v15 = vmul.f32 %v9880_v7, %v9880_v7 }
 0x68d   :  { %v9885_v11 = vpop.f32.mrf.mxu1 }
 0x68e   :  { %v1568_v12 = vadd.f32 %v9885_v11, %v9880_v7  ;;  %v1572_v19 = vmul.f32 %v9885_v11, %v9885_v11 }
 0x690   :  { %1569 = vadd.xlane.f32.xlu0 %v1568_v12  ;;  %v1573_v20 = vadd.f32 %v1572_v19, %v1571_v15 }
 0x692   :  { %1574 = vadd.xlane.f32.xlu1 %v1573_v20 }
 0x6a3   :  { %512 = vperm.xlu1 %9222, %v9239_v25  }
 0x6a6   :  { %503 = vperm.xlu0 %9221, %v9790_v26  }
 0x6a7   :  { %1418 = vperm.xlu1 %9222, %v1411_v58  }
 0x6aa   :  { %817 = vperm.xlu0 %9221, %v9241_v29  }
 0x6ab   :  { %1113 = vperm.xlu1 %9222, %v9852_v10  }
 0x6af   :  { %1427 = vperm.xlu1 %9222, %v9243_v0  }
 0x6b3   :  { %808 = vperm.xlu1 %9222, %v9842_v24  }
 0x6b7   :  { %1122 = vperm.xlu1 %9222, %v9245_v6  }
 0x719   :  { %v1570_v1 = vpop.xlane.xlu0 %1569 }
 0x71a   :  { %8445 = vmatpush3.msra.mxu0 %v1570_v1 }
 0x71b   :  { %v1575_v13 = vpop.xlane.xlu1 %1574  ;;  %8447 = vmatmul.mubr.msk.f32.vlgmr.msra.gmra.mxu0 %vm352_vm1, %v9250_v14  ;;  %8449 = vmatprep.subr.mxu0 %v11646_v2 }
 0x71c   :  { %8450 = vmatpush3.msra.mxu0 %v1575_v13  ;;  %8451 = vmatprep.mubr.msk.f32.mxu0 %vm9591_vm0, %v11646_v2 }
 0x71f   :  { %v513_v26 = vpop.permute.xlu1 %512  ;;  %8452 = vmatmul.mubr.msk.f32.vlgmr.msra.gmra.mxu0 %vm352_vm1, %v9250_v14 }
 0x721   :  { %v504_v10 = vpop.permute.xlu0 %503 }
 0x722   :  { %v506_v24 = vsub.f32 %v9760_v3, %v504_v10  ;;  %v507_v16 = vsub.f32 %v9762_v4, %v504_v10 }
 0x723   :  { %v1419_v31 = vpop.permute.xlu1 %1418 }
 0x724   :  { %v9909_v35 = vmul.f32 %v513_v26, %v506_v24  ;;  %v9911_v36 = vmul.f32 %v513_v26, %v507_v16 }
 0x725   :  { %v818_v9 = vpop.permute.xlu0 %817 }
 0x726   :  { %11666 = vst [vmem:[#allocation28_spill] sm:$0xff] %v9909_v35  ;;  %11667 = vst [vmem:[#allocation29_spill] sm:$0xff] %v9911_v36  ;;  %1902 = vrot.lane.b32.xlu0 %v9911_v36, %s9593_s12  ;;  %1900 = vrot.lane.b32.xlu1 %v9909_v35, %s9593_s12 }
 0x727   :  { %v1114_v37 = vpop.permute.xlu1 %1113 }
 0x728   :  { %v1116_v42 = vsub.f32 %v9810_v39, %v1114_v37  ;;  %v1117_v3 = vsub.f32 %v9812_v40, %v1114_v37 }
 0x72b   :  { %v1428_v38 = vpop.permute.xlu1 %1427 }
 0x72f   :  { %v809_v41 = vpop.permute.xlu1 %808 }
 0x730   :  { %v811_v43 = vsub.f32 %v9800_v33, %v809_v41  ;;  %v812_v44 = vsub.f32 %v9802_v34, %v809_v41  ;;  %v1421_v33 = vsub.f32 %v9862_v17, %v1419_v31  ;;  %v1422_v34 = vsub.f32 %v9864_v18, %v1419_v31 }
 0x731   :  { %v1741_v17 = vlaneseq }
 0x732   :  { %v9929_v39 = vmul.f32 %v818_v9, %v811_v43  ;;  %v9931_v40 = vmul.f32 %v818_v9, %v812_v44  ;;  %v9951_v47 = vmul.f32 %v1428_v38, %v1421_v33  ;;  %v9953_v48 = vmul.f32 %v1428_v38, %v1422_v34 }
 0x733   :  { %v1123_v4 = vpop.permute.xlu1 %1122  ;;  %v1749_v18 = vshrl.u32 %v1741_v17, 7  ;;  %v9993_v49 = vand.u32 127, %v1741_v17 }
 0x734   :  { %v9921_v45 = vmul.f32 %v1123_v4, %v1116_v42  ;;  %v9923_v46 = vmul.f32 %v1123_v4, %v1117_v3  ;;  %11669 = vst [vmem:[#allocation31_spill] sm:$0xff] %v9929_v39  ;;  %11670 = vst [vmem:[#allocation32_spill] sm:$0xff] %v9931_v40 }
 0x735   :  { %v9995_v50 = vsub.s32 0, %v1749_v18  ;;  %v9997_v51 = vsub.s32 1, %v1749_v18  ;;  %vm1904_vm2 = vcmp.lt.s32.totalorder %v9993_v49, 1  ;;  %vm1958_vm3 = vcmp.lt.s32.totalorder %v9993_v49, 127 }
 0x736   :  { %11668 = vst [vmem:[#allocation30_spill] sm:$0xff] %v9921_v45  ;;  %1878 = vrot.lane.b32.xlu0 %v9923_v46, %s9594_s15  ;;  %1876 = vrot.lane.b32.xlu1 %v9921_v45, %s9594_s15  ;;  %vm1850_vm4 = vcmp.lt.s32.totalorder %v9993_v49, 15  ;;  %vm1796_vm5 = vcmp.lt.s32.totalorder %v9993_v49, 16  ;;  %vm1743_vm6 = vcmp.lt.s32.totalorder %v9993_v49, 17  ;;  %vm2012_vm7 = vcmp.lt.s32.totalorder %v9993_v49, 113 }
 0x737   :  { %v10001_v53 = vrot.slane %v1908_v52, %v9995_v50  ;;  %v10004_v54 = vrot.slane %v1908_v52, %v9997_v51  ;;  %vm2120_vm8 = vcmp.lt.s32.totalorder %v9993_v49, 111  ;;  %vm2066_vm9 = vcmp.lt.s32.totalorder %v9993_v49, 112 }
 0x739   :  { %11671 = vst [vmem:[#allocation33_spill] sm:$0xff] %v10001_v53  ;;  %11672 = vst [vmem:[#allocation34_spill] sm:$0xff] %v10004_v54 }
 0x73a   :  { %1870 = vrot.lane.b32.xlu0 %v9931_v40, %s9594_s15  ;;  %1868 = vrot.lane.b32.xlu1 %v9929_v39, %s9594_s15 }
 0x73e   :  { %1848 = vrot.lane.b32.xlu0 %v9911_v36, %s9594_s15  ;;  %1846 = vrot.lane.b32.xlu1 %v9909_v35, %s9594_s15 }
 0x742   :  { %1824 = vrot.lane.b32.xlu0 %v9923_v46, %s9573_s1  ;;  %1822 = vrot.lane.b32.xlu1 %v9921_v45, %s9573_s1 }
 0x746   :  { %1816 = vrot.lane.b32.xlu0 %v9931_v40, %s9573_s1  ;;  %1814 = vrot.lane.b32.xlu1 %v9929_v39, %s9573_s1 }
 0x74a   :  { %1886 = vrot.lane.b32.xlu0 %v9953_v48, %s9594_s15  ;;  %1884 = vrot.lane.b32.xlu1 %v9951_v47, %s9594_s15 }
 0x74e   :  { %1832 = vrot.lane.b32.xlu0 %v9953_v48, %s9573_s1  ;;  %1830 = vrot.lane.b32.xlu1 %v9951_v47, %s9573_s1 }
 0x752   :  { %1794 = vrot.lane.b32.xlu0 %v9911_v36, %s9573_s1 }
 0x756   :  { %1778 = vrot.lane.b32.xlu0 %v9953_v48, %s9595_s21 }
 0x75a   :  { %1770 = vrot.lane.b32.xlu0 %v9923_v46, %s9595_s21 }
 0x75e   :  { %1762 = vrot.lane.b32.xlu0 %v9931_v40, %s9595_s21 }
 0x762   :  { %1739 = vrot.lane.b32.xlu0 %v9911_v36, %s9595_s21 }
 0x766   :  { %2032 = vrot.lane.b32.xlu0 %v9931_v40, %s9596_s23 }
 0x76a   :  { %2010 = vrot.lane.b32.xlu0 %v9911_v36, %s9596_s23 }
 0x76e   :  { %1994 = vrot.lane.b32.xlu0 %v9953_v48, %s9597_s24 }
 0x772   :  { %1986 = vrot.lane.b32.xlu0 %v9923_v46, %s9597_s24 }
 0x776   :  { %1978 = vrot.lane.b32.xlu0 %v9931_v40, %s9597_s24 }
 0x77a   :  { %2156 = vrot.lane.b32.xlu0 %v9953_v48, %s9598_s3 }
 0x77e   :  { %1956 = vrot.lane.b32.xlu0 %v9911_v36, %s9597_s24 }
 0x782   :  { %2148 = vrot.lane.b32.xlu0 %v9923_v46, %s9598_s3 }
 0x786   :  { %2140 = vrot.lane.b32.xlu0 %v9931_v40, %s9598_s3 }
 0x78a   :  { %2118 = vrot.lane.b32.xlu0 %v9911_v36, %s9598_s3 }
 0x798   :  { %v1901_v55 = vpop.permute.xlu1 %1900  ;;  %v1903_v56 = vpop.permute.xlu0 %1902 }
 0x799   :  { %v1905_v57 = vsel %vm1904_vm2, %v1901_v55, %v1903_v56  ;;  %v1906_v58 = vsel %vm1904_vm2, %v1903_v56, %v1901_v55 }
 0x79a   :  { %v1920_v59 = vmul.f32 %v10001_v53, %v1906_v58  ;;  %v1921_v60 = vmul.f32 %v10004_v54, %v1905_v57 }
 0x79c   :  { %2183 = vmatprep.subr.mxu0 %v1921_v60 }
 0x79d   :  { %2184 = vmatpush1.msra.mxu0 %v1920_v59 }
 0x7a8   :  { %v10042_v30 = vpop.permute.xlu0 %1878  ;;  %v10046_v22 = vpop.permute.xlu1 %1876 }
 0x7a9   :  { %v1880_v53 = vsel %vm1850_vm4, %v10046_v22, %v10042_v30 }
 0x7ac   :  { %v10044_v32 = vpop.permute.xlu0 %1870  ;;  %v10050_v25 = vpop.permute.xlu1 %1868 }
 0x7b0   :  { %v10048_v23 = vpop.permute.xlu0 %1848  ;;  %v10054_v29 = vpop.permute.xlu1 %1846 }
 0x7b4   :  { %v10052_v27 = vpop.permute.xlu0 %1824  ;;  %v10058_v6 = vpop.permute.xlu1 %1822 }
 0x7b8   :  { %v10056_v0 = vpop.permute.xlu0 %1816  ;;  %v10062_v13 = vpop.permute.xlu1 %1814 }
 0x7bc   :  { %v10060_v1 = vpop.permute.xlu0 %1886  ;;  %v10066_v26 = vpop.permute.xlu1 %1884 }
 0x7c0   :  { %v10064_v14 = vpop.permute.xlu0 %1832  ;;  %v10070_v24 = vpop.permute.xlu1 %1830 }
 0x7c4   :  { %v10068_v10 = vpop.permute.xlu0 %1794 }
 0x7c8   :  { %v10072_v16 = vpop.permute.xlu0 %1778 }
 0x7cc   :  { %v10074_v37 = vpop.permute.xlu0 %1770 }
 0x7d0   :  { %v10086_v43 = vpop.permute.xlu0 %1762 }
 0x7db   :  { %v1642_v61 = vpop.f32.mrf.mxu0 }
 0x7dc   :  { %v1716_v62 = vmul.f32 0.0009765625, %v1642_v61 }
 0x7dd   :  { %v8448_v63 = vpop.f32.mrf.mxu0 }
 0x7de   :  { %1723 = vperm.xlu1 %9222, %v1716_v62   ;;  %v1718_v8 = vmul.f32 %v1716_v62, %v1716_v62 }
 0x7df   :  { %v1712_v5 = vpop.f32.mrf.mxu0 }
 0x7e0   :  { %v1717_v12 = vmul.f32 0.0009765625, %v1712_v5  ;;  %v2171_v5 = vld [vmem:[#allocation17 + $0x8] sm:$0xff] }
 0x7e1   :  { %v8453_v15 = vpop.f32.mrf.mxu0  ;;  %2247 = vmatprep.mubr.f32.mxu0 %v2171_v5 }
 0x7e2   :  { %v1719_v19 = vsub.f32 %v1717_v12, %v1718_v8  ;;  %v2173_v8 = vld [vmem:[%s11640_s14] sm:$0xff] }
 0x7e4   :  { %v1720_v20 = vmax.f32 %v1719_v19, 0.0 }
 0x7e6   :  { %v1728_v21 = vadd.f32 1e-12, %v1720_v20 }
 0x7e8   :  { %9246 = vrsqrt.f32 %v1728_v21 }
 0x7f5   :  { %v9247_v28 = vpop.eup %9246 }
 0x7f6   :  { %1732 = vperm.xlu1 %9222, %v9247_v28  }
 0x7fa   :  { %1792 = vrot.lane.b32.xlu1 %v9909_v35, %s9573_s1 }
 0x7fe   :  { %1776 = vrot.lane.b32.xlu1 %v9951_v47, %s9595_s21 }
 0x802   :  { %1768 = vrot.lane.b32.xlu1 %v9921_v45, %s9595_s21 }
 0x806   :  { %1760 = vrot.lane.b32.xlu1 %v9929_v39, %s9595_s21 }
 0x80a   :  { %1737 = vrot.lane.b32.xlu1 %v9909_v35, %s9595_s21 }
 0x80e   :  { %2030 = vrot.lane.b32.xlu1 %v9929_v39, %s9596_s23 }
 0x812   :  { %2008 = vrot.lane.b32.xlu1 %v9909_v35, %s9596_s23 }
 0x816   :  { %1992 = vrot.lane.b32.xlu1 %v9951_v47, %s9597_s24 }
 0x81a   :  { %1984 = vrot.lane.b32.xlu1 %v9921_v45, %s9597_s24 }
 0x81e   :  { %1976 = vrot.lane.b32.xlu1 %v9929_v39, %s9597_s24 }
 0x822   :  { %2154 = vrot.lane.b32.xlu1 %v9951_v47, %s9598_s3 }
 0x826   :  { %1954 = vrot.lane.b32.xlu1 %v9909_v35, %s9597_s24 }
 0x82a   :  { %2146 = vrot.lane.b32.xlu1 %v9921_v45, %s9598_s3 }
 0x82e   :  { %2138 = vrot.lane.b32.xlu1 %v9929_v39, %s9598_s3 }
 0x832   :  { %2116 = vrot.lane.b32.xlu1 %v9909_v35, %s9598_s3 }
 0x859   :  { %v1724_v31 = vpop.permute.xlu1 %1723 }
 0x85a   :  { %v1726_v38 = vsub.f32 %v9880_v7, %v1724_v31  ;;  %v1727_v41 = vsub.f32 %v9885_v11, %v1724_v31  ;;  %v10096_v11 = vpop.permute.xlu0 %1739 }
 0x85e   :  { %v10108_v33 = vpop.permute.xlu0 %2032 }
 0x862   :  { %v10118_v18 = vpop.permute.xlu0 %2010 }
 0x866   :  { %v10130_v55 = vpop.permute.xlu0 %1994 }
 0x86a   :  { %v10140_v58 = vpop.permute.xlu0 %1986 }
 0x86e   :  { %v1979_v60 = vpop.permute.xlu0 %1978 }
 0x871   :  { %v1733_v42 = vpop.permute.xlu1 %1732 }
 0x872   :  { %v10078_v3 = vmul.f32 %v1733_v42, %v1726_v38  ;;  %v10080_v4 = vmul.f32 %v1733_v42, %v1727_v41  ;;  %v10192_v12 = vpop.permute.xlu0 %2156 }
 0x874   :  { %1894 = vrot.lane.b32.xlu0 %v10080_v4, %s9594_s15  ;;  %1892 = vrot.lane.b32.xlu1 %v10078_v3, %s9594_s15 }
 0x875   :  { %v10088_v44 = vpop.permute.xlu1 %1792 }
 0x876   :  { %v10196_v19 = vpop.permute.xlu0 %1956 }
 0x878   :  { %2102 = vrot.lane.b32.xlu0 %v9953_v48, %s9599_s11  ;;  %2100 = vrot.lane.b32.xlu1 %v9951_v47, %s9599_s11 }
 0x879   :  { %v10094_v7 = vpop.permute.xlu1 %1776 }
 0x87a   :  { %v10200_v21 = vpop.permute.xlu0 %2148 }
 0x87c   :  { %2094 = vrot.lane.b32.xlu0 %v9923_v46, %s9599_s11  ;;  %2092 = vrot.lane.b32.xlu1 %v9921_v45, %s9599_s11 }
 0x87d   :  { %v10102_v9 = vpop.permute.xlu1 %1768 }
 0x87e   :  { %v10204_v31 = vpop.permute.xlu0 %2140 }
 0x880   :  { %1840 = vrot.lane.b32.xlu0 %v10080_v4, %s9573_s1  ;;  %1838 = vrot.lane.b32.xlu1 %v10078_v3, %s9573_s1 }
 0x881   :  { %v10110_v34 = vpop.permute.xlu1 %1760 }
 0x882   :  { %v10208_v41 = vpop.permute.xlu0 %2118 }
 0x884   :  { %2086 = vrot.lane.b32.xlu0 %v9931_v40, %s9599_s11  ;;  %2084 = vrot.lane.b32.xlu1 %v9929_v39, %s9599_s11 }
 0x885   :  { %v10116_v17 = vpop.permute.xlu1 %1737 }
 0x888   :  { %1786 = vrot.lane.b32.xlu0 %v10080_v4, %s9595_s21  ;;  %1784 = vrot.lane.b32.xlu1 %v10078_v3, %s9595_s21 }
 0x889   :  { %v10124_v52 = vpop.permute.xlu1 %2030 }
 0x88c   :  { %1940 = vrot.lane.b32.xlu0 %v9953_v48, %s9593_s12  ;;  %1938 = vrot.lane.b32.xlu1 %v9951_v47, %s9593_s12 }
 0x88d   :  { %v10132_v56 = vpop.permute.xlu1 %2008 }
 0x890   :  { %2064 = vrot.lane.b32.xlu0 %v9911_v36, %s9599_s11  ;;  %2062 = vrot.lane.b32.xlu1 %v9909_v35, %s9599_s11  ;;  %v1888_v35 = vsel %vm1850_vm4, %v10066_v26, %v10060_v1 }
 0x891   :  { %v10138_v57 = vpop.permute.xlu1 %1992 }
 0x894   :  { %1932 = vrot.lane.b32.xlu0 %v9923_v46, %s9593_s12  ;;  %1930 = vrot.lane.b32.xlu1 %v9921_v45, %s9593_s12 }
 0x895   :  { %v10146_v59 = vpop.permute.xlu1 %1984 }
 0x898   :  { %2002 = vrot.lane.b32.xlu0 %v10080_v4, %s9597_s24  ;;  %2000 = vrot.lane.b32.xlu1 %v10078_v3, %s9597_s24 }
 0x899   :  { %v1977_v61 = vpop.permute.xlu1 %1976 }
 0x89a   :  { %v10155_v62 = vsel %vm1958_vm3, %v1977_v61, %v1979_v60  ;;  %v10159_v63 = vsel %vm1958_vm3, %v1979_v60, %v1977_v61  ;;  %v1854_v60 = vld [vmem:[#allocation8 + $0x4] sm:$0x3] }
 0x89b   :  { %v10214_v61 = vrot.slane %v1854_v60, %v9995_v50  ;;  %v10217_v5 = vrot.slane %v1854_v60, %v9997_v51 }
 0x89c   :  { %2164 = vrot.lane.b32.xlu0 %v10080_v4, %s9598_s3  ;;  %2162 = vrot.lane.b32.xlu1 %v10078_v3, %s9598_s3 }
 0x89d   :  { %v10194_v15 = vpop.permute.xlu1 %2154 }
 0x8a0   :  { %1924 = vrot.lane.b32.xlu0 %v9931_v40, %s9593_s12  ;;  %1922 = vrot.lane.b32.xlu1 %v9929_v39, %s9593_s12  ;;  %v1889_v39 = vsel %vm1850_vm4, %v10060_v1, %v10066_v26 }
 0x8a1   :  { %v10198_v20 = vpop.permute.xlu1 %1954 }
 0x8a4   :  { %2110 = vrot.lane.b32.xlu0 %v10080_v4, %s9599_s11  ;;  %2108 = vrot.lane.b32.xlu1 %v10078_v3, %s9599_s11 }
 0x8a5   :  { %v10202_v28 = vpop.permute.xlu1 %2146 }
 0x8a8   :  { %2048 = vrot.lane.b32.xlu0 %v9953_v48, %s9596_s23  ;;  %2046 = vrot.lane.b32.xlu1 %v9951_v47, %s9596_s23 }
 0x8a9   :  { %v10206_v38 = vpop.permute.xlu1 %2138 }
 0x8ac   :  { %1948 = vrot.lane.b32.xlu0 %v10080_v4, %s9593_s12  ;;  %1946 = vrot.lane.b32.xlu1 %v10078_v3, %s9593_s12 }
 0x8ad   :  { %v10210_v42 = vpop.permute.xlu1 %2116 }
 0x8b0   :  { %2056 = vrot.lane.b32.xlu0 %v10080_v4, %s9596_s23  ;;  %2054 = vrot.lane.b32.xlu1 %v10078_v3, %s9596_s23 }
 0x8b4   :  { %2040 = vrot.lane.b32.xlu0 %v9923_v46, %s9596_s23  ;;  %2038 = vrot.lane.b32.xlu1 %v9921_v45, %s9596_s23  ;;  %v1881_v45 = vsel %vm1850_vm4, %v10042_v30, %v10046_v22  ;;  %v1873_v30 = vsel %vm1850_vm4, %v10044_v32, %v10050_v25  ;;  %v1851_v22 = vsel %vm1850_vm4, %v10054_v29, %v10048_v23 }
 0x8b8   :  { %2176 = vperm.xlu1 %9222, %v2173_v8  }
 0x8e6   :  { %v1893_v8 = vpop.permute.xlu1 %1892  ;;  %v1895_v2 = vpop.permute.xlu0 %1894 }
 0x8e7   :  { %v1896_v36 = vsel %vm1850_vm4, %v1893_v8, %v1895_v2  ;;  %v1897_v54 = vsel %vm1850_vm4, %v1895_v2, %v1893_v8  ;;  %v1891_v2 = vmul.f32 %v1888_v35, %v10217_v5  ;;  %v1883_v35 = vmul.f32 %v1880_v53, %v10217_v5 }
 0x8e8   :  { %v1898_v60 = vmul.f32 %v1897_v54, %v10214_v61  ;;  %v1899_v40 = vmul.f32 %v1896_v36, %v10217_v5  ;;  %v1872_v36 = vsel %vm1850_vm4, %v10050_v25, %v10044_v32  ;;  %v1890_v54 = vmul.f32 %v1889_v39, %v10214_v61  ;;  %v1800_v25 = vld [vmem:[#allocation8 + $0x2] sm:$0x3] }
 0x8e9   :  { %v1852_v39 = vsel %vm1850_vm4, %v10048_v23, %v10054_v29  ;;  %v1875_v53 = vmul.f32 %v1872_v36, %v10217_v5  ;;  %v10275_v23 = vrot.slane %v1800_v25, %v9995_v50  ;;  %v10278_v29 = vrot.slane %v1800_v25, %v9997_v51 }
 0x8ea   :  { %v10242_v8 = vpop.permute.xlu1 %2100  ;;  %2185 = vmatprep.subr.mxu0 %v1899_v40  ;;  %v10244_v1 = vpop.permute.xlu0 %2102  ;;  %v1882_v40 = vmul.f32 %v1881_v45, %v10214_v61  ;;  %v1874_v45 = vmul.f32 %v1873_v30, %v10214_v61  ;;  %v1834_v30 = vsel %vm1796_vm5, %v10070_v24, %v10064_v14  ;;  %v1827_v25 = vsel %vm1796_vm5, %v10052_v27, %v10058_v6 }
 0x8eb   :  { %2186 = vmatpush1.msra.mxu0 %v1898_v60  ;;  %v1867_v60 = vmul.f32 %v10217_v5, %v1851_v22  ;;  %v1835_v22 = vsel %vm1796_vm5, %v10064_v14, %v10070_v24  ;;  %v1818_v24 = vsel %vm1796_vm5, %v10062_v13, %v10056_v0 }
 0x8ec   :  { %2187 = vmatprep.subr.mxu0 %v1891_v2  ;;  %v1866_v2 = vmul.f32 %v10214_v61, %v1852_v39 }
 0x8ed   :  { %2188 = vmatpush1.msra.mxu0 %v1890_v54 }
 0x8ee   :  { %v10265_v26 = vpop.permute.xlu1 %2092  ;;  %2189 = vmatprep.subr.mxu0 %v1883_v35  ;;  %v10267_v32 = vpop.permute.xlu0 %2094 }
 0x8ef   :  { %2190 = vmatpush1.msra.mxu0 %v1882_v40 }
 0x8f0   :  { %2191 = vmatprep.subr.mxu0 %v1875_v53 }
 0x8f1   :  { %2192 = vmatpush1.msra.mxu0 %v1874_v45  ;;  %v1826_v45 = vsel %vm1796_vm5, %v10058_v6, %v10052_v27  ;;  %v1819_v27 = vsel %vm1796_vm5, %v10056_v0, %v10062_v13 }
 0x8f2   :  { %v1839_v54 = vpop.permute.xlu1 %1838  ;;  %2193 = vmatprep.subr.mxu0 %v1867_v60  ;;  %v1841_v36 = vpop.permute.xlu0 %1840  ;;  %v1837_v60 = vmul.f32 %v1834_v30, %v10278_v29  ;;  %v1829_v6 = vmul.f32 %v1826_v45, %v10278_v29  ;;  %v1797_v30 = vsel %vm1796_vm5, %v10088_v44, %v10068_v10 }
 0x8f3   :  { %v1842_v35 = vsel %vm1796_vm5, %v1839_v54, %v1841_v36  ;;  %v1843_v40 = vsel %vm1796_vm5, %v1841_v36, %v1839_v54  ;;  %2194 = vmatpush1.msra.mxu0 %v1866_v2  ;;  %v1836_v54 = vmul.f32 %v1835_v22, %v10275_v23  ;;  %v1828_v36 = vmul.f32 %v1827_v25, %v10275_v23 }
 0x8f4   :  { %v1844_v39 = vmul.f32 %v1843_v40, %v10275_v23  ;;  %v1845_v53 = vmul.f32 %v1842_v35, %v10278_v29  ;;  %v1746_v35 = vld [vmem:[#allocation8] sm:$0x3]  ;;  %v1821_v40 = vmul.f32 %v1818_v24, %v10278_v29  ;;  %v1798_v22 = vsel %vm1796_vm5, %v10068_v10, %v10088_v44 }
 0x8f5   :  { %v1813_v45 = vmul.f32 %v10278_v29, %v1797_v30  ;;  %v10333_v25 = vrot.slane %v1746_v35, %v9997_v51  ;;  %v1812_v10 = vmul.f32 %v10275_v23, %v1798_v22  ;;  %v10339_v44 = vrot.slane %v1746_v35, %v9995_v50 }
 0x8f6   :  { %v10303_v2 = vpop.permute.xlu1 %2084  ;;  %2195 = vmatprep.subr.mxu0 %v1845_v53  ;;  %v10305_v14 = vpop.permute.xlu0 %2086  ;;  %v1780_v24 = vsel %vm1743_vm6, %v10094_v7, %v10072_v16  ;;  %v1772_v30 = vsel %vm1743_vm6, %v10102_v9, %v10074_v37  ;;  %v1764_v22 = vsel %vm1743_vm6, %v10110_v34, %v10086_v43 }
 0x8f7   :  { %2196 = vmatpush1.msra.mxu0 %v1844_v39  ;;  %v1820_v39 = vmul.f32 %v1819_v27, %v10275_v23 }
 0x8f8   :  { %2197 = vmatprep.subr.mxu0 %v1837_v60 }
 0x8f9   :  { %2198 = vmatpush1.msra.mxu0 %v1836_v54  ;;  %v1781_v54 = vsel %vm1743_vm6, %v10072_v16, %v10094_v7  ;;  %v1773_v16 = vsel %vm1743_vm6, %v10074_v37, %v10102_v9 }
 0x8fa   :  { %v1785_v0 = vpop.permute.xlu1 %1784  ;;  %2199 = vmatprep.subr.mxu0 %v1829_v6  ;;  %v1787_v13 = vpop.permute.xlu0 %1786  ;;  %v1782_v7 = vmul.f32 %v1781_v54, %v10339_v44  ;;  %v2035_v54 = vsel %vm2012_vm7, %v10108_v33, %v10124_v52 }
 0x8fb   :  { %v1788_v53 = vsel %vm1743_vm6, %v1785_v0, %v1787_v13  ;;  %2200 = vmatpush1.msra.mxu0 %v1828_v36  ;;  %v1789_v60 = vsel %vm1743_vm6, %v1787_v13, %v1785_v0  ;;  %v2016_v0 = vld [vmem:[#allocation8 + $0xc] sm:$0x3]  ;;  %v1775_v13 = vmul.f32 %v1772_v30, %v10333_v25 }
 0x8fc   :  { %2201 = vmatprep.subr.mxu0 %v1821_v40  ;;  %v1791_v27 = vmul.f32 %v1788_v53, %v10333_v25  ;;  %v1790_v35 = vmul.f32 %v1789_v60, %v10339_v44  ;;  %v1783_v40 = vmul.f32 %v1780_v24, %v10333_v25  ;;  %v1774_v53 = vmul.f32 %v1773_v16, %v10339_v44 }
 0x8fd   :  { %2202 = vmatpush1.msra.mxu0 %v1820_v39  ;;  %v1765_v39 = vsel %vm1743_vm6, %v10086_v43, %v10110_v34  ;;  %v1767_v60 = vmul.f32 %v1764_v22, %v10333_v25  ;;  %v1745_v43 = vsel %vm1743_vm6, %v10096_v11, %v10116_v17  ;;  %v10390_v34 = vrot.slane %v2016_v0, %v9997_v51 }
 0x8fe   :  { %v10350_v6 = vpop.permute.xlu1 %1938  ;;  %2203 = vmatprep.subr.mxu0 %v1813_v45  ;;  %v10352_v36 = vpop.permute.xlu0 %1940  ;;  %v1744_v45 = vsel %vm1743_vm6, %v10116_v17, %v10096_v11  ;;  %v10394_v24 = vrot.slane %v2016_v0, %v9995_v50  ;;  %v2034_v11 = vsel %vm2012_vm7, %v10124_v52, %v10108_v33  ;;  %v2014_v16 = vsel %vm2012_vm7, %v10118_v18, %v10132_v56 }
 0x8ff   :  { %2204 = vmatpush1.msra.mxu0 %v1812_v10  ;;  %v1766_v10 = vmul.f32 %v1765_v39, %v10339_v44  ;;  %v2037_v33 = vmul.f32 %v2035_v54, %v10390_v34  ;;  %v2029_v0 = vmul.f32 %v10390_v34, %v2014_v16  ;;  %v1989_v54 = vsel %vm1958_vm3, %v10140_v58, %v10146_v59 }
 0x900   :  { %2205 = vmatprep.subr.mxu0 %v1791_v27  ;;  %v1759_v27 = vmul.f32 %v10333_v25, %v1744_v45  ;;  %v2036_v52 = vmul.f32 %v2034_v11, %v10394_v24  ;;  %v1996_v45 = vsel %vm1958_vm3, %v10138_v57, %v10130_v55 }
 0x901   :  { %2206 = vmatpush1.msra.mxu0 %v1790_v35  ;;  %v1758_v35 = vmul.f32 %v10339_v44, %v1745_v43 }
 0x902   :  { %v10375_v37 = vpop.permute.xlu1 %2062  ;;  %2207 = vmatprep.subr.mxu0 %v1783_v40  ;;  %v10377_v9 = vpop.permute.xlu0 %2064  ;;  %v2013_v40 = vsel %vm2012_vm7, %v10132_v56, %v10118_v18 }
 0x903   :  { %2208 = vmatpush1.msra.mxu0 %v1782_v7  ;;  %v1962_v7 = vld [vmem:[#allocation8 + $0xa] sm:$0x3]  ;;  %v2028_v22 = vmul.f32 %v10394_v24, %v2013_v40  ;;  %v1988_v40 = vsel %vm1958_vm3, %v10146_v59, %v10140_v58  ;;  %v2158_v58 = vsel %vm2120_vm8, %v10194_v15, %v10192_v12  ;;  %v1960_v59 = vsel %vm1958_vm3, %v10196_v19, %v10198_v20 }
 0x904   :  { %2209 = vmatprep.subr.mxu0 %v1775_v13  ;;  %v10423_v13 = vrot.slane %v1962_v7, %v9995_v50  ;;  %v10426_v39 = vrot.slane %v1962_v7, %v9997_v51 }
 0x905   :  { %2210 = vmatpush1.msra.mxu0 %v1774_v53  ;;  %v2124_v53 = vld [vmem:[#allocation8 + $0x10] sm:$0x3] }
 0x906   :  { %v10405_v17 = vpop.permute.xlu1 %1930  ;;  %2211 = vmatprep.subr.mxu0 %v1767_v60  ;;  %v10407_v30 = vpop.permute.xlu0 %1932  ;;  %v1997_v60 = vsel %vm1958_vm3, %v10130_v55, %v10138_v57  ;;  %v10448_v55 = vrot.slane %v2124_v53, %v9995_v50  ;;  %v1998_v57 = vmul.f32 %v1996_v45, %v10423_v13  ;;  %v10457_v16 = vrot.slane %v2124_v53, %v9997_v51 }
 0x907   :  { %2212 = vmatpush1.msra.mxu0 %v1766_v10  ;;  %v1990_v45 = vmul.f32 %v1988_v40, %v10423_v13 }
 0x908   :  { %2213 = vmatprep.subr.mxu0 %v1759_v27 }
 0x909   :  { %2214 = vmatpush1.msra.mxu0 %v1758_v35  ;;  %v1999_v35 = vmul.f32 %v1997_v60, %v10426_v39  ;;  %v1982_v60 = vmul.f32 %v10155_v62, %v10423_v13  ;;  %v2150_v62 = vsel %vm2120_vm8, %v10202_v28, %v10200_v21 }
 0x90a   :  { %v2001_v18 = vpop.permute.xlu1 %2000  ;;  %2215 = vmatprep.subr.mxu0 %v2037_v33  ;;  %v2003_v56 = vpop.permute.xlu0 %2002  ;;  %v2152_v40 = vmul.f32 %v2150_v62, %v10448_v55  ;;  %v2068_v62 = vsel %vm2066_vm9, %v10377_v9, %v10375_v37 }
 0x90b   :  { %v2004_v43 = vsel %vm1958_vm3, %v2001_v18, %v2003_v56  ;;  %v2005_v10 = vsel %vm1958_vm3, %v2003_v56, %v2001_v18  ;;  %2216 = vmatpush2.msra.mxu0 %v2036_v52  ;;  %v1991_v52 = vmul.f32 %v1989_v54, %v10426_v39 }
 0x90c   :  { %v2006_v27 = vmul.f32 %v2004_v43, %v10423_v13  ;;  %v2007_v11 = vmul.f32 %v2005_v10, %v10426_v39  ;;  %2217 = vmatprep.subr.mxu0 %v2029_v0  ;;  %v1983_v43 = vmul.f32 %v10159_v63, %v10426_v39  ;;  %v1959_v10 = vsel %vm1958_vm3, %v10198_v20, %v10196_v19  ;;  %v2070_v20 = vld [vmem:[#allocation8 + $0xe] sm:$0x3] }
 0x90d   :  { %2218 = vmatpush2.msra.mxu0 %v2028_v22  ;;  %v2159_v22 = vsel %vm2120_vm8, %v10192_v12, %v10194_v15  ;;  %v2151_v12 = vsel %vm2120_vm8, %v10200_v21, %v10202_v28  ;;  %v2143_v19 = vsel %vm2120_vm8, %v10204_v31, %v10206_v38  ;;  %v2142_v28 = vsel %vm2120_vm8, %v10206_v38, %v10204_v31 }
 0x90e   :  { %v2163_v7 = vpop.permute.xlu1 %2162  ;;  %2219 = vmatprep.subr.mxu0 %v2007_v11  ;;  %v2165_v33 = vpop.permute.xlu0 %2164  ;;  %v2161_v15 = vmul.f32 %v2159_v22, %v10457_v16  ;;  %v1975_v11 = vmul.f32 %v10426_v39, %v1960_v59  ;;  %v2153_v21 = vmul.f32 %v2151_v12, %v10457_v16  ;;  %v2145_v31 = vmul.f32 %v2143_v19, %v10457_v16 }
 0x90f   :  { %v2166_v0 = vsel %vm2120_vm8, %v2163_v7, %v2165_v33  ;;  %v2167_v18 = vsel %vm2120_vm8, %v2165_v33, %v2163_v7  ;;  %2220 = vmatpush2.msra.mxu0 %v2006_v27  ;;  %v2160_v27 = vmul.f32 %v2158_v58, %v10448_v55  ;;  %v2122_v7 = vsel %vm2120_vm8, %v10208_v41, %v10210_v42 }
 0x910   :  { %v2168_v53 = vmul.f32 %v2166_v0, %v10448_v55  ;;  %v2169_v56 = vmul.f32 %v2167_v18, %v10457_v16  ;;  %2221 = vmatprep.subr.mxu0 %v1999_v35  ;;  %v1974_v35 = vmul.f32 %v10423_v13, %v1959_v10  ;;  %v10524_v38 = vrot.slane %v2070_v20, %v9995_v50 }
 0x911   :  { %2222 = vmatpush2.msra.mxu0 %v1998_v57  ;;  %v2121_v57 = vsel %vm2120_vm8, %v10210_v42, %v10208_v41  ;;  %v10527_v33 = vrot.slane %v2070_v20, %v9997_v51  ;;  %v2144_v0 = vmul.f32 %v2142_v28, %v10448_v55  ;;  %v2137_v18 = vmul.f32 %v10457_v16, %v2122_v7 }
 0x912   :  { %v10496_v54 = vpop.permute.xlu1 %1922  ;;  %2223 = vmatprep.subr.mxu0 %v1991_v52  ;;  %2260 = vmatprep.subr.mxu1 %v2169_v56  ;;  %v10498_v63 = vpop.permute.xlu0 %1924  ;;  %v2136_v41 = vmul.f32 %v10448_v55, %v2121_v57  ;;  %v2104_v50 = vsel %vm2066_vm9, %v10242_v8, %v10244_v1  ;;  %v2105_v58 = vsel %vm2066_vm9, %v10244_v1, %v10242_v8 }
 0x913   :  { %2224 = vmatpush2.msra.mxu0 %v1990_v45  ;;  %2261 = vmatpush1.msra.mxu1 %v2168_v53  ;;  %v2096_v59 = vsel %vm2066_vm9, %v10265_v26, %v10267_v32  ;;  %v2097_v53 = vsel %vm2066_vm9, %v10267_v32, %v10265_v26  ;;  %v2089_v8 = vsel %vm2066_vm9, %v10305_v14, %v10303_v2 }
 0x914   :  { %2225 = vmatprep.subr.mxu0 %v1983_v43  ;;  %2262 = vmatprep.subr.mxu1 %v2161_v15  ;;  %v1943_v32 = vsel %vm1904_vm2, %v10352_v36, %v10350_v6  ;;  %v2091_v43 = vmul.f32 %v2089_v8, %v10527_v33  ;;  %v1942_v12 = vsel %vm1904_vm2, %v10350_v6, %v10352_v36  ;;  %v11674_v15 = vld [vmem:[#allocation33_spill] sm:$0xff] }
 0x915   :  { %2226 = vmatpush2.msra.mxu0 %v1982_v60  ;;  %2263 = vmatpush1.msra.mxu1 %v2160_v27  ;;  %v1944_v10 = vmul.f32 %v1943_v32, %v11674_v15  ;;  %v1934_v36 = vsel %vm1904_vm2, %v10405_v17, %v10407_v30  ;;  %v2083_v7 = vmul.f32 %v10527_v33, %v2068_v62  ;;  %v2170_v32 = vld [vmem:[#allocation17] sm:$0xff]  ;;  %v2377_v62 = vld [vmem:[%s11633_s7 + $0xe0] sm:$0xff] }
 0x916   :  { %v2109_v52 = vpop.permute.xlu1 %2108  ;;  %2227 = vmatprep.subr.mxu0 %v1975_v11  ;;  %2264 = vmatprep.subr.mxu1 %v2153_v21  ;;  %v2111_v22 = vpop.permute.xlu0 %2110  ;;  %v11675_v11 = vld [vmem:[#allocation32_spill] sm:$0xff]  ;;  %v11676_v21 = vld [vmem:[#allocation31_spill] sm:$0xff] }
 0x917   :  { %v2113_v42 = vsel %vm2066_vm9, %v2111_v22, %v2109_v52  ;;  %2228 = vmatpush2.msra.mxu0 %v1974_v35  ;;  %2265 = vmatpush1.msra.mxu1 %v2152_v40  ;;  %v2112_v51 = vsel %vm2066_vm9, %v2109_v52, %v2111_v22  ;;  %v11678_v35 = vld [vmem:[#allocation29_spill] sm:$0xff]  ;;  %v11679_v52 = vld [vmem:[#allocation28_spill] sm:$0xff] }
 0x918   :  { %2229 = vmatprep.subr.mxu0 %v10080_v4  ;;  %2266 = vmatprep.subr.mxu1 %v2145_v31  ;;  %v2088_v4 = vsel %vm2066_vm9, %v10303_v2, %v10305_v14  ;;  %v2115_v1 = vmul.f32 %v2113_v42, %v10527_v33  ;;  %v2114_v45 = vmul.f32 %v2112_v51, %v10524_v38 }
 0x919   :  { %2230 = vmatpush2.msra.mxu0 %v10078_v3  ;;  %2267 = vmatpush1.msra.mxu1 %v2144_v0  ;;  %v2106_v3 = vmul.f32 %v2104_v50, %v10524_v38  ;;  %v2107_v2 = vmul.f32 %v2105_v58, %v10527_v33  ;;  %v2098_v14 = vmul.f32 %v2096_v59, %v10524_v38 }
 0x91a   :  { %v2047_v56 = vpop.permute.xlu1 %2046  ;;  %2231 = vmatprep.subr.mxu0 %v9953_v48  ;;  %2268 = vmatprep.subr.mxu1 %v2137_v18  ;;  %v2049_v26 = vpop.permute.xlu0 %2048  ;;  %v2099_v48 = vmul.f32 %v2097_v53, %v10527_v33  ;;  %v2090_v60 = vmul.f32 %v2088_v4, %v10524_v38  ;;  %v1935_v31 = vsel %vm1904_vm2, %v10407_v30, %v10405_v17 }
 0x91b   :  { %2232 = vmatpush2.msra.mxu0 %v9951_v47  ;;  %2269 = vmatpush1.msra.mxu1 %v2136_v41  ;;  %v11673_v47 = vld [vmem:[#allocation30_spill] sm:$0xff]  ;;  %v1926_v0 = vsel %vm1904_vm2, %v10496_v54, %v10498_v63  ;;  %v1927_v41 = vsel %vm1904_vm2, %v10498_v63, %v10496_v54  ;;  %v2051_v17 = vsel %vm2012_vm7, %v2049_v26, %v2047_v56 }
 0x91c   :  { %2233 = vmatprep.subr.mxu0 %v9923_v46  ;;  %2270 = vmatprep.subr.mxu1 %v2115_v1  ;;  %v2067_v46 = vsel %vm2066_vm9, %v10375_v37, %v10377_v9  ;;  %v11677_v37 = vld [vmem:[#allocation34_spill] sm:$0xff]  ;;  %v2050_v51 = vsel %vm2012_vm7, %v2047_v56, %v2049_v26  ;;  %v1936_v58 = vmul.f32 %v1935_v31, %v11674_v15  ;;  %v2370_v31 = vld [vmem:[%s11633_s7 + $0xa8] sm:$0xff] }
 0x91d   :  { %2234 = vmatpush2.msra.mxu0 %v11673_v47  ;;  %2271 = vmatpush1.msra.mxu1 %v2114_v45  ;;  %v1945_v9 = vmul.f32 %v1942_v12, %v11677_v37  ;;  %v2082_v40 = vmul.f32 %v10524_v38, %v2067_v46  ;;  %v1937_v22 = vmul.f32 %v1934_v36, %v11677_v37  ;;  %v2379_v12 = vld [vmem:[%s11633_s7 + $0xf0] sm:$0xff]  ;;  %v2362_v46 = vld [vmem:[%s11633_s7 + $0x68] sm:$0xff] }
 0x91e   :  { %v1947_v27 = vpop.permute.xlu1 %1946  ;;  %2235 = vmatprep.subr.mxu0 %v11675_v11  ;;  %2272 = vmatprep.subr.mxu1 %v2107_v2  ;;  %v1949_v6 = vpop.permute.xlu0 %1948  ;;  %v1928_v59 = vmul.f32 %v1927_v41, %v11674_v15  ;;  %v1929_v53 = vmul.f32 %v1926_v0, %v11677_v37  ;;  %v2053_v4 = vmul.f32 %v2051_v17, %v10390_v34  ;;  %v2363_v47 = vld [vmem:[%s11633_s7 + $0x70] sm:$0xff]  ;;  %v2376_v11 = vld [vmem:[%s11633_s7 + $0xd8] sm:$0xff]  ;;  %v2353_v0 = vld [vmem:[%s11633_s7 + $0x20] sm:$0xff] }
 0x91f   :  { %v1950_v19 = vsel %vm1904_vm2, %v1947_v27, %v1949_v6  ;;  %v1951_v20 = vsel %vm1904_vm2, %v1949_v6, %v1947_v27  ;;  %2236 = vmatpush2.msra.mxu0 %v11676_v21  ;;  %2273 = vmatpush1.msra.mxu1 %v2106_v3  ;;  %v2052_v56 = vmul.f32 %v2050_v51, %v10394_v24  ;;  %v2361_v27 = vld [vmem:[%s11633_s7 + $0x60] sm:$0xff]  ;;  %v2360_v6 = vld [vmem:[%s11633_s7 + $0x58] sm:$0xff]  ;;  %v2375_v36 = vld [vmem:[%s11633_s7 + $0xd0] sm:$0xff] }
 0x920   :  { %v1952_v28 = vmul.f32 %v1951_v20, %v11674_v15  ;;  %v1953_v57 = vmul.f32 %v1950_v19, %v11677_v37  ;;  %2237 = vmatprep.subr.mxu0 %v11678_v35  ;;  %2274 = vmatprep.subr.mxu1 %v2099_v48  ;;  %v11680_v48 = vmov 0.0   ;;  %v2359_v19 = vld [vmem:[%s11633_s7 + $0x50] sm:$0xff]  ;;  %v2374_v20 = vld [vmem:[%s11633_s7 + $0xc8] sm:$0xff]  ;;  %v2356_v35 = vld [vmem:[%s11633_s7 + $0x38] sm:$0xff] }
 0x921   :  { %2238 = vmatpush2.msra.mxu0 %v11679_v52  ;;  %2275 = vmatpush1.msra.mxu1 %v2098_v14  ;;  %v2172_v14 = vld [vmem:[#allocation17 + $0x10] sm:$0xff]  ;;  %v2358_v21 = vld [vmem:[%s11633_s7 + $0x48] sm:$0xff] }
 0x922   :  { %v2055_v42 = vpop.permute.xlu1 %2054  ;;  %2239 = vmatprep.subr.mxu0 %v1953_v57  ;;  %2276 = vmatprep.subr.mxu1 %v2091_v43  ;;  %v2057_v18 = vpop.permute.xlu0 %2056  ;;  %v2364_v43 = vld [vmem:[%s11633_s7 + $0x78] sm:$0xff]  ;;  %v2354_v52 = vld [vmem:[%s11633_s7 + $0x28] sm:$0xff] }
 0x923   :  { %v2058_v30 = vsel %vm2012_vm7, %v2055_v42, %v2057_v18  ;;  %v2059_v50 = vsel %vm2012_vm7, %v2057_v18, %v2055_v42  ;;  %2240 = vmatpush2.msra.mxu0 %v1952_v28  ;;  %2277 = vmatpush1.msra.mxu1 %v2090_v60  ;;  %v2380_v60 = vld [vmem:[%s11633_s7 + $0xf8] sm:$0xff]  ;;  %v2357_v28 = vld [vmem:[%s11633_s7 + $0x40] sm:$0xff] }
 0x924   :  { %v2060_v54 = vmul.f32 %v2058_v30, %v10394_v24  ;;  %v2061_v63 = vmul.f32 %v2059_v50, %v10390_v34  ;;  %2241 = vmatprep.subr.mxu0 %v1945_v9  ;;  %2278 = vmatprep.subr.mxu1 %v2083_v7  ;;  %v2373_v9 = vld [vmem:[%s11633_s7 + $0xc0] sm:$0xff]  ;;  %v2372_v57 = vld [vmem:[%s11633_s7 + $0xb8] sm:$0xff]  ;;  %v2355_v7 = vld [vmem:[%s11633_s7 + $0x30] sm:$0xff] }
 0x925   :  { %2242 = vmatpush2.msra.mxu0 %v1944_v10  ;;  %2279 = vmatpush1.msra.mxu1 %v2082_v40  ;;  %v2378_v10 = vld [vmem:[%s11633_s7 + $0xe8] sm:$0xff]  ;;  %v2371_v40 = vld [vmem:[%s11633_s7 + $0xb0] sm:$0xff]  ;;  %v2368_v41 = vld [vmem:[%s11633_s7 + $0x98] sm:$0xff] }
 0x926   :  { %v2039_v8 = vpop.permute.xlu1 %2038  ;;  %2243 = vmatprep.subr.mxu0 %v1937_v22  ;;  %2280 = vmatprep.subr.mxu1 %v2061_v63  ;;  %v2041_v1 = vpop.permute.xlu0 %2040  ;;  %v2369_v22 = vld [vmem:[%s11633_s7 + $0xa0] sm:$0xff]  ;;  %v2352_v17 = vld [vmem:[%s11633_s7 + $0x18] sm:$0xff]  ;;  %v2367_v50 = vld [vmem:[%s11633_s7 + $0x90] sm:$0xff] }
 0x927   :  { %v2042_v26 = vsel %vm2012_vm7, %v2039_v8, %v2041_v1  ;;  %v2043_v3 = vsel %vm2012_vm7, %v2041_v1, %v2039_v8  ;;  %2244 = vmatpush2.msra.mxu0 %v1936_v58  ;;  %2281 = vmatpush1.msra.mxu1 %v2060_v54  ;;  %v2351_v63 = vld [vmem:[%s11633_s7 + $0x10] sm:$0xff]  ;;  %v2349_v1 = vld [vmem:[%s11633_s7] sm:$0xff] }
 0x928   :  { %v2044_v45 = vmul.f32 %v2042_v26, %v10394_v24  ;;  %v2045_v2 = vmul.f32 %v2043_v3, %v10390_v34  ;;  %2245 = vmatprep.subr.mxu0 %v1929_v53  ;;  %2282 = vmatprep.subr.mxu1 %v2053_v4  ;;  %v2350_v53 = vld [vmem:[%s11633_s7 + $0x8] sm:$0xff]  ;;  %v2365_v4 = vld [vmem:[%s11633_s7 + $0x80] sm:$0xff] }
 0x929   :  { %2246 = vmatpush2.msra.mxu0 %v1928_v59  ;;  %2283 = vmatpush1.msra.mxu1 %v2052_v56  ;;  %v2366_v59 = vld [vmem:[%s11633_s7 + $0x88] sm:$0xff] }
 0x92a   :  { %2248 = vmatmul.mubr.f32.vlgmr.msra.gmra.mxu0 %v2170_v32  ;;  %2284 = vmatprep.subr.mxu1 %v2045_v2  ;;  %v3087_v32 = vld [vmem:[%s11642_s16] sm:$0xff]  ;;  %v7917_v2 = vld [vmem:[%s11642_s16 + $0x8] sm:$0xff] }
 0x92b   :  { %2285 = vmatpush1.msra.mxu1 %v2044_v45  ;;  %8028 = vmatprep.subr.mxu0 %v2380_v60  ;;  %v7946_v45 = vld [vmem:[%s11642_s16 + $0x10] sm:$0xff]  ;;  %v5524_v60 = vld [vmem:[%s11644_s18] sm:$0xff] }
 0x92c   :  { %7895 = vmatmul.mubr.msk.f32.vlgmr.msra.gmra.mxu1 %vm2179_vm10, %v2172_v14  ;;  %8454 = vmatprep.subr.mxu1 %v11680_v48  ;;  %v7968_v14 = vld [vmem:[%s11642_s16 + $0x18] sm:$0xff] }
 0x92d   :  { %8470 = vmatprep.mubr.msk.f32.mxu1 %vm9591_vm0, %v11680_v48  ;;  %8029 = vmatpush3.msra.mxu0 %v2364_v43  ;;  %v7991_v43 = vld [vmem:[%s11642_s16 + $0x20] sm:$0xff] }
 0x92e   :  { %8030 = vmatprep.subr.mxu0 %v2379_v12  ;;  %v7982_v12 = vld [vmem:[%s11644_s18 + $0x8] sm:$0xff] }
 0x92f   :  { %8031 = vmatpush3.msra.mxu0 %v2363_v47  ;;  %v2458_v47 = vld [vmem:[#allocation10 + $0x38] sm:$0xff] }
 0x930   :  { %8032 = vmatprep.subr.mxu0 %v2378_v10  ;;  %v2457_v10 = vld [vmem:[#allocation10 + $0x30] sm:$0xff]  ;;  %8455 = vmatpush3.msra.mxu1 %v2458_v47  ;;  %v2697_v47 = vld [vmem:[#allocation10 + $0xe8] sm:$0xff] }
 0x931   :  { %8033 = vmatpush3.msra.mxu0 %v2362_v46  ;;  %v8005_v46 = vld [vmem:[%s11644_s18 + $0x10] sm:$0xff]  ;;  %8456 = vmatprep.subr.mxu1 %v11680_v48 }
 0x932   :  { %8034 = vmatprep.subr.mxu0 %v2377_v62  ;;  %v2456_v62 = vld [vmem:[#allocation10 + $0x28] sm:$0xff]  ;;  %8457 = vmatpush3.msra.mxu1 %v2457_v10  ;;  %v2617_v10 = vld [vmem:[#allocation10 + $0xa0] sm:$0xff] }
 0x933   :  { %8035 = vmatpush3.msra.mxu0 %v2361_v27  ;;  %v2177_v42 = vpop.permute.xlu1 %2176  ;;  %8458 = vmatprep.subr.mxu1 %v11680_v48  ;;  %v2455_v27 = vld [vmem:[#allocation10 + $0x20] sm:$0xff] }
 0x934   :  { %8036 = vmatprep.subr.mxu0 %v2376_v11  ;;  %8459 = vmatpush3.msra.mxu1 %v2456_v62  ;;  %v2454_v11 = vld [vmem:[#allocation10 + $0x18] sm:$0xff] }
 0x935   :  { %8037 = vmatpush3.msra.mxu0 %v2360_v6  ;;  %8460 = vmatprep.subr.mxu1 %v11680_v48  ;;  %v2453_v6 = vld [vmem:[#allocation10 + $0x10] sm:$0xff]  ;;  %v2616_v62 = vld [vmem:[#allocation10 + $0x98] sm:$0xff] }
 0x936   :  { %8038 = vmatprep.subr.mxu0 %v2375_v36  ;;  %8461 = vmatpush3.msra.mxu1 %v2455_v27  ;;  %v2695_v27 = vld [vmem:[#allocation10 + $0xd8] sm:$0xff] }
 0x937   :  { %8039 = vmatpush3.msra.mxu0 %v2359_v19  ;;  %8462 = vmatprep.subr.mxu1 %v11680_v48 }
 0x938   :  { %8040 = vmatprep.subr.mxu0 %v2374_v20  ;;  %8463 = vmatpush3.msra.mxu1 %v2454_v11  ;;  %v2615_v11 = vld [vmem:[#allocation10 + $0x90] sm:$0xff] }
 0x939   :  { %8041 = vmatpush3.msra.mxu0 %v2358_v21  ;;  %8464 = vmatprep.subr.mxu1 %v11680_v48 }
 0x93a   :  { %8042 = vmatprep.subr.mxu0 %v2373_v9  ;;  %8465 = vmatpush3.msra.mxu1 %v2453_v6  ;;  %v2694_v6 = vld [vmem:[#allocation10 + $0xd0] sm:$0xff] }
 0x93b   :  { %8043 = vmatpush3.msra.mxu0 %v2357_v28  ;;  %8466 = vmatprep.subr.mxu1 %v11680_v48 }
 0x93c   :  { %8044 = vmatprep.subr.mxu0 %v2372_v57 }
 0x93d   :  { %8045 = vmatpush3.msra.mxu0 %v2356_v35 }
 0x93e   :  { %8046 = vmatprep.subr.mxu0 %v2371_v40 }
 0x93f   :  { %8047 = vmatpush3.msra.mxu0 %v2355_v7 }
 0x940   :  { %8048 = vmatprep.subr.mxu0 %v2370_v31 }
 0x941   :  { %8049 = vmatpush3.msra.mxu0 %v2354_v52 }
 0x942   :  { %8050 = vmatprep.subr.mxu0 %v2369_v22 }
 0x943   :  { %8051 = vmatpush3.msra.mxu0 %v2353_v0 }
 0x944   :  { %8052 = vmatprep.subr.mxu0 %v2368_v41 }
 0x945   :  { %8053 = vmatpush3.msra.mxu0 %v2352_v17 }
 0x946   :  { %8054 = vmatprep.subr.mxu0 %v2367_v50 }
 0x947   :  { %8055 = vmatpush3.msra.mxu0 %v2351_v63  ;;  %v2540_v63 = vld [vmem:[#allocation10 + $0x70] sm:$0xff] }
 0x948   :  { %8056 = vmatprep.subr.mxu0 %v2366_v59  ;;  %v2538_v59 = vld [vmem:[#allocation10 + $0x60] sm:$0xff] }
 0x949   :  { %8057 = vmatpush3.msra.mxu0 %v2350_v53  ;;  %v2537_v53 = vld [vmem:[#allocation10 + $0x58] sm:$0xff] }
 0x94a   :  { %8058 = vmatprep.subr.mxu0 %v2365_v4  ;;  %v2536_v4 = vld [vmem:[#allocation10 + $0x50] sm:$0xff] }
 0x94b   :  { %8059 = vmatpush3.msra.mxu0 %v2349_v1  ;;  %v2535_v1 = vld [vmem:[#allocation10 + $0x48] sm:$0xff] }
 0x94c   :  { %8473 = vmatprep.subr.mxu0 %v11680_v48 }
 0x9ea   :  { %v2249_v18 = vpop.f32.mrf.mxu0 }
 0x9eb   :  { %v2250_v30 = vadd.f32 %v2249_v18, %v2177_v42 }
 0x9ec   :  { %v2251_v51 = vpop.f32.mrf.mxu0  ;;  %v2320_v54 = vpop.f32.mrf.mxu1 }
 0x9ed   :  { %v2252_v58 = vadd.f32 %v2251_v51, %v2177_v42  ;;  %v10741_v56 = vadd.f32 %v2320_v54, %v2250_v30  ;;  %v2541_v54 = vld [vmem:[#allocation10 + $0x78] sm:$0xff] }
 0x9ee   :  { %v2322_v8 = vpop.f32.mrf.mxu1 }
 0x9ef   :  { %v10743_v26 = vadd.f32 %v2322_v8, %v2252_v58  ;;  %v2539_v58 = vld [vmem:[#allocation10 + $0x68] sm:$0xff] }
 0x9f0   :  { %v2452_v8 = vld [vmem:[#allocation10 + $0x8] sm:$0xff] }
 0x9f1   :  { %v9228_v3 = vpack.i.bf16 %v10743_v26, %v10741_v56  ;;  %8467 = vmatpush3.msra.mxu1 %v2452_v8  ;;  %v10907_v8 = vld [vmem:[#allocation10 + $0x220] sm:$0xff] }
 0x9f2   :  { %8468 = vmatprep.subr.mxu1 %v11680_v48 }
 0x9f3   :  { %9229 = vrot.lane.b32.xlu1 %v9228_v3, %s9599_s11  ;;  %9224 = vrot.lane.b32.xlu0 %v9228_v3, %s9597_s24 }
 0x9f7   :  { %3090 = vperm.xlu1 %9222, %v3087_v32   ;;  %9234 = vrot.lane.b32.xlu0 %v9228_v3, %s9598_s3 }
 0x9fb   :  { %5034 = vperm.xlu1 %9222, %v7946_v45   ;;  %4057 = vperm.xlu0 %9221, %v7917_v2   ;;  %v2620_v2 = vld [vmem:[#allocation10 + $0xb8] sm:$0xff] }
 0x9ff   :  { %6100 = vperm.xlu1 %9222, %v7968_v14   ;;  %5527 = vperm.xlu0 %9221, %v5524_v60   ;;  %v2699_v14 = vld [vmem:[#allocation10 + $0xf8] sm:$0xff]  ;;  %v2619_v60 = vld [vmem:[#allocation10 + $0xb0] sm:$0xff] }
 0xa03   :  { %7160 = vperm.xlu1 %9222, %v7991_v43   ;;  %6587 = vperm.xlu0 %9221, %v7982_v12   ;;  %v2698_v43 = vld [vmem:[#allocation10 + $0xf0] sm:$0xff]  ;;  %v2618_v12 = vld [vmem:[#allocation10 + $0xa8] sm:$0xff] }
 0xa07   :  { %7709 = vperm.xlu0 %9221, %v8005_v46   ;;  %v2696_v46 = vld [vmem:[#allocation10 + $0xe0] sm:$0xff] }
 0xa65   :  { %v9230_v36 = vpop.permute.xlu1 %9229  ;;  %v9225_v19 = vpop.permute.xlu0 %9224 }
 0xa66   :  { %v9227_v20 = vunpack.i.h.bf16 %v9225_v19  ;;  %v9226_v21 = vunpack.i.l.bf16 %v9225_v19  ;;  %v9232_v9 = vunpack.i.h.bf16 %v9230_v36  ;;  %v9231_v28 = vunpack.i.l.bf16 %v9230_v36  ;;  %v2614_v36 = vld [vmem:[#allocation10 + $0x88] sm:$0xff] }
 0xa67   :  { %v2693_v19 = vld [vmem:[#allocation10 + $0xc8] sm:$0xff] }
 0xa68   :  { %v2329_v35 = vsel %vm1958_vm3, %v9226_v21, %v9227_v20  ;;  %v2330_v40 = vsel %vm1958_vm3, %v9227_v20, %v9226_v21  ;;  %v2335_v52 = vsel %vm2066_vm9, %v9231_v28, %v9232_v9  ;;  %v2336_v22 = vsel %vm2066_vm9, %v9232_v9, %v9231_v28  ;;  %v2613_v20 = vld [vmem:[#allocation10 + $0x80] sm:$0xff]  ;;  %v10831_v9 = vld [vmem:[#allocation10 + $0x178] sm:$0xff] }
 0xa69   :  { %v9235_v57 = vpop.permute.xlu0 %9234  ;;  %v2343_v42 = vmax.f32 %v10741_v56, %v2329_v35  ;;  %v2344_v17 = vmax.f32 %v10743_v26, %v2330_v40  ;;  %v2451_v56 = vld [vmem:[#allocation10] sm:$0xff]  ;;  %v2857_v28 = vld [vmem:[#allocation10 + $0x1b8] sm:$0xff]  ;;  %v2856_v35 = vld [vmem:[#allocation10 + $0x1b0] sm:$0xff] }
 0xa6a   :  { %v9237_v7 = vunpack.i.h.bf16 %v9235_v57  ;;  %v9236_v31 = vunpack.i.l.bf16 %v9235_v57  ;;  %v2534_v26 = vld [vmem:[#allocation10 + $0x40] sm:$0xff]  ;;  %8469 = vmatpush3.msra.mxu1 %v2451_v56  ;;  %v10839_v57 = vld [vmem:[#allocation10 + $0x170] sm:$0xff]  ;;  %v10844_v40 = vld [vmem:[#allocation10 + $0x168] sm:$0xff] }
 0xa6b   :  { %8492 = vmatprep.subr.mxu1 %v11680_v48  ;;  %v2692_v21 = vld [vmem:[#allocation10 + $0xc0] sm:$0xff]  ;;  %v10915_v56 = vld [vmem:[#allocation10 + $0x218] sm:$0xff] }
 0xa6c   :  { %v2341_v0 = vsel %vm2120_vm8, %v9236_v31, %v9237_v7  ;;  %v2342_v41 = vsel %vm2120_vm8, %v9237_v7, %v9236_v31  ;;  %v2855_v7 = vld [vmem:[#allocation10 + $0x1a8] sm:$0xff]  ;;  %v10849_v31 = vld [vmem:[#allocation10 + $0x160] sm:$0xff] }
 0xa6d   :  { %v2345_v18 = vmax.f32 %v2335_v52, %v2341_v0  ;;  %v2346_v30 = vmax.f32 %v2336_v22, %v2342_v41  ;;  %v2854_v52 = vld [vmem:[#allocation10 + $0x1a0] sm:$0xff]  ;;  %v10854_v22 = vld [vmem:[#allocation10 + $0x158] sm:$0xff]  ;;  %v10859_v41 = vld [vmem:[#allocation10 + $0x150] sm:$0xff] }
 0xa6e   :  { %v2853_v0 = vld [vmem:[#allocation10 + $0x198] sm:$0xff] }
 0xa6f   :  { %v2348_v50 = vmax.f32 %v2344_v17, %v2346_v30  ;;  %v2347_v51 = vmax.f32 %v2343_v42, %v2345_v18  ;;  %v2852_v42 = vld [vmem:[#allocation10 + $0x190] sm:$0xff]  ;;  %v10864_v18 = vld [vmem:[#allocation10 + $0x148] sm:$0xff]  ;;  %v10869_v30 = vld [vmem:[#allocation10 + $0x140] sm:$0xff] }
 0xa70   :  { %v2851_v17 = vld [vmem:[#allocation10 + $0x188] sm:$0xff] }
 0xa71   :  { %2445 = vmatprep.mubr.f32.mxu0 %v2348_v50  ;;  %v2850_v50 = vld [vmem:[#allocation10 + $0x180] sm:$0xff] }
 0xa72   :  { %2446 = vmatmul.mubr.f32.vlgmr.msra.gmra.mxu0 %v2347_v51  ;;  %v10879_v51 = vld [vmem:[#allocation10 + $0x1f8] sm:$0xff] }
 0xa73   :  { %8474 = vmatpush3.msra.mxu0 %v2541_v54  ;;  %8489 = vmatprep.mubr.msk.f32.mxu0 %vm9591_vm0, %v11680_v48  ;;  %v10881_v54 = vld [vmem:[#allocation10 + $0x238] sm:$0xff] }
 0xa74   :  { %8475 = vmatprep.subr.mxu0 %v11680_v48 }
 0xa75   :  { %8476 = vmatpush3.msra.mxu0 %v2540_v63  ;;  %v10889_v63 = vld [vmem:[#allocation10 + $0x1f0] sm:$0xff] }
 0xa76   :  { %8477 = vmatprep.subr.mxu0 %v11680_v48 }
 0xa77   :  { %8478 = vmatpush3.msra.mxu0 %v2539_v58  ;;  %v10891_v58 = vld [vmem:[#allocation10 + $0x230] sm:$0xff] }
 0xa78   :  { %8479 = vmatprep.subr.mxu0 %v11680_v48 }
 0xa79   :  { %8480 = vmatpush3.msra.mxu0 %v2538_v59  ;;  %v10897_v59 = vld [vmem:[#allocation10 + $0x1e8] sm:$0xff] }
 0xa7a   :  { %8481 = vmatprep.subr.mxu0 %v11680_v48 }
 0xa7b   :  { %8482 = vmatpush3.msra.mxu0 %v2537_v53  ;;  %v10899_v53 = vld [vmem:[#allocation10 + $0x228] sm:$0xff] }
 0xa7c   :  { %8483 = vmatprep.subr.mxu0 %v11680_v48 }
 0xa7d   :  { %8484 = vmatpush3.msra.mxu0 %v2536_v4  ;;  %v10905_v4 = vld [vmem:[#allocation10 + $0x1e0] sm:$0xff] }
 0xa7e   :  { %8485 = vmatprep.subr.mxu0 %v11680_v48 }
 0xa7f   :  { %8486 = vmatpush3.msra.mxu0 %v2535_v1  ;;  %v10913_v1 = vld [vmem:[#allocation10 + $0x1d8] sm:$0xff] }
 0xa80   :  { %8487 = vmatprep.subr.mxu0 %v11680_v48 }
 0xa81   :  { %8488 = vmatpush3.msra.mxu0 %v2534_v26  ;;  %v10921_v26 = vld [vmem:[#allocation10 + $0x1d0] sm:$0xff] }
 0xa82   :  { %8511 = vmatprep.subr.mxu0 %v11680_v48 }
 0xb32   :  { %v8060_v3 = vpop.f32.mrf.mxu0 }
 0xb34   :  { %v8061_v32 = vpop.f32.mrf.mxu0 }
 0xb35   :  { %v10807_v45 = vadd.f32 %v8061_v32, %v8060_v3  ;;  %v10923_v3 = vld [vmem:[#allocation10 + $0x210] sm:$0xff]  ;;  %v10929_v32 = vld [vmem:[#allocation10 + $0x1c8] sm:$0xff] }
 0xb37   :  { %8471 = vmatmul.mubr.msk.f32.vlgmr.msra.gmra.mxu1 %vm2459_vm11, %v10807_v45  ;;  %8490 = vmatmul.mubr.msk.f32.vlgmr.msra.gmra.mxu0 %vm2459_vm11, %v10807_v45 }
 0xb38   :  { %8493 = vmatpush3.msra.mxu1 %v2620_v2  ;;  %8512 = vmatpush3.msra.mxu0 %v2699_v14  ;;  %v10931_v2 = vld [vmem:[#allocation10 + $0x208] sm:$0xff]  ;;  %v10937_v14 = vld [vmem:[#allocation10 + $0x1c0] sm:$0xff] }
 0xb39   :  { %8494 = vmatprep.subr.mxu1 %v11680_v48  ;;  %8513 = vmatprep.subr.mxu0 %v11680_v48 }
 0xb3a   :  { %8495 = vmatpush3.msra.mxu1 %v2619_v60  ;;  %8514 = vmatpush3.msra.mxu0 %v2698_v43  ;;  %v10941_v60 = vld [vmem:[#allocation10 + $0x200] sm:$0xff] }
 0xb3b   :  { %8496 = vmatprep.subr.mxu1 %v11680_v48  ;;  %8515 = vmatprep.subr.mxu0 %v11680_v48 }
 0xb3c   :  { %8497 = vmatpush3.msra.mxu1 %v2618_v12  ;;  %8516 = vmatpush3.msra.mxu0 %v2697_v47 }
 0xb3d   :  { %8498 = vmatprep.subr.mxu1 %v11680_v48  ;;  %8517 = vmatprep.subr.mxu0 %v11680_v48 }
 0xb3e   :  { %8499 = vmatpush3.msra.mxu1 %v2617_v10  ;;  %8518 = vmatpush3.msra.mxu0 %v2696_v46 }
 0xb3f   :  { %8500 = vmatprep.subr.mxu1 %v11680_v48  ;;  %8519 = vmatprep.subr.mxu0 %v11680_v48 }
 0xb40   :  { %8501 = vmatpush3.msra.mxu1 %v2616_v62  ;;  %8520 = vmatpush3.msra.mxu0 %v2695_v27 }
 0xb41   :  { %8502 = vmatprep.subr.mxu1 %v11680_v48  ;;  %8521 = vmatprep.subr.mxu0 %v11680_v48 }
 0xb42   :  { %8503 = vmatpush3.msra.mxu1 %v2615_v11  ;;  %8522 = vmatpush3.msra.mxu0 %v2694_v6 }
 0xb43   :  { %8504 = vmatprep.subr.mxu1 %v11680_v48  ;;  %8523 = vmatprep.subr.mxu0 %v11680_v48 }
 0xb44   :  { %8505 = vmatpush3.msra.mxu1 %v2614_v36  ;;  %8524 = vmatpush3.msra.mxu0 %v2693_v19 }
 0xb45   :  { %8506 = vmatprep.subr.mxu1 %v11680_v48  ;;  %8525 = vmatprep.subr.mxu0 %v11680_v48 }
 0xb46   :  { %8507 = vmatpush3.msra.mxu1 %v2613_v20  ;;  %8508 = vmatprep.mubr.msk.f32.mxu1 %vm9591_vm0, %v11680_v48 }
 0xb47   :  { %8526 = vmatpush3.msra.mxu0 %v2692_v21  ;;  %8527 = vmatprep.mubr.msk.f32.mxu0 %vm9591_vm0, %v11680_v48 }
 0xb48   :  { %8509 = vmatmul.mubr.msk.f32.vlgmr.msra.gmra.mxu1 %vm2459_vm11, %v10807_v45  ;;  %8528 = vmatmul.mubr.msk.f32.vlgmr.msra.gmra.mxu0 %vm2459_vm11, %v10807_v45 }
 0xb49   :  { %8530 = vmatprep.subr.mxu1 %v11680_v48  ;;  %8549 = vmatprep.subr.mxu0 %v11680_v48 }
 0xb4a   :  { %8531 = vmatpush3.msra.mxu1 %v10831_v9  ;;  %8550 = vmatpush3.msra.mxu0 %v2857_v28 }
 0xb4b   :  { %8532 = vmatprep.subr.mxu1 %v11680_v48  ;;  %8551 = vmatprep.subr.mxu0 %v11680_v48 }
 0xb4c   :  { %8533 = vmatpush3.msra.mxu1 %v10839_v57  ;;  %8552 = vmatpush3.msra.mxu0 %v2856_v35  ;;  %v3086_v35 = vld [vmem:[#allocation19] sm:$0xff] }
 0xb4d   :  { %8534 = vmatprep.subr.mxu1 %v11680_v48  ;;  %8553 = vmatprep.subr.mxu0 %v11680_v48 }
 0xb4e   :  { %8535 = vmatpush3.msra.mxu1 %v10844_v40  ;;  %8554 = vmatpush3.msra.mxu0 %v2855_v7 }
 0xb4f   :  { %8536 = vmatprep.subr.mxu1 %v11680_v48  ;;  %8555 = vmatprep.subr.mxu0 %v11680_v48 }
 0xb50   :  { %8537 = vmatpush3.msra.mxu1 %v10849_v31  ;;  %8556 = vmatpush3.msra.mxu0 %v2854_v52  ;;  %v3390_v52 = vld [vmem:[%s11634_s8 + $0x38] sm:$0xff] }
 0xb51   :  { %8538 = vmatprep.subr.mxu1 %v11680_v48  ;;  %8557 = vmatprep.subr.mxu0 %v11680_v48 }
 0xb52   :  { %8539 = vmatpush3.msra.mxu1 %v10854_v22  ;;  %8558 = vmatpush3.msra.mxu0 %v2853_v0  ;;  %v3388_v0 = vld [vmem:[%s11634_s8 + $0x28] sm:$0xff] }
 0xb53   :  { %8540 = vmatprep.subr.mxu1 %v11680_v48  ;;  %8559 = vmatprep.subr.mxu0 %v11680_v48 }
 0xb54   :  { %8541 = vmatpush3.msra.mxu1 %v10859_v41  ;;  %8560 = vmatpush3.msra.mxu0 %v2852_v42  ;;  %v3386_v42 = vld [vmem:[%s11634_s8 + $0x18] sm:$0xff] }
 0xb55   :  { %8542 = vmatprep.subr.mxu1 %v11680_v48  ;;  %8561 = vmatprep.subr.mxu0 %v11680_v48 }
 0xb56   :  { %8543 = vmatpush3.msra.mxu1 %v10864_v18  ;;  %8562 = vmatpush3.msra.mxu0 %v2851_v17  ;;  %v3384_v17 = vld [vmem:[%s11634_s8 + $0x8] sm:$0xff] }
 0xb57   :  { %8544 = vmatprep.subr.mxu1 %v11680_v48  ;;  %8563 = vmatprep.subr.mxu0 %v11680_v48 }
 0xb58   :  { %8545 = vmatpush3.msra.mxu1 %v10869_v30  ;;  %8546 = vmatprep.mubr.msk.f32.mxu1 %vm9591_vm0, %v11680_v48 }
 0xb59   :  { %8564 = vmatpush3.msra.mxu0 %v2850_v50  ;;  %8565 = vmatprep.mubr.msk.f32.mxu0 %vm9591_vm0, %v11680_v48  ;;  %v11063_v50 = vld [vmem:[#allocation11 + $0x8] sm:$0xff] }
 0xb5a   :  { %8547 = vmatmul.mubr.msk.f32.vlgmr.msra.gmra.mxu1 %vm2459_vm11, %v10807_v45  ;;  %8566 = vmatmul.mubr.msk.f32.vlgmr.msra.gmra.mxu0 %vm2459_vm11, %v10807_v45 }
 0xb5b   :  { %8568 = vmatprep.subr.mxu1 %v11680_v48  ;;  %8587 = vmatprep.subr.mxu0 %v11680_v48 }
 0xb5c   :  { %8569 = vmatpush3.msra.mxu1 %v10879_v51  ;;  %8588 = vmatpush3.msra.mxu0 %v10881_v54 }
 0xb5d   :  { %8570 = vmatprep.subr.mxu1 %v11680_v48  ;;  %8589 = vmatprep.subr.mxu0 %v11680_v48 }
 0xb5e   :  { %8571 = vmatpush3.msra.mxu1 %v10889_v63  ;;  %8590 = vmatpush3.msra.mxu0 %v10891_v58 }
 0xb5f   :  { %8572 = vmatprep.subr.mxu1 %v11680_v48  ;;  %8591 = vmatprep.subr.mxu0 %v11680_v48 }
 0xb60   :  { %8573 = vmatpush3.msra.mxu1 %v10897_v59  ;;  %8592 = vmatpush3.msra.mxu0 %v10899_v53 }
 0xb61   :  { %8574 = vmatprep.subr.mxu1 %v11680_v48  ;;  %8593 = vmatprep.subr.mxu0 %v11680_v48 }
 0xb62   :  { %8575 = vmatpush3.msra.mxu1 %v10905_v4  ;;  %8594 = vmatpush3.msra.mxu0 %v10907_v8 }
 0xb63   :  { %8576 = vmatprep.subr.mxu1 %v11680_v48  ;;  %8595 = vmatprep.subr.mxu0 %v11680_v48 }
 0xb64   :  { %8577 = vmatpush3.msra.mxu1 %v10913_v1  ;;  %8596 = vmatpush3.msra.mxu0 %v10915_v56 }
 0xb65   :  { %8578 = vmatprep.subr.mxu1 %v11680_v48  ;;  %8597 = vmatprep.subr.mxu0 %v11680_v48 }
 0xb66   :  { %8579 = vmatpush3.msra.mxu1 %v10921_v26  ;;  %8598 = vmatpush3.msra.mxu0 %v10923_v3 }
 0xb67   :  { %8580 = vmatprep.subr.mxu1 %v11680_v48  ;;  %8599 = vmatprep.subr.mxu0 %v11680_v48 }
 0xb68   :  { %8581 = vmatpush3.msra.mxu1 %v10929_v32  ;;  %8600 = vmatpush3.msra.mxu0 %v10931_v2 }
 0xb69   :  { %8582 = vmatprep.subr.mxu1 %v11680_v48  ;;  %8601 = vmatprep.subr.mxu0 %v11680_v48 }
 0xb6a   :  { %8583 = vmatpush3.msra.mxu1 %v10937_v14  ;;  %8584 = vmatprep.mubr.msk.f32.mxu1 %vm9591_vm0, %v11680_v48 }
 0xb6b   :  { %8602 = vmatpush3.msra.mxu0 %v10941_v60  ;;  %8603 = vmatprep.mubr.msk.f32.mxu0 %vm9591_vm0, %v11680_v48 }
 0xb6c   :  { %8585 = vmatmul.mubr.msk.f32.vlgmr.msra.gmra.mxu1 %vm2459_vm11, %v10807_v45  ;;  %8604 = vmatmul.mubr.msk.f32.vlgmr.msra.gmra.mxu0 %vm2459_vm11, %v10807_v45 }
 0xb6d   :  { %8606 = vmatprep.subr.mxu1 %v11680_v48  ;;  %8624 = vmatprep.mubr.msk.f32.mxu1 %vm9591_vm0, %v11680_v48 }
 0xb6e   :  { %8627 = vmatprep.subr.mxu0 %v11680_v48  ;;  %8643 = vmatprep.mubr.msk.f32.mxu0 %vm9591_vm0, %v11680_v48 }
 0xb6f   :  { %8628 = vmatpush3.msra.mxu0 %v10831_v9 }
 0xb70   :  { %8629 = vmatprep.subr.mxu0 %v11680_v48 }
 0xb71   :  { %8630 = vmatpush3.msra.mxu0 %v10839_v57 }
 0xb72   :  { %8631 = vmatprep.subr.mxu0 %v11680_v48 }
 0xb73   :  { %8632 = vmatpush3.msra.mxu0 %v10844_v40 }
 0xb74   :  { %8633 = vmatprep.subr.mxu0 %v11680_v48 }
 0xb75   :  { %8634 = vmatpush3.msra.mxu0 %v10849_v31 }
 0xb76   :  { %8635 = vmatprep.subr.mxu0 %v11680_v48 }
 0xb77   :  { %8636 = vmatpush3.msra.mxu0 %v10854_v22  ;;  %v3389_v22 = vld [vmem:[%s11634_s8 + $0x30] sm:$0xff] }
 0xb78   :  { %8637 = vmatprep.subr.mxu0 %v11680_v48 }
 0xb79   :  { %8638 = vmatpush3.msra.mxu0 %v10859_v41  ;;  %v3387_v41 = vld [vmem:[%s11634_s8 + $0x20] sm:$0xff] }
 0xb7a   :  { %8639 = vmatprep.subr.mxu0 %v11680_v48 }
 0xb7b   :  { %8640 = vmatpush3.msra.mxu0 %v10864_v18  ;;  %v3385_v18 = vld [vmem:[%s11634_s8 + $0x10] sm:$0xff] }
 0xb7c   :  { %8641 = vmatprep.subr.mxu0 %v11680_v48 }
 0xb7d   :  { %8642 = vmatpush3.msra.mxu0 %v10869_v30  ;;  %v3383_v30 = vld [vmem:[%s11634_s8] sm:$0xff] }
 0xb7e   :  { %8665 = vmatprep.subr.mxu0 %v11680_v48 }
 0xbf7   :  { %v2529_v43 = vpop.f32.mrf.mxu1  ;;  %v2608_v12 = vpop.f32.mrf.mxu0 }
 0xbf9   :  { %v8472_v47 = vpop.f32.mrf.mxu1  ;;  %v8491_v10 = vpop.f32.mrf.mxu0 }
 0xbfa   :  { %v11106_v47 = vld [vmem:[#allocation11 + $0x58] sm:$0xff]  ;;  %v11108_v10 = vld [vmem:[#allocation11 + $0x68] sm:$0xff] }
 0xc08   :  { %v2687_v46 = vpop.f32.mrf.mxu1  ;;  %v2766_v62 = vpop.f32.mrf.mxu0 }
 0xc0a   :  { %v8510_v27 = vpop.f32.mrf.mxu1  ;;  %v8529_v11 = vpop.f32.mrf.mxu0 }
 0xc0b   :  { %v11130_v27 = vld [vmem:[#allocation11 + $0x78] sm:$0xff]  ;;  %v11132_v11 = vld [vmem:[#allocation11 + $0x88] sm:$0xff] }
 0xc1a   :  { %v2845_v6 = vpop.f32.mrf.mxu1  ;;  %v2924_v36 = vpop.f32.mrf.mxu0 }
 0xc1c   :  { %v8548_v19 = vpop.f32.mrf.mxu1  ;;  %v8567_v20 = vpop.f32.mrf.mxu0 }
 0xc2c   :  { %v3003_v21 = vpop.f32.mrf.mxu1  ;;  %v3082_v9 = vpop.f32.mrf.mxu0 }
 0xc2d   :  { %8607 = vmatpush3.msra.mxu1 %v3082_v9 }
 0xc2e   :  { %v8586_v28 = vpop.f32.mrf.mxu1  ;;  %v8605_v57 = vpop.f32.mrf.mxu0  ;;  %8608 = vmatprep.subr.mxu1 %v11680_v48 }
 0xc2f   :  { %8609 = vmatpush3.msra.mxu1 %v3003_v21 }
 0xc30   :  { %8610 = vmatprep.subr.mxu1 %v11680_v48 }
 0xc31   :  { %8611 = vmatpush3.msra.mxu1 %v2924_v36  ;;  %v11144_v36 = vld [vmem:[#allocation11 + $0x80] sm:$0xff] }
 0xc32   :  { %8612 = vmatprep.subr.mxu1 %v11680_v48 }
 0xc33   :  { %8613 = vmatpush3.msra.mxu1 %v2845_v6  ;;  %v11140_v6 = vld [vmem:[#allocation11 + $0x70] sm:$0xff] }
 0xc34   :  { %8614 = vmatprep.subr.mxu1 %v11680_v48 }
 0xc35   :  { %8615 = vmatpush3.msra.mxu1 %v10807_v45  ;;  %v3091_v45 = vpop.permute.xlu1 %3090 }
 0xc36   :  { %8616 = vmatprep.subr.mxu1 %v11680_v48 }
 0xc37   :  { %8617 = vmatpush3.msra.mxu1 %v2766_v62  ;;  %v11120_v62 = vld [vmem:[#allocation11 + $0x60] sm:$0xff] }
 0xc38   :  { %8618 = vmatprep.subr.mxu1 %v11680_v48 }
 0xc39   :  { %8619 = vmatpush3.msra.mxu1 %v2687_v46  ;;  %v11116_v46 = vld [vmem:[#allocation11 + $0x50] sm:$0xff] }
 0xc3a   :  { %8620 = vmatprep.subr.mxu1 %v11680_v48 }
 0xc3b   :  { %8621 = vmatpush3.msra.mxu1 %v2608_v12  ;;  %v11096_v12 = vld [vmem:[#allocation11 + $0x30] sm:$0xff] }
 0xc3c   :  { %8622 = vmatprep.subr.mxu1 %v11680_v48 }
 0xc3d   :  { %8623 = vmatpush3.msra.mxu1 %v2529_v43 }
 0xc3e   :  { %8625 = vmatmul.mubr.msk.f32.vlgmr.msra.gmra.mxu1 %vm3093_vm12, %v3086_v35  ;;  %8646 = vmatprep.subr.mxu1 %v11680_v48 }
 0xc3f   :  { %8647 = vmatpush3.msra.mxu1 %v10879_v51  ;;  %8662 = vmatprep.mubr.msk.f32.mxu1 %vm9591_vm0, %v11680_v48 }
 0xc40   :  { %8648 = vmatprep.subr.mxu1 %v11680_v48 }
 0xc41   :  { %8649 = vmatpush3.msra.mxu1 %v10889_v63 }
 0xc42   :  { %8650 = vmatprep.subr.mxu1 %v11680_v48 }
 0xc43   :  { %8651 = vmatpush3.msra.mxu1 %v10897_v59 }
 0xc44   :  { %8652 = vmatprep.subr.mxu1 %v11680_v48 }
 0xc45   :  { %8653 = vmatpush3.msra.mxu1 %v10905_v4 }
 0xc46   :  { %8654 = vmatprep.subr.mxu1 %v11680_v48 }
 0xc47   :  { %8655 = vmatpush3.msra.mxu1 %v10913_v1 }
 0xc48   :  { %8656 = vmatprep.subr.mxu1 %v11680_v48 }
 0xc49   :  { %8657 = vmatpush3.msra.mxu1 %v10921_v26  ;;  %v11074_v26 = vld [vmem:[#allocation11] sm:$0xff] }
 0xc4a   :  { %8658 = vmatprep.subr.mxu1 %v11680_v48 }
 0xc4b   :  { %8659 = vmatpush3.msra.mxu1 %v10929_v32  ;;  %v11082_v32 = vld [vmem:[#allocation11 + $0x28] sm:$0xff] }
 0xc4c   :  { %8660 = vmatprep.subr.mxu1 %v11680_v48 }
 0xc4d   :  { %8661 = vmatpush3.msra.mxu1 %v10937_v14 }
 0xc4e   :  { %8684 = vmatprep.subr.mxu1 %v11680_v48 }
 0xcfe   :  { %v3163_v40 = vpop.f32.mrf.mxu1 }
 0xcff   :  { %v3164_v7 = vadd.f32 %v3163_v40, %v3091_v45 }
 0xd00   :  { %v8626_v31 = vpop.f32.mrf.mxu1 }
 0xd01   :  { %8644 = vmatmul.mubr.msk.f32.vlgmr.msra.gmra.mxu0 %vm2459_vm11, %v3164_v7  ;;  %8663 = vmatmul.mubr.msk.f32.vlgmr.msra.gmra.mxu1 %vm2459_vm11, %v3164_v7 }
 0xd02   :  { %8666 = vmatpush3.msra.mxu0 %v10881_v54  ;;  %8681 = vmatprep.mubr.msk.f32.mxu0 %vm9591_vm0, %v11680_v48 }
 0xd03   :  { %8667 = vmatprep.subr.mxu0 %v11680_v48  ;;  %8700 = vmatprep.mubr.msk.f32.mxu1 %vm9591_vm0, %v11680_v48 }
 0xd04   :  { %8668 = vmatpush3.msra.mxu0 %v10891_v58  ;;  %8685 = vmatpush3.msra.mxu1 %v3390_v52 }
 0xd05   :  { %8669 = vmatprep.subr.mxu0 %v11680_v48  ;;  %8686 = vmatprep.subr.mxu1 %v11680_v48 }
 0xd06   :  { %8670 = vmatpush3.msra.mxu0 %v10899_v53  ;;  %8687 = vmatpush3.msra.mxu1 %v3389_v22 }
 0xd07   :  { %8671 = vmatprep.subr.mxu0 %v11680_v48  ;;  %8688 = vmatprep.subr.mxu1 %v11680_v48 }
 0xd08   :  { %8672 = vmatpush3.msra.mxu0 %v10907_v8  ;;  %8689 = vmatpush3.msra.mxu1 %v3388_v0 }
 0xd09   :  { %8673 = vmatprep.subr.mxu0 %v11680_v48  ;;  %8690 = vmatprep.subr.mxu1 %v11680_v48 }
 0xd0a   :  { %8674 = vmatpush3.msra.mxu0 %v10915_v56  ;;  %8691 = vmatpush3.msra.mxu1 %v3387_v41  ;;  %v11067_v56 = vld [vmem:[#allocation11 + $0x18] sm:$0xff] }
 0xd0b   :  { %8675 = vmatprep.subr.mxu0 %v11680_v48  ;;  %8692 = vmatprep.subr.mxu1 %v11680_v48 }
 0xd0c   :  { %8676 = vmatpush3.msra.mxu0 %v10923_v3  ;;  %8693 = vmatpush3.msra.mxu1 %v3386_v42  ;;  %v11076_v3 = vld [vmem:[#allocation11 + $0x10] sm:$0xff] }
 0xd0d   :  { %8677 = vmatprep.subr.mxu0 %v11680_v48  ;;  %8694 = vmatprep.subr.mxu1 %v11680_v48 }
 0xd0e   :  { %8678 = vmatpush3.msra.mxu0 %v10931_v2  ;;  %8695 = vmatpush3.msra.mxu1 %v3385_v18  ;;  %v11084_v2 = vld [vmem:[#allocation11 + $0x38] sm:$0xff]  ;;  %v4052_v18 = vld [vmem:[#allocation19 + $0x8] sm:$0xff] }
 0xd0f   :  { %8679 = vmatprep.subr.mxu0 %v11680_v48  ;;  %8696 = vmatprep.subr.mxu1 %v11680_v48 }
 0xd10   :  { %8680 = vmatpush3.msra.mxu0 %v10941_v60  ;;  %8697 = vmatpush3.msra.mxu1 %v3384_v17  ;;  %v11092_v60 = vld [vmem:[#allocation11 + $0x20] sm:$0xff]  ;;  %v4058_v17 = vpop.permute.xlu0 %4057 }
 0xd11   :  { %8682 = vmatmul.mubr.msk.f32.vlgmr.msra.gmra.mxu0 %vm2459_vm11, %v3164_v7  ;;  %8703 = vmatprep.subr.mxu0 %v11680_v48 }
 0xd12   :  { %8707 = vmatprep.mubr.msk.f32.mxu0 %vm9591_vm0, %v11680_v48  ;;  %8698 = vmatprep.subr.mxu1 %v11680_v48 }
 0xd13   :  { %8699 = vmatpush3.msra.mxu1 %v3383_v30  ;;  %8704 = vmatpush3.msra.mxu0 %v11063_v50 }
 0xd14   :  { %8710 = vmatprep.subr.mxu1 %v11680_v48  ;;  %8705 = vmatprep.subr.mxu0 %v11680_v48 }
 0xd15   :  { %8706 = vmatpush3.msra.mxu0 %v11074_v26 }
 0xd16   :  { %8717 = vmatprep.subr.mxu0 %v11680_v48 }
 0xdc1   :  { %v3236_v51 = vpop.f32.mrf.mxu0  ;;  %v3307_v54 = vpop.f32.mrf.mxu1 }
 0xdc2   :  { %v3240_v53 = vmax.f32 %v3164_v7, %v3236_v51 }
 0xdc3   :  { %v8645_v63 = vpop.f32.mrf.mxu0  ;;  %v8664_v58 = vpop.f32.mrf.mxu1 }
 0xdc4   :  { %v4350_v63 = vld [vmem:[%s11635_s9 + $0x8] sm:$0xff]  ;;  %v4349_v58 = vld [vmem:[%s11635_s9] sm:$0xff] }
 0xdd1   :  { %v3377_v59 = vpop.f32.mrf.mxu0 }
 0xdd2   :  { %v3381_v4 = vmax.f32 %v3307_v54, %v3377_v59 }
 0xdd3   :  { %v8683_v8 = vpop.f32.mrf.mxu0 }
 0xdd4   :  { %v3382_v1 = vmax.f32 %v3240_v53, %v3381_v4 }
 0xdd6   :  { %8701 = vmatmul.mubr.msk.f32.vlgmr.msra.gmra.mxu1 %vm2459_vm11, %v3382_v1 }
 0xdd7   :  { %8711 = vmatpush3.msra.mxu1 %v11067_v56  ;;  %8714 = vmatprep.mubr.msk.f32.mxu1 %vm9591_vm0, %v11680_v48 }
 0xdd8   :  { %8712 = vmatprep.subr.mxu1 %v11680_v48 }
 0xdd9   :  { %8713 = vmatpush3.msra.mxu1 %v11076_v3 }
 0xdda   :  { %8724 = vmatprep.subr.mxu1 %v11680_v48 }
 0xe96   :  { %v11086_v14 = vpop.f32.mrf.mxu1 }
 0xe97   :  { %8708 = vmatmul.mubr.msk.f32.vlgmr.msra.gmra.mxu0 %vm3466_vm13, %v11086_v14  ;;  %8715 = vmatmul.mubr.msk.f32.vlgmr.msra.gmra.mxu1 %vm3466_vm13, %v11086_v14 }
 0xe98   :  { %v8702_v43 = vpop.f32.mrf.mxu1  ;;  %8718 = vmatpush3.msra.mxu0 %v11082_v32  ;;  %8725 = vmatpush3.msra.mxu1 %v11084_v2 }
 0xe99   :  { %8719 = vmatprep.subr.mxu0 %v11680_v48  ;;  %8726 = vmatprep.subr.mxu1 %v11680_v48 }
 0xe9a   :  { %8720 = vmatpush3.msra.mxu0 %v11092_v60  ;;  %8721 = vmatprep.mubr.msk.f32.mxu0 %vm9591_vm0, %v11680_v48 }
 0xe9b   :  { %8727 = vmatpush3.msra.mxu1 %v11096_v12  ;;  %8728 = vmatprep.mubr.msk.f32.mxu1 %vm9591_vm0, %v11680_v48 }
 0xe9c   :  { %8722 = vmatmul.mubr.msk.f32.vlgmr.msra.gmra.mxu0 %vm3466_vm13, %v11086_v14  ;;  %8729 = vmatmul.mubr.msk.f32.vlgmr.msra.gmra.mxu1 %vm3466_vm13, %v11086_v14 }
 0xe9d   :  { %8731 = vmatprep.subr.mxu0 %v11680_v48  ;;  %8738 = vmatprep.subr.mxu1 %v11680_v48 }
 0xe9e   :  { %8732 = vmatpush3.msra.mxu0 %v11106_v47  ;;  %8739 = vmatpush3.msra.mxu1 %v11108_v10 }
 0xe9f   :  { %8733 = vmatprep.subr.mxu0 %v11680_v48  ;;  %8740 = vmatprep.subr.mxu1 %v11680_v48 }
 0xea0   :  { %8734 = vmatpush3.msra.mxu0 %v11116_v46  ;;  %8735 = vmatprep.mubr.msk.f32.mxu0 %vm9591_vm0, %v11680_v48 }
 0xea1   :  { %8741 = vmatpush3.msra.mxu1 %v11120_v62  ;;  %8742 = vmatprep.mubr.msk.f32.mxu1 %vm9591_vm0, %v11680_v48 }
 0xea2   :  { %8736 = vmatmul.mubr.msk.f32.vlgmr.msra.gmra.mxu0 %vm3466_vm13, %v11086_v14  ;;  %8743 = vmatmul.mubr.msk.f32.vlgmr.msra.gmra.mxu1 %vm3466_vm13, %v11086_v14 }
 0xea3   :  { %8745 = vmatprep.subr.mxu0 %v11680_v48  ;;  %8752 = vmatprep.subr.mxu1 %v11680_v48 }
 0xea4   :  { %8746 = vmatpush3.msra.mxu0 %v11130_v27  ;;  %8753 = vmatpush3.msra.mxu1 %v11132_v11 }
 0xea5   :  { %8747 = vmatprep.subr.mxu0 %v11680_v48  ;;  %8754 = vmatprep.subr.mxu1 %v11680_v48 }
 0xea6   :  { %8748 = vmatpush3.msra.mxu0 %v11140_v6  ;;  %8749 = vmatprep.mubr.msk.f32.mxu0 %vm9591_vm0, %v11680_v48 }
 0xea7   :  { %8755 = vmatpush3.msra.mxu1 %v11144_v36  ;;  %8756 = vmatprep.mubr.msk.f32.mxu1 %vm9591_vm0, %v11680_v48 }
 0xea8   :  { %8750 = vmatmul.mubr.msk.f32.vlgmr.msra.gmra.mxu0 %vm3466_vm13, %v11086_v14  ;;  %8757 = vmatmul.mubr.msk.f32.vlgmr.msra.gmra.mxu1 %vm3466_vm13, %v11086_v14 }
 0xea9   :  { %8759 = vmatprep.subr.mxu0 %v11680_v48  ;;  %8777 = vmatprep.mubr.msk.f32.mxu0 %vm9591_vm0, %v11680_v48 }
 0xeaa   :  { %8780 = vmatprep.subr.mxu1 %v11680_v48  ;;  %8784 = vmatprep.mubr.msk.f32.mxu1 %vm9591_vm0, %v11680_v48 }
 0xeab   :  { %8781 = vmatpush3.msra.mxu1 %v11106_v47 }
 0xeac   :  { %8782 = vmatprep.subr.mxu1 %v11680_v48 }
 0xead   :  { %8783 = vmatpush3.msra.mxu1 %v11116_v46 }
 0xeae   :  { %8787 = vmatprep.subr.mxu1 %v11680_v48 }
 0xf57   :  { %v3536_v19 = vpop.f32.mrf.mxu0  ;;  %v3609_v20 = vpop.f32.mrf.mxu1 }
 0xf59   :  { %v8709_v21 = vpop.f32.mrf.mxu0  ;;  %v8716_v9 = vpop.f32.mrf.mxu1 }
 0xf5a   :  { %v4424_v21 = vld [vmem:[%s11632_s6] sm:$0xf]  ;;  %v7925_v9 = vld [vmem:[%s11632_s6 + $0x4] sm:$0xf] }
 0xf5c   :  { %v3682_v28 = vpop.f32.mrf.mxu0  ;;  %v3755_v57 = vpop.f32.mrf.mxu1 }
 0xf5e   :  { %v8723_v35 = vpop.f32.mrf.mxu0  ;;  %v8730_v45 = vpop.f32.mrf.mxu1 }
 0xf5f   :  { %v7931_v35 = vld [vmem:[%s11632_s6 + $0xc] sm:$0xf] }
 0xf62   :  { %v3828_v40 = vpop.f32.mrf.mxu0  ;;  %v3901_v7 = vpop.f32.mrf.mxu1 }
 0xf64   :  { %v8737_v31 = vpop.f32.mrf.mxu0  ;;  %v8744_v52 = vpop.f32.mrf.mxu1 }
 0xf65   :  { %v7940_v31 = vld [vmem:[%s11632_s6 + $0x1c] sm:$0xf]  ;;  %v7943_v52 = vld [vmem:[%s11632_s6 + $0x20] sm:$0xf] }
 0xf68   :  { %v3974_v22 = vpop.f32.mrf.mxu0  ;;  %v4047_v0 = vpop.f32.mrf.mxu1 }
 0xf69   :  { %8760 = vmatpush3.msra.mxu0 %v4047_v0 }
 0xf6a   :  { %v8751_v41 = vpop.f32.mrf.mxu0  ;;  %v8758_v42 = vpop.f32.mrf.mxu1  ;;  %8761 = vmatprep.subr.mxu0 %v11680_v48 }
 0xf6b   :  { %8762 = vmatpush3.msra.mxu0 %v3974_v22 }
 0xf6c   :  { %8763 = vmatprep.subr.mxu0 %v11680_v48 }
 0xf6d   :  { %8764 = vmatpush3.msra.mxu0 %v3901_v7  ;;  %v7937_v7 = vld [vmem:[%s11632_s6 + $0x18] sm:$0xf] }
 0xf6e   :  { %8765 = vmatprep.subr.mxu0 %v11680_v48 }
 0xf6f   :  { %8766 = vmatpush3.msra.mxu0 %v3828_v40  ;;  %v7934_v40 = vld [vmem:[%s11632_s6 + $0x14] sm:$0xf] }
 0xf70   :  { %8767 = vmatprep.subr.mxu0 %v11680_v48 }
 0xf71   :  { %8768 = vmatpush3.msra.mxu0 %v11086_v14 }
 0xf72   :  { %8769 = vmatprep.subr.mxu0 %v11680_v48 }
 0xf73   :  { %8770 = vmatpush3.msra.mxu0 %v3755_v57 }
 0xf74   :  { %8771 = vmatprep.subr.mxu0 %v11680_v48 }
 0xf75   :  { %8772 = vmatpush3.msra.mxu0 %v3682_v28  ;;  %v7928_v28 = vld [vmem:[%s11632_s6 + $0x8] sm:$0xf] }
 0xf76   :  { %8773 = vmatprep.subr.mxu0 %v11680_v48 }
 0xf77   :  { %8774 = vmatpush3.msra.mxu0 %v3609_v20 }
 0xf78   :  { %8775 = vmatprep.subr.mxu0 %v11680_v48 }
 0xf79   :  { %8776 = vmatpush3.msra.mxu0 %v3536_v19 }
 0xf7a   :  { %8778 = vmatmul.mubr.msk.f32.vlgmr.msra.gmra.mxu0 %vm3093_vm12, %v4052_v18  ;;  %8808 = vmatprep.subr.mxu0 %v11680_v48 }
 0xf7b   :  { %8810 = vmatprep.mubr.msk.f32.mxu0 %vm9591_vm0, %v11680_v48  ;;  %8809 = vmatpush3.msk.msra.mxu0 %vm4429_vm14, %v4424_v21 }
 0xf7c   :  { %8818 = vmatprep.subr.mxu0 %v11680_v48 }
0x103a   :  { %v4129_v30 = vpop.f32.mrf.mxu0 }
0x103b   :  { %v4130_v51 = vadd.f32 %v4129_v30, %v4058_v17 }
0x103c   :  { %v8779_v54 = vpop.f32.mrf.mxu0 }
0x103d   :  { %8785 = vmatmul.mubr.msk.f32.vlgmr.msra.gmra.mxu1 %vm3466_vm13, %v4130_v51 }
0x103e   :  { %8788 = vmatpush3.msra.mxu1 %v11130_v27  ;;  %8791 = vmatprep.mubr.msk.f32.mxu1 %vm9591_vm0, %v11680_v48 }
0x103f   :  { %8789 = vmatprep.subr.mxu1 %v11680_v48 }
0x1040   :  { %8790 = vmatpush3.msra.mxu1 %v11140_v6 }
0x1041   :  { %8792 = vmatmul.mubr.msk.f32.vlgmr.msra.gmra.mxu1 %vm3466_vm13, %v4130_v51  ;;  %8794 = vmatprep.subr.mxu1 %v11680_v48 }
0x1042   :  { %8795 = vmatpush3.msra.mxu1 %v11132_v11  ;;  %8798 = vmatprep.mubr.msk.f32.mxu1 %vm9591_vm0, %v11680_v48 }
0x1043   :  { %8796 = vmatprep.subr.mxu1 %v11680_v48 }
0x1044   :  { %8797 = vmatpush3.msra.mxu1 %v11144_v36 }
0x1045   :  { %8799 = vmatmul.mubr.msk.f32.vlgmr.msra.gmra.mxu1 %vm3466_vm13, %v4130_v51  ;;  %8801 = vmatprep.subr.mxu1 %v11680_v48 }
0x1046   :  { %8805 = vmatprep.mubr.msk.f32.mxu1 %vm9591_vm0, %v11680_v48  ;;  %8802 = vmatpush3.msra.mxu1 %v4350_v63 }
0x1047   :  { %8803 = vmatprep.subr.mxu1 %v11680_v48 }
0x1048   :  { %8804 = vmatpush3.msra.mxu1 %v4349_v58 }
0x1049   :  { %8813 = vmatprep.subr.mxu1 %v11680_v48 }
0x10fd   :  { %v4202_v59 = vpop.f32.mrf.mxu1 }
0x10fe   :  { %v4206_v14 = vmax.f32 %v4130_v51, %v4202_v59 }
0x10ff   :  { %v8786_v53 = vpop.f32.mrf.mxu1 }
0x1101   :  { %v4273_v4 = vpop.f32.mrf.mxu1 }
0x1103   :  { %v8793_v8 = vpop.f32.mrf.mxu1 }
0x1105   :  { %v4343_v1 = vpop.f32.mrf.mxu1 }
0x1106   :  { %v4347_v43 = vmax.f32 %v4273_v4, %v4343_v1 }
0x1107   :  { %v8800_v19 = vpop.f32.mrf.mxu1 }
0x1108   :  { %v4348_v20 = vmax.f32 %v4206_v14, %v4347_v43  ;;  %v5029_v14 = vld [vmem:[#allocation19 + $0x10] sm:$0xff]  ;;  %v5110_v43 = vld [vmem:[%s11643_s17] sm:$0xff]  ;;  %v5035_v19 = vpop.permute.xlu1 %5034 }
0x110a   :  { %8806 = vmatmul.mubr.msk.f32.vlgmr.msra.gmra.mxu1 %vm3466_vm13, %v4348_v20 }
0x110b   :  { %8815 = vmatprep.mubr.msk.f32.mxu1 %vm9591_vm0, %v11680_v48  ;;  %8814 = vmatpush3.msk.msra.mxu1 %vm4429_vm14, %v7925_v9 }
0x110c   :  { %8823 = vmatprep.subr.mxu1 %v11680_v48 }
0x11ca   :  { %v4420_v57 = vpop.f32.mrf.mxu1 }
0x11cb   :  { %8811 = vmatmul.mubr.msk.f32.vlgmr.msra.gmra.mxu0 %vm4425_vm15, %v4420_v57  ;;  %8816 = vmatmul.mubr.msk.f32.vlgmr.msra.gmra.mxu1 %vm4425_vm15, %v4420_v57 }
0x11cc   :  { %v8807_v45 = vpop.f32.mrf.mxu1  ;;  %8819 = vmatpush3.msk.msra.mxu0 %vm4429_vm14, %v7928_v28  ;;  %8820 = vmatprep.mubr.msk.f32.mxu0 %vm9591_vm0, %v11680_v48  ;;  %v5111_v28 = vld [vmem:[%s11643_s17 + $0x8] sm:$0xff] }
0x11cd   :  { %8824 = vmatpush3.msk.msra.mxu1 %vm4429_vm14, %v7931_v35  ;;  %8825 = vmatprep.mubr.msk.f32.mxu1 %vm9591_vm0, %v11680_v48  ;;  %v5213_v35 = vld [vmem:[#allocation13 + $0x4] sm:$0xf] }
0x11ce   :  { %8828 = vmatprep.subr.mxu0 %v11680_v48  ;;  %8833 = vmatprep.subr.mxu1 %v11680_v48  ;;  %v5113_v45 = vld [vmem:[%s11643_s17 + $0x18] sm:$0xff] }
0x11cf   :  { %8821 = vmatmul.mubr.msk.f32.vlgmr.msra.gmra.mxu0 %vm4425_vm15, %v4420_v57  ;;  %8826 = vmatmul.mubr.msk.f32.vlgmr.msra.gmra.mxu1 %vm4425_vm15, %v4420_v57 }
0x11d0   :  { %8829 = vmatpush3.msk.msra.mxu0 %vm4429_vm14, %v7934_v40  ;;  %8830 = vmatprep.mubr.msk.f32.mxu0 %vm9591_vm0, %v11680_v48  ;;  %v5446_v40 = vld [vmem:[#allocation13 + $0xc] sm:$0xf] }
0x11d1   :  { %8834 = vmatpush3.msk.msra.mxu1 %vm4429_vm14, %v7937_v7  ;;  %8835 = vmatprep.mubr.msk.f32.mxu1 %vm9591_vm0, %v11680_v48  ;;  %v5211_v7 = vld [vmem:[#allocation13] sm:$0xf] }
0x11d2   :  { %8838 = vmatprep.subr.mxu0 %v11680_v48  ;;  %8843 = vmatprep.subr.mxu1 %v11680_v48 }
0x11d3   :  { %8831 = vmatmul.mubr.msk.f32.vlgmr.msra.gmra.mxu0 %vm4425_vm15, %v4420_v57  ;;  %8836 = vmatmul.mubr.msk.f32.vlgmr.msra.gmra.mxu1 %vm4425_vm15, %v4420_v57 }
0x11d4   :  { %8839 = vmatpush3.msk.msra.mxu0 %vm4429_vm14, %v7940_v31  ;;  %8840 = vmatprep.mubr.msk.f32.mxu0 %vm9591_vm0, %v11680_v48 }
0x11d5   :  { %8844 = vmatpush3.msk.msra.mxu1 %vm4429_vm14, %v7943_v52  ;;  %8845 = vmatprep.mubr.msk.f32.mxu1 %vm9591_vm0, %v11680_v48 }
0x11d6   :  { %8848 = vmatprep.subr.mxu0 %v11680_v48 }
0x11d7   :  { %8841 = vmatmul.mubr.msk.f32.vlgmr.msra.gmra.mxu0 %vm4425_vm15, %v4420_v57  ;;  %8846 = vmatmul.mubr.msk.f32.vlgmr.msra.gmra.mxu1 %vm4425_vm15, %v4420_v57 }
0x11d8   :  { %8866 = vmatprep.mubr.msk.f32.mxu0 %vm9591_vm0, %v11680_v48  ;;  %8871 = vmatprep.mubr.msk.f32.mxu1 %vm352_vm1, %v5110_v43  ;;  %v7970_v43 = vld [vmem:[%s11643_s17 + $0x20] sm:$0xff] }
0x128b   :  { %v4499_v22 = vpop.f32.mrf.mxu0  ;;  %v4574_v0 = vpop.f32.mrf.mxu1 }
0x128d   :  { %v8812_v41 = vpop.f32.mrf.mxu0  ;;  %v8817_v42 = vpop.f32.mrf.mxu1 }
0x128f   :  { %v4649_v18 = vpop.f32.mrf.mxu0  ;;  %v4724_v17 = vpop.f32.mrf.mxu1 }
0x1291   :  { %v8822_v30 = vpop.f32.mrf.mxu0  ;;  %v8827_v51 = vpop.f32.mrf.mxu1 }
0x1293   :  { %v4799_v54 = vpop.f32.mrf.mxu0  ;;  %v4874_v63 = vpop.f32.mrf.mxu1 }
0x1295   :  { %v8832_v58 = vpop.f32.mrf.mxu0  ;;  %v8837_v59 = vpop.f32.mrf.mxu1 }
0x1296   :  { %v5528_v59 = vpop.permute.xlu0 %5527 }
0x1297   :  { %v4949_v53 = vpop.f32.mrf.mxu0  ;;  %v5024_v4 = vpop.f32.mrf.mxu1 }
0x1298   :  { %8849 = vmatpush3.msra.mxu0 %v5024_v4 }
0x1299   :  { %v8842_v8 = vpop.f32.mrf.mxu0  ;;  %v8847_v1 = vpop.f32.mrf.mxu1  ;;  %8850 = vmatprep.subr.mxu0 %v11680_v48 }
0x129a   :  { %8851 = vmatpush3.msra.mxu0 %v4949_v53 }
0x129b   :  { %8852 = vmatprep.subr.mxu0 %v11680_v48 }
0x129c   :  { %8853 = vmatpush3.msra.mxu0 %v4874_v63 }
0x129d   :  { %8854 = vmatprep.subr.mxu0 %v11680_v48 }
0x129e   :  { %8855 = vmatpush3.msra.mxu0 %v4799_v54 }
0x129f   :  { %8856 = vmatprep.subr.mxu0 %v11680_v48 }
0x12a0   :  { %8857 = vmatpush3.msra.mxu0 %v4420_v57  ;;  %v5112_v57 = vld [vmem:[%s11643_s17 + $0x10] sm:$0xff] }
0x12a1   :  { %8858 = vmatprep.subr.mxu0 %v11680_v48 }
0x12a2   :  { %8859 = vmatpush3.msra.mxu0 %v4724_v17 }
0x12a3   :  { %8860 = vmatprep.subr.mxu0 %v11680_v48 }
0x12a4   :  { %8861 = vmatpush3.msra.mxu0 %v4649_v18 }
0x12a5   :  { %8862 = vmatprep.subr.mxu0 %v11680_v48 }
0x12a6   :  { %8863 = vmatpush3.msra.mxu0 %v4574_v0 }
0x12a7   :  { %8864 = vmatprep.subr.mxu0 %v11680_v48 }
0x12a8   :  { %8865 = vmatpush3.msra.mxu0 %v4499_v22  ;;  %v5367_v22 = vld [vmem:[#allocation13 + $0x8] sm:$0xf] }
0x12a9   :  { %8867 = vmatmul.mubr.msk.f32.vlgmr.msra.gmra.mxu0 %vm3093_vm12, %v5029_v14  ;;  %8892 = vmatprep.subr.mxu0 %v11680_v48  ;;  %v6095_v14 = vld [vmem:[#allocation19 + $0x18] sm:$0xff] }
0x12aa   :  { %8894 = vmatprep.mubr.msk.f32.mxu0 %vm9591_vm0, %v11680_v48  ;;  %8893 = vmatpush3.msk.msra.mxu0 %vm4429_vm14, %v5446_v40  ;;  %v6281_v40 = vld [vmem:[#allocation14 + $0x10] sm:$0xff] }
0x12ab   :  { %8904 = vmatprep.subr.mxu0 %v11680_v48 }
0x1369   :  { %v5106_v20 = vpop.f32.mrf.mxu0 }
0x136a   :  { %v5107_v21 = vadd.f32 %v5106_v20, %v5035_v19  ;;  %v6101_v19 = vpop.permute.xlu1 %6100 }
0x136b   :  { %v8868_v9 = vpop.f32.mrf.mxu0 }
0x136c   :  { %8869 = vmatprep.subr.mxu1 %v5107_v21 }
0x136d   :  { %8870 = vmatpush3.msra.mxu1 %v5107_v21 }
0x136e   :  { %8872 = vmatmul.mubr.msk.f32.vlgmr.msra.gmra.mxu1 %vm352_vm1, %v5111_v28  ;;  %8877 = vmatprep.subr.mxu1 %v11680_v48  ;;  %v7971_v28 = vld [vmem:[%s11643_s17 + $0x28] sm:$0xff] }
0x136f   :  { %8874 = vmatprep.mubr.msk.f32.mxu1 %vm352_vm1, %v5112_v57  ;;  %8878 = vmatpush3.msk.msra.mxu1 %vm4429_vm14, %v5213_v35  ;;  %v7972_v57 = vld [vmem:[%s11643_s17 + $0x30] sm:$0xff]  ;;  %v6282_v35 = vld [vmem:[#allocation14 + $0x18] sm:$0xff] }
0x1370   :  { %8882 = vmatprep.subr.mxu1 %v11680_v48 }
0x1372   :  { %8875 = vmatmul.mubr.msk.f32.gmra.mxu1 %vm352_vm1, %v5113_v45  ;;  %v7973_v45 = vld [vmem:[%s11643_s17 + $0x38] sm:$0xff] }
0x1373   :  { %8879 = vmatprep.mubr.msk.f32.mxu1 %vm9591_vm0, %v11680_v48 }
0x142e   :  { %v8873_v31 = vpop.f32.mrf.mxu1 }
0x142f   :  { %8880 = vmatmul.mubr.msk.f32.vlgmr.msra.gmra.mxu1 %vm4425_vm15, %v8873_v31  ;;  %v6507_v31 = vld [vmem:[#allocation14 + $0x30] sm:$0xff] }
0x1430   :  { %v5192_v52 = vpop.f32.mrf.mxu1  ;;  %8883 = vmatpush3.msk.msra.mxu1 %vm4429_vm14, %v5211_v7  ;;  %8884 = vmatprep.mubr.msk.f32.mxu1 %vm9591_vm0, %v11680_v48  ;;  %v6508_v7 = vld [vmem:[#allocation14 + $0x38] sm:$0xff] }
0x1431   :  { %8887 = vmatprep.subr.mxu1 %v11680_v48 }
0x1432   :  { %v8876_v0 = vpop.f32.mrf.mxu1 }
0x1433   :  { %8885 = vmatmul.mubr.msk.f32.vlgmr.msra.gmra.mxu1 %vm4425_vm15, %v5192_v52  ;;  %8895 = vmatmul.mubr.msk.f32.vlgmr.msra.gmra.mxu0 %vm4425_vm15, %v8876_v0  ;;  %v6279_v52 = vld [vmem:[#allocation14 + $0x8] sm:$0xff]  ;;  %v6278_v0 = vld [vmem:[#allocation14] sm:$0xff] }
0x1434   :  { %8888 = vmatpush3.msk.msra.mxu1 %vm4429_vm14, %v5367_v22  ;;  %8889 = vmatprep.mubr.msk.f32.mxu1 %vm9591_vm0, %v11680_v48  ;;  %v5202_v41 = vpop.f32.mrf.mxu1 }
0x1435   :  { %8897 = vmatprep.subr.mxu1 %v11680_v48  ;;  %8905 = vmatpush3.msra.mxu0 %v11067_v56 }
0x1436   :  { %8906 = vmatprep.subr.mxu0 %v11680_v48  ;;  %8908 = vmatprep.mubr.msk.f32.mxu0 %vm9591_vm0, %v11680_v48 }
0x1437   :  { %8890 = vmatmul.mubr.msk.f32.vlgmr.msra.gmra.mxu1 %vm4425_vm15, %v5202_v41  ;;  %8907 = vmatpush3.msra.mxu0 %v11076_v3 }
0x1438   :  { %8898 = vmatpush3.msra.mxu1 %v11063_v50  ;;  %8901 = vmatprep.mubr.msk.f32.mxu1 %vm9591_vm0, %v11680_v48 }
0x1439   :  { %8899 = vmatprep.subr.mxu1 %v11680_v48  ;;  %8918 = vmatprep.subr.mxu0 %v11680_v48 }
0x143a   :  { %8900 = vmatpush3.msra.mxu1 %v11074_v26 }
0x143b   :  { %8911 = vmatprep.subr.mxu1 %v11680_v48 }
0x14ef   :  { %v5286_v56 = vpop.f32.mrf.mxu1 }
0x14f1   :  { %v8881_v42 = vpop.f32.mrf.mxu1 }
0x14f3   :  { %v5362_v18 = vpop.f32.mrf.mxu1  ;;  %v5519_v17 = vpop.f32.mrf.mxu0 }
0x14f4   :  { %v5363_v3 = vadd.f32 %v5362_v18, %v5286_v56  ;;  %v6431_v56 = vld [vmem:[#allocation14 + $0x28] sm:$0xff]  ;;  %v6430_v18 = vld [vmem:[#allocation14 + $0x20] sm:$0xff] }
0x14f5   :  { %v8886_v30 = vpop.f32.mrf.mxu1  ;;  %v8896_v51 = vpop.f32.mrf.mxu0 }
0x14f6   :  { %v9251_v30 = vld [vmem:[#allocation10 + $0x78] sm:$0xff] }
0x14f7   :  { %v5440_v54 = vpop.f32.mrf.mxu1  ;;  %v9252_v51 = vld [vmem:[#allocation10 + $0x38] sm:$0xff] }
0x14f8   :  { %v5444_v50 = vadd.f32 %v5440_v54, %v5363_v3  ;;  %v9253_v3 = vld [vmem:[#allocation10 + $0x70] sm:$0xff] }
0x14f9   :  { %v8891_v63 = vpop.f32.mrf.mxu1  ;;  %v9254_v54 = vld [vmem:[#allocation10 + $0x30] sm:$0xff] }
0x14fa   :  { %v5523_v58 = vadd.f32 %v5519_v17, %v5444_v50  ;;  %v9255_v50 = vld [vmem:[#allocation10 + $0x68] sm:$0xff] }
0x14fb   :  { %v9256_v63 = vld [vmem:[#allocation10 + $0x28] sm:$0xff] }
0x14fc   :  { %v5530_v53 = vadd.f32 %v5528_v59, %v5523_v58  ;;  %v9257_v58 = vld [vmem:[#allocation10 + $0x60] sm:$0xff] }
0x14fd   :  { %v9258_v59 = vld [vmem:[#allocation10 + $0x20] sm:$0xff] }
0x14fe   :  { %8902 = vmatmul.mubr.msk.f32.vlgmr.msra.gmra.mxu1 %vm3466_vm13, %v5530_v53  ;;  %8909 = vmatmul.mubr.msk.f32.vlgmr.msra.gmra.mxu0 %vm3466_vm13, %v5530_v53 }
0x14ff   :  { %8912 = vmatpush3.msra.mxu1 %v11082_v32  ;;  %8919 = vmatpush3.msra.mxu0 %v11084_v2 }
0x1500   :  { %8913 = vmatprep.subr.mxu1 %v11680_v48  ;;  %8920 = vmatprep.subr.mxu0 %v11680_v48 }
0x1501   :  { %8914 = vmatpush3.msra.mxu1 %v11092_v60  ;;  %8915 = vmatprep.mubr.msk.f32.mxu1 %vm9591_vm0, %v11680_v48 }
0x1502   :  { %8921 = vmatpush3.msra.mxu0 %v11096_v12  ;;  %8922 = vmatprep.mubr.msk.f32.mxu0 %vm9591_vm0, %v11680_v48 }
0x1503   :  { %8916 = vmatmul.mubr.msk.f32.vlgmr.msra.gmra.mxu1 %vm3466_vm13, %v5530_v53  ;;  %8923 = vmatmul.mubr.msk.f32.vlgmr.msra.gmra.mxu0 %vm3466_vm13, %v5530_v53 }
0x1504   :  { %8925 = vmatprep.subr.mxu1 %v11680_v48  ;;  %8932 = vmatprep.subr.mxu0 %v11680_v48 }
0x1505   :  { %8926 = vmatpush3.msra.mxu1 %v11106_v47  ;;  %8933 = vmatpush3.msra.mxu0 %v11108_v10 }
0x1506   :  { %8927 = vmatprep.subr.mxu1 %v11680_v48  ;;  %8934 = vmatprep.subr.mxu0 %v11680_v48 }
0x1507   :  { %8928 = vmatpush3.msra.mxu1 %v11116_v46  ;;  %8929 = vmatprep.mubr.msk.f32.mxu1 %vm9591_vm0, %v11680_v48 }
0x1508   :  { %8935 = vmatpush3.msra.mxu0 %v11120_v62  ;;  %8936 = vmatprep.mubr.msk.f32.mxu0 %vm9591_vm0, %v11680_v48 }
0x1509   :  { %8930 = vmatmul.mubr.msk.f32.vlgmr.msra.gmra.mxu1 %vm3466_vm13, %v5530_v53  ;;  %8937 = vmatmul.mubr.msk.f32.vlgmr.msra.gmra.mxu0 %vm3466_vm13, %v5530_v53 }
0x150a   :  { %8939 = vmatprep.subr.mxu1 %v11680_v48  ;;  %8946 = vmatprep.subr.mxu0 %v11680_v48 }
0x150b   :  { %8940 = vmatpush3.msra.mxu1 %v11130_v27  ;;  %8947 = vmatpush3.msra.mxu0 %v11132_v11 }
0x150c   :  { %8941 = vmatprep.subr.mxu1 %v11680_v48  ;;  %8948 = vmatprep.subr.mxu0 %v11680_v48 }
0x150d   :  { %8942 = vmatpush3.msra.mxu1 %v11140_v6  ;;  %8943 = vmatprep.mubr.msk.f32.mxu1 %vm9591_vm0, %v11680_v48 }
0x150e   :  { %8949 = vmatpush3.msra.mxu0 %v11144_v36  ;;  %8950 = vmatprep.mubr.msk.f32.mxu0 %vm9591_vm0, %v11680_v48 }
0x150f   :  { %8944 = vmatmul.mubr.msk.f32.vlgmr.msra.gmra.mxu1 %vm3466_vm13, %v5530_v53  ;;  %8951 = vmatmul.mubr.msk.f32.vlgmr.msra.gmra.mxu0 %vm3466_vm13, %v5530_v53 }
0x1510   :  { %8953 = vmatprep.subr.mxu1 %v11680_v48  ;;  %8971 = vmatprep.mubr.msk.f32.mxu1 %vm9591_vm0, %v11680_v48 }
0x1511   :  { %8976 = vmatprep.mubr.msk.f32.mxu0 %vm352_vm1, %v7970_v43 }
0x15be   :  { %v5600_v26 = vpop.f32.mrf.mxu1  ;;  %v5670_v32 = vpop.f32.mrf.mxu0 }
0x15c0   :  { %v8903_v2 = vpop.f32.mrf.mxu1  ;;  %v8910_v60 = vpop.f32.mrf.mxu0 }
0x15c1   :  { %v9262_v2 = vld [vmem:[#allocation10 + $0x10] sm:$0xff]  ;;  %v9263_v60 = vld [vmem:[#allocation10 + $0x48] sm:$0xff] }
0x15c3   :  { %v5740_v12 = vpop.f32.mrf.mxu1  ;;  %v5810_v47 = vpop.f32.mrf.mxu0 }
0x15c5   :  { %v8917_v10 = vpop.f32.mrf.mxu1  ;;  %v8924_v46 = vpop.f32.mrf.mxu0 }
0x15c6   :  { %v9266_v10 = vld [vmem:[#allocation10] sm:$0xff] }
0x15c9   :  { %v5880_v62 = vpop.f32.mrf.mxu1  ;;  %v5950_v27 = vpop.f32.mrf.mxu0 }
0x15cb   :  { %v8931_v11 = vpop.f32.mrf.mxu1  ;;  %v8938_v6 = vpop.f32.mrf.mxu0 }
0x15cf   :  { %v6020_v36 = vpop.f32.mrf.mxu1  ;;  %v6090_v4 = vpop.f32.mrf.mxu0 }
0x15d0   :  { %8954 = vmatpush3.msra.mxu1 %v6090_v4 }
0x15d1   :  { %v8945_v8 = vpop.f32.mrf.mxu1  ;;  %v8952_v1 = vpop.f32.mrf.mxu0  ;;  %8955 = vmatprep.subr.mxu1 %v11680_v48 }
0x15d2   :  { %8956 = vmatpush3.msra.mxu1 %v6020_v36 }
0x15d3   :  { %8957 = vmatprep.subr.mxu1 %v11680_v48 }
0x15d4   :  { %8958 = vmatpush3.msra.mxu1 %v5950_v27 }
0x15d5   :  { %8959 = vmatprep.subr.mxu1 %v11680_v48 }
0x15d6   :  { %8960 = vmatpush3.msra.mxu1 %v5880_v62 }
0x15d7   :  { %8961 = vmatprep.subr.mxu1 %v11680_v48 }
0x15d8   :  { %8962 = vmatpush3.msra.mxu1 %v5530_v53  ;;  %v9259_v53 = vld [vmem:[#allocation10 + $0x58] sm:$0xff] }
0x15d9   :  { %8963 = vmatprep.subr.mxu1 %v11680_v48 }
0x15da   :  { %8964 = vmatpush3.msra.mxu1 %v5810_v47  ;;  %v9265_v47 = vld [vmem:[#allocation10 + $0x40] sm:$0xff] }
0x15db   :  { %8965 = vmatprep.subr.mxu1 %v11680_v48 }
0x15dc   :  { %8966 = vmatpush3.msra.mxu1 %v5740_v12  ;;  %v9264_v12 = vld [vmem:[#allocation10 + $0x8] sm:$0xff] }
0x15dd   :  { %8967 = vmatprep.subr.mxu1 %v11680_v48 }
0x15de   :  { %8968 = vmatpush3.msra.mxu1 %v5670_v32  ;;  %v9261_v32 = vld [vmem:[#allocation10 + $0x50] sm:$0xff] }
0x15df   :  { %8969 = vmatprep.subr.mxu1 %v11680_v48 }
0x15e0   :  { %8970 = vmatpush3.msra.mxu1 %v5600_v26  ;;  %v9260_v26 = vld [vmem:[#allocation10 + $0x18] sm:$0xff] }
0x15e1   :  { %8972 = vmatmul.mubr.msk.f32.vlgmr.msra.gmra.mxu1 %vm3093_vm12, %v6095_v14  ;;  %9003 = vmatprep.subr.mxu1 %v11680_v48 }
0x15e2   :  { %9007 = vmatprep.mubr.msk.f32.mxu1 %vm9591_vm0, %v11680_v48  ;;  %9004 = vmatpush3.msra.mxu1 %v6508_v7  ;;  %v9274_v7 = vld [vmem:[#allocation10 + $0xe0] sm:$0xff] }
0x15e3   :  { %9005 = vmatprep.subr.mxu1 %v11680_v48 }
0x15e4   :  { %9006 = vmatpush3.msra.mxu1 %v6507_v31  ;;  %v9275_v31 = vld [vmem:[#allocation10 + $0x98] sm:$0xff] }
0x15e5   :  { %9029 = vmatprep.subr.mxu1 %v11680_v48 }
0x16a1   :  { %v6172_v20 = vpop.f32.mrf.mxu1 }
0x16a2   :  { %v6173_v21 = vadd.f32 %v6172_v20, %v6101_v19  ;;  %v6588_v19 = vpop.permute.xlu0 %6587 }
0x16a3   :  { %v8973_v9 = vpop.f32.mrf.mxu1 }
0x16a4   :  { %8974 = vmatprep.subr.mxu0 %v6173_v21  ;;  %v9268_v9 = vld [vmem:[#allocation10 + $0xf8] sm:$0xff] }
0x16a5   :  { %8975 = vmatpush3.msra.mxu0 %v6173_v21  ;;  %v9267_v21 = vld [vmem:[#allocation10 + $0xb8] sm:$0xff] }
0x16a6   :  { %8977 = vmatmul.mubr.msk.f32.vlgmr.msra.gmra.mxu0 %vm352_vm1, %v7971_v28  ;;  %8982 = vmatprep.subr.mxu0 %v11680_v48  ;;  %v9269_v28 = vld [vmem:[#allocation10 + $0xb0] sm:$0xff] }
0x16a7   :  { %8979 = vmatprep.mubr.msk.f32.mxu0 %vm352_vm1, %v7972_v57  ;;  %8983 = vmatpush3.msra.mxu0 %v6282_v35  ;;  %v9270_v57 = vld [vmem:[#allocation10 + $0xf0] sm:$0xff]  ;;  %v9271_v35 = vld [vmem:[#allocation10 + $0xa8] sm:$0xff] }
0x16a8   :  { %8984 = vmatprep.subr.mxu0 %v11680_v48 }
0x16a9   :  { %8985 = vmatpush3.msra.mxu0 %v6281_v40  ;;  %v9273_v40 = vld [vmem:[#allocation10 + $0xa0] sm:$0xff] }
0x16aa   :  { %8980 = vmatmul.mubr.msk.f32.gmra.mxu0 %vm352_vm1, %v7973_v45  ;;  %8989 = vmatprep.subr.mxu0 %v11680_v48  ;;  %v9272_v45 = vld [vmem:[#allocation10 + $0xe8] sm:$0xff] }
0x16ab   :  { %8986 = vmatprep.mubr.msk.f32.mxu0 %vm9591_vm0, %v11680_v48 }
0x1766   :  { %v8978_v22 = vpop.f32.mrf.mxu0 }
0x1767   :  { %8987 = vmatmul.mubr.msk.f32.vlgmr.msra.gmra.mxu0 %vm3466_vm13, %v8978_v22  ;;  %v9277_v22 = vld [vmem:[#allocation10 + $0x90] sm:$0xff] }
0x1768   :  { %v6259_v41 = vpop.f32.mrf.mxu0  ;;  %8990 = vmatpush3.msra.mxu0 %v6279_v52  ;;  %8993 = vmatprep.mubr.msk.f32.mxu0 %vm9591_vm0, %v11680_v48  ;;  %v9276_v52 = vld [vmem:[#allocation10 + $0xd8] sm:$0xff] }
0x1769   :  { %8991 = vmatprep.subr.mxu0 %v11680_v48 }
0x176a   :  { %v8981_v42 = vpop.f32.mrf.mxu0  ;;  %8992 = vmatpush3.msra.mxu0 %v6278_v0  ;;  %v9278_v0 = vld [vmem:[#allocation10 + $0xd0] sm:$0xff] }
0x176b   :  { %8994 = vmatmul.mubr.msk.f32.vlgmr.msra.gmra.mxu0 %vm3466_vm13, %v6259_v41  ;;  %8996 = vmatprep.subr.mxu0 %v11680_v48  ;;  %v9279_v41 = vld [vmem:[#allocation10 + $0x88] sm:$0xff] }
0x176c   :  { %9008 = vmatmul.mubr.msk.f32.vlgmr.msra.gmra.mxu1 %vm3466_vm13, %v8981_v42  ;;  %8997 = vmatpush3.msra.mxu0 %v6431_v56  ;;  %v6269_v17 = vpop.f32.mrf.mxu0  ;;  %v9280_v56 = vld [vmem:[#allocation10 + $0xc8] sm:$0xff]  ;;  %v9281_v42 = vld [vmem:[#allocation10 + $0x80] sm:$0xff] }
0x176d   :  { %8998 = vmatprep.subr.mxu0 %v11680_v48  ;;  %9000 = vmatprep.mubr.msk.f32.mxu0 %vm9591_vm0, %v11680_v48 }
0x176e   :  { %8999 = vmatpush3.msra.mxu0 %v6430_v18  ;;  %9030 = vmatpush3.msra.mxu1 %v9251_v30  ;;  %v9282_v18 = vld [vmem:[#allocation10 + $0xc0] sm:$0xff]  ;;  %v9284_v30 = vld [vmem:[#allocation10 + $0x1b8] sm:$0xff] }
0x176f   :  { %9001 = vmatmul.mubr.msk.f32.vlgmr.msra.gmra.mxu0 %vm3466_vm13, %v6269_v17  ;;  %9010 = vmatprep.subr.mxu0 %v11680_v48  ;;  %v9283_v17 = vld [vmem:[#allocation10 + $0x178] sm:$0xff] }
0x1770   :  { %9011 = vmatpush3.msra.mxu0 %v9252_v51  ;;  %9031 = vmatprep.subr.mxu1 %v11680_v48  ;;  %v9285_v51 = vld [vmem:[#allocation10 + $0x170] sm:$0xff] }
0x1771   :  { %9012 = vmatprep.subr.mxu0 %v11680_v48  ;;  %9032 = vmatpush3.msra.mxu1 %v9253_v3  ;;  %v9286_v3 = vld [vmem:[#allocation10 + $0x1b0] sm:$0xff] }
0x1772   :  { %9013 = vmatpush3.msra.mxu0 %v9254_v54  ;;  %9033 = vmatprep.subr.mxu1 %v11680_v48  ;;  %v9287_v54 = vld [vmem:[#allocation10 + $0x168] sm:$0xff] }
0x1773   :  { %9014 = vmatprep.subr.mxu0 %v11680_v48  ;;  %9034 = vmatpush3.msra.mxu1 %v9255_v50  ;;  %v9288_v50 = vld [vmem:[#allocation10 + $0x1a8] sm:$0xff] }
0x1774   :  { %9015 = vmatpush3.msra.mxu0 %v9256_v63  ;;  %9035 = vmatprep.subr.mxu1 %v11680_v48  ;;  %v9289_v63 = vld [vmem:[#allocation10 + $0x160] sm:$0xff] }
0x1775   :  { %9016 = vmatprep.subr.mxu0 %v11680_v48  ;;  %9036 = vmatpush3.msra.mxu1 %v9257_v58  ;;  %v9290_v58 = vld [vmem:[#allocation10 + $0x1a0] sm:$0xff] }
0x1776   :  { %9017 = vmatpush3.msra.mxu0 %v9258_v59  ;;  %9037 = vmatprep.subr.mxu1 %v11680_v48  ;;  %v9291_v59 = vld [vmem:[#allocation10 + $0x158] sm:$0xff] }
0x1777   :  { %9018 = vmatprep.subr.mxu0 %v11680_v48  ;;  %9038 = vmatpush3.msra.mxu1 %v9259_v53  ;;  %v9292_v53 = vld [vmem:[#allocation10 + $0x198] sm:$0xff] }
0x1778   :  { %9019 = vmatpush3.msra.mxu0 %v9260_v26  ;;  %9039 = vmatprep.subr.mxu1 %v11680_v48  ;;  %v9293_v26 = vld [vmem:[#allocation10 + $0x150] sm:$0xff] }
0x1779   :  { %9020 = vmatprep.subr.mxu0 %v11680_v48  ;;  %9040 = vmatpush3.msra.mxu1 %v9261_v32  ;;  %v9294_v32 = vld [vmem:[#allocation10 + $0x190] sm:$0xff] }
0x177a   :  { %9021 = vmatpush3.msra.mxu0 %v9262_v2  ;;  %9041 = vmatprep.subr.mxu1 %v11680_v48  ;;  %v9295_v2 = vld [vmem:[#allocation10 + $0x148] sm:$0xff] }
0x177b   :  { %9022 = vmatprep.subr.mxu0 %v11680_v48  ;;  %9042 = vmatpush3.msra.mxu1 %v9263_v60  ;;  %v9296_v60 = vld [vmem:[#allocation10 + $0x188] sm:$0xff] }
0x177c   :  { %9023 = vmatpush3.msra.mxu0 %v9264_v12  ;;  %9043 = vmatprep.subr.mxu1 %v11680_v48  ;;  %v9297_v12 = vld [vmem:[#allocation10 + $0x140] sm:$0xff] }
0x177d   :  { %9024 = vmatprep.subr.mxu0 %v11680_v48  ;;  %9044 = vmatpush3.msra.mxu1 %v9265_v47  ;;  %v9298_v47 = vld [vmem:[#allocation10 + $0x180] sm:$0xff] }
0x177e   :  { %9025 = vmatpush3.msra.mxu0 %v9266_v10  ;;  %9026 = vmatprep.mubr.msk.f32.mxu0 %vm9591_vm0, %v11680_v48  ;;  %v9299_v10 = vld [vmem:[#allocation10 + $0x1f8] sm:$0xff] }
0x177f   :  { %9045 = vmatprep.mubr.msk.f32.mxu1 %vm9591_vm0, %v11680_v48  ;;  %9048 = vmatprep.subr.mxu0 %v11680_v48 }
0x1780   :  { %9067 = vmatprep.subr.mxu1 %v11680_v48 }
0x1827   :  { %v6352_v46 = vpop.f32.mrf.mxu0 }
0x1829   :  { %v8988_v62 = vpop.f32.mrf.mxu0 }
0x182a   :  { %v9301_v62 = vld [vmem:[#allocation10 + $0x1f0] sm:$0xff] }
0x182b   :  { %v6425_v27 = vpop.f32.mrf.mxu0 }
0x182c   :  { %v6578_v11 = vpop.f32.mrf.mxu1  ;;  %v6426_v36 = vadd.f32 %v6425_v27, %v6352_v46  ;;  %v9300_v46 = vld [vmem:[#allocation10 + $0x238] sm:$0xff]  ;;  %v9302_v27 = vld [vmem:[#allocation10 + $0x230] sm:$0xff] }
0x182d   :  { %v8995_v6 = vpop.f32.mrf.mxu0 }
0x182e   :  { %v9009_v4 = vpop.f32.mrf.mxu1  ;;  %v9304_v6 = vld [vmem:[#allocation10 + $0x228] sm:$0xff] }
0x182f   :  { %v6501_v8 = vpop.f32.mrf.mxu0  ;;  %v9306_v4 = vld [vmem:[#allocation10 + $0x220] sm:$0xff] }
0x1830   :  { %v6505_v1 = vadd.f32 %v6501_v8, %v6426_v36  ;;  %v9305_v36 = vld [vmem:[#allocation10 + $0x1e0] sm:$0xff]  ;;  %v9307_v8 = vld [vmem:[#allocation10 + $0x1d8] sm:$0xff] }
0x1831   :  { %v9002_v14 = vpop.f32.mrf.mxu0 }
0x1832   :  { %v6582_v43 = vadd.f32 %v6578_v11, %v6505_v1  ;;  %v9303_v11 = vld [vmem:[#allocation10 + $0x1e8] sm:$0xff]  ;;  %v9308_v1 = vld [vmem:[#allocation10 + $0x218] sm:$0xff]  ;;  %v9309_v14 = vld [vmem:[#allocation10 + $0x1d0] sm:$0xff] }
0x1834   :  { %v11441_v20 = vadd.f32 %v6588_v19, %v6582_v43  ;;  %v9310_v43 = vld [vmem:[#allocation10 + $0x210] sm:$0xff]  ;;  %v9311_v19 = vld [vmem:[#allocation10 + $0x1c8] sm:$0xff] }
0x1836   :  { %9027 = vmatmul.mubr.msk.f32.vlgmr.msra.gmra.mxu0 %vm2459_vm11, %v11441_v20  ;;  %9046 = vmatmul.mubr.msk.f32.vlgmr.msra.gmra.mxu1 %vm2459_vm11, %v11441_v20 }
0x1837   :  { %9049 = vmatpush3.msra.mxu0 %v9267_v21  ;;  %9068 = vmatpush3.msra.mxu1 %v9268_v9  ;;  %v9312_v21 = vld [vmem:[#allocation10 + $0x208] sm:$0xff]  ;;  %v9313_v9 = vld [vmem:[#allocation10 + $0x1c0] sm:$0xff] }
0x1838   :  { %9050 = vmatprep.subr.mxu0 %v11680_v48  ;;  %9069 = vmatprep.subr.mxu1 %v11680_v48 }
0x1839   :  { %9051 = vmatpush3.msra.mxu0 %v9269_v28  ;;  %9070 = vmatpush3.msra.mxu1 %v9270_v57  ;;  %v9314_v28 = vld [vmem:[#allocation10 + $0x200] sm:$0xff] }
0x183a   :  { %9052 = vmatprep.subr.mxu0 %v11680_v48  ;;  %9071 = vmatprep.subr.mxu1 %v11680_v48 }
0x183b   :  { %9053 = vmatpush3.msra.mxu0 %v9271_v35  ;;  %9072 = vmatpush3.msra.mxu1 %v9272_v45 }
0x183c   :  { %9054 = vmatprep.subr.mxu0 %v11680_v48  ;;  %9073 = vmatprep.subr.mxu1 %v11680_v48 }
0x183d   :  { %9055 = vmatpush3.msra.mxu0 %v9273_v40  ;;  %9074 = vmatpush3.msra.mxu1 %v9274_v7 }
0x183e   :  { %9056 = vmatprep.subr.mxu0 %v11680_v48  ;;  %9075 = vmatprep.subr.mxu1 %v11680_v48 }
0x183f   :  { %9057 = vmatpush3.msra.mxu0 %v9275_v31  ;;  %9076 = vmatpush3.msra.mxu1 %v9276_v52 }
0x1840   :  { %9058 = vmatprep.subr.mxu0 %v11680_v48  ;;  %9077 = vmatprep.subr.mxu1 %v11680_v48 }
0x1841   :  { %9059 = vmatpush3.msra.mxu0 %v9277_v22  ;;  %9078 = vmatpush3.msra.mxu1 %v9278_v0 }
0x1842   :  { %9060 = vmatprep.subr.mxu0 %v11680_v48  ;;  %9079 = vmatprep.subr.mxu1 %v11680_v48 }
0x1843   :  { %9061 = vmatpush3.msra.mxu0 %v9279_v41  ;;  %9080 = vmatpush3.msra.mxu1 %v9280_v56 }
0x1844   :  { %9062 = vmatprep.subr.mxu0 %v11680_v48  ;;  %9081 = vmatprep.subr.mxu1 %v11680_v48 }
0x1845   :  { %9063 = vmatpush3.msra.mxu0 %v9281_v42  ;;  %9064 = vmatprep.mubr.msk.f32.mxu0 %vm9591_vm0, %v11680_v48 }
0x1846   :  { %9082 = vmatpush3.msra.mxu1 %v9282_v18  ;;  %9083 = vmatprep.mubr.msk.f32.mxu1 %vm9591_vm0, %v11680_v48 }
0x1847   :  { %9065 = vmatmul.mubr.msk.f32.vlgmr.msra.gmra.mxu0 %vm2459_vm11, %v11441_v20  ;;  %9084 = vmatmul.mubr.msk.f32.vlgmr.msra.gmra.mxu1 %vm2459_vm11, %v11441_v20 }
0x1848   :  { %9086 = vmatprep.subr.mxu0 %v11680_v48  ;;  %9105 = vmatprep.subr.mxu1 %v11680_v48 }
0x1849   :  { %9087 = vmatpush3.msra.mxu0 %v9283_v17  ;;  %9106 = vmatpush3.msra.mxu1 %v9284_v30 }
0x184a   :  { %9088 = vmatprep.subr.mxu0 %v11680_v48  ;;  %9107 = vmatprep.subr.mxu1 %v11680_v48 }
0x184b   :  { %9089 = vmatpush3.msra.mxu0 %v9285_v51  ;;  %9108 = vmatpush3.msra.mxu1 %v9286_v3  ;;  %v7155_v3 = vld [vmem:[#allocation19 + $0x20] sm:$0xff] }
0x184c   :  { %9090 = vmatprep.subr.mxu0 %v11680_v48  ;;  %9109 = vmatprep.subr.mxu1 %v11680_v48 }
0x184d   :  { %9091 = vmatpush3.msra.mxu0 %v9287_v54  ;;  %9110 = vmatpush3.msra.mxu1 %v9288_v50  ;;  %v7353_v54 = vld [vmem:[#allocation16 + $0x78] sm:$0xff]  ;;  %v7352_v50 = vld [vmem:[#allocation16 + $0x70] sm:$0xff] }
0x184e   :  { %9092 = vmatprep.subr.mxu0 %v11680_v48  ;;  %9111 = vmatprep.subr.mxu1 %v11680_v48 }
0x184f   :  { %9093 = vmatpush3.msra.mxu0 %v9289_v63  ;;  %9112 = vmatpush3.msra.mxu1 %v9290_v58  ;;  %v7351_v63 = vld [vmem:[#allocation16 + $0x68] sm:$0xff]  ;;  %v7350_v58 = vld [vmem:[#allocation16 + $0x60] sm:$0xff] }
0x1850   :  { %9094 = vmatprep.subr.mxu0 %v11680_v48  ;;  %9113 = vmatprep.subr.mxu1 %v11680_v48 }
0x1851   :  { %9095 = vmatpush3.msra.mxu0 %v9291_v59  ;;  %9114 = vmatpush3.msra.mxu1 %v9292_v53  ;;  %v7349_v59 = vld [vmem:[#allocation16 + $0x58] sm:$0xff]  ;;  %v7348_v53 = vld [vmem:[#allocation16 + $0x50] sm:$0xff] }
0x1852   :  { %9096 = vmatprep.subr.mxu0 %v11680_v48  ;;  %9115 = vmatprep.subr.mxu1 %v11680_v48 }
0x1853   :  { %9097 = vmatpush3.msra.mxu0 %v9293_v26  ;;  %9116 = vmatpush3.msra.mxu1 %v9294_v32  ;;  %v7347_v26 = vld [vmem:[#allocation16 + $0x48] sm:$0xff]  ;;  %v7346_v32 = vld [vmem:[#allocation16 + $0x40] sm:$0xff] }
0x1854   :  { %9098 = vmatprep.subr.mxu0 %v11680_v48  ;;  %9117 = vmatprep.subr.mxu1 %v11680_v48 }
0x1855   :  { %9099 = vmatpush3.msra.mxu0 %v9295_v2  ;;  %9118 = vmatpush3.msra.mxu1 %v9296_v60  ;;  %v7345_v2 = vld [vmem:[#allocation16 + $0x38] sm:$0xff]  ;;  %v7344_v60 = vld [vmem:[#allocation16 + $0x30] sm:$0xff] }
0x1856   :  { %9100 = vmatprep.subr.mxu0 %v11680_v48  ;;  %9119 = vmatprep.subr.mxu1 %v11680_v48 }
0x1857   :  { %9101 = vmatpush3.msra.mxu0 %v9297_v12  ;;  %9102 = vmatprep.mubr.msk.f32.mxu0 %vm9591_vm0, %v11680_v48  ;;  %v7343_v12 = vld [vmem:[#allocation16 + $0x28] sm:$0xff] }
0x1858   :  { %9120 = vmatpush3.msra.mxu1 %v9298_v47  ;;  %9121 = vmatprep.mubr.msk.f32.mxu1 %vm9591_vm0, %v11680_v48  ;;  %v7342_v47 = vld [vmem:[#allocation16 + $0x20] sm:$0xff] }
0x1859   :  { %9103 = vmatmul.mubr.msk.f32.vlgmr.msra.gmra.mxu0 %vm2459_vm11, %v11441_v20  ;;  %9122 = vmatmul.mubr.msk.f32.vlgmr.msra.gmra.mxu1 %vm2459_vm11, %v11441_v20 }
0x185a   :  { %9124 = vmatprep.subr.mxu0 %v11680_v48  ;;  %9143 = vmatprep.subr.mxu1 %v11680_v48 }
0x185b   :  { %9125 = vmatpush3.msra.mxu0 %v9299_v10  ;;  %9144 = vmatpush3.msra.mxu1 %v9300_v46  ;;  %v7341_v10 = vld [vmem:[#allocation16 + $0x18] sm:$0xff]  ;;  %v7340_v46 = vld [vmem:[#allocation16 + $0x10] sm:$0xff] }
0x185c   :  { %9126 = vmatprep.subr.mxu0 %v11680_v48  ;;  %9145 = vmatprep.subr.mxu1 %v11680_v48 }
0x185d   :  { %9127 = vmatpush3.msra.mxu0 %v9301_v62  ;;  %9146 = vmatpush3.msra.mxu1 %v9302_v27  ;;  %v7161_v62 = vpop.permute.xlu1 %7160 }
0x185e   :  { %9128 = vmatprep.subr.mxu0 %v11680_v48  ;;  %9147 = vmatprep.subr.mxu1 %v11680_v48 }
0x185f   :  { %9129 = vmatpush3.msra.mxu0 %v9303_v11  ;;  %9148 = vmatpush3.msra.mxu1 %v9304_v6 }
0x1860   :  { %9130 = vmatprep.subr.mxu0 %v11680_v48  ;;  %9149 = vmatprep.subr.mxu1 %v11680_v48 }
0x1861   :  { %9131 = vmatpush3.msra.mxu0 %v9305_v36  ;;  %9150 = vmatpush3.msra.mxu1 %v9306_v4  ;;  %v7994_v36 = vld [vmem:[%s11643_s17 + $0x48] sm:$0xff] }
0x1862   :  { %9132 = vmatprep.subr.mxu0 %v11680_v48  ;;  %9151 = vmatprep.subr.mxu1 %v11680_v48  ;;  %v7370_v4 = vld [vmem:[#allocation16 + $0xf8] sm:$0xff] }
0x1863   :  { %9133 = vmatpush3.msra.mxu0 %v9307_v8  ;;  %9152 = vmatpush3.msra.mxu1 %v9308_v1  ;;  %v7995_v8 = vld [vmem:[%s11643_s17 + $0x50] sm:$0xff]  ;;  %v7369_v1 = vld [vmem:[#allocation16 + $0xf0] sm:$0xff] }
0x1864   :  { %9134 = vmatprep.subr.mxu0 %v11680_v48  ;;  %9153 = vmatprep.subr.mxu1 %v11680_v48 }
0x1865   :  { %9135 = vmatpush3.msra.mxu0 %v9309_v14  ;;  %9154 = vmatpush3.msra.mxu1 %v9310_v43  ;;  %v7368_v14 = vld [vmem:[#allocation16 + $0xe8] sm:$0xff]  ;;  %v7367_v43 = vld [vmem:[#allocation16 + $0xe0] sm:$0xff] }
0x1866   :  { %9136 = vmatprep.subr.mxu0 %v11680_v48  ;;  %9155 = vmatprep.subr.mxu1 %v11680_v48 }
0x1867   :  { %9137 = vmatpush3.msra.mxu0 %v9311_v19  ;;  %9156 = vmatpush3.msra.mxu1 %v9312_v21  ;;  %v7996_v19 = vld [vmem:[%s11643_s17 + $0x58] sm:$0xff]  ;;  %v7366_v21 = vld [vmem:[#allocation16 + $0xd8] sm:$0xff] }
0x1868   :  { %9138 = vmatprep.subr.mxu0 %v11680_v48  ;;  %9157 = vmatprep.subr.mxu1 %v11680_v48 }
0x1869   :  { %9139 = vmatpush3.msra.mxu0 %v9313_v9  ;;  %9140 = vmatprep.mubr.msk.f32.mxu0 %vm9591_vm0, %v11680_v48  ;;  %v7365_v9 = vld [vmem:[#allocation16 + $0xd0] sm:$0xff] }
0x186a   :  { %9158 = vmatpush3.msra.mxu1 %v9314_v28  ;;  %9159 = vmatprep.mubr.msk.f32.mxu1 %vm9591_vm0, %v11680_v48  ;;  %v7364_v28 = vld [vmem:[#allocation16 + $0xc8] sm:$0xff] }
0x186b   :  { %9141 = vmatmul.mubr.msk.f32.vlgmr.msra.gmra.mxu0 %vm2459_vm11, %v11441_v20  ;;  %9160 = vmatmul.mubr.msk.f32.vlgmr.msra.gmra.mxu1 %vm2459_vm11, %v11441_v20 }
0x186c   :  { %9162 = vmatprep.subr.mxu0 %v11680_v48  ;;  %9180 = vmatprep.mubr.msk.f32.mxu0 %vm9591_vm0, %v11680_v48 }
0x18f6   :  { %v6660_v57 = vpop.f32.mrf.mxu0  ;;  %v6730_v35 = vpop.f32.mrf.mxu1 }
0x18f8   :  { %v9028_v45 = vpop.f32.mrf.mxu0  ;;  %v9047_v40 = vpop.f32.mrf.mxu1 }
0x18f9   :  { %v7361_v45 = vld [vmem:[#allocation16 + $0xb0] sm:$0xff]  ;;  %v7360_v40 = vld [vmem:[#allocation16 + $0xa8] sm:$0xff] }
0x1907   :  { %v6800_v7 = vpop.f32.mrf.mxu0  ;;  %v6870_v31 = vpop.f32.mrf.mxu1 }
0x1909   :  { %v9066_v52 = vpop.f32.mrf.mxu0  ;;  %v9085_v22 = vpop.f32.mrf.mxu1 }
0x190a   :  { %v7357_v52 = vld [vmem:[#allocation16 + $0x90] sm:$0xff]  ;;  %v7356_v22 = vld [vmem:[#allocation16 + $0x88] sm:$0xff] }
0x1919   :  { %v6940_v0 = vpop.f32.mrf.mxu0  ;;  %v7010_v41 = vpop.f32.mrf.mxu1 }
0x191b   :  { %v9104_v56 = vpop.f32.mrf.mxu0  ;;  %v9123_v42 = vpop.f32.mrf.mxu1 }
0x191c   :  { %v7535_v56 = vld [vmem:[#allocation16 + $0x178] sm:$0xff]  ;;  %v7338_v42 = vld [vmem:[#allocation16] sm:$0xff] }
0x192b   :  { %v7080_v18 = vpop.f32.mrf.mxu0  ;;  %v7150_v17 = vpop.f32.mrf.mxu1 }
0x192c   :  { %9163 = vmatpush3.msra.mxu0 %v7150_v17  ;;  %v7534_v17 = vld [vmem:[#allocation16 + $0x170] sm:$0xff] }
0x192d   :  { %v9142_v30 = vpop.f32.mrf.mxu0  ;;  %v9161_v51 = vpop.f32.mrf.mxu1  ;;  %9164 = vmatprep.subr.mxu0 %v11680_v48 }
0x192e   :  { %9165 = vmatpush3.msra.mxu0 %v7080_v18  ;;  %v7628_v18 = vld [vmem:[#allocation16 + $0x1f8] sm:$0xff]  ;;  %v7533_v51 = vld [vmem:[#allocation16 + $0x168] sm:$0xff] }
0x192f   :  { %9166 = vmatprep.subr.mxu0 %v11680_v48 }
0x1930   :  { %9167 = vmatpush3.msra.mxu0 %v7010_v41  ;;  %v7339_v41 = vld [vmem:[#allocation16 + $0x8] sm:$0xff] }
0x1931   :  { %9168 = vmatprep.subr.mxu0 %v11680_v48 }
0x1932   :  { %9169 = vmatpush3.msra.mxu0 %v6940_v0  ;;  %v7355_v0 = vld [vmem:[#allocation16 + $0x80] sm:$0xff] }
0x1933   :  { %9170 = vmatprep.subr.mxu0 %v11680_v48 }
0x1934   :  { %9171 = vmatpush3.msra.mxu0 %v11441_v20  ;;  %v7993_v20 = vld [vmem:[%s11643_s17 + $0x40] sm:$0xff] }
0x1935   :  { %9172 = vmatprep.subr.mxu0 %v11680_v48  ;;  %9185 = vmatprep.mubr.msk.f32.mxu1 %vm352_vm1, %v7993_v20  ;;  %v7627_v20 = vld [vmem:[#allocation16 + $0x1f0] sm:$0xff] }
0x1936   :  { %9173 = vmatpush3.msra.mxu0 %v6870_v31  ;;  %v7358_v31 = vld [vmem:[#allocation16 + $0x98] sm:$0xff] }
0x1937   :  { %9174 = vmatprep.subr.mxu0 %v11680_v48 }
0x1938   :  { %9175 = vmatpush3.msra.mxu0 %v6800_v7  ;;  %v7359_v7 = vld [vmem:[#allocation16 + $0xa0] sm:$0xff] }
0x1939   :  { %9176 = vmatprep.subr.mxu0 %v11680_v48 }
0x193a   :  { %9177 = vmatpush3.msra.mxu0 %v6730_v35  ;;  %v7362_v35 = vld [vmem:[#allocation16 + $0xb8] sm:$0xff] }
0x193b   :  { %9178 = vmatprep.subr.mxu0 %v11680_v48 }
0x193c   :  { %9179 = vmatpush3.msra.mxu0 %v6660_v57  ;;  %v7363_v57 = vld [vmem:[#allocation16 + $0xc0] sm:$0xff] }
0x193d   :  { %9181 = vmatmul.mubr.msk.f32.vlgmr.msra.gmra.mxu0 %vm3093_vm12, %v7155_v3  ;;  %7464 = vmatprep.subr.mxu0 %v7353_v54  ;;  %v7532_v3 = vld [vmem:[#allocation16 + $0x160] sm:$0xff] }
0x193e   :  { %7512 = vmatprep.mubr.f32.mxu0 %v11680_v48  ;;  %7465 = vmatpush1.msra.mxu0 %v7352_v50  ;;  %v7531_v50 = vld [vmem:[#allocation16 + $0x158] sm:$0xff] }
0x193f   :  { %7466 = vmatprep.subr.mxu0 %v7351_v63  ;;  %v7626_v63 = vld [vmem:[#allocation16 + $0x1e8] sm:$0xff] }
0x1940   :  { %7467 = vmatpush1.msra.mxu0 %v7350_v58  ;;  %v7530_v58 = vld [vmem:[#allocation16 + $0x150] sm:$0xff] }
0x1941   :  { %7468 = vmatprep.subr.mxu0 %v7349_v59  ;;  %v7625_v59 = vld [vmem:[#allocation16 + $0x1e0] sm:$0xff] }
0x1942   :  { %7469 = vmatpush1.msra.mxu0 %v7348_v53  ;;  %v7529_v53 = vld [vmem:[#allocation16 + $0x148] sm:$0xff] }
0x1943   :  { %7470 = vmatprep.subr.mxu0 %v7347_v26  ;;  %v7624_v26 = vld [vmem:[#allocation16 + $0x1d8] sm:$0xff] }
0x1944   :  { %7471 = vmatpush1.msra.mxu0 %v7346_v32  ;;  %v7528_v32 = vld [vmem:[#allocation16 + $0x140] sm:$0xff] }
0x1945   :  { %7472 = vmatprep.subr.mxu0 %v7345_v2  ;;  %v7623_v2 = vld [vmem:[#allocation16 + $0x1d0] sm:$0xff] }
0x1946   :  { %7473 = vmatpush1.msra.mxu0 %v7344_v60  ;;  %v7527_v60 = vld [vmem:[#allocation16 + $0x138] sm:$0xff] }
0x1947   :  { %7474 = vmatprep.subr.mxu0 %v7343_v12  ;;  %v7622_v12 = vld [vmem:[#allocation16 + $0x1c8] sm:$0xff] }
0x1948   :  { %7475 = vmatpush1.msra.mxu0 %v7342_v47  ;;  %v7526_v47 = vld [vmem:[#allocation16 + $0x130] sm:$0xff] }
0x1949   :  { %7476 = vmatprep.subr.mxu0 %v7341_v10  ;;  %v7621_v10 = vld [vmem:[#allocation16 + $0x1c0] sm:$0xff] }
0x194a   :  { %7477 = vmatpush1.msra.mxu0 %v7340_v46  ;;  %v7525_v46 = vld [vmem:[#allocation16 + $0x128] sm:$0xff] }
0x194b   :  { %7478 = vmatprep.subr.mxu0 %v7339_v41 }
0x194c   :  { %7479 = vmatpush1.msra.mxu0 %v7338_v42 }
0x194d   :  { %7648 = vmatprep.subr.mxu0 %v7628_v18 }
0x19fd   :  { %v7232_v27 = vpop.f32.mrf.mxu0 }
0x19fe   :  { %v7233_v11 = vadd.f32 %v7232_v27, %v7161_v62  ;;  %v7620_v62 = vld [vmem:[#allocation16 + $0x1b8] sm:$0xff]  ;;  %v7524_v27 = vld [vmem:[#allocation16 + $0x120] sm:$0xff] }
0x19ff   :  { %v9182_v6 = vpop.f32.mrf.mxu0 }
0x1a00   :  { %9183 = vmatprep.subr.mxu1 %v7233_v11  ;;  %v7523_v6 = vld [vmem:[#allocation16 + $0x118] sm:$0xff] }
0x1a01   :  { %9184 = vmatpush3.msra.mxu1 %v7233_v11  ;;  %v7619_v11 = vld [vmem:[#allocation16 + $0x1b0] sm:$0xff] }
0x1a02   :  { %9186 = vmatmul.mubr.msk.f32.vlgmr.msra.gmra.mxu1 %vm352_vm1, %v7994_v36  ;;  %7390 = vmatprep.subr.mxu1 %v7370_v4  ;;  %v7618_v36 = vld [vmem:[#allocation16 + $0x1a8] sm:$0xff]  ;;  %v7522_v4 = vld [vmem:[#allocation16 + $0x110] sm:$0xff] }
0x1a03   :  { %9188 = vmatprep.mubr.msk.f32.mxu1 %vm352_vm1, %v7995_v8  ;;  %7391 = vmatpush1.msra.mxu1 %v7369_v1  ;;  %v7617_v8 = vld [vmem:[#allocation16 + $0x1a0] sm:$0xff] }
0x1a04   :  { %7392 = vmatprep.subr.mxu1 %v7368_v14  ;;  %v7521_v14 = vld [vmem:[#allocation16 + $0x108] sm:$0xff] }
0x1a05   :  { %7393 = vmatpush1.msra.mxu1 %v7367_v43  ;;  %v7616_v43 = vld [vmem:[#allocation16 + $0x198] sm:$0xff] }
0x1a06   :  { %9189 = vmatmul.mubr.msk.f32.gmra.mxu1 %vm352_vm1, %v7996_v19  ;;  %7394 = vmatprep.subr.mxu1 %v7366_v21  ;;  %v7520_v19 = vld [vmem:[#allocation16 + $0x100] sm:$0xff]  ;;  %v7615_v21 = vld [vmem:[#allocation16 + $0x190] sm:$0xff] }
0x1a07   :  { %7395 = vmatpush1.msra.mxu1 %v7365_v9  ;;  %7438 = vmatprep.mubr.f32.mxu1 %v11680_v48  ;;  %v7614_v9 = vld [vmem:[#allocation16 + $0x188] sm:$0xff] }
0x1a08   :  { %7396 = vmatprep.subr.mxu1 %v7364_v28  ;;  %v7613_v28 = vld [vmem:[#allocation16 + $0x180] sm:$0xff] }
0x1a09   :  { %7397 = vmatpush1.msra.mxu1 %v7363_v57 }
0x1a0a   :  { %7398 = vmatprep.subr.mxu1 %v7362_v35 }
0x1a0b   :  { %7399 = vmatpush1.msra.mxu1 %v7361_v45 }
0x1a0c   :  { %7400 = vmatprep.subr.mxu1 %v7360_v40 }
0x1a0d   :  { %7401 = vmatpush1.msra.mxu1 %v7359_v7 }
0x1a0e   :  { %7402 = vmatprep.subr.mxu1 %v7358_v31 }
0x1a0f   :  { %7403 = vmatpush1.msra.mxu1 %v7357_v52 }
0x1a10   :  { %7404 = vmatprep.subr.mxu1 %v7356_v22 }
0x1a11   :  { %7405 = vmatpush1.msra.mxu1 %v7355_v0 }
0x1a12   :  { %7555 = vmatprep.subr.mxu1 %v7535_v56 }
0x1ac2   :  { %v9187_v30 = vpop.f32.mrf.mxu1 }
0x1ac3   :  { %8001 = vmatmul.mubr.msk.f32.vlgmr.msra.gmra.mxu1 %vm2459_vm11, %v9187_v30 }
0x1ac4   :  { %7556 = vmatpush1.msra.mxu1 %v7534_v17  ;;  %v7319_v54 = vpop.f32.mrf.mxu1  ;;  %7603 = vmatprep.mubr.f32.mxu1 %v11680_v48  ;;  %v7710_v17 = vpop.permute.xlu0 %7709 }
0x1ac5   :  { %7557 = vmatprep.subr.mxu1 %v7533_v51  ;;  %8002 = vmatmul.mubr.msk.f32.vlgmr.msra.gmra.mxu0 %vm2459_vm11, %v7319_v54 }
0x1ac6   :  { %7558 = vmatpush1.msra.mxu1 %v7532_v3  ;;  %7649 = vmatpush1.msra.mxu0 %v7627_v20  ;;  %v9190_v1 = vpop.f32.mrf.mxu1 }
0x1ac7   :  { %7559 = vmatprep.subr.mxu1 %v7531_v50  ;;  %7650 = vmatprep.subr.mxu0 %v7626_v63 }
0x1ac8   :  { %7560 = vmatpush1.msra.mxu1 %v7530_v58  ;;  %7651 = vmatpush1.msra.mxu0 %v7625_v59  ;;  %v7329_v57 = vpop.f32.mrf.mxu1 }
0x1ac9   :  { %7561 = vmatprep.subr.mxu1 %v7529_v53  ;;  %7652 = vmatprep.subr.mxu0 %v7624_v26 }
0x1aca   :  { %7562 = vmatpush1.msra.mxu1 %v7528_v32  ;;  %7653 = vmatpush1.msra.mxu0 %v7623_v2 }
0x1acb   :  { %7563 = vmatprep.subr.mxu1 %v7527_v60  ;;  %7654 = vmatprep.subr.mxu0 %v7622_v12 }
0x1acc   :  { %7564 = vmatpush1.msra.mxu1 %v7526_v47  ;;  %7655 = vmatpush1.msra.mxu0 %v7621_v10 }
0x1acd   :  { %7565 = vmatprep.subr.mxu1 %v7525_v46  ;;  %7656 = vmatprep.subr.mxu0 %v7620_v62 }
0x1ace   :  { %7566 = vmatpush1.msra.mxu1 %v7524_v27  ;;  %7657 = vmatpush1.msra.mxu0 %v7619_v11 }
0x1acf   :  { %7567 = vmatprep.subr.mxu1 %v7523_v6  ;;  %7658 = vmatprep.subr.mxu0 %v7618_v36 }
0x1ad0   :  { %7568 = vmatpush1.msra.mxu1 %v7522_v4  ;;  %7659 = vmatpush1.msra.mxu0 %v7617_v8 }
0x1ad1   :  { %7569 = vmatprep.subr.mxu1 %v7521_v14  ;;  %7660 = vmatprep.subr.mxu0 %v7616_v43 }
0x1ad2   :  { %7570 = vmatpush1.msra.mxu1 %v7520_v19  ;;  %7661 = vmatpush1.msra.mxu0 %v7615_v21 }
0x1ad3   :  { %8003 = vmatmul.mubr.msk.f32.vlgmr.msra.gmra.mxu1 %vm2459_vm11, %v7329_v57  ;;  %7662 = vmatprep.subr.mxu0 %v7614_v9 }
0x1ad4   :  { %7663 = vmatpush1.msra.mxu0 %v7613_v28  ;;  %7696 = vmatprep.mubr.f32.mxu0 %v11680_v48 }
0x1ad5   :  { %8004 = vmatmul.mubr.msk.f32.vlgmr.msra.gmra.mxu0 %vm2459_vm11, %v9190_v1  ;;  %7854 = vmatprep.mubr.f32.mxu1 %v11680_v48  ;;  %v8006_v48 = vld [vmem:[%s11642_s16 + $0x28] sm:$0xff]  ;;  %s9600_s16 = smov [#allocation20]  }
0x1b83   :  { %v7440_v35 = vpop.f32.mrf.mxu1 }
0x1b85   :  { %v7514_v45 = vpop.f32.mrf.mxu0  ;;  %v7442_v40 = vpop.f32.mrf.mxu1 }
0x1b86   :  { %v7515_v31 = vadd.f32 %v7514_v45, %v7440_v35 }
0x1b87   :  { %v7516_v7 = vpop.f32.mrf.mxu0 }
0x1b88   :  { %v7517_v22 = vadd.f32 %v7516_v7, %v7442_v40 }
0x1b93   :  { %v7605_v52 = vpop.f32.mrf.mxu1 }
0x1b94   :  { %v7610_v0 = vadd.f32 %v7605_v52, %v7515_v31 }
0x1b95   :  { %v7607_v41 = vpop.f32.mrf.mxu1  ;;  %v7698_v56 = vpop.f32.mrf.mxu0 }
0x1b96   :  { %v7611_v42 = vadd.f32 %v7607_v41, %v7517_v22  ;;  %v7703_v18 = vadd.f32 %v7698_v56, %v7610_v0  ;;  %v7779_v0 = vld [vmem:[#allocation19 + $0x28] sm:$0xff] }
0x1b97   :  { %v7700_v30 = vpop.f32.mrf.mxu0 }
0x1b98   :  { %v7712_v51 = vadd.f32 %v7710_v17, %v7703_v18  ;;  %v7704_v3 = vadd.f32 %v7700_v30, %v7611_v42  ;;  %v9315_v42 = vld [vmem:[#allocation2] sm:$0xff] }
0x1b9a   :  { %v7713_v20 = vadd.f32 %v7710_v17, %v7704_v3  ;;  %7770 = vrot.lane.b32.xlu1 %v7712_v51, %s9598_s3  ;;  %v9316_v17 = vld [vmem:[#allocation2 + $0x8] sm:$0xff] }
0x1b9c   :  { %7772 = vrot.lane.b32.xlu0 %v7713_v20, %s9598_s3 }
0x1b9e   :  { %7762 = vrot.lane.b32.xlu1 %v7712_v51, %s9599_s11 }
0x1ba0   :  { %7764 = vrot.lane.b32.xlu0 %v7713_v20, %s9599_s11 }
0x1ba2   :  { %7754 = vrot.lane.b32.xlu1 %v7712_v51, %s9596_s23 }
0x1ba4   :  { %7756 = vrot.lane.b32.xlu0 %v7713_v20, %s9596_s23 }
0x1ba6   :  { %7746 = vrot.lane.b32.xlu1 %v7712_v51, %s9597_s24 }
0x1ba8   :  { %7748 = vrot.lane.b32.xlu0 %v7713_v20, %s9597_s24 }
0x1baa   :  { %7738 = vrot.lane.b32.xlu1 %v7712_v51, %s9593_s12 }
0x1bac   :  { %7740 = vrot.lane.b32.xlu0 %v7713_v20, %s9593_s12 }
0x1bae   :  { %7730 = vrot.lane.b32.xlu1 %v7712_v51, %s9594_s15 }
0x1bb0   :  { %7732 = vrot.lane.b32.xlu0 %v7713_v20, %s9594_s15 }
0x1bb2   :  { %7722 = vrot.lane.b32.xlu1 %v7712_v51, %s9573_s1 }
0x1bb4   :  { %7724 = vrot.lane.b32.xlu0 %v7713_v20, %s9573_s1  ;;  %s7871_s1 = sshll.u32 %s9600_s16, 4  ;;  %s7872_s1 = int_to_ptr.vmem [resolvable:$true] %s7871_s1 }
0x1bb5   :  { %s9537_s12 = scalar_lea.vmem %s7872_s1, 256  ;;  %p9542_p0 = scmp.lt.s32.totalorder %s7872_s1, %s7872_s1 }
0x1bb6   :  { %7714 = vrot.lane.b32.xlu1 %v7712_v51, %s9595_s21  ;;  %p9538_p13 = scmp.ne.s32.totalorder %s7872_s1, %s9537_s12  ;;  %p9543_p1 = scmp.lt.s32.totalorder %s9537_s12, %s9537_s12 }
0x1bb8   :  { %7716 = vrot.lane.b32.xlu0 %v7713_v20, %s9595_s21  ;;  %p9544_p2 = por %p9543_p1, %p9542_p0 }
0x1bba   :  { %7784 = vperm.xlu1 %9222, %v8006_v48   ;;  %p9545_p3 = pnand %p9544_p2, %p9538_p13 }
0x1c0c   :  { %v7771_v54 = vpop.permute.xlu1 %7770 }
0x1c0e   :  { %v7773_v50 = vpop.permute.xlu0 %7772 }
0x1c0f   :  { %v7774_v63 = vsel %vm2120_vm8, %v7771_v54, %v7773_v50  ;;  %v7775_v58 = vsel %vm2120_vm8, %v7773_v50, %v7771_v54 }
0x1c10   :  { %v7776_v59 = vmul.f32 %v7774_v63, %v10448_v55  ;;  %v7777_v53 = vmul.f32 %v7775_v58, %v10457_v16  ;;  %v7763_v26 = vpop.permute.xlu1 %7762 }
0x1c12   :  { %7804 = vmatprep.subr.mxu1 %v7777_v53  ;;  %v7765_v32 = vpop.permute.xlu0 %7764 }
0x1c13   :  { %v7766_v2 = vsel %vm2066_vm9, %v7763_v26, %v7765_v32  ;;  %v7767_v60 = vsel %vm2066_vm9, %v7765_v32, %v7763_v26  ;;  %7805 = vmatpush1.msra.mxu1 %v7776_v59 }
0x1c14   :  { %v7768_v12 = vmul.f32 %v7766_v2, %v10524_v38  ;;  %v7769_v47 = vmul.f32 %v7767_v60, %v10527_v33  ;;  %v7755_v10 = vpop.permute.xlu1 %7754 }
0x1c16   :  { %7806 = vmatprep.subr.mxu1 %v7769_v47  ;;  %v7757_v46 = vpop.permute.xlu0 %7756 }
0x1c17   :  { %v7758_v55 = vsel %vm2012_vm7, %v7755_v10, %v7757_v46  ;;  %v7759_v16 = vsel %vm2012_vm7, %v7757_v46, %v7755_v10  ;;  %7807 = vmatpush1.msra.mxu1 %v7768_v12 }
0x1c18   :  { %v7760_v62 = vmul.f32 %v7758_v55, %v10394_v24  ;;  %v7761_v27 = vmul.f32 %v7759_v16, %v10390_v34  ;;  %v7747_v11 = vpop.permute.xlu1 %7746 }
0x1c1a   :  { %7808 = vmatprep.subr.mxu1 %v7761_v27  ;;  %v7749_v6 = vpop.permute.xlu0 %7748 }
0x1c1b   :  { %v7750_v38 = vsel %vm1958_vm3, %v7747_v11, %v7749_v6  ;;  %v7751_v33 = vsel %vm1958_vm3, %v7749_v6, %v7747_v11  ;;  %7809 = vmatpush1.msra.mxu1 %v7760_v62 }
0x1c1c   :  { %v7752_v36 = vmul.f32 %v7750_v38, %v10423_v13  ;;  %v7753_v4 = vmul.f32 %v7751_v33, %v10426_v39  ;;  %v7739_v8 = vpop.permute.xlu1 %7738 }
0x1c1e   :  { %7810 = vmatprep.subr.mxu1 %v7753_v4  ;;  %v7741_v1 = vpop.permute.xlu0 %7740 }
0x1c1f   :  { %v7742_v34 = vsel %vm1904_vm2, %v7739_v8, %v7741_v1  ;;  %v7743_v24 = vsel %vm1904_vm2, %v7741_v1, %v7739_v8  ;;  %7811 = vmatpush1.msra.mxu1 %v7752_v36 }
0x1c20   :  { %v7744_v14 = vmul.f32 %v7743_v24, %v11674_v15  ;;  %v7745_v43 = vmul.f32 %v7742_v34, %v11677_v37  ;;  %v7731_v19 = vpop.permute.xlu1 %7730  ;;  %7812 = vmatprep.subr.mxu1 %v7713_v20 }
0x1c21   :  { %7813 = vmatpush1.msra.mxu1 %v7712_v51 }
0x1c22   :  { %7814 = vmatprep.subr.mxu1 %v7745_v43  ;;  %v7733_v13 = vpop.permute.xlu0 %7732 }
0x1c23   :  { %v7734_v39 = vsel %vm1850_vm4, %v7731_v19, %v7733_v13  ;;  %v7735_v21 = vsel %vm1850_vm4, %v7733_v13, %v7731_v19  ;;  %7815 = vmatpush1.msra.mxu1 %v7744_v14 }
0x1c24   :  { %v7736_v9 = vmul.f32 %v7735_v21, %v10214_v61  ;;  %v7737_v28 = vmul.f32 %v7734_v39, %v10217_v5  ;;  %v7723_v57 = vpop.permute.xlu1 %7722 }
0x1c26   :  { %7816 = vmatprep.subr.mxu1 %v7737_v28  ;;  %v7725_v15 = vpop.permute.xlu0 %7724 }
0x1c27   :  { %v7726_v37 = vsel %vm1796_vm5, %v7723_v57, %v7725_v15  ;;  %v7727_v35 = vsel %vm1796_vm5, %v7725_v15, %v7723_v57  ;;  %7817 = vmatpush1.msra.mxu1 %v7736_v9 }
0x1c28   :  { %v7728_v45 = vmul.f32 %v7727_v35, %v10275_v23  ;;  %v7729_v40 = vmul.f32 %v7726_v37, %v10278_v29  ;;  %v7715_v7 = vpop.permute.xlu1 %7714 }
0x1c2a   :  { %7818 = vmatprep.subr.mxu1 %v7729_v40  ;;  %v7717_v31 = vpop.permute.xlu0 %7716 }
0x1c2b   :  { %v7718_v61 = vsel %vm1743_vm6, %v7715_v7, %v7717_v31  ;;  %v7719_v5 = vsel %vm1743_vm6, %v7717_v31, %v7715_v7  ;;  %7819 = vmatpush1.msra.mxu1 %v7728_v45 }
0x1c2c   :  { %v7720_v52 = vmul.f32 %v7719_v5, %v10339_v44  ;;  %v7721_v22 = vmul.f32 %v7718_v61, %v10333_v25 }
0x1c2e   :  { %7820 = vmatprep.subr.mxu1 %v7721_v22 }
0x1c2f   :  { %7821 = vmatpush1.msra.mxu1 %v7720_v52 }
0x1c30   :  { %8007 = vmatmul.mubr.msk.f32.vlgmr.msra.gmra.mxu1 %vm3093_vm12, %v7779_v0 }
0x1c35   :  { %v7785_v23 = vpop.permute.xlu1 %7784 }
0x1cf0   :  { %v7856_v29 = vpop.f32.mrf.mxu1 }
0x1cf1   :  { %v7857_v41 = vadd.f32 %v7856_v29, %v7785_v23 }
0x1cf2   :  { %v7858_v56 = vpop.f32.mrf.mxu1 }
0x1cf3   :  { %v7861_v18 = vmul.f32 %v9315_v42, %v7857_v41  ;;  %v7859_v49 = vadd.f32 %v7858_v56, %v7785_v23 }
0x1cf5   :  { %7863 = vst [vmem:[#allocation20] sm:$0xff] %v7861_v18  ;;  %v7862_v30 = vmul.f32 %v9316_v17, %v7859_v49 }
0x1cf7   :  { %7864 = vst [vmem:[#allocation20 + $0x8] sm:$0xff] %v7862_v30 }
0x1cf8   :  { %9548 = shalt.err (!%p9545_p3)
}
0x1cf9   :  { %s11681_s24 = sld [smem:[#allocation39_spill]] }
0x1cff   :  { %7874 = dma.vmem_to_hbm [thread:$0]  %s7872_s1, 256, %s11681_s24, [#allocation4]  }
0x1d00   :  { %9569 = dma.done.wait [#allocation4], 256  }
0x1d01   :  { %9570 = vsyncadd [#allocation4], 4294967040 }
0x1d02   :  { %7878 = vsyncpa [#allocation3], 1 }
0x1d03   :  { %7879 = vsyncpa [#allocation6], 1 }
0x1d04   :  { %7880 = vsyncpa [#allocation9], 1 }
0x1d05   :  { %7881 = vsyncpa [#allocation12], 1 }
0x1d06   :  { %7882 = vsyncpa [#allocation15], 1 }
0x1d07   :  { %7883 = vsyncpa [#allocation18], 1 }
0x1d08   :  { %7884 = vsyncpa [#allocation4], 1 }

</bundles_post_ra>
